<compile_context>
chip_gen: v7x
topology: tpu7x:2x2x1
jax: 0.10.0
libtpu: 0.0.40
codegen_flags: <defaults>
</compile_context>

<pallas_src>
import functools

import jax
import jax.numpy as jnp
from jax.experimental import pallas as pl
from jax.experimental.pallas import tpu as pltpu

EPS = 1e-5      # PyTorch BatchNorm2d default eps
ALPHA = 0.2     # LeakyReLU negative slope
LANE = 128


# ----------------------------------------------------------------------------
# Tiling helpers
# ----------------------------------------------------------------------------
def _round_up(x, m):
    return (x + m - 1) // m * m


def _tile_m(m):
    """Single tile when it fits; otherwise an even count of <=1024-row tiles
    (even count keeps both v7x TensorCores busy; big tiles win on v5e/v6e)."""
    mp = _round_up(m, 8)
    if mp <= 1024:
        return mp
    gm = -(-mp // 1024)
    if gm % 2:
        gm += 1
    return _round_up(-(-mp // gm), 8)


def _tile_k(k):
    # K <= 2048: single K tile -> nk == 1, accumulator-free fast path.
    if k <= 2048:
        return k
    for tk in (2048, 1024, 512, 256, 128):
        if k % tk == 0:
            return tk
    return k


# ----------------------------------------------------------------------------
# Fused conv (matmul) kernel
# ----------------------------------------------------------------------------
def _conv_kernel(*refs, nk, tk, m_real, tm, act, with_affine, with_stats):
    it = iter(refs)
    p_ref = next(it)
    w_ref = next(it)
    s_ref = next(it) if with_affine else None
    t_ref = next(it) if with_affine else None
    o_ref = next(it)
    st_ref = next(it) if with_stats else None
    acc_ref = next(it) if nk > 1 else None

    i = pl.program_id(0)

    # -- prologue: previous layer's BN affine + LeakyReLU, bf16 on the VPU ----
    p = p_ref[...]
    if with_affine:
        p = p * s_ref[...] + t_ref[...]
        p = jnp.maximum(p, ALPHA * p)

    # -- MXU matmul ------------------------------------------------------------
    if nk == 1:
        acc = jnp.dot(p, w_ref[...], preferred_element_type=jnp.float32)
    else:
        k = pl.program_id(1)

        @pl.when(k == 0)
        def _():
            acc_ref[...] = jnp.zeros_like(acc_ref)

        off = pl.multiple_of(k * tk, tk)
        acc_ref[...] += jnp.dot(p, w_ref[pl.ds(off, tk), :],
                                preferred_element_type=jnp.float32)

    # -- epilogue: BN statistics + activation + lane-dense store ---------------
    def epilogue(acc):
        n = acc.shape[-1]
        if with_stats:
            accm = acc
            if m_real % tm != 0:       # mask padded tail rows (static check)
                rows = jax.lax.broadcasted_iota(jnp.int32, acc.shape, 0) + i * tm
                accm = jnp.where(rows < m_real, acc, 0.0)
            s_row = jnp.sum(accm, axis=0, keepdims=True)
            q_row = jnp.sum(accm * accm, axis=0, keepdims=True)
            st_ref[...] = jnp.concatenate(
                [s_row, q_row, jnp.zeros((6, n), jnp.float32)], axis=0)
        if act == "leaky":
            acc = jnp.maximum(acc, ALPHA * acc)
        elif act == "sigmoid":
            acc = pl.reciprocal(1.0 + jnp.exp(-acc), approx=True)
        o_ref[...] = acc.astype(o_ref.dtype)

    if nk == 1:
        epilogue(acc)
    else:
        @pl.when(pl.program_id(1) == nk - 1)
        def _():
            epilogue(acc_ref[...])


def conv_layer(patches, w, *, act, with_stats, scale_k=None, shift_k=None,
               out_dtype=jnp.bfloat16):
    """patches: (M, K) bf16, w: (K, N) bf16 with N a multiple of 128.
    Returns (out[:M], stats-or-None)."""
    M, K = patches.shape
    N = w.shape[1]
    with_affine = scale_k is not None

    tm = _tile_m(M)
    tk = _tile_k(K)
    gm = -(-M // tm)
    nk = K // tk
    Mp = gm * tm
    if Mp != M:
        patches = jnp.pad(patches, ((0, Mp - M), (0, 0)))

    inputs = [patches, w]
    in_specs = [pl.BlockSpec((tm, tk), lambda i, k: (i, k)),
                # full weight, i/k-invariant -> DMA'd to VMEM exactly once
                pl.BlockSpec((K, N), lambda i, k: (0, 0))]
    if with_affine:
        inputs += [scale_k.reshape(1, K).astype(jnp.bfloat16),
                   shift_k.reshape(1, K).astype(jnp.bfloat16)]
        in_specs += [pl.BlockSpec((1, tk), lambda i, k: (0, k)),
                     pl.BlockSpec((1, tk), lambda i, k: (0, k))]

    out_shape = [jax.ShapeDtypeStruct((Mp, N), out_dtype)]
    out_specs = [pl.BlockSpec((tm, N), lambda i, k: (i, 0))]
    if with_stats:
        out_shape.append(jax.ShapeDtypeStruct((gm * 8, N), jnp.float32))
        out_specs.append(pl.BlockSpec((8, N), lambda i, k: (i, 0)))

    scratch = [] if nk == 1 else [pltpu.VMEM((tm, N), jnp.float32)]

    kernel = functools.partial(
        _conv_kernel, nk=nk, tk=tk, m_real=M, tm=tm, act=act,
        with_affine=with_affine, with_stats=with_stats)

    out_bytes = Mp * N * (2 if out_dtype == jnp.bfloat16 else 4)
    cost = pl.CostEstimate(flops=2 * M * K * N,
                           transcendentals=M * N if act == "sigmoid" else 0,
                           bytes_accessed=int(patches.size * 2 + w.size * 2
                                              + out_bytes))

    outs = pl.pallas_call(
        kernel,
        out_shape=out_shape,
        grid=(gm, nk),
        in_specs=in_specs,
        out_specs=out_specs,
        scratch_shapes=scratch,
        compiler_params=pltpu.CompilerParams(
            dimension_semantics=("parallel", "arbitrary"),
            vmem_limit_bytes=48 * 1024 * 1024),
        cost_estimate=cost,
    )(*inputs)

    y = outs[0][:M] if Mp != M else outs[0]
    stats = outs[1] if with_stats else None
    return y, stats


# ----------------------------------------------------------------------------
# Plain-JAX glue: im2col patch extraction (pad + strided slicing + reshape).
# Optional per-channel pad value (pre-BN feature maps are padded with the value
# that maps to zero after the fused affine + LeakyReLU).
# ----------------------------------------------------------------------------
def im2col(x, k, stride, pad, pad_value=None):
    N, H, W, C = x.shape
    if pad > 0:
        if pad_value is None:
            xp = jnp.pad(x, ((0, 0), (pad, pad), (pad, pad), (0, 0)))
        else:
            pv = jnp.broadcast_to(
                pad_value.astype(x.dtype).reshape(1, 1, 1, C),
                (N, H + 2 * pad, W + 2 * pad, C))
            xp = pv.at[:, pad:pad + H, pad:pad + W, :].set(x)
    else:
        xp = x
    Ho = (H + 2 * pad - k) // stride + 1
    Wo = (W + 2 * pad - k) // stride + 1
    cols = []
    for i in range(k):
        for j in range(k):
            cols.append(xp[:, i:i + Ho * stride:stride, j:j + Wo * stride:stride, :])
    patches = jnp.stack(cols, axis=3)                    # (N, Ho, Wo, k*k, C)
    return patches.reshape(N * Ho * Wo, k * k * C), Ho, Wo


# ----------------------------------------------------------------------------
# Discriminator forward (Pallas)
# ----------------------------------------------------------------------------
def discriminator_forward(x_nchw, params):
    x = jnp.transpose(x_nchw, (0, 2, 3, 1)).astype(jnp.bfloat16)   # NCHW -> NHWC
    batch = x.shape[0]

    # Pad input channels so layer-1 K = 16*cin_p is a multiple of 128.
    cin = x.shape[-1]
    cin_p = _round_up(cin, 8)
    if cin_p != cin:
        x = jnp.pad(x, ((0, 0), (0, 0), (0, 0), (0, cin_p - cin)))

    def w2d(idx, cin_pad):
        w = params[f"w{idx}"]                     # HWIO (4, 4, Cin, Cout)
        ci, co = w.shape[2], w.shape[3]
        co_p = _round_up(co, LANE)                # lane-dense output channels
        wp = jnp.zeros((4, 4, cin_pad, co_p), jnp.float32)
        wp = wp.at[:, :, :ci, :co].set(w)
        return wp.reshape(16 * cin_pad, co_p).astype(jnp.bfloat16), co, co_p

    # Layer 1: Conv(4, s2, p1) + LeakyReLU (fused epilogue).
    p, Ho, Wo = im2col(x, 4, 2, 1)
    w1, _, c1p = w2d(1, cin_p)
    y, _ = conv_layer(p, w1, act="leaky", with_stats=False)
    x = y.reshape(batch, Ho, Wo, c1p)
    cin_p = c1p

    scale = shift = None   # pending BN affine, folded into the next conv prologue
    for idx in (2, 3, 4):
        if scale is None:
            pad_value, sk, sh = None, None, None
        else:
            safe = jnp.where(scale == 0, 1.0, scale)       # guard gamma ~ 0
            pad_value = -shift / safe     # maps to ~0 after affine + LeakyReLU
            sk = jnp.tile(scale, 16)      # K order is (kh*kw major, cin minor)
            sh = jnp.tile(shift, 16)
        p, Ho, Wo = im2col(x, 4, 2, 1, pad_value=pad_value)
        wmat, cout, cout_p = w2d(idx, cin_p)
        z, st = conv_layer(p, wmat, act="none", with_stats=True,
                           scale_k=sk, shift_k=sh)
        # BatchNorm (training-mode batch stats) from the fused per-tile sums.
        m_count = batch * Ho * Wo
        stv = st.reshape(-1, 8, cout_p)
        s_sum = stv[:, 0, :cout].sum(axis=0)
        q_sum = stv[:, 1, :cout].sum(axis=0)
        mean = s_sum / m_count
        var = jnp.maximum(q_sum / m_count - mean * mean, 0.0)   # biased variance
        invstd = jax.lax.rsqrt(var + EPS)
        sc = params[f"g{idx}"] * invstd
        sf = params[f"b{idx}"] - mean * sc
        scale = jnp.ones((cout_p,), jnp.float32).at[:cout].set(sc)   # pad ch: id
        shift = jnp.zeros((cout_p,), jnp.float32).at[:cout].set(sf)
        x = z.reshape(batch, Ho, Wo, cout_p)      # pre-BN conv output (bf16)
        cin_p = cout_p

    # Layer 5: BN4 affine + LeakyReLU prologue, Conv(4, s1, p0), Sigmoid.
    # N padded 1 -> 128 for lane-dense stores; real column sliced afterwards.
    p, Ho, Wo = im2col(x, 4, 1, 0)
    w5, _, _ = w2d(5, cin_p)
    out, _ = conv_layer(p, w5, act="sigmoid", with_stats=False,
                        scale_k=jnp.tile(scale, 16), shift_k=jnp.tile(shift, 16),
                        out_dtype=jnp.float32)
    return out[:, 0]                              # matches .view(-1, 1).squeeze(1)


# ----------------------------------------------------------------------------
# Pure-JAX f32 reference (lax.conv) for a sanity check
# ----------------------------------------------------------------------------
def reference_forward(x_nchw, params):
    x = jnp.transpose(x_nchw, (0, 2, 3, 1)).astype(jnp.float32)

    def conv(v, w, stride, pad):
        return jax.lax.conv_general_dilated(
            v, w, (stride, stride), [(pad, pad), (pad, pad)],
            dimension_numbers=("NHWC", "HWIO", "NHWC"))

    def leaky(v):
        return jnp.where(v > 0, v, ALPHA * v)

    def bn(v, g, b):
        m = jnp.mean(v, axis=(0, 1, 2), keepdims=True)
        var = jnp.mean((v - m) ** 2, axis=(0, 1, 2), keepdims=True)
        return (v - m) / jnp.sqrt(var + EPS) * g + b

    h = leaky(conv(x, params["w1"], 2, 1))
    h = leaky(bn(conv(h, params["w2"], 2, 1), params["g2"], params["b2"]))
    h = leaky(bn(conv(h, params["w3"], 2, 1), params["g3"], params["b3"]))
    h = leaky(bn(conv(h, params["w4"], 2, 1), params["g4"], params["b4"]))
    h = jax.nn.sigmoid(conv(h, params["w5"], 1, 0))
    return h.reshape(-1)


# ----------------------------------------------------------------------------
# Deterministic parameter init (DCGAN-style N(0, 0.02) conv weights)
# ----------------------------------------------------------------------------
def init_params(key, img_channels, fms):
    chans = [img_channels, fms, fms * 2, fms * 4, fms * 8, 1]
    params = {}
    keys = jax.random.split(key, 5)
    for i in range(5):
        cin, cout = chans[i], chans[i + 1]
        # HWIO weight, equivalent to reshaped PyTorch OIHW (C_out, C_in, 4, 4)
        params[f"w{i + 1}"] = 0.02 * jax.random.normal(
            keys[i], (4, 4, cin, cout), dtype=jnp.float32)
    for idx, c in ((2, fms * 2), (3, fms * 4), (4, fms * 8)):
        params[f"g{idx}"] = jnp.ones((c,), jnp.float32)   # BN gamma (default)
        params[f"b{idx}"] = jnp.zeros((c,), jnp.float32)  # BN beta
    return params


if __name__ == "__main__":
    BATCH = 2
    IMG_CHANNELS = 3
    FEATURE_MAP_SIZE = 8   # small feature_map_size; spatial 64 required by the net
    SPATIAL = 64

    key = jax.random.PRNGKey(0)
    k_x, k_p = jax.random.split(key)
    x = jax.random.normal(k_x, (BATCH, IMG_CHANNELS, SPATIAL, SPATIAL),
                          dtype=jnp.float32)
    params = init_params(k_p, IMG_CHANNELS, FEATURE_MAP_SIZE)

    out = jax.jit(discriminator_forward)(x, params)
    out = jax.block_until_ready(out)
    assert out.shape == (BATCH,), out.shape

    ref = jax.block_until_ready(reference_forward(x, params))
    assert jnp.allclose(out, ref, atol=3e-2, rtol=3e-2), (out, ref)

    print("KERNEL_OK")
</pallas_src>

<mosaic_0001>
module attributes {stable_mosaic.version = 11 : i64} {
  func.func @_conv_kernel(%arg0: i32, %arg1: i32, %arg2: memref<1024x128xbf16, #tpu.memory_space<vmem>>, %arg3: memref<128x128xbf16, #tpu.memory_space<vmem>>, %arg4: memref<1024x128xbf16, #tpu.memory_space<vmem>>) attributes {dimension_semantics = [#tpu.dimension_semantics<parallel>, #tpu.dimension_semantics<arbitrary>], iteration_bounds = array<i64: 2, 1>, scalar_prefetch = 0 : i64, scratch_operands = 0 : i64, tpu.core_type = #tpu.core_type<tc>, window_params = [{transform_indices = @transform_0, window_bounds = array<i64: 1024, 128>}, {pipeline_mode = #tpu.pipeline_mode<synchronous>, transform_indices = @transform_1, window_bounds = array<i64: 128, 128>}, {transform_indices = @transform_2, window_bounds = array<i64: 1024, 128>}]} {
    %c0 = arith.constant 0 : index
    %c0_0 = arith.constant 0 : index
    %0 = vector.load %arg2[%c0, %c0_0] : memref<1024x128xbf16, #tpu.memory_space<vmem>>, vector<1024x128xbf16>
    %c0_1 = arith.constant 0 : index
    %c0_2 = arith.constant 0 : index
    %1 = vector.load %arg3[%c0_1, %c0_2] : memref<128x128xbf16, #tpu.memory_space<vmem>>, vector<128x128xbf16>
    %cst = arith.constant dense<0.000000e+00> : vector<1024x128xf32>
    %2 = tpu.matmul %0, %1, %cst {dimension_numbers = #tpu.dot_dimension_numbers<[1], [0], [0], [1], [0, 0, 1, 1], [], []>} : vector<1024x128xbf16>, vector<128x128xbf16>, vector<1024x128xf32> -> vector<1024x128xf32>
    %cst_3 = arith.constant 2.000000e-01 : f32
    %3 = vector.broadcast %cst_3 : f32 to vector<1024x128xf32>
    %4 = arith.mulf %3, %2 : vector<1024x128xf32>
    %5 = arith.maximumf %2, %4 : vector<1024x128xf32>
    %6 = arith.truncf %5 : vector<1024x128xf32> to vector<1024x128xbf16>
    %c0_4 = arith.constant 0 : index
    %c0_5 = arith.constant 0 : index
    %7 = vector.load %arg4[%c0_4, %c0_5] : memref<1024x128xbf16, #tpu.memory_space<vmem>>, vector<1024x128xbf16>
    tpu.vector_store %arg4[%c0_4, %c0_5], %6 {strides = array<i32>} : memref<1024x128xbf16, #tpu.memory_space<vmem>>, vector<1024x128xbf16>,
    return
  }
  func.func @transform_0(%arg0: i32, %arg1: i32) -> (i32, i32) {
    %c0_i32 = arith.constant 0 : i32
    return %arg0, %arg1 : i32, i32
  }
  func.func @transform_1(%arg0: i32, %arg1: i32) -> (i32, i32) {
    %c0_i32 = arith.constant 0 : i32
    %c0_i32_0 = arith.constant 0 : i32
    %c0_i32_1 = arith.constant 0 : i32
    return %c0_i32, %c0_i32_0 : i32, i32
  }
  func.func @transform_2(%arg0: i32, %arg1: i32) -> (i32, i32) {
    %c0_i32 = arith.constant 0 : i32
    %c0_i32_0 = arith.constant 0 : i32
    return %arg0, %c0_i32 : i32, i32
  }
}

module attributes {stable_mosaic.version = 11 : i64} {
  func.func @_conv_kernel(%arg0: i32, %arg1: i32, %arg2: memref<512x2048xbf16, #tpu.memory_space<vmem>>, %arg3: memref<2048x128xbf16, #tpu.memory_space<vmem>>, %arg4: memref<512x128xbf16, #tpu.memory_space<vmem>>, %arg5: memref<8x128xf32, #tpu.memory_space<vmem>>) attributes {dimension_semantics = [#tpu.dimension_semantics<parallel>, #tpu.dimension_semantics<arbitrary>], iteration_bounds = array<i64: 1, 1>, scalar_prefetch = 0 : i64, scratch_operands = 0 : i64, tpu.core_type = #tpu.core_type<tc>, window_params = [{transform_indices = @transform_0, window_bounds = array<i64: 512, 2048>}, {pipeline_mode = #tpu.pipeline_mode<synchronous>, transform_indices = @transform_1, window_bounds = array<i64: 2048, 128>}, {transform_indices = @transform_2, window_bounds = array<i64: 512, 128>}, {transform_indices = @transform_3, window_bounds = array<i64: 8, 128>}]} {
    %c0 = arith.constant 0 : index
    %c0_0 = arith.constant 0 : index
    %0 = vector.load %arg2[%c0, %c0_0] : memref<512x2048xbf16, #tpu.memory_space<vmem>>, vector<512x2048xbf16>
    %c0_1 = arith.constant 0 : index
    %c0_2 = arith.constant 0 : index
    %1 = vector.load %arg3[%c0_1, %c0_2] : memref<2048x128xbf16, #tpu.memory_space<vmem>>, vector<2048x128xbf16>
    %cst = arith.constant dense<0.000000e+00> : vector<512x128xf32>
    %2 = tpu.matmul %0, %1, %cst {dimension_numbers = #tpu.dot_dimension_numbers<[1], [0], [0], [1], [0, 0, 1, 1], [], []>} : vector<512x2048xbf16>, vector<2048x128xbf16>, vector<512x128xf32> -> vector<512x128xf32>
    %cst_3 = arith.constant dense<0.000000e+00> : vector<128xf32>
    %3 = vector.multi_reduction <add>, %2, %cst_3 [0] : vector<512x128xf32> to vector<128xf32>
    %4 = vector.shape_cast %3 : vector<128xf32> to vector<1x128xf32>
    %5 = arith.mulf %2, %2 : vector<512x128xf32>
    %cst_4 = arith.constant dense<0.000000e+00> : vector<128xf32>
    %6 = vector.multi_reduction <add>, %5, %cst_4 [0] : vector<512x128xf32> to vector<128xf32>
    %7 = vector.shape_cast %6 : vector<128xf32> to vector<1x128xf32>
    %cst_5 = arith.constant 0.000000e+00 : f32
    %8 = vector.broadcast %cst_5 : f32 to vector<6x128xf32>
    %9 = tpu.concatenate %4, %7, %8 in 0 : vector<1x128xf32>, vector<1x128xf32>, vector<6x128xf32> -> vector<8x128xf32>
    %c0_6 = arith.constant 0 : index
    %c0_7 = arith.constant 0 : index
    %10 = vector.load %arg5[%c0_6, %c0_7] : memref<8x128xf32, #tpu.memory_space<vmem>>, vector<8x128xf32>
    tpu.vector_store %arg5[%c0_6, %c0_7], %9 {strides = array<i32>} : memref<8x128xf32, #tpu.memory_space<vmem>>, vector<8x128xf32>,
    %11 = arith.truncf %2 : vector<512x128xf32> to vector<512x128xbf16>
    %c0_8 = arith.constant 0 : index
    %c0_9 = arith.constant 0 : index
    %12 = vector.load %arg4[%c0_8, %c0_9] : memref<512x128xbf16, #tpu.memory_space<vmem>>, vector<512x128xbf16>
    tpu.vector_store %arg4[%c0_8, %c0_9], %11 {strides = array<i32>} : memref<512x128xbf16, #tpu.memory_space<vmem>>, vector<512x128xbf16>,
    return
  }
  func.func @transform_0(%arg0: i32, %arg1: i32) -> (i32, i32) {
    %c0_i32 = arith.constant 0 : i32
    return %arg0, %arg1 : i32, i32
  }
  func.func @transform_1(%arg0: i32, %arg1: i32) -> (i32, i32) {
    %c0_i32 = arith.constant 0 : i32
    %c0_i32_0 = arith.constant 0 : i32
    %c0_i32_1 = arith.constant 0 : i32
    return %c0_i32, %c0_i32_0 : i32, i32
  }
  func.func @transform_2(%arg0: i32, %arg1: i32) -> (i32, i32) {
    %c0_i32 = arith.constant 0 : i32
    %c0_i32_0 = arith.constant 0 : i32
    return %arg0, %c0_i32 : i32, i32
  }
  func.func @transform_3(%arg0: i32, %arg1: i32) -> (i32, i32) {
    %c0_i32 = arith.constant 0 : i32
    %c0_i32_0 = arith.constant 0 : i32
    return %arg0, %c0_i32 : i32, i32
  }
}

module attributes {stable_mosaic.version = 11 : i64} {
  func.func @_conv_kernel(%arg0: i32, %arg1: i32, %arg2: memref<128x2048xbf16, #tpu.memory_space<vmem>>, %arg3: memref<2048x128xbf16, #tpu.memory_space<vmem>>, %arg4: memref<1x2048xbf16, #tpu.memory_space<vmem>>, %arg5: memref<1x2048xbf16, #tpu.memory_space<vmem>>, %arg6: memref<128x128xbf16, #tpu.memory_space<vmem>>, %arg7: memref<8x128xf32, #tpu.memory_space<vmem>>) attributes {dimension_semantics = [#tpu.dimension_semantics<parallel>, #tpu.dimension_semantics<arbitrary>], iteration_bounds = array<i64: 1, 1>, scalar_prefetch = 0 : i64, scratch_operands = 0 : i64, tpu.core_type = #tpu.core_type<tc>, window_params = [{transform_indices = @transform_0, window_bounds = array<i64: 128, 2048>}, {pipeline_mode = #tpu.pipeline_mode<synchronous>, transform_indices = @transform_1, window_bounds = array<i64: 2048, 128>}, {transform_indices = @transform_2, window_bounds = array<i64: 1, 2048>}, {transform_indices = @transform_3, window_bounds = array<i64: 1, 2048>}, {transform_indices = @transform_4, window_bounds = array<i64: 128, 128>}, {transform_indices = @transform_5, window_bounds = array<i64: 8, 128>}]} {
    %c0 = arith.constant 0 : index
    %c0_0 = arith.constant 0 : index
    %0 = vector.load %arg2[%c0, %c0_0] : memref<128x2048xbf16, #tpu.memory_space<vmem>>, vector<128x2048xbf16>
    %c0_1 = arith.constant 0 : index
    %c0_2 = arith.constant 0 : index
    %1 = vector.load %arg4[%c0_1, %c0_2] : memref<1x2048xbf16, #tpu.memory_space<vmem>>, vector<1x2048xbf16>
    %2 = vector.broadcast %1 : vector<1x2048xbf16> to vector<128x2048xbf16>
    %3 = arith.mulf %0, %2 : vector<128x2048xbf16>
    %c0_3 = arith.constant 0 : index
    %c0_4 = arith.constant 0 : index
    %4 = vector.load %arg5[%c0_3, %c0_4] : memref<1x2048xbf16, #tpu.memory_space<vmem>>, vector<1x2048xbf16>
    %5 = vector.broadcast %4 : vector<1x2048xbf16> to vector<128x2048xbf16>
    %6 = arith.addf %3, %5 : vector<128x2048xbf16>
    %cst = arith.constant 2.001950e-01 : bf16
    %7 = vector.broadcast %cst : bf16 to vector<128x2048xbf16>
    %8 = arith.mulf %7, %6 : vector<128x2048xbf16>
    %9 = arith.maximumf %6, %8 : vector<128x2048xbf16>
    %c0_5 = arith.constant 0 : index
    %c0_6 = arith.constant 0 : index
    %10 = vector.load %arg3[%c0_5, %c0_6] : memref<2048x128xbf16, #tpu.memory_space<vmem>>, vector<2048x128xbf16>
    %cst_7 = arith.constant dense<0.000000e+00> : vector<128x128xf32>
    %11 = tpu.matmul %9, %10, %cst_7 {dimension_numbers = #tpu.dot_dimension_numbers<[1], [0], [0], [1], [0, 0, 1, 1], [], []>} : vector<128x2048xbf16>, vector<2048x128xbf16>, vector<128x128xf32> -> vector<128x128xf32>
    %cst_8 = arith.constant dense<0.000000e+00> : vector<128xf32>
    %12 = vector.multi_reduction <add>, %11, %cst_8 [0] : vector<128x128xf32> to vector<128xf32>
    %13 = vector.shape_cast %12 : vector<128xf32> to vector<1x128xf32>
    %14 = arith.mulf %11, %11 : vector<128x128xf32>
    %cst_9 = arith.constant dense<0.000000e+00> : vector<128xf32>
    %15 = vector.multi_reduction <add>, %14, %cst_9 [0] : vector<128x128xf32> to vector<128xf32>
    %16 = vector.shape_cast %15 : vector<128xf32> to vector<1x128xf32>
    %cst_10 = arith.constant 0.000000e+00 : f32
    %17 = vector.broadcast %cst_10 : f32 to vector<6x128xf32>
    %18 = tpu.concatenate %13, %16, %17 in 0 : vector<1x128xf32>, vector<1x128xf32>, vector<6x128xf32> -> vector<8x128xf32>
    %c0_11 = arith.constant 0 : index
    %c0_12 = arith.constant 0 : index
    %19 = vector.load %arg7[%c0_11, %c0_12] : memref<8x128xf32, #tpu.memory_space<vmem>>, vector<8x128xf32>
    tpu.vector_store %arg7[%c0_11, %c0_12], %18 {strides = array<i32>} : memref<8x128xf32, #tpu.memory_space<vmem>>, vector<8x128xf32>,
    %20 = arith.truncf %11 : vector<128x128xf32> to vector<128x128xbf16>
    %c0_13 = arith.constant 0 : index
    %c0_14 = arith.constant 0 : index
    %21 = vector.load %arg6[%c0_13, %c0_14] : memref<128x128xbf16, #tpu.memory_space<vmem>>, vector<128x128xbf16>
    tpu.vector_store %arg6[%c0_13, %c0_14], %20 {strides = array<i32>} : memref<128x128xbf16, #tpu.memory_space<vmem>>, vector<128x128xbf16>,
    return
  }
  func.func @transform_0(%arg0: i32, %arg1: i32) -> (i32, i32) {
    %c0_i32 = arith.constant 0 : i32
    return %arg0, %arg1 : i32, i32
  }
  func.func @transform_1(%arg0: i32, %arg1: i32) -> (i32, i32) {
    %c0_i32 = arith.constant 0 : i32
    %c0_i32_0 = arith.constant 0 : i32
    %c0_i32_1 = arith.constant 0 : i32
    return %c0_i32, %c0_i32_0 : i32, i32
  }
  func.func @transform_2(%arg0: i32, %arg1: i32) -> (i32, i32) {
    %c0_i32 = arith.constant 0 : i32
    %c0_i32_0 = arith.constant 0 : i32
    return %c0_i32, %arg1 : i32, i32
  }
  func.func @transform_3(%arg0: i32, %arg1: i32) -> (i32, i32) {
    %c0_i32 = arith.constant 0 : i32
    %c0_i32_0 = arith.constant 0 : i32
    return %c0_i32, %arg1 : i32, i32
  }
  func.func @transform_4(%arg0: i32, %arg1: i32) -> (i32, i32) {
    %c0_i32 = arith.constant 0 : i32
    %c0_i32_0 = arith.constant 0 : i32
    return %arg0, %c0_i32 : i32, i32
  }
  func.func @transform_5(%arg0: i32, %arg1: i32) -> (i32, i32) {
    %c0_i32 = arith.constant 0 : i32
    %c0_i32_0 = arith.constant 0 : i32
    return %arg0, %c0_i32 : i32, i32
  }
}

module attributes {stable_mosaic.version = 11 : i64} {
  func.func @_conv_kernel(%arg0: i32, %arg1: i32, %arg2: memref<32x2048xbf16, #tpu.memory_space<vmem>>, %arg3: memref<2048x128xbf16, #tpu.memory_space<vmem>>, %arg4: memref<1x2048xbf16, #tpu.memory_space<vmem>>, %arg5: memref<1x2048xbf16, #tpu.memory_space<vmem>>, %arg6: memref<32x128xbf16, #tpu.memory_space<vmem>>, %arg7: memref<8x128xf32, #tpu.memory_space<vmem>>) attributes {dimension_semantics = [#tpu.dimension_semantics<parallel>, #tpu.dimension_semantics<arbitrary>], iteration_bounds = array<i64: 1, 1>, scalar_prefetch = 0 : i64, scratch_operands = 0 : i64, tpu.core_type = #tpu.core_type<tc>, window_params = [{transform_indices = @transform_0, window_bounds = array<i64: 32, 2048>}, {pipeline_mode = #tpu.pipeline_mode<synchronous>, transform_indices = @transform_1, window_bounds = array<i64: 2048, 128>}, {transform_indices = @transform_2, window_bounds = array<i64: 1, 2048>}, {transform_indices = @transform_3, window_bounds = array<i64: 1, 2048>}, {transform_indices = @transform_4, window_bounds = array<i64: 32, 128>}, {transform_indices = @transform_5, window_bounds = array<i64: 8, 128>}]} {
    %c0 = arith.constant 0 : index
    %c0_0 = arith.constant 0 : index
    %0 = vector.load %arg2[%c0, %c0_0] : memref<32x2048xbf16, #tpu.memory_space<vmem>>, vector<32x2048xbf16>
    %c0_1 = arith.constant 0 : index
    %c0_2 = arith.constant 0 : index
    %1 = vector.load %arg4[%c0_1, %c0_2] : memref<1x2048xbf16, #tpu.memory_space<vmem>>, vector<1x2048xbf16>
    %2 = vector.broadcast %1 : vector<1x2048xbf16> to vector<32x2048xbf16>
    %3 = arith.mulf %0, %2 : vector<32x2048xbf16>
    %c0_3 = arith.constant 0 : index
    %c0_4 = arith.constant 0 : index
    %4 = vector.load %arg5[%c0_3, %c0_4] : memref<1x2048xbf16, #tpu.memory_space<vmem>>, vector<1x2048xbf16>
    %5 = vector.broadcast %4 : vector<1x2048xbf16> to vector<32x2048xbf16>
    %6 = arith.addf %3, %5 : vector<32x2048xbf16>
    %cst = arith.constant 2.001950e-01 : bf16
    %7 = vector.broadcast %cst : bf16 to vector<32x2048xbf16>
    %8 = arith.mulf %7, %6 : vector<32x2048xbf16>
    %9 = arith.maximumf %6, %8 : vector<32x2048xbf16>
    %c0_5 = arith.constant 0 : index
    %c0_6 = arith.constant 0 : index
    %10 = vector.load %arg3[%c0_5, %c0_6] : memref<2048x128xbf16, #tpu.memory_space<vmem>>, vector<2048x128xbf16>
    %cst_7 = arith.constant dense<0.000000e+00> : vector<32x128xf32>
    %11 = tpu.matmul %9, %10, %cst_7 {dimension_numbers = #tpu.dot_dimension_numbers<[1], [0], [0], [1], [0, 0, 1, 1], [], []>} : vector<32x2048xbf16>, vector<2048x128xbf16>, vector<32x128xf32> -> vector<32x128xf32>
    %cst_8 = arith.constant dense<0.000000e+00> : vector<128xf32>
    %12 = vector.multi_reduction <add>, %11, %cst_8 [0] : vector<32x128xf32> to vector<128xf32>
    %13 = vector.shape_cast %12 : vector<128xf32> to vector<1x128xf32>
    %14 = arith.mulf %11, %11 : vector<32x128xf32>
    %cst_9 = arith.constant dense<0.000000e+00> : vector<128xf32>
    %15 = vector.multi_reduction <add>, %14, %cst_9 [0] : vector<32x128xf32> to vector<128xf32>
    %16 = vector.shape_cast %15 : vector<128xf32> to vector<1x128xf32>
    %cst_10 = arith.constant 0.000000e+00 : f32
    %17 = vector.broadcast %cst_10 : f32 to vector<6x128xf32>
    %18 = tpu.concatenate %13, %16, %17 in 0 : vector<1x128xf32>, vector<1x128xf32>, vector<6x128xf32> -> vector<8x128xf32>
    %c0_11 = arith.constant 0 : index
    %c0_12 = arith.constant 0 : index
    %19 = vector.load %arg7[%c0_11, %c0_12] : memref<8x128xf32, #tpu.memory_space<vmem>>, vector<8x128xf32>
    tpu.vector_store %arg7[%c0_11, %c0_12], %18 {strides = array<i32>} : memref<8x128xf32, #tpu.memory_space<vmem>>, vector<8x128xf32>,
    %20 = arith.truncf %11 : vector<32x128xf32> to vector<32x128xbf16>
    %c0_13 = arith.constant 0 : index
    %c0_14 = arith.constant 0 : index
    %21 = vector.load %arg6[%c0_13, %c0_14] : memref<32x128xbf16, #tpu.memory_space<vmem>>, vector<32x128xbf16>
    tpu.vector_store %arg6[%c0_13, %c0_14], %20 {strides = array<i32>} : memref<32x128xbf16, #tpu.memory_space<vmem>>, vector<32x128xbf16>,
    return
  }
  func.func @transform_0(%arg0: i32, %arg1: i32) -> (i32, i32) {
    %c0_i32 = arith.constant 0 : i32
    return %arg0, %arg1 : i32, i32
  }
  func.func @transform_1(%arg0: i32, %arg1: i32) -> (i32, i32) {
    %c0_i32 = arith.constant 0 : i32
    %c0_i32_0 = arith.constant 0 : i32
    %c0_i32_1 = arith.constant 0 : i32
    return %c0_i32, %c0_i32_0 : i32, i32
  }
  func.func @transform_2(%arg0: i32, %arg1: i32) -> (i32, i32) {
    %c0_i32 = arith.constant 0 : i32
    %c0_i32_0 = arith.constant 0 : i32
    return %c0_i32, %arg1 : i32, i32
  }
  func.func @transform_3(%arg0: i32, %arg1: i32) -> (i32, i32) {
    %c0_i32 = arith.constant 0 : i32
    %c0_i32_0 = arith.constant 0 : i32
    return %c0_i32, %arg1 : i32, i32
  }
  func.func @transform_4(%arg0: i32, %arg1: i32) -> (i32, i32) {
    %c0_i32 = arith.constant 0 : i32
    %c0_i32_0 = arith.constant 0 : i32
    return %arg0, %c0_i32 : i32, i32
  }
  func.func @transform_5(%arg0: i32, %arg1: i32) -> (i32, i32) {
    %c0_i32 = arith.constant 0 : i32
    %c0_i32_0 = arith.constant 0 : i32
    return %arg0, %c0_i32 : i32, i32
  }
}

module attributes {stable_mosaic.version = 11 : i64} {
  func.func @_conv_kernel(%arg0: i32, %arg1: i32, %arg2: memref<8x2048xbf16, #tpu.memory_space<vmem>>, %arg3: memref<2048x128xbf16, #tpu.memory_space<vmem>>, %arg4: memref<1x2048xbf16, #tpu.memory_space<vmem>>, %arg5: memref<1x2048xbf16, #tpu.memory_space<vmem>>, %arg6: memref<8x128xf32, #tpu.memory_space<vmem>>) attributes {dimension_semantics = [#tpu.dimension_semantics<parallel>, #tpu.dimension_semantics<arbitrary>], iteration_bounds = array<i64: 1, 1>, scalar_prefetch = 0 : i64, scratch_operands = 0 : i64, tpu.core_type = #tpu.core_type<tc>, window_params = [{transform_indices = @transform_0, window_bounds = array<i64: 8, 2048>}, {pipeline_mode = #tpu.pipeline_mode<synchronous>, transform_indices = @transform_1, window_bounds = array<i64: 2048, 128>}, {transform_indices = @transform_2, window_bounds = array<i64: 1, 2048>}, {transform_indices = @transform_3, window_bounds = array<i64: 1, 2048>}, {transform_indices = @transform_4, window_bounds = array<i64: 8, 128>}]} {
    %c0 = arith.constant 0 : index
    %c0_0 = arith.constant 0 : index
    %0 = vector.load %arg2[%c0, %c0_0] : memref<8x2048xbf16, #tpu.memory_space<vmem>>, vector<8x2048xbf16>
    %c0_1 = arith.constant 0 : index
    %c0_2 = arith.constant 0 : index
    %1 = vector.load %arg4[%c0_1, %c0_2] : memref<1x2048xbf16, #tpu.memory_space<vmem>>, vector<1x2048xbf16>
    %2 = vector.broadcast %1 : vector<1x2048xbf16> to vector<8x2048xbf16>
    %3 = arith.mulf %0, %2 : vector<8x2048xbf16>
    %c0_3 = arith.constant 0 : index
    %c0_4 = arith.constant 0 : index
    %4 = vector.load %arg5[%c0_3, %c0_4] : memref<1x2048xbf16, #tpu.memory_space<vmem>>, vector<1x2048xbf16>
    %5 = vector.broadcast %4 : vector<1x2048xbf16> to vector<8x2048xbf16>
    %6 = arith.addf %3, %5 : vector<8x2048xbf16>
    %cst = arith.constant 2.001950e-01 : bf16
    %7 = vector.broadcast %cst : bf16 to vector<8x2048xbf16>
    %8 = arith.mulf %7, %6 : vector<8x2048xbf16>
    %9 = arith.maximumf %6, %8 : vector<8x2048xbf16>
    %c0_5 = arith.constant 0 : index
    %c0_6 = arith.constant 0 : index
    %10 = vector.load %arg3[%c0_5, %c0_6] : memref<2048x128xbf16, #tpu.memory_space<vmem>>, vector<2048x128xbf16>
    %cst_7 = arith.constant dense<0.000000e+00> : vector<8x128xf32>
    %11 = tpu.matmul %9, %10, %cst_7 {dimension_numbers = #tpu.dot_dimension_numbers<[1], [0], [0], [1], [0, 0, 1, 1], [], []>} : vector<8x2048xbf16>, vector<2048x128xbf16>, vector<8x128xf32> -> vector<8x128xf32>
    %cst_8 = arith.constant 0.000000e+00 : f32
    %12 = vector.broadcast %cst_8 : f32 to vector<8x128xf32>
    %13 = arith.subf %12, %11 : vector<8x128xf32>
    %14 = math.exp %13 : vector<8x128xf32>
    %cst_9 = arith.constant 1.000000e+00 : f32
    %15 = vector.broadcast %cst_9 : f32 to vector<8x128xf32>
    %16 = arith.addf %15, %14 : vector<8x128xf32>
    %17 = tpu.reciprocal %16 {approx = true} : vector<8x128xf32> -> vector<8x128xf32>
    %c0_10 = arith.constant 0 : index
    %c0_11 = arith.constant 0 : index
    %18 = vector.load %arg6[%c0_10, %c0_11] : memref<8x128xf32, #tpu.memory_space<vmem>>, vector<8x128xf32>
    tpu.vector_store %arg6[%c0_10, %c0_11], %17 {strides = array<i32>} : memref<8x128xf32, #tpu.memory_space<vmem>>, vector<8x128xf32>,
    return
  }
  func.func @transform_0(%arg0: i32, %arg1: i32) -> (i32, i32) {
    %c0_i32 = arith.constant 0 : i32
    return %arg0, %arg1 : i32, i32
  }
  func.func @transform_1(%arg0: i32, %arg1: i32) -> (i32, i32) {
    %c0_i32 = arith.constant 0 : i32
    %c0_i32_0 = arith.constant 0 : i32
    %c0_i32_1 = arith.constant 0 : i32
    return %c0_i32, %c0_i32_0 : i32, i32
  }
  func.func @transform_2(%arg0: i32, %arg1: i32) -> (i32, i32) {
    %c0_i32 = arith.constant 0 : i32
    %c0_i32_0 = arith.constant 0 : i32
    return %c0_i32, %arg1 : i32, i32
  }
  func.func @transform_3(%arg0: i32, %arg1: i32) -> (i32, i32) {
    %c0_i32 = arith.constant 0 : i32
    %c0_i32_0 = arith.constant 0 : i32
    return %c0_i32, %arg1 : i32, i32
  }
  func.func @transform_4(%arg0: i32, %arg1: i32) -> (i32, i32) {
    %c0_i32 = arith.constant 0 : i32
    %c0_i32_0 = arith.constant 0 : i32
    return %arg0, %c0_i32 : i32, i32
  }
}

</mosaic_0001>

<bundles_post_ra>
// kernel: discriminator_forward.5
= control target key start
LH: loop header
LB: loop body
LE: loop exit
PB: predicated region body
PF: predicated region fallthrough
CT: control target
= control target key end

     0   :  { %s3345_s9 = smov 0   ;;  %s3347_s10 = smov 0   ;;  %s3541_s0 = inlined_call_operand.vmem [shape: bf16[2048,128], index: 0, kind: input, shape index: {}]   ;;  %s3542_s1 = inlined_call_operand.vmem [shape: bf16[128,128], index: 1, kind: input, shape index: {}]   ;;  %s3543_s2 = inlined_call_operand.vmem [shape: bf16[2048,128], index: 2, kind: output, shape index: {}]  }
   0x1   :  { %s3349_s11 = smov 0  }
   0x2 LB: > { %s24_s12 = sadd.s32 1, %s3324_s10  ;;  %p2260_p0 = scmp.ge.s32.totalorder %s3328_s11, 1  ;;  %s3328_s11 = sphi %s3349_s11, %s12_s11   ;;  %s3324_s10 = sphi %s3347_s10, %s3545_s10   ;;  %s3320_s9 = sphi %s3345_s9, %s3544_s9  }
   0x3   : > { %p26_p1 = scmp.ge.s32.totalorder %s24_s12, 2  ;;  %p130_p2 = scmp.lt.s32.totalorder %s3328_s11, 3 }
   0x5   : > { %s3547_s12 = smov (%p26_p1, %s24_s12), 0  ;;  %p131_p3 = pnand %p2260_p0, %p130_p2 }
   0x6   : > { %v3234_v0 = vld [vmem:[%s3542_s1] sm:$0xff] (!%p131_p3)   ;;  %s2261_s15 = sshll.u32 (!%p131_p3), %s3320_s9, 7  ;;  %v3235_v1 = vld [vmem:[%s3542_s1 + $0x8] sm:$0xff] (!%p131_p3)   ;;  %v3236_v2 = vld [vmem:[%s3542_s1 + $0x10] sm:$0xff] (!%p131_p3)  }
   0x7   : > { %134 = sbr.rel (%p131_p3) target bundleno = 382 (0x17e), region = 28  ;;  %p156_p4 = scmp.lt.s32.totalorder (!%p131_p3), %s2261_s15, 255  ;;  %3050 = vmatprep.subr.bf16.mxu0 (!%p131_p3), %v3234_v0  ;;  %3194 = vmatprep.subr.bf16.mxu1 (!%p131_p3), %v3234_v0  ;;  %v3237_v3 = vld [vmem:[%s3542_s1 + $0x18] sm:$0xff] (!%p131_p3)   ;;  %v3238_v6 = vld [vmem:[%s3542_s1 + $0x20] sm:$0xff] (!%p131_p3)   ;;  %v3239_v7 = vld [vmem:[%s3542_s1 + $0x28] sm:$0xff] (!%p131_p3)  }
   0x8   : > { %3051 = vmatpush3.bf16.msra.mxu0 (!%p131_p3), %v3234_v0  ;;  %3202 = vmatpush3.bf16.msra.mxu1 (!%p131_p3), %v3234_v0  ;;  %v3240_v8 = vld [vmem:[%s3542_s1 + $0x30] sm:$0xff] (!%p131_p3)   ;;  %v3241_v9 = vld [vmem:[%s3542_s1 + $0x38] sm:$0xff] (!%p131_p3)  }
   0x9   : > { %3052 = vmatprep.subr.bf16.mxu0 (!%p131_p3), %v3235_v1  ;;  %3195 = vmatprep.subr.bf16.mxu1 (!%p131_p3), %v3235_v1 }
   0xc   : > { %3053 = vmatpush3.bf16.msra.mxu0 (!%p131_p3), %v3235_v1  ;;  %3203 = vmatpush3.bf16.msra.mxu1 (!%p131_p3), %v3235_v1 }
   0xd   : > { %3054 = vmatprep.subr.bf16.mxu0 (!%p131_p3), %v3236_v2  ;;  %3196 = vmatprep.subr.bf16.mxu1 (!%p131_p3), %v3236_v2 }
   0xe   : > { %s3549_s15 = smov (!%p156_p4, %s2261_s15), 255 }
   0xf   : > { %s2262_s20 = sshll.u32 %s3549_s15, 2 }
  0x10   : > { %s3380_s23 = scalar_lea.vmem %s3541_s0, %s2262_s20  ;;  %3055 = vmatpush3.bf16.msra.mxu0 %v3236_v2  ;;  %3204 = vmatpush3.bf16.msra.mxu1 %v3236_v2  ;;  %s3466_s8 = scalar_lea.vmem %s3543_s2, %s2262_s20 }
  0x11   : > { %v3242_v4 = vld [vmem:[%s3380_s23] sm:$0xff]   ;;  %3056 = vmatprep.subr.bf16.mxu0 %v3237_v3  ;;  %3197 = vmatprep.subr.bf16.mxu1 %v3237_v3  ;;  %v3244_v10 = vld [vmem:[%s3380_s23 + $0x8] sm:$0xff]   ;;  %v3246_v12 = vld [vmem:[%s3380_s23 + $0x10] sm:$0xff]  }
  0x12   : > { %v3243_v5 = vld [vmem:[%s3380_s23 + $0x100] sm:$0xff]   ;;  %3066 = vmatprep.mubr.bf16.mxu0 %v3242_v4  ;;  %v3245_v11 = vld [vmem:[%s3380_s23 + $0x108] sm:$0xff]   ;;  %v3247_v13 = vld [vmem:[%s3380_s23 + $0x110] sm:$0xff]  }
  0x13   : > { %3130 = vmatprep.mubr.bf16.mxu1 %v3243_v5  ;;  %v3248_v14 = vld [vmem:[%s3380_s23 + $0x18] sm:$0xff]   ;;  %v3250_v16 = vld [vmem:[%s3380_s23 + $0x20] sm:$0xff]   ;;  %v3252_v18 = vld [vmem:[%s3380_s23 + $0x28] sm:$0xff]  }
  0x14   : > { %3057 = vmatpush3.bf16.msra.mxu0 %v3237_v3  ;;  %3205 = vmatpush3.bf16.msra.mxu1 %v3237_v3  ;;  %v3249_v15 = vld [vmem:[%s3380_s23 + $0x118] sm:$0xff]   ;;  %v3251_v17 = vld [vmem:[%s3380_s23 + $0x120] sm:$0xff]   ;;  %v3253_v19 = vld [vmem:[%s3380_s23 + $0x128] sm:$0xff]  }
  0x15   : > { %3058 = vmatprep.subr.bf16.mxu0 %v3238_v6  ;;  %3198 = vmatprep.subr.bf16.mxu1 %v3238_v6  ;;  %v3254_v20 = vld [vmem:[%s3380_s23 + $0x30] sm:$0xff]   ;;  %v3256_v22 = vld [vmem:[%s3380_s23 + $0x38] sm:$0xff]   ;;  %v3258_v24 = vld [vmem:[%s3380_s23 + $0x40] sm:$0xff]  }
  0x16   : > { %v3255_v21 = vld [vmem:[%s3380_s23 + $0x130] sm:$0xff]   ;;  %v3257_v23 = vld [vmem:[%s3380_s23 + $0x138] sm:$0xff]   ;;  %v3259_v25 = vld [vmem:[%s3380_s23 + $0x140] sm:$0xff]  }
  0x17   : > { %v3260_v26 = vld [vmem:[%s3380_s23 + $0x48] sm:$0xff]   ;;  %v3262_v28 = vld [vmem:[%s3380_s23 + $0x50] sm:$0xff]   ;;  %v3264_v30 = vld [vmem:[%s3380_s23 + $0x58] sm:$0xff]  }
  0x18   : > { %3059 = vmatpush3.bf16.msra.mxu0 %v3238_v6  ;;  %3206 = vmatpush3.bf16.msra.mxu1 %v3238_v6  ;;  %v3261_v27 = vld [vmem:[%s3380_s23 + $0x148] sm:$0xff]   ;;  %v3263_v29 = vld [vmem:[%s3380_s23 + $0x150] sm:$0xff]   ;;  %v3265_v31 = vld [vmem:[%s3380_s23 + $0x158] sm:$0xff]  }
  0x19   : > { %3060 = vmatprep.subr.bf16.mxu0 %v3239_v7  ;;  %3199 = vmatprep.subr.bf16.mxu1 %v3239_v7  ;;  %v3266_v32 = vld [vmem:[%s3380_s23 + $0x60] sm:$0xff]   ;;  %v3268_v34 = vld [vmem:[%s3380_s23 + $0x68] sm:$0xff]   ;;  %v3270_v36 = vld [vmem:[%s3380_s23 + $0x70] sm:$0xff]  }
  0x1a   : > { %v3267_v33 = vld [vmem:[%s3380_s23 + $0x160] sm:$0xff]   ;;  %v3269_v35 = vld [vmem:[%s3380_s23 + $0x168] sm:$0xff]   ;;  %v3271_v37 = vld [vmem:[%s3380_s23 + $0x170] sm:$0xff]  }
  0x1b   : > { %v3272_v38 = vld [vmem:[%s3380_s23 + $0x78] sm:$0xff]   ;;  %v3274_v40 = vld [vmem:[%s3380_s23 + $0x80] sm:$0xff]   ;;  %v3276_v42 = vld [vmem:[%s3380_s23 + $0x88] sm:$0xff]  }
  0x1c   : > { %3061 = vmatpush3.bf16.msra.mxu0 %v3239_v7  ;;  %3207 = vmatpush3.bf16.msra.mxu1 %v3239_v7  ;;  %v3273_v39 = vld [vmem:[%s3380_s23 + $0x178] sm:$0xff]   ;;  %v3275_v41 = vld [vmem:[%s3380_s23 + $0x180] sm:$0xff]   ;;  %v3277_v43 = vld [vmem:[%s3380_s23 + $0x188] sm:$0xff]  }
  0x1d   : > { %3062 = vmatprep.subr.bf16.mxu0 %v3240_v8  ;;  %3200 = vmatprep.subr.bf16.mxu1 %v3240_v8  ;;  %v3278_v44 = vld [vmem:[%s3380_s23 + $0x90] sm:$0xff]   ;;  %v3280_v46 = vld [vmem:[%s3380_s23 + $0x98] sm:$0xff]   ;;  %v3282_v48 = vld [vmem:[%s3380_s23 + $0xa0] sm:$0xff]  }
  0x1e   : > { %v3279_v45 = vld [vmem:[%s3380_s23 + $0x190] sm:$0xff]   ;;  %v3281_v47 = vld [vmem:[%s3380_s23 + $0x198] sm:$0xff]   ;;  %v3283_v49 = vld [vmem:[%s3380_s23 + $0x1a0] sm:$0xff]  }
  0x1f   : > { %v3284_v50 = vld [vmem:[%s3380_s23 + $0xa8] sm:$0xff]   ;;  %v3286_v52 = vld [vmem:[%s3380_s23 + $0xb0] sm:$0xff]   ;;  %v3288_v54 = vld [vmem:[%s3380_s23 + $0xb8] sm:$0xff]  }
  0x20   : > { %3063 = vmatpush3.bf16.msra.mxu0 %v3240_v8  ;;  %3208 = vmatpush3.bf16.msra.mxu1 %v3240_v8  ;;  %v3285_v51 = vld [vmem:[%s3380_s23 + $0x1a8] sm:$0xff]   ;;  %v3287_v53 = vld [vmem:[%s3380_s23 + $0x1b0] sm:$0xff]   ;;  %v3289_v55 = vld [vmem:[%s3380_s23 + $0x1b8] sm:$0xff]  }
  0x21   : > { %3064 = vmatprep.subr.bf16.mxu0 %v3241_v9  ;;  %3201 = vmatprep.subr.bf16.mxu1 %v3241_v9  ;;  %v3290_v56 = vld [vmem:[%s3380_s23 + $0xc0] sm:$0xff]   ;;  %v3292_v58 = vld [vmem:[%s3380_s23 + $0xc8] sm:$0xff]   ;;  %v3294_v60 = vld [vmem:[%s3380_s23 + $0xd0] sm:$0xff]  }
  0x22   : > { %v3291_v57 = vld [vmem:[%s3380_s23 + $0x1c0] sm:$0xff]   ;;  %v3293_v59 = vld [vmem:[%s3380_s23 + $0x1c8] sm:$0xff]   ;;  %v3295_v61 = vld [vmem:[%s3380_s23 + $0x1d0] sm:$0xff]  }
  0x23   : > { %v3296_v62 = vld [vmem:[%s3380_s23 + $0xd8] sm:$0xff]   ;;  %v3298_v0 = vld [vmem:[%s3380_s23 + $0xe0] sm:$0xff]   ;;  %v3300_v2 = vld [vmem:[%s3380_s23 + $0xe8] sm:$0xff]  }
  0x24   : > { %3065 = vmatpush3.bf16.msra.mxu0 %v3241_v9  ;;  %3209 = vmatpush3.bf16.msra.mxu1 %v3241_v9  ;;  %v3297_v63 = vld [vmem:[%s3380_s23 + $0x1d8] sm:$0xff]   ;;  %v3299_v1 = vld [vmem:[%s3380_s23 + $0x1e0] sm:$0xff]   ;;  %v3301_v3 = vld [vmem:[%s3380_s23 + $0x1e8] sm:$0xff]  }
  0x25   : > { %v3302_v4 = vld [vmem:[%s3380_s23 + $0xf0] sm:$0xff]   ;;  %v3304_v6 = vld [vmem:[%s3380_s23 + $0xf8] sm:$0xff]  }
  0x26   : > { %v3303_v5 = vld [vmem:[%s3380_s23 + $0x1f0] sm:$0xff]   ;;  %v3305_v7 = vld [vmem:[%s3380_s23 + $0x1f8] sm:$0xff]  }
  0x27   : > { %3067 = vmatmul.mubr.bf16.vlgmr.msra.gmra.mrb[0].mxu0 %v3244_v10  ;;  %3131 = vmatmul.mubr.bf16.vlgmr.msra.gmra.mrb[0].mxu1 %v3245_v11 }
  0x28   : > { %3070 = vmatprep.mubr.bf16.mxu0 %v3246_v12  ;;  %3134 = vmatprep.mubr.bf16.mxu1 %v3247_v13 }
  0x2f   : > { %3071 = vmatmul.mubr.bf16.gmra.mrb[4].mxu0 %v3248_v14  ;;  %3135 = vmatmul.mubr.bf16.gmra.mrb[4].mxu1 %v3249_v15 }
  0x30   : > { %3074 = vmatprep.mubr.bf16.mxu0 %v3250_v16  ;;  %3138 = vmatprep.mubr.bf16.mxu1 %v3251_v17 }
  0x37   : > { %3075 = vmatmul.mubr.bf16.gmra.mrb[8].mxu0 %v3252_v18  ;;  %3139 = vmatmul.mubr.bf16.gmra.mrb[8].mxu1 %v3253_v19 }
  0x38   : > { %3078 = vmatprep.mubr.bf16.mxu0 %v3254_v20  ;;  %3142 = vmatprep.mubr.bf16.mxu1 %v3255_v21 }
  0x3f   : > { %3079 = vmatmul.mubr.bf16.gmra.mrb[12].mxu0 %v3256_v22  ;;  %3143 = vmatmul.mubr.bf16.gmra.mrb[12].mxu1 %v3257_v23 }
  0x40   : > { %3082 = vmatprep.mubr.bf16.mxu0 %v3258_v24  ;;  %3146 = vmatprep.mubr.bf16.mxu1 %v3259_v25 }
  0x47   : > { %3083 = vmatmul.mubr.bf16.gmra.mrb[16].mxu0 %v3260_v26  ;;  %3147 = vmatmul.mubr.bf16.gmra.mrb[16].mxu1 %v3261_v27 }
  0x48   : > { %3086 = vmatprep.mubr.bf16.mxu0 %v3262_v28  ;;  %3150 = vmatprep.mubr.bf16.mxu1 %v3263_v29 }
  0x4f   : > { %3087 = vmatmul.mubr.bf16.gmra.mrb[20].mxu0 %v3264_v30  ;;  %3151 = vmatmul.mubr.bf16.gmra.mrb[20].mxu1 %v3265_v31 }
  0x50   : > { %3090 = vmatprep.mubr.bf16.mxu0 %v3266_v32  ;;  %3154 = vmatprep.mubr.bf16.mxu1 %v3267_v33 }
  0x57   : > { %3091 = vmatmul.mubr.bf16.gmra.mrb[24].mxu0 %v3268_v34  ;;  %3155 = vmatmul.mubr.bf16.gmra.mrb[24].mxu1 %v3269_v35 }
  0x58   : > { %3094 = vmatprep.mubr.bf16.mxu0 %v3270_v36  ;;  %3158 = vmatprep.mubr.bf16.mxu1 %v3271_v37 }
  0x5f   : > { %3095 = vmatmul.mubr.bf16.gmra.mrb[28].mxu0 %v3272_v38  ;;  %3159 = vmatmul.mubr.bf16.gmra.mrb[28].mxu1 %v3273_v39 }
  0x60   : > { %3098 = vmatprep.mubr.bf16.mxu0 %v3274_v40  ;;  %3162 = vmatprep.mubr.bf16.mxu1 %v3275_v41 }
  0x67   : > { %3099 = vmatmul.mubr.bf16.gmra.mrb[32].mxu0 %v3276_v42  ;;  %3163 = vmatmul.mubr.bf16.gmra.mrb[32].mxu1 %v3277_v43 }
  0x68   : > { %3102 = vmatprep.mubr.bf16.mxu0 %v3278_v44  ;;  %3166 = vmatprep.mubr.bf16.mxu1 %v3279_v45 }
  0x6f   : > { %3103 = vmatmul.mubr.bf16.gmra.mrb[36].mxu0 %v3280_v46  ;;  %3167 = vmatmul.mubr.bf16.gmra.mrb[36].mxu1 %v3281_v47 }
  0x70   : > { %3106 = vmatprep.mubr.bf16.mxu0 %v3282_v48  ;;  %3170 = vmatprep.mubr.bf16.mxu1 %v3283_v49 }
  0x77   : > { %3107 = vmatmul.mubr.bf16.gmra.mrb[40].mxu0 %v3284_v50  ;;  %3171 = vmatmul.mubr.bf16.gmra.mrb[40].mxu1 %v3285_v51 }
  0x78   : > { %3110 = vmatprep.mubr.bf16.mxu0 %v3286_v52  ;;  %3174 = vmatprep.mubr.bf16.mxu1 %v3287_v53 }
  0x7f   : > { %3111 = vmatmul.mubr.bf16.gmra.mrb[44].mxu0 %v3288_v54  ;;  %3175 = vmatmul.mubr.bf16.gmra.mrb[44].mxu1 %v3289_v55 }
  0x80   : > { %3114 = vmatprep.mubr.bf16.mxu0 %v3290_v56  ;;  %3178 = vmatprep.mubr.bf16.mxu1 %v3291_v57 }
  0x87   : > { %3115 = vmatmul.mubr.bf16.gmra.mrb[48].mxu0 %v3292_v58  ;;  %3179 = vmatmul.mubr.bf16.gmra.mrb[48].mxu1 %v3293_v59 }
  0x88   : > { %3118 = vmatprep.mubr.bf16.mxu0 %v3294_v60  ;;  %3182 = vmatprep.mubr.bf16.mxu1 %v3295_v61 }
  0x8f   : > { %3119 = vmatmul.mubr.bf16.gmra.mrb[52].mxu0 %v3296_v62  ;;  %3183 = vmatmul.mubr.bf16.gmra.mrb[52].mxu1 %v3297_v63 }
  0x90   : > { %3122 = vmatprep.mubr.bf16.mxu0 %v3298_v0  ;;  %3186 = vmatprep.mubr.bf16.mxu1 %v3299_v1 }
  0x97   : > { %3123 = vmatmul.mubr.bf16.gmra.mrb[56].mxu0 %v3300_v2  ;;  %3187 = vmatmul.mubr.bf16.gmra.mrb[56].mxu1 %v3301_v3 }
  0x98   : > { %3126 = vmatprep.mubr.bf16.mxu0 %v3302_v4  ;;  %3190 = vmatprep.mubr.bf16.mxu1 %v3303_v5 }
  0x9f   : > { %3127 = vmatmul.mubr.bf16.gmra.mrb[60].mxu0 %v3304_v6  ;;  %3191 = vmatmul.mubr.bf16.gmra.mrb[60].mxu1 %v3305_v7 }
  0xfa   : > { %v3068_v8 = vpop.f32.mrb[0].mxu0  ;;  %v3132_v9 = vpop.f32.mrb[0].mxu1 }
  0xfb   : > { %v1294_v10 = vmul.f32 0.2, %v3068_v8  ;;  %v1358_v11 = vmul.f32 0.2, %v3132_v9  ;;  %v781_v12 = vpop.f32.mrb[1].mxu0  ;;  %v1037_v13 = vpop.f32.mrb[1].mxu1 }
  0xfc   : > { %v1292_v14 = vmul.f32 0.2, %v781_v12  ;;  %v1356_v15 = vmul.f32 0.2, %v1037_v13  ;;  %v3069_v16 = vpop.f32.mrb[2].mxu0  ;;  %v3133_v17 = vpop.f32.mrb[2].mxu1 }
  0xfd   : > { %v1295_v18 = vmul.f32 0.2, %v3069_v16  ;;  %v1359_v19 = vmul.f32 0.2, %v3133_v17  ;;  %v784_v20 = vpop.f32.mrb[3].mxu0  ;;  %v1040_v21 = vpop.f32.mrb[3].mxu1  ;;  %v1422_v24 = vmax.f32 %v3068_v8, %v1294_v10  ;;  %v1486_v25 = vmax.f32 %v3132_v9, %v1358_v11 }
  0xfe   : > { %v1293_v22 = vmul.f32 0.2, %v784_v20  ;;  %v1357_v23 = vmul.f32 0.2, %v1040_v21  ;;  %v1420_v28 = vmax.f32 %v781_v12, %v1292_v14  ;;  %v1484_v29 = vmax.f32 %v1037_v13, %v1356_v15 }
  0xff   : > { %v1423_v26 = vmax.f32 %v3069_v16, %v1295_v18  ;;  %v1487_v27 = vmax.f32 %v3133_v17, %v1359_v19 }
 0x100   : > { %v1421_v30 = vmax.f32 %v784_v20, %v1293_v22  ;;  %v1485_v31 = vmax.f32 %v1040_v21, %v1357_v23 }
 0x101   : > { %v2603_v32 = vpack.c.bf16 %v1423_v26, %v1422_v24  ;;  %v2763_v33 = vpack.c.bf16 %v1487_v27, %v1486_v25 }
 0x102   : > { %v2598_v34 = vpack.c.bf16 %v1421_v30, %v1420_v28  ;;  %v2758_v35 = vpack.c.bf16 %v1485_v31, %v1484_v29  ;;  %v3072_v36 = vpop.f32.mrb[4].mxu0  ;;  %v3136_v37 = vpop.f32.mrb[4].mxu1 }
 0x103   : > { %2915 = vst [vmem:[%s3466_s8 + $0x8] sm:$0xff] %v2603_v32   ;;  %2947 = vst [vmem:[%s3466_s8 + $0x108] sm:$0xff] %v2763_v33   ;;  %v1298_v38 = vmul.f32 0.2, %v3072_v36  ;;  %v1362_v39 = vmul.f32 0.2, %v3136_v37 }
 0x104   : > { %v797_v40 = vpop.f32.mrb[5].mxu0  ;;  %v1053_v41 = vpop.f32.mrb[5].mxu1  ;;  %2599 = vst [vmem:[%s3466_s8] sm:$0xff] %v2598_v34   ;;  %2946 = vst [vmem:[%s3466_s8 + $0x100] sm:$0xff] %v2758_v35  }
 0x105   : > { %v1296_v42 = vmul.f32 0.2, %v797_v40  ;;  %v1360_v43 = vmul.f32 0.2, %v1053_v41  ;;  %v3073_v44 = vpop.f32.mrb[6].mxu0  ;;  %v3137_v45 = vpop.f32.mrb[6].mxu1  ;;  %v1426_v52 = vmax.f32 %v3072_v36, %v1298_v38  ;;  %v1490_v53 = vmax.f32 %v3136_v37, %v1362_v39 }
 0x106   : > { %v1299_v46 = vmul.f32 0.2, %v3073_v44  ;;  %v1363_v47 = vmul.f32 0.2, %v3137_v45  ;;  %v800_v48 = vpop.f32.mrb[7].mxu0  ;;  %v1056_v49 = vpop.f32.mrb[7].mxu1 }
 0x107   : > { %v1297_v50 = vmul.f32 0.2, %v800_v48  ;;  %v1361_v51 = vmul.f32 0.2, %v1056_v49  ;;  %v1424_v56 = vmax.f32 %v797_v40, %v1296_v42  ;;  %v1488_v57 = vmax.f32 %v1053_v41, %v1360_v43 }
 0x108   : > { %v1427_v54 = vmax.f32 %v3073_v44, %v1299_v46  ;;  %v1491_v55 = vmax.f32 %v3137_v45, %v1363_v47 }
 0x109   : > { %v1425_v58 = vmax.f32 %v800_v48, %v1297_v50  ;;  %v1489_v59 = vmax.f32 %v1056_v49, %v1361_v51 }
 0x10a   : > { %v2613_v60 = vpack.c.bf16 %v1427_v54, %v1426_v52  ;;  %v2773_v61 = vpack.c.bf16 %v1491_v55, %v1490_v53  ;;  %v3076_v0 = vpop.f32.mrb[8].mxu0  ;;  %v3140_v1 = vpop.f32.mrb[8].mxu1 }
 0x10b   : > { %v2608_v62 = vpack.c.bf16 %v1425_v58, %v1424_v56  ;;  %v2768_v63 = vpack.c.bf16 %v1489_v59, %v1488_v57  ;;  %v1302_v2 = vmul.f32 0.2, %v3076_v0  ;;  %v1366_v3 = vmul.f32 0.2, %v3140_v1  ;;  %v813_v4 = vpop.f32.mrb[9].mxu0  ;;  %v1069_v5 = vpop.f32.mrb[9].mxu1 }
 0x10c   : > { %2917 = vst [vmem:[%s3466_s8 + $0x18] sm:$0xff] %v2613_v60   ;;  %2949 = vst [vmem:[%s3466_s8 + $0x118] sm:$0xff] %v2773_v61   ;;  %v1300_v6 = vmul.f32 0.2, %v813_v4  ;;  %v1364_v7 = vmul.f32 0.2, %v1069_v5 }
 0x10d   : > { %2916 = vst [vmem:[%s3466_s8 + $0x10] sm:$0xff] %v2608_v62   ;;  %2948 = vst [vmem:[%s3466_s8 + $0x110] sm:$0xff] %v2768_v63   ;;  %v3077_v8 = vpop.f32.mrb[10].mxu0  ;;  %v3141_v9 = vpop.f32.mrb[10].mxu1  ;;  %v1430_v16 = vmax.f32 %v3076_v0, %v1302_v2  ;;  %v1494_v17 = vmax.f32 %v3140_v1, %v1366_v3 }
 0x10e   : > { %v1303_v10 = vmul.f32 0.2, %v3077_v8  ;;  %v1367_v11 = vmul.f32 0.2, %v3141_v9  ;;  %v816_v12 = vpop.f32.mrb[11].mxu0  ;;  %v1072_v13 = vpop.f32.mrb[11].mxu1  ;;  %v1428_v20 = vmax.f32 %v813_v4, %v1300_v6  ;;  %v1492_v21 = vmax.f32 %v1069_v5, %v1364_v7 }
 0x10f   : > { %v1301_v14 = vmul.f32 0.2, %v816_v12  ;;  %v1365_v15 = vmul.f32 0.2, %v1072_v13 }
 0x110   : > { %v1431_v18 = vmax.f32 %v3077_v8, %v1303_v10  ;;  %v1495_v19 = vmax.f32 %v3141_v9, %v1367_v11 }
 0x111   : > { %v1429_v22 = vmax.f32 %v816_v12, %v1301_v14  ;;  %v1493_v23 = vmax.f32 %v1072_v13, %v1365_v15 }
 0x112   : > { %v2623_v24 = vpack.c.bf16 %v1431_v18, %v1430_v16  ;;  %v2783_v25 = vpack.c.bf16 %v1495_v19, %v1494_v17  ;;  %v3080_v28 = vpop.f32.mrb[12].mxu0  ;;  %v3144_v29 = vpop.f32.mrb[12].mxu1 }
 0x113   : > { %v2618_v26 = vpack.c.bf16 %v1429_v22, %v1428_v20  ;;  %v2778_v27 = vpack.c.bf16 %v1493_v23, %v1492_v21  ;;  %v1306_v30 = vmul.f32 0.2, %v3080_v28  ;;  %v1370_v31 = vmul.f32 0.2, %v3144_v29  ;;  %v829_v32 = vpop.f32.mrb[13].mxu0  ;;  %v1085_v33 = vpop.f32.mrb[13].mxu1 }
 0x114   : > { %2919 = vst [vmem:[%s3466_s8 + $0x28] sm:$0xff] %v2623_v24   ;;  %2951 = vst [vmem:[%s3466_s8 + $0x128] sm:$0xff] %v2783_v25   ;;  %v1304_v34 = vmul.f32 0.2, %v829_v32  ;;  %v1368_v35 = vmul.f32 0.2, %v1085_v33 }
 0x115   : > { %2918 = vst [vmem:[%s3466_s8 + $0x20] sm:$0xff] %v2618_v26   ;;  %2950 = vst [vmem:[%s3466_s8 + $0x120] sm:$0xff] %v2778_v27   ;;  %v3081_v36 = vpop.f32.mrb[14].mxu0  ;;  %v3145_v37 = vpop.f32.mrb[14].mxu1  ;;  %v1434_v44 = vmax.f32 %v3080_v28, %v1306_v30  ;;  %v1498_v45 = vmax.f32 %v3144_v29, %v1370_v31 }
 0x116   : > { %v1307_v38 = vmul.f32 0.2, %v3081_v36  ;;  %v1371_v39 = vmul.f32 0.2, %v3145_v37  ;;  %v832_v40 = vpop.f32.mrb[15].mxu0  ;;  %v1088_v41 = vpop.f32.mrb[15].mxu1  ;;  %v1432_v48 = vmax.f32 %v829_v32, %v1304_v34  ;;  %v1496_v49 = vmax.f32 %v1085_v33, %v1368_v35 }
 0x117   : > { %v1305_v42 = vmul.f32 0.2, %v832_v40  ;;  %v1369_v43 = vmul.f32 0.2, %v1088_v41 }
 0x118   : > { %v1435_v46 = vmax.f32 %v3081_v36, %v1307_v38  ;;  %v1499_v47 = vmax.f32 %v3145_v37, %v1371_v39 }
 0x119   : > { %v1433_v50 = vmax.f32 %v832_v40, %v1305_v42  ;;  %v1497_v51 = vmax.f32 %v1088_v41, %v1369_v43 }
 0x11a   : > { %v2633_v52 = vpack.c.bf16 %v1435_v46, %v1434_v44  ;;  %v2793_v53 = vpack.c.bf16 %v1499_v47, %v1498_v45  ;;  %v3084_v56 = vpop.f32.mrb[16].mxu0  ;;  %v3148_v57 = vpop.f32.mrb[16].mxu1 }
 0x11b   : > { %v2628_v54 = vpack.c.bf16 %v1433_v50, %v1432_v48  ;;  %v2788_v55 = vpack.c.bf16 %v1497_v51, %v1496_v49  ;;  %v1310_v58 = vmul.f32 0.2, %v3084_v56  ;;  %v1374_v59 = vmul.f32 0.2, %v3148_v57  ;;  %v845_v60 = vpop.f32.mrb[17].mxu0  ;;  %v1101_v61 = vpop.f32.mrb[17].mxu1 }
 0x11c   : > { %2921 = vst [vmem:[%s3466_s8 + $0x38] sm:$0xff] %v2633_v52   ;;  %2953 = vst [vmem:[%s3466_s8 + $0x138] sm:$0xff] %v2793_v53   ;;  %v1308_v62 = vmul.f32 0.2, %v845_v60  ;;  %v1372_v63 = vmul.f32 0.2, %v1101_v61 }
 0x11d   : > { %2920 = vst [vmem:[%s3466_s8 + $0x30] sm:$0xff] %v2628_v54   ;;  %2952 = vst [vmem:[%s3466_s8 + $0x130] sm:$0xff] %v2788_v55   ;;  %v3085_v0 = vpop.f32.mrb[18].mxu0  ;;  %v3149_v1 = vpop.f32.mrb[18].mxu1  ;;  %v1438_v8 = vmax.f32 %v3084_v56, %v1310_v58  ;;  %v1502_v9 = vmax.f32 %v3148_v57, %v1374_v59 }
 0x11e   : > { %v1311_v2 = vmul.f32 0.2, %v3085_v0  ;;  %v1375_v3 = vmul.f32 0.2, %v3149_v1  ;;  %v848_v4 = vpop.f32.mrb[19].mxu0  ;;  %v1104_v5 = vpop.f32.mrb[19].mxu1  ;;  %v1436_v12 = vmax.f32 %v845_v60, %v1308_v62  ;;  %v1500_v13 = vmax.f32 %v1101_v61, %v1372_v63 }
 0x11f   : > { %v1309_v6 = vmul.f32 0.2, %v848_v4  ;;  %v1373_v7 = vmul.f32 0.2, %v1104_v5 }
 0x120   : > { %v1439_v10 = vmax.f32 %v3085_v0, %v1311_v2  ;;  %v1503_v11 = vmax.f32 %v3149_v1, %v1375_v3 }
 0x121   : > { %v1437_v14 = vmax.f32 %v848_v4, %v1309_v6  ;;  %v1501_v15 = vmax.f32 %v1104_v5, %v1373_v7 }
 0x122   : > { %v2643_v16 = vpack.c.bf16 %v1439_v10, %v1438_v8  ;;  %v2803_v17 = vpack.c.bf16 %v1503_v11, %v1502_v9  ;;  %v3088_v20 = vpop.f32.mrb[20].mxu0  ;;  %v3152_v21 = vpop.f32.mrb[20].mxu1 }
 0x123   : > { %v2638_v18 = vpack.c.bf16 %v1437_v14, %v1436_v12  ;;  %v2798_v19 = vpack.c.bf16 %v1501_v15, %v1500_v13  ;;  %v1314_v22 = vmul.f32 0.2, %v3088_v20  ;;  %v1378_v23 = vmul.f32 0.2, %v3152_v21  ;;  %v861_v24 = vpop.f32.mrb[21].mxu0  ;;  %v1117_v25 = vpop.f32.mrb[21].mxu1 }
 0x124   : > { %2923 = vst [vmem:[%s3466_s8 + $0x48] sm:$0xff] %v2643_v16   ;;  %2955 = vst [vmem:[%s3466_s8 + $0x148] sm:$0xff] %v2803_v17   ;;  %v1312_v26 = vmul.f32 0.2, %v861_v24  ;;  %v1376_v27 = vmul.f32 0.2, %v1117_v25 }
 0x125   : > { %2922 = vst [vmem:[%s3466_s8 + $0x40] sm:$0xff] %v2638_v18   ;;  %2954 = vst [vmem:[%s3466_s8 + $0x140] sm:$0xff] %v2798_v19   ;;  %v3089_v28 = vpop.f32.mrb[22].mxu0  ;;  %v3153_v29 = vpop.f32.mrb[22].mxu1  ;;  %v1442_v36 = vmax.f32 %v3088_v20, %v1314_v22  ;;  %v1506_v37 = vmax.f32 %v3152_v21, %v1378_v23 }
 0x126   : > { %v1315_v30 = vmul.f32 0.2, %v3089_v28  ;;  %v1379_v31 = vmul.f32 0.2, %v3153_v29  ;;  %v864_v32 = vpop.f32.mrb[23].mxu0  ;;  %v1120_v33 = vpop.f32.mrb[23].mxu1  ;;  %v1440_v40 = vmax.f32 %v861_v24, %v1312_v26  ;;  %v1504_v41 = vmax.f32 %v1117_v25, %v1376_v27 }
 0x127   : > { %v1313_v34 = vmul.f32 0.2, %v864_v32  ;;  %v1377_v35 = vmul.f32 0.2, %v1120_v33 }
 0x128   : > { %v1443_v38 = vmax.f32 %v3089_v28, %v1315_v30  ;;  %v1507_v39 = vmax.f32 %v3153_v29, %v1379_v31 }
 0x129   : > { %v1441_v42 = vmax.f32 %v864_v32, %v1313_v34  ;;  %v1505_v43 = vmax.f32 %v1120_v33, %v1377_v35 }
 0x12a   : > { %v2653_v44 = vpack.c.bf16 %v1443_v38, %v1442_v36  ;;  %v2813_v45 = vpack.c.bf16 %v1507_v39, %v1506_v37  ;;  %v3092_v48 = vpop.f32.mrb[24].mxu0  ;;  %v3156_v49 = vpop.f32.mrb[24].mxu1 }
 0x12b   : > { %v2648_v46 = vpack.c.bf16 %v1441_v42, %v1440_v40  ;;  %v2808_v47 = vpack.c.bf16 %v1505_v43, %v1504_v41  ;;  %v1318_v50 = vmul.f32 0.2, %v3092_v48  ;;  %v1382_v51 = vmul.f32 0.2, %v3156_v49  ;;  %v877_v52 = vpop.f32.mrb[25].mxu0  ;;  %v1133_v53 = vpop.f32.mrb[25].mxu1 }
 0x12c   : > { %2925 = vst [vmem:[%s3466_s8 + $0x58] sm:$0xff] %v2653_v44   ;;  %2957 = vst [vmem:[%s3466_s8 + $0x158] sm:$0xff] %v2813_v45   ;;  %v1316_v54 = vmul.f32 0.2, %v877_v52  ;;  %v1380_v55 = vmul.f32 0.2, %v1133_v53 }
 0x12d   : > { %2924 = vst [vmem:[%s3466_s8 + $0x50] sm:$0xff] %v2648_v46   ;;  %2956 = vst [vmem:[%s3466_s8 + $0x150] sm:$0xff] %v2808_v47   ;;  %v3093_v56 = vpop.f32.mrb[26].mxu0  ;;  %v3157_v57 = vpop.f32.mrb[26].mxu1  ;;  %v1446_v0 = vmax.f32 %v3092_v48, %v1318_v50  ;;  %v1510_v1 = vmax.f32 %v3156_v49, %v1382_v51 }
 0x12e   : > { %v1319_v58 = vmul.f32 0.2, %v3093_v56  ;;  %v1383_v59 = vmul.f32 0.2, %v3157_v57  ;;  %v880_v60 = vpop.f32.mrb[27].mxu0  ;;  %v1136_v61 = vpop.f32.mrb[27].mxu1  ;;  %v1444_v4 = vmax.f32 %v877_v52, %v1316_v54  ;;  %v1508_v5 = vmax.f32 %v1133_v53, %v1380_v55 }
 0x12f   : > { %v1317_v62 = vmul.f32 0.2, %v880_v60  ;;  %v1381_v63 = vmul.f32 0.2, %v1136_v61 }
 0x130   : > { %v1447_v2 = vmax.f32 %v3093_v56, %v1319_v58  ;;  %v1511_v3 = vmax.f32 %v3157_v57, %v1383_v59 }
 0x131   : > { %v1445_v6 = vmax.f32 %v880_v60, %v1317_v62  ;;  %v1509_v7 = vmax.f32 %v1136_v61, %v1381_v63 }
 0x132   : > { %v2663_v8 = vpack.c.bf16 %v1447_v2, %v1446_v0  ;;  %v2823_v9 = vpack.c.bf16 %v1511_v3, %v1510_v1  ;;  %v3096_v12 = vpop.f32.mrb[28].mxu0  ;;  %v3160_v13 = vpop.f32.mrb[28].mxu1 }
 0x133   : > { %v2658_v10 = vpack.c.bf16 %v1445_v6, %v1444_v4  ;;  %v2818_v11 = vpack.c.bf16 %v1509_v7, %v1508_v5  ;;  %v1322_v14 = vmul.f32 0.2, %v3096_v12  ;;  %v1386_v15 = vmul.f32 0.2, %v3160_v13  ;;  %v893_v16 = vpop.f32.mrb[29].mxu0  ;;  %v1149_v17 = vpop.f32.mrb[29].mxu1 }
 0x134   : > { %2927 = vst [vmem:[%s3466_s8 + $0x68] sm:$0xff] %v2663_v8   ;;  %2959 = vst [vmem:[%s3466_s8 + $0x168] sm:$0xff] %v2823_v9   ;;  %v1320_v18 = vmul.f32 0.2, %v893_v16  ;;  %v1384_v19 = vmul.f32 0.2, %v1149_v17 }
 0x135   : > { %2926 = vst [vmem:[%s3466_s8 + $0x60] sm:$0xff] %v2658_v10   ;;  %2958 = vst [vmem:[%s3466_s8 + $0x160] sm:$0xff] %v2818_v11   ;;  %v3097_v20 = vpop.f32.mrb[30].mxu0  ;;  %v3161_v21 = vpop.f32.mrb[30].mxu1  ;;  %v1450_v28 = vmax.f32 %v3096_v12, %v1322_v14  ;;  %v1514_v29 = vmax.f32 %v3160_v13, %v1386_v15 }
 0x136   : > { %v1323_v22 = vmul.f32 0.2, %v3097_v20  ;;  %v1387_v23 = vmul.f32 0.2, %v3161_v21  ;;  %v896_v24 = vpop.f32.mrb[31].mxu0  ;;  %v1152_v25 = vpop.f32.mrb[31].mxu1  ;;  %v1448_v32 = vmax.f32 %v893_v16, %v1320_v18  ;;  %v1512_v33 = vmax.f32 %v1149_v17, %v1384_v19 }
 0x137   : > { %v1321_v26 = vmul.f32 0.2, %v896_v24  ;;  %v1385_v27 = vmul.f32 0.2, %v1152_v25 }
 0x138   : > { %v1451_v30 = vmax.f32 %v3097_v20, %v1323_v22  ;;  %v1515_v31 = vmax.f32 %v3161_v21, %v1387_v23 }
 0x139   : > { %v1449_v34 = vmax.f32 %v896_v24, %v1321_v26  ;;  %v1513_v35 = vmax.f32 %v1152_v25, %v1385_v27 }
 0x13a   : > { %v2673_v36 = vpack.c.bf16 %v1451_v30, %v1450_v28  ;;  %v2833_v37 = vpack.c.bf16 %v1515_v31, %v1514_v29  ;;  %v3100_v40 = vpop.f32.mrb[32].mxu0  ;;  %v3164_v41 = vpop.f32.mrb[32].mxu1 }
 0x13b   : > { %v2668_v38 = vpack.c.bf16 %v1449_v34, %v1448_v32  ;;  %v2828_v39 = vpack.c.bf16 %v1513_v35, %v1512_v33  ;;  %v1326_v42 = vmul.f32 0.2, %v3100_v40  ;;  %v1390_v43 = vmul.f32 0.2, %v3164_v41  ;;  %v909_v44 = vpop.f32.mrb[33].mxu0  ;;  %v1165_v45 = vpop.f32.mrb[33].mxu1 }
 0x13c   : > { %2929 = vst [vmem:[%s3466_s8 + $0x78] sm:$0xff] %v2673_v36   ;;  %2961 = vst [vmem:[%s3466_s8 + $0x178] sm:$0xff] %v2833_v37   ;;  %v1324_v46 = vmul.f32 0.2, %v909_v44  ;;  %v1388_v47 = vmul.f32 0.2, %v1165_v45 }
 0x13d   : > { %2928 = vst [vmem:[%s3466_s8 + $0x70] sm:$0xff] %v2668_v38   ;;  %2960 = vst [vmem:[%s3466_s8 + $0x170] sm:$0xff] %v2828_v39   ;;  %v3101_v48 = vpop.f32.mrb[34].mxu0  ;;  %v3165_v49 = vpop.f32.mrb[34].mxu1  ;;  %v1454_v56 = vmax.f32 %v3100_v40, %v1326_v42  ;;  %v1518_v57 = vmax.f32 %v3164_v41, %v1390_v43 }
 0x13e   : > { %v1327_v50 = vmul.f32 0.2, %v3101_v48  ;;  %v1391_v51 = vmul.f32 0.2, %v3165_v49  ;;  %v912_v52 = vpop.f32.mrb[35].mxu0  ;;  %v1168_v53 = vpop.f32.mrb[35].mxu1  ;;  %v1452_v60 = vmax.f32 %v909_v44, %v1324_v46  ;;  %v1516_v61 = vmax.f32 %v1165_v45, %v1388_v47 }
 0x13f   : > { %v1325_v54 = vmul.f32 0.2, %v912_v52  ;;  %v1389_v55 = vmul.f32 0.2, %v1168_v53 }
 0x140   : > { %v1455_v58 = vmax.f32 %v3101_v48, %v1327_v50  ;;  %v1519_v59 = vmax.f32 %v3165_v49, %v1391_v51 }
 0x141   : > { %v1453_v62 = vmax.f32 %v912_v52, %v1325_v54  ;;  %v1517_v63 = vmax.f32 %v1168_v53, %v1389_v55 }
 0x142   : > { %v2683_v0 = vpack.c.bf16 %v1455_v58, %v1454_v56  ;;  %v2843_v1 = vpack.c.bf16 %v1519_v59, %v1518_v57  ;;  %v3104_v4 = vpop.f32.mrb[36].mxu0  ;;  %v3168_v5 = vpop.f32.mrb[36].mxu1 }
 0x143   : > { %v2678_v2 = vpack.c.bf16 %v1453_v62, %v1452_v60  ;;  %v2838_v3 = vpack.c.bf16 %v1517_v63, %v1516_v61  ;;  %v1330_v6 = vmul.f32 0.2, %v3104_v4  ;;  %v1394_v7 = vmul.f32 0.2, %v3168_v5  ;;  %v925_v8 = vpop.f32.mrb[37].mxu0  ;;  %v1181_v9 = vpop.f32.mrb[37].mxu1 }
 0x144   : > { %2931 = vst [vmem:[%s3466_s8 + $0x88] sm:$0xff] %v2683_v0   ;;  %2963 = vst [vmem:[%s3466_s8 + $0x188] sm:$0xff] %v2843_v1   ;;  %v1328_v10 = vmul.f32 0.2, %v925_v8  ;;  %v1392_v11 = vmul.f32 0.2, %v1181_v9 }
 0x145   : > { %2930 = vst [vmem:[%s3466_s8 + $0x80] sm:$0xff] %v2678_v2   ;;  %2962 = vst [vmem:[%s3466_s8 + $0x180] sm:$0xff] %v2838_v3   ;;  %v3105_v12 = vpop.f32.mrb[38].mxu0  ;;  %v3169_v13 = vpop.f32.mrb[38].mxu1  ;;  %v1458_v20 = vmax.f32 %v3104_v4, %v1330_v6  ;;  %v1522_v21 = vmax.f32 %v3168_v5, %v1394_v7 }
 0x146   : > { %v1331_v14 = vmul.f32 0.2, %v3105_v12  ;;  %v1395_v15 = vmul.f32 0.2, %v3169_v13  ;;  %v928_v16 = vpop.f32.mrb[39].mxu0  ;;  %v1184_v17 = vpop.f32.mrb[39].mxu1  ;;  %v1456_v24 = vmax.f32 %v925_v8, %v1328_v10  ;;  %v1520_v25 = vmax.f32 %v1181_v9, %v1392_v11 }
 0x147   : > { %v1329_v18 = vmul.f32 0.2, %v928_v16  ;;  %v1393_v19 = vmul.f32 0.2, %v1184_v17 }
 0x148   : > { %v1459_v22 = vmax.f32 %v3105_v12, %v1331_v14  ;;  %v1523_v23 = vmax.f32 %v3169_v13, %v1395_v15 }
 0x149   : > { %v1457_v26 = vmax.f32 %v928_v16, %v1329_v18  ;;  %v1521_v27 = vmax.f32 %v1184_v17, %v1393_v19 }
 0x14a   : > { %v2693_v28 = vpack.c.bf16 %v1459_v22, %v1458_v20  ;;  %v2853_v29 = vpack.c.bf16 %v1523_v23, %v1522_v21  ;;  %v3108_v32 = vpop.f32.mrb[40].mxu0  ;;  %v3172_v33 = vpop.f32.mrb[40].mxu1 }
 0x14b   : > { %v2688_v30 = vpack.c.bf16 %v1457_v26, %v1456_v24  ;;  %v2848_v31 = vpack.c.bf16 %v1521_v27, %v1520_v25  ;;  %v1334_v34 = vmul.f32 0.2, %v3108_v32  ;;  %v1398_v35 = vmul.f32 0.2, %v3172_v33  ;;  %v941_v36 = vpop.f32.mrb[41].mxu0  ;;  %v1197_v37 = vpop.f32.mrb[41].mxu1 }
 0x14c   : > { %2933 = vst [vmem:[%s3466_s8 + $0x98] sm:$0xff] %v2693_v28   ;;  %2965 = vst [vmem:[%s3466_s8 + $0x198] sm:$0xff] %v2853_v29   ;;  %v1332_v38 = vmul.f32 0.2, %v941_v36  ;;  %v1396_v39 = vmul.f32 0.2, %v1197_v37 }
 0x14d   : > { %2932 = vst [vmem:[%s3466_s8 + $0x90] sm:$0xff] %v2688_v30   ;;  %2964 = vst [vmem:[%s3466_s8 + $0x190] sm:$0xff] %v2848_v31   ;;  %v3109_v40 = vpop.f32.mrb[42].mxu0  ;;  %v3173_v41 = vpop.f32.mrb[42].mxu1  ;;  %v1462_v48 = vmax.f32 %v3108_v32, %v1334_v34  ;;  %v1526_v49 = vmax.f32 %v3172_v33, %v1398_v35 }
 0x14e   : > { %v1335_v42 = vmul.f32 0.2, %v3109_v40  ;;  %v1399_v43 = vmul.f32 0.2, %v3173_v41  ;;  %v944_v44 = vpop.f32.mrb[43].mxu0  ;;  %v1200_v45 = vpop.f32.mrb[43].mxu1  ;;  %v1460_v52 = vmax.f32 %v941_v36, %v1332_v38  ;;  %v1524_v53 = vmax.f32 %v1197_v37, %v1396_v39 }
 0x14f   : > { %v1333_v46 = vmul.f32 0.2, %v944_v44  ;;  %v1397_v47 = vmul.f32 0.2, %v1200_v45 }
 0x150   : > { %v1463_v50 = vmax.f32 %v3109_v40, %v1335_v42  ;;  %v1527_v51 = vmax.f32 %v3173_v41, %v1399_v43 }
 0x151   : > { %v1461_v54 = vmax.f32 %v944_v44, %v1333_v46  ;;  %v1525_v55 = vmax.f32 %v1200_v45, %v1397_v47 }
 0x152   : > { %v2703_v56 = vpack.c.bf16 %v1463_v50, %v1462_v48  ;;  %v2863_v57 = vpack.c.bf16 %v1527_v51, %v1526_v49  ;;  %v3112_v60 = vpop.f32.mrb[44].mxu0  ;;  %v3176_v61 = vpop.f32.mrb[44].mxu1 }
 0x153   : > { %v2698_v58 = vpack.c.bf16 %v1461_v54, %v1460_v52  ;;  %v2858_v59 = vpack.c.bf16 %v1525_v55, %v1524_v53  ;;  %v1338_v62 = vmul.f32 0.2, %v3112_v60  ;;  %v1402_v63 = vmul.f32 0.2, %v3176_v61  ;;  %v957_v0 = vpop.f32.mrb[45].mxu0  ;;  %v1213_v1 = vpop.f32.mrb[45].mxu1 }
 0x154   : > { %2935 = vst [vmem:[%s3466_s8 + $0xa8] sm:$0xff] %v2703_v56   ;;  %2967 = vst [vmem:[%s3466_s8 + $0x1a8] sm:$0xff] %v2863_v57   ;;  %v1336_v2 = vmul.f32 0.2, %v957_v0  ;;  %v1400_v3 = vmul.f32 0.2, %v1213_v1 }
 0x155   : > { %2934 = vst [vmem:[%s3466_s8 + $0xa0] sm:$0xff] %v2698_v58   ;;  %2966 = vst [vmem:[%s3466_s8 + $0x1a0] sm:$0xff] %v2858_v59   ;;  %v3113_v4 = vpop.f32.mrb[46].mxu0  ;;  %v3177_v5 = vpop.f32.mrb[46].mxu1  ;;  %v1466_v12 = vmax.f32 %v3112_v60, %v1338_v62  ;;  %v1530_v13 = vmax.f32 %v3176_v61, %v1402_v63 }
 0x156   : > { %v1339_v6 = vmul.f32 0.2, %v3113_v4  ;;  %v1403_v7 = vmul.f32 0.2, %v3177_v5  ;;  %v960_v8 = vpop.f32.mrb[47].mxu0  ;;  %v1216_v9 = vpop.f32.mrb[47].mxu1  ;;  %v1464_v16 = vmax.f32 %v957_v0, %v1336_v2  ;;  %v1528_v17 = vmax.f32 %v1213_v1, %v1400_v3 }
 0x157   : > { %v1337_v10 = vmul.f32 0.2, %v960_v8  ;;  %v1401_v11 = vmul.f32 0.2, %v1216_v9 }
 0x158   : > { %v1467_v14 = vmax.f32 %v3113_v4, %v1339_v6  ;;  %v1531_v15 = vmax.f32 %v3177_v5, %v1403_v7 }
 0x159   : > { %v1465_v18 = vmax.f32 %v960_v8, %v1337_v10  ;;  %v1529_v19 = vmax.f32 %v1216_v9, %v1401_v11 }
 0x15a   : > { %v2713_v20 = vpack.c.bf16 %v1467_v14, %v1466_v12  ;;  %v2873_v21 = vpack.c.bf16 %v1531_v15, %v1530_v13  ;;  %v3116_v24 = vpop.f32.mrb[48].mxu0  ;;  %v3180_v25 = vpop.f32.mrb[48].mxu1 }
 0x15b   : > { %v2708_v22 = vpack.c.bf16 %v1465_v18, %v1464_v16  ;;  %v2868_v23 = vpack.c.bf16 %v1529_v19, %v1528_v17  ;;  %v1342_v26 = vmul.f32 0.2, %v3116_v24  ;;  %v1406_v27 = vmul.f32 0.2, %v3180_v25  ;;  %v973_v28 = vpop.f32.mrb[49].mxu0  ;;  %v1229_v29 = vpop.f32.mrb[49].mxu1 }
 0x15c   : > { %2937 = vst [vmem:[%s3466_s8 + $0xb8] sm:$0xff] %v2713_v20   ;;  %2969 = vst [vmem:[%s3466_s8 + $0x1b8] sm:$0xff] %v2873_v21   ;;  %v1340_v30 = vmul.f32 0.2, %v973_v28  ;;  %v1404_v31 = vmul.f32 0.2, %v1229_v29 }
 0x15d   : > { %2936 = vst [vmem:[%s3466_s8 + $0xb0] sm:$0xff] %v2708_v22   ;;  %2968 = vst [vmem:[%s3466_s8 + $0x1b0] sm:$0xff] %v2868_v23   ;;  %v3117_v32 = vpop.f32.mrb[50].mxu0  ;;  %v3181_v33 = vpop.f32.mrb[50].mxu1  ;;  %v1470_v40 = vmax.f32 %v3116_v24, %v1342_v26  ;;  %v1534_v41 = vmax.f32 %v3180_v25, %v1406_v27 }
 0x15e   : > { %v1343_v34 = vmul.f32 0.2, %v3117_v32  ;;  %v1407_v35 = vmul.f32 0.2, %v3181_v33  ;;  %v976_v36 = vpop.f32.mrb[51].mxu0  ;;  %v1232_v37 = vpop.f32.mrb[51].mxu1  ;;  %v1468_v44 = vmax.f32 %v973_v28, %v1340_v30  ;;  %v1532_v45 = vmax.f32 %v1229_v29, %v1404_v31 }
 0x15f   : > { %v1341_v38 = vmul.f32 0.2, %v976_v36  ;;  %v1405_v39 = vmul.f32 0.2, %v1232_v37 }
 0x160   : > { %v1471_v42 = vmax.f32 %v3117_v32, %v1343_v34  ;;  %v1535_v43 = vmax.f32 %v3181_v33, %v1407_v35 }
 0x161   : > { %v1469_v46 = vmax.f32 %v976_v36, %v1341_v38  ;;  %v1533_v47 = vmax.f32 %v1232_v37, %v1405_v39 }
 0x162   : > { %v2723_v48 = vpack.c.bf16 %v1471_v42, %v1470_v40  ;;  %v2883_v49 = vpack.c.bf16 %v1535_v43, %v1534_v41  ;;  %v3120_v52 = vpop.f32.mrb[52].mxu0  ;;  %v3184_v53 = vpop.f32.mrb[52].mxu1 }
 0x163   : > { %v2718_v50 = vpack.c.bf16 %v1469_v46, %v1468_v44  ;;  %v2878_v51 = vpack.c.bf16 %v1533_v47, %v1532_v45  ;;  %v1346_v54 = vmul.f32 0.2, %v3120_v52  ;;  %v1410_v55 = vmul.f32 0.2, %v3184_v53  ;;  %v989_v56 = vpop.f32.mrb[53].mxu0  ;;  %v1245_v57 = vpop.f32.mrb[53].mxu1 }
 0x164   : > { %2939 = vst [vmem:[%s3466_s8 + $0xc8] sm:$0xff] %v2723_v48   ;;  %2971 = vst [vmem:[%s3466_s8 + $0x1c8] sm:$0xff] %v2883_v49   ;;  %v1344_v58 = vmul.f32 0.2, %v989_v56  ;;  %v1408_v59 = vmul.f32 0.2, %v1245_v57 }
 0x165   : > { %2938 = vst [vmem:[%s3466_s8 + $0xc0] sm:$0xff] %v2718_v50   ;;  %2970 = vst [vmem:[%s3466_s8 + $0x1c0] sm:$0xff] %v2878_v51   ;;  %v3121_v60 = vpop.f32.mrb[54].mxu0  ;;  %v3185_v61 = vpop.f32.mrb[54].mxu1  ;;  %v1474_v4 = vmax.f32 %v3120_v52, %v1346_v54  ;;  %v1538_v5 = vmax.f32 %v3184_v53, %v1410_v55 }
 0x166   : > { %v1347_v62 = vmul.f32 0.2, %v3121_v60  ;;  %v1411_v63 = vmul.f32 0.2, %v3185_v61  ;;  %v992_v0 = vpop.f32.mrb[55].mxu0  ;;  %v1248_v1 = vpop.f32.mrb[55].mxu1  ;;  %v1472_v8 = vmax.f32 %v989_v56, %v1344_v58  ;;  %v1536_v9 = vmax.f32 %v1245_v57, %v1408_v59 }
 0x167   : > { %v1345_v2 = vmul.f32 0.2, %v992_v0  ;;  %v1409_v3 = vmul.f32 0.2, %v1248_v1 }
 0x168   : > { %v1475_v6 = vmax.f32 %v3121_v60, %v1347_v62  ;;  %v1539_v7 = vmax.f32 %v3185_v61, %v1411_v63 }
 0x169   : > { %v1473_v10 = vmax.f32 %v992_v0, %v1345_v2  ;;  %v1537_v11 = vmax.f32 %v1248_v1, %v1409_v3 }
 0x16a   : > { %v2733_v12 = vpack.c.bf16 %v1475_v6, %v1474_v4  ;;  %v2893_v13 = vpack.c.bf16 %v1539_v7, %v1538_v5  ;;  %v3124_v16 = vpop.f32.mrb[56].mxu0  ;;  %v3188_v17 = vpop.f32.mrb[56].mxu1 }
 0x16b   : > { %v2728_v14 = vpack.c.bf16 %v1473_v10, %v1472_v8  ;;  %v2888_v15 = vpack.c.bf16 %v1537_v11, %v1536_v9  ;;  %v1350_v18 = vmul.f32 0.2, %v3124_v16  ;;  %v1414_v19 = vmul.f32 0.2, %v3188_v17  ;;  %v1005_v20 = vpop.f32.mrb[57].mxu0  ;;  %v1261_v21 = vpop.f32.mrb[57].mxu1 }
 0x16c   : > { %2941 = vst [vmem:[%s3466_s8 + $0xd8] sm:$0xff] %v2733_v12   ;;  %2973 = vst [vmem:[%s3466_s8 + $0x1d8] sm:$0xff] %v2893_v13   ;;  %v1348_v22 = vmul.f32 0.2, %v1005_v20  ;;  %v1412_v23 = vmul.f32 0.2, %v1261_v21 }
 0x16d   : > { %2940 = vst [vmem:[%s3466_s8 + $0xd0] sm:$0xff] %v2728_v14   ;;  %2972 = vst [vmem:[%s3466_s8 + $0x1d0] sm:$0xff] %v2888_v15   ;;  %v3125_v24 = vpop.f32.mrb[58].mxu0  ;;  %v3189_v25 = vpop.f32.mrb[58].mxu1  ;;  %v1478_v32 = vmax.f32 %v3124_v16, %v1350_v18  ;;  %v1542_v33 = vmax.f32 %v3188_v17, %v1414_v19 }
 0x16e   : > { %v1351_v26 = vmul.f32 0.2, %v3125_v24  ;;  %v1415_v27 = vmul.f32 0.2, %v3189_v25  ;;  %v1008_v28 = vpop.f32.mrb[59].mxu0  ;;  %v1264_v29 = vpop.f32.mrb[59].mxu1  ;;  %v1476_v36 = vmax.f32 %v1005_v20, %v1348_v22  ;;  %v1540_v37 = vmax.f32 %v1261_v21, %v1412_v23 }
 0x16f   : > { %v1349_v30 = vmul.f32 0.2, %v1008_v28  ;;  %v1413_v31 = vmul.f32 0.2, %v1264_v29 }
 0x170   : > { %v1479_v34 = vmax.f32 %v3125_v24, %v1351_v26  ;;  %v1543_v35 = vmax.f32 %v3189_v25, %v1415_v27 }
 0x171   : > { %v1477_v38 = vmax.f32 %v1008_v28, %v1349_v30  ;;  %v1541_v39 = vmax.f32 %v1264_v29, %v1413_v31 }
 0x172   : > { %v2743_v40 = vpack.c.bf16 %v1479_v34, %v1478_v32  ;;  %v2903_v41 = vpack.c.bf16 %v1543_v35, %v1542_v33  ;;  %v3128_v44 = vpop.f32.mrb[60].mxu0  ;;  %v3192_v45 = vpop.f32.mrb[60].mxu1 }
 0x173   : > { %v2738_v42 = vpack.c.bf16 %v1477_v38, %v1476_v36  ;;  %v2898_v43 = vpack.c.bf16 %v1541_v39, %v1540_v37  ;;  %v1354_v46 = vmul.f32 0.2, %v3128_v44  ;;  %v1418_v47 = vmul.f32 0.2, %v3192_v45  ;;  %v1021_v48 = vpop.f32.mrb[61].mxu0  ;;  %v1277_v49 = vpop.f32.mrb[61].mxu1 }
 0x174   : > { %2943 = vst [vmem:[%s3466_s8 + $0xe8] sm:$0xff] %v2743_v40   ;;  %2975 = vst [vmem:[%s3466_s8 + $0x1e8] sm:$0xff] %v2903_v41   ;;  %v1352_v50 = vmul.f32 0.2, %v1021_v48  ;;  %v1416_v51 = vmul.f32 0.2, %v1277_v49 }
 0x175   : > { %2942 = vst [vmem:[%s3466_s8 + $0xe0] sm:$0xff] %v2738_v42   ;;  %2974 = vst [vmem:[%s3466_s8 + $0x1e0] sm:$0xff] %v2898_v43   ;;  %v3129_v52 = vpop.f32.mrb[62].mxu0  ;;  %v3193_v53 = vpop.f32.mrb[62].mxu1  ;;  %v1482_v60 = vmax.f32 %v3128_v44, %v1354_v46  ;;  %v1546_v61 = vmax.f32 %v3192_v45, %v1418_v47 }
 0x176   : > { %v1355_v54 = vmul.f32 0.2, %v3129_v52  ;;  %v1419_v55 = vmul.f32 0.2, %v3193_v53  ;;  %v1024_v56 = vpop.f32.mrb[63].mxu0  ;;  %v1280_v57 = vpop.f32.mrb[63].mxu1  ;;  %v1480_v0 = vmax.f32 %v1021_v48, %v1352_v50  ;;  %v1544_v1 = vmax.f32 %v1277_v49, %v1416_v51 }
 0x177   : > { %v1353_v58 = vmul.f32 0.2, %v1024_v56  ;;  %v1417_v59 = vmul.f32 0.2, %v1280_v57 }
 0x178   : > { %v1483_v62 = vmax.f32 %v3129_v52, %v1355_v54  ;;  %v1547_v63 = vmax.f32 %v3193_v53, %v1419_v55 }
 0x179   : > { %v1481_v2 = vmax.f32 %v1024_v56, %v1353_v58  ;;  %v1545_v3 = vmax.f32 %v1280_v57, %v1417_v59 }
 0x17a   : > { %v2753_v4 = vpack.c.bf16 %v1483_v62, %v1482_v60  ;;  %v2913_v5 = vpack.c.bf16 %v1547_v63, %v1546_v61 }
 0x17b   : > { %v2748_v6 = vpack.c.bf16 %v1481_v2, %v1480_v0  ;;  %v2908_v7 = vpack.c.bf16 %v1545_v3, %v1544_v1 }
 0x17c   : > { %2945 = vst [vmem:[%s3466_s8 + $0xf8] sm:$0xff] %v2753_v4   ;;  %2977 = vst [vmem:[%s3466_s8 + $0x1f8] sm:$0xff] %v2913_v5  }
 0x17d   : > { %2944 = vst [vmem:[%s3466_s8 + $0xf0] sm:$0xff] %v2748_v6   ;;  %2976 = vst [vmem:[%s3466_s8 + $0x1f0] sm:$0xff] %v2908_v7  }
 0x17e PF: > { %s12_s11 = sadd.s32 1, %s3328_s11   ;;  %s3544_s9 = smov %s3324_s10 }
 0x17f   : > { %p9_p5 = scmp.ge.s32.totalorder %s12_s11, 4   ;;  %s3545_s10 = smov %s3547_s12 }
 0x181   :  { %11 = sbr.rel (!%p9_p5) target bundleno = 2 (0x2), region = 58 }

// kernel: discriminator_forward.6
= control target key start
LH: loop header
LB: loop body
LE: loop exit
PB: predicated region body
PF: predicated region fallthrough
CT: control target
= control target key end

     0   :  { %v8877_v0 = vmov 0   ;;  %vm6624_vm0 = vcmask 1040384   ;;  %vm6626_vm1 = vcmask 1041408   ;;  %s11061_s1 = inlined_call_operand.vmem [shape: bf16[2048,128], index: 1, kind: input, shape index: {}]   ;;  %s11062_s0 = inlined_call_operand.vmem [shape: bf16[512,2048], index: 0, kind: input, shape index: {}]   ;;  %s11063_s2 = inlined_call_operand.vmem [shape: bf16[512,128], index: 2, kind: output, shape index: {0}]   ;;  %s11064_s3 = inlined_call_operand.vmem [shape: f32[8,128], index: 3, kind: output, shape index: {1}]  }
   0x1   :  { %4110 = vmatprep.subr.bf16.mxu1 %v8877_v0  ;;  %5266 = vmatprep.subr.bf16.mxu0 %v8877_v0  ;;  %v8749_v1 = vld [vmem:[%s11061_s1] sm:$0xff]   ;;  %v8751_v3 = vld [vmem:[%s11061_s1 + $0x8] sm:$0xff]   ;;  %v8753_v5 = vld [vmem:[%s11061_s1 + $0x10] sm:$0xff]  }
   0x2   :  { %v8750_v2 = vld [vmem:[%s11061_s1 + $0x200] sm:$0xff]   ;;  %4111 = vmatpush1.bf16.msra.mxu1 %v8749_v1  ;;  %v8752_v4 = vld [vmem:[%s11061_s1 + $0x208] sm:$0xff]   ;;  %v8754_v6 = vld [vmem:[%s11061_s1 + $0x210] sm:$0xff]  }
   0x3   :  { %5267 = vmatpush1.bf16.msra.mxu0 %v8750_v2  ;;  %4112 = vmatprep.subr.bf16.mxu1 %v8877_v0  ;;  %v8755_v7 = vld [vmem:[%s11061_s1 + $0x18] sm:$0xff]   ;;  %v8757_v9 = vld [vmem:[%s11061_s1 + $0x20] sm:$0xff]   ;;  %v8759_v11 = vld [vmem:[%s11061_s1 + $0x28] sm:$0xff]  }
   0x4   :  { %5268 = vmatprep.subr.bf16.mxu0 %v8877_v0  ;;  %v8756_v8 = vld [vmem:[%s11061_s1 + $0x218] sm:$0xff]   ;;  %v8758_v10 = vld [vmem:[%s11061_s1 + $0x220] sm:$0xff]   ;;  %v8760_v12 = vld [vmem:[%s11061_s1 + $0x228] sm:$0xff]  }
   0x5   :  { %v8761_v13 = vld [vmem:[%s11061_s1 + $0x30] sm:$0xff]   ;;  %v8763_v15 = vld [vmem:[%s11061_s1 + $0x38] sm:$0xff]   ;;  %v8765_v17 = vld [vmem:[%s11061_s1 + $0x40] sm:$0xff]  }
   0x6   :  { %4113 = vmatpush1.bf16.msra.mxu1 %v8751_v3  ;;  %v8762_v14 = vld [vmem:[%s11061_s1 + $0x230] sm:$0xff]   ;;  %v8764_v16 = vld [vmem:[%s11061_s1 + $0x238] sm:$0xff]   ;;  %v8766_v18 = vld [vmem:[%s11061_s1 + $0x240] sm:$0xff]  }
   0x7   :  { %5269 = vmatpush1.bf16.msra.mxu0 %v8752_v4  ;;  %4114 = vmatprep.subr.bf16.mxu1 %v8877_v0  ;;  %v8973_v19 = vld [vmem:[%s11062_s0] sm:$0xff]  ;;  %v8767_v24 = vld [vmem:[%s11061_s1 + $0x48] sm:$0xff]   ;;  %v8769_v27 = vld [vmem:[%s11061_s1 + $0x50] sm:$0xff]  }
   0x8   :  { %5270 = vmatprep.subr.bf16.mxu0 %v8877_v0  ;;  %v8978_v20 = vld [vmem:[%s11062_s0 + $0x40] sm:$0xff]  ;;  %v8768_v26 = vld [vmem:[%s11061_s1 + $0x248] sm:$0xff]   ;;  %v8770_v28 = vld [vmem:[%s11061_s1 + $0x250] sm:$0xff]  }
   0x9   :  { %v8983_v21 = vld [vmem:[%s11062_s0 + $0x20] sm:$0xff]  ;;  %v6958_v22 = vcombine.high %v8973_v19, %v8978_v20  ;;  %v8771_v29 = vld [vmem:[%s11061_s1 + $0x58] sm:$0xff]   ;;  %v8775_v33 = vld [vmem:[%s11061_s1 + $0x68] sm:$0xff]   ;;  %v6957_v42 = vcombine.low %v8973_v19, %v8978_v20 }
   0xa   :  { %4115 = vmatpush1.bf16.msra.mxu1 %v8753_v5  ;;  %v8990_v23 = vld [vmem:[%s11062_s0 + $0x60] sm:$0xff]  ;;  %v8772_v30 = vld [vmem:[%s11061_s1 + $0x258] sm:$0xff]   ;;  %v8776_v34 = vld [vmem:[%s11061_s1 + $0x268] sm:$0xff]  }
   0xb   :  { %5271 = vmatpush1.bf16.msra.mxu0 %v8754_v6  ;;  %4116 = vmatprep.subr.bf16.mxu1 %v8877_v0  ;;  %v6966_v25 = vcombine.high %v8983_v21, %v8990_v23  ;;  %v8773_v31 = vld [vmem:[%s11061_s1 + $0x60] sm:$0xff]   ;;  %v8777_v35 = vld [vmem:[%s11061_s1 + $0x70] sm:$0xff]   ;;  %v8779_v37 = vld [vmem:[%s11061_s1 + $0x78] sm:$0xff]   ;;  %v6965_v44 = vcombine.low %v8983_v21, %v8990_v23 }
   0xc   :  { %5272 = vmatprep.subr.bf16.mxu0 %v8877_v0  ;;  %4142 = vmatprep.mubr.bf16.mxu1 %v6958_v22  ;;  %v8774_v32 = vld [vmem:[%s11061_s1 + $0x260] sm:$0xff]   ;;  %v8778_v36 = vld [vmem:[%s11061_s1 + $0x270] sm:$0xff]   ;;  %v8780_v38 = vld [vmem:[%s11061_s1 + $0x278] sm:$0xff]  }
   0xd   :  { %5298 = vmatprep.mubr.bf16.mxu0 %v6966_v25  ;;  %v30_v39 = vld [vmem:[%s11062_s0 + $0x80] sm:$0xff]  ;;  %v8783_v51 = vld [vmem:[%s11061_s1 + $0x88] sm:$0xff]   ;;  %v8785_v59 = vld [vmem:[%s11061_s1 + $0x90] sm:$0xff]  }
   0xe   :  { %4117 = vmatpush1.bf16.msra.mxu1 %v8755_v7  ;;  %v38_v40 = vld [vmem:[%s11062_s0 + $0xc0] sm:$0xff]  ;;  %v8784_v52 = vld [vmem:[%s11061_s1 + $0x288] sm:$0xff]   ;;  %v8786_v60 = vld [vmem:[%s11061_s1 + $0x290] sm:$0xff]  }
   0xf   :  { %5273 = vmatpush1.bf16.msra.mxu0 %v8756_v8  ;;  %4118 = vmatprep.subr.bf16.mxu1 %v8877_v0  ;;  %v34_v41 = vld [vmem:[%s11062_s0 + $0xa0] sm:$0xff]  ;;  %v6974_v47 = vcombine.high %v30_v39, %v38_v40  ;;  %v6973_v55 = vcombine.low %v30_v39, %v38_v40  ;;  %v8787_v2 = vld [vmem:[%s11061_s1 + $0x98] sm:$0xff]   ;;  %v8794_v20 = vld [vmem:[%s11061_s1 + $0x2b0] sm:$0xff]  }
  0x10   :  { %5274 = vmatprep.subr.bf16.mxu0 %v8877_v0  ;;  %v42_v43 = vld [vmem:[%s11062_s0 + $0xe0] sm:$0xff]  ;;  %v8788_v3 = vld [vmem:[%s11061_s1 + $0x298] sm:$0xff]   ;;  %v8800_v39 = vld [vmem:[%s11061_s1 + $0x2c8] sm:$0xff]  }
  0x11   :  { %v8781_v45 = vld [vmem:[%s11061_s1 + $0x80] sm:$0xff]   ;;  %v6982_v48 = vcombine.high %v34_v41, %v42_v43  ;;  %v6981_v56 = vcombine.low %v34_v41, %v42_v43  ;;  %v8801_v41 = vld [vmem:[%s11061_s1 + $0xd0] sm:$0xff]  }
  0x12   :  { %4119 = vmatpush1.bf16.msra.mxu1 %v8757_v9  ;;  %v8782_v46 = vld [vmem:[%s11061_s1 + $0x280] sm:$0xff]  }
  0x13   :  { %5275 = vmatpush1.bf16.msra.mxu0 %v8758_v10  ;;  %4120 = vmatprep.subr.bf16.mxu1 %v8877_v0  ;;  %v46_v49 = vld [vmem:[%s11062_s0 + $0x100] sm:$0xff] }
  0x14   :  { %5276 = vmatprep.subr.bf16.mxu0 %v8877_v0  ;;  %v54_v50 = vld [vmem:[%s11062_s0 + $0x140] sm:$0xff] }
  0x15   :  { %v50_v53 = vld [vmem:[%s11062_s0 + $0x120] sm:$0xff]  ;;  %v6990_v57 = vcombine.high %v46_v49, %v54_v50  ;;  %v6989_v4 = vcombine.low %v46_v49, %v54_v50 }
  0x16   :  { %4121 = vmatpush1.bf16.msra.mxu1 %v8759_v11  ;;  %v58_v54 = vld [vmem:[%s11062_s0 + $0x160] sm:$0xff] }
  0x17   :  { %5277 = vmatpush1.bf16.msra.mxu0 %v8760_v12  ;;  %4122 = vmatprep.subr.bf16.mxu1 %v8877_v0  ;;  %v6998_v58 = vcombine.high %v50_v53, %v58_v54  ;;  %v62_v61 = vld [vmem:[%s11062_s0 + $0x180] sm:$0xff]  ;;  %v6997_v6 = vcombine.low %v50_v53, %v58_v54 }
  0x18   :  { %5278 = vmatprep.subr.bf16.mxu0 %v8877_v0  ;;  %v70_v62 = vld [vmem:[%s11062_s0 + $0x1c0] sm:$0xff] }
  0x19   :  { %v66_v63 = vld [vmem:[%s11062_s0 + $0x1a0] sm:$0xff]  ;;  %v7006_v7 = vcombine.high %v62_v61, %v70_v62 }
  0x1a   :  { %4123 = vmatpush1.bf16.msra.mxu1 %v8761_v13  ;;  %v74_v1 = vld [vmem:[%s11062_s0 + $0x1e0] sm:$0xff] }
  0x1b   :  { %5279 = vmatpush1.bf16.msra.mxu0 %v8762_v14  ;;  %4124 = vmatprep.subr.bf16.mxu1 %v8877_v0  ;;  %v8789_v5 = vld [vmem:[%s11061_s1 + $0xa0] sm:$0xff]   ;;  %v7014_v9 = vcombine.high %v66_v63, %v74_v1  ;;  %v8791_v14 = vld [vmem:[%s11061_s1 + $0xa8] sm:$0xff]  }
  0x1c   :  { %5280 = vmatprep.subr.bf16.mxu0 %v8877_v0  ;;  %v8790_v8 = vld [vmem:[%s11061_s1 + $0x2a0] sm:$0xff]  }
  0x1d   :  { %v78_v10 = vld [vmem:[%s11062_s0 + $0x200] sm:$0xff] }
  0x1e   :  { %4125 = vmatpush1.bf16.msra.mxu1 %v8763_v15  ;;  %v86_v11 = vld [vmem:[%s11062_s0 + $0x240] sm:$0xff]  ;;  %v8792_v15 = vld [vmem:[%s11061_s1 + $0x2a8] sm:$0xff]  }
  0x1f   :  { %5281 = vmatpush1.bf16.msra.mxu0 %v8764_v16  ;;  %4126 = vmatprep.subr.bf16.mxu1 %v8877_v0  ;;  %v82_v12 = vld [vmem:[%s11062_s0 + $0x220] sm:$0xff]  ;;  %v7005_v16 = vcombine.low %v62_v61, %v70_v62  ;;  %v7022_v19 = vcombine.high %v78_v10, %v86_v11 }
  0x20   :  { %5282 = vmatprep.subr.bf16.mxu0 %v8877_v0  ;;  %v90_v13 = vld [vmem:[%s11062_s0 + $0x260] sm:$0xff] }
  0x21   :  { %v7030_v21 = vcombine.high %v82_v12, %v90_v13  ;;  %v94_v22 = vld [vmem:[%s11062_s0 + $0x280] sm:$0xff] }
  0x22   :  { %4127 = vmatpush1.bf16.msra.mxu1 %v8765_v17  ;;  %v8793_v17 = vld [vmem:[%s11061_s1 + $0xb0] sm:$0xff]   ;;  %v102_v23 = vld [vmem:[%s11062_s0 + $0x2c0] sm:$0xff] }
  0x23   :  { %5283 = vmatpush1.bf16.msra.mxu0 %v8766_v18  ;;  %4128 = vmatprep.subr.bf16.mxu1 %v8877_v0  ;;  %v7013_v18 = vcombine.low %v66_v63, %v74_v1  ;;  %v106_v25 = vld [vmem:[%s11062_s0 + $0x2e0] sm:$0xff]  ;;  %v7037_v40 = vcombine.low %v94_v22, %v102_v23 }
  0x24   :  { %5284 = vmatprep.subr.bf16.mxu0 %v8877_v0  ;;  %v138_v49 = vld [vmem:[%s11062_s0 + $0x3e0] sm:$0xff] }
  0x25   :  { %v142_v54 = vld [vmem:[%s11062_s0 + $0x400] sm:$0xff] }
  0x26   :  { %4129 = vmatpush1.bf16.msra.mxu1 %v8767_v24  ;;  %v98_v24 = vld [vmem:[%s11062_s0 + $0x2a0] sm:$0xff] }
  0x27   :  { %5285 = vmatpush1.bf16.msra.mxu0 %v8768_v26  ;;  %4130 = vmatprep.subr.bf16.mxu1 %v8877_v0  ;;  %v8795_v26 = vld [vmem:[%s11061_s1 + $0xb8] sm:$0xff]   ;;  %v158_v1 = vld [vmem:[%s11062_s0 + $0x480] sm:$0xff] }
  0x28   :  { %5286 = vmatprep.subr.bf16.mxu0 %v8877_v0 }
  0x2a   :  { %4131 = vmatpush1.bf16.msra.mxu1 %v8769_v27  ;;  %v8796_v27 = vld [vmem:[%s11061_s1 + $0x2b8] sm:$0xff]  }
  0x2b   :  { %5287 = vmatpush1.bf16.msra.mxu0 %v8770_v28  ;;  %4132 = vmatprep.subr.bf16.mxu1 %v8877_v0  ;;  %v7021_v28 = vcombine.low %v78_v10, %v86_v11  ;;  %v8805_v10 = vld [vmem:[%s11061_s1 + $0xe0] sm:$0xff]  }
  0x2c   :  { %5288 = vmatprep.subr.bf16.mxu0 %v8877_v0  ;;  %v8806_v11 = vld [vmem:[%s11061_s1 + $0x2e0] sm:$0xff]  }
  0x2e   :  { %4133 = vmatpush1.bf16.msra.mxu1 %v8771_v29  ;;  %v8797_v29 = vld [vmem:[%s11061_s1 + $0xc0] sm:$0xff]  }
  0x2f   :  { %5289 = vmatpush1.bf16.msra.mxu0 %v8772_v30  ;;  %4134 = vmatprep.subr.bf16.mxu1 %v8877_v0  ;;  %v7029_v30 = vcombine.low %v82_v12, %v90_v13  ;;  %v182_v12 = vld [vmem:[%s11062_s0 + $0x540] sm:$0xff] }
  0x30   :  { %5290 = vmatprep.subr.bf16.mxu0 %v8877_v0  ;;  %v178_v13 = vld [vmem:[%s11062_s0 + $0x520] sm:$0xff] }
  0x32   :  { %4135 = vmatpush1.bf16.msra.mxu1 %v8773_v31  ;;  %v7038_v31 = vcombine.high %v94_v22, %v102_v23  ;;  %v202_v22 = vld [vmem:[%s11062_s0 + $0x5e0] sm:$0xff] }
  0x33   :  { %5291 = vmatpush1.bf16.msra.mxu0 %v8774_v32  ;;  %4136 = vmatprep.subr.bf16.mxu1 %v8877_v0  ;;  %v8798_v32 = vld [vmem:[%s11061_s1 + $0x2c0] sm:$0xff]  }
  0x34   :  { %5292 = vmatprep.subr.bf16.mxu0 %v8877_v0 }
  0x36   :  { %4137 = vmatpush1.bf16.msra.mxu1 %v8775_v33  ;;  %v7046_v33 = vcombine.high %v98_v24, %v106_v25 }
  0x37   :  { %5293 = vmatpush1.bf16.msra.mxu0 %v8776_v34  ;;  %4138 = vmatprep.subr.bf16.mxu1 %v8877_v0  ;;  %v110_v34 = vld [vmem:[%s11062_s0 + $0x300] sm:$0xff] }
  0x38   :  { %5294 = vmatprep.subr.bf16.mxu0 %v8877_v0 }
  0x3a   :  { %4139 = vmatpush1.bf16.msra.mxu1 %v8777_v35  ;;  %v118_v35 = vld [vmem:[%s11062_s0 + $0x340] sm:$0xff] }
  0x3b   :  { %5295 = vmatpush1.bf16.msra.mxu0 %v8778_v36  ;;  %4140 = vmatprep.subr.bf16.mxu1 %v8877_v0  ;;  %v114_v36 = vld [vmem:[%s11062_s0 + $0x320] sm:$0xff]  ;;  %v7054_v43 = vcombine.high %v110_v34, %v118_v35  ;;  %v7053_v50 = vcombine.low %v110_v34, %v118_v35 }
  0x3c   :  { %5296 = vmatprep.subr.bf16.mxu0 %v8877_v0 }
  0x3e   :  { %4141 = vmatpush1.bf16.msra.mxu1 %v8779_v37  ;;  %v122_v37 = vld [vmem:[%s11062_s0 + $0x360] sm:$0xff] }
  0x3f   :  { %5297 = vmatpush1.bf16.msra.mxu0 %v8780_v38  ;;  %4399 = vmatprep.subr.bf16.mxu1 %v8877_v0  ;;  %v8799_v38 = vld [vmem:[%s11061_s1 + $0xc8] sm:$0xff]  }
  0x40   :  { %5555 = vmatprep.subr.bf16.mxu0 %v8877_v0 }
  0x41   :  { %4143 = vmatmul.mubr.bf16.vlgmr.msra.gmra.mrb[0].mxu1 %v6957_v42  ;;  %v7045_v42 = vcombine.low %v98_v24, %v106_v25 }
  0x42   :  { %5299 = vmatmul.mubr.bf16.vlgmr.msra.gmra.mrb[0].mxu0 %v6965_v44  ;;  %4400 = vmatpush1.bf16.msra.mxu1 %v8781_v45  ;;  %v8802_v44 = vld [vmem:[%s11061_s1 + $0x2d0] sm:$0xff]   ;;  %v7062_v45 = vcombine.high %v114_v36, %v122_v37 }
  0x43   :  { %5556 = vmatpush1.bf16.msra.mxu0 %v8782_v46  ;;  %4150 = vmatprep.mubr.bf16.mxu1 %v6974_v47  ;;  %v126_v46 = vld [vmem:[%s11062_s0 + $0x380] sm:$0xff] }
  0x44   :  { %5306 = vmatprep.mubr.bf16.mxu0 %v6982_v48  ;;  %4401 = vmatprep.subr.bf16.mxu1 %v8877_v0  ;;  %v134_v47 = vld [vmem:[%s11062_s0 + $0x3c0] sm:$0xff] }
  0x45   :  { %5557 = vmatprep.subr.bf16.mxu0 %v8877_v0  ;;  %v130_v48 = vld [vmem:[%s11062_s0 + $0x3a0] sm:$0xff] }
  0x46   :  { %4402 = vmatpush1.bf16.msra.mxu1 %v8783_v51  ;;  %v7061_v51 = vcombine.low %v114_v36, %v122_v37  ;;  %v7078_v53 = vcombine.high %v130_v48, %v138_v49  ;;  %v7077_v61 = vcombine.low %v130_v48, %v138_v49  ;;  %v222_v37 = vld [vmem:[%s11062_s0 + $0x680] sm:$0xff] }
  0x47   :  { %5558 = vmatpush1.bf16.msra.mxu0 %v8784_v52  ;;  %4403 = vmatprep.subr.bf16.mxu1 %v8877_v0  ;;  %v7070_v52 = vcombine.high %v126_v46, %v134_v47  ;;  %v246_v48 = vld [vmem:[%s11062_s0 + $0x740] sm:$0xff] }
  0x48   :  { %5559 = vmatprep.subr.bf16.mxu0 %v8877_v0  ;;  %v242_v49 = vld [vmem:[%s11062_s0 + $0x720] sm:$0xff] }
  0x49   :  { %4151 = vmatmul.mubr.bf16.gmra.mrb[4].mxu1 %v6973_v55  ;;  %v8803_v55 = vld [vmem:[%s11061_s1 + $0xd8] sm:$0xff]  }
  0x4a   :  { %5307 = vmatmul.mubr.bf16.gmra.mrb[4].mxu0 %v6981_v56  ;;  %4158 = vmatprep.mubr.bf16.mxu1 %v6990_v57  ;;  %v8804_v56 = vld [vmem:[%s11061_s1 + $0x2d8] sm:$0xff]   ;;  %v150_v57 = vld [vmem:[%s11062_s0 + $0x440] sm:$0xff] }
  0x4b   :  { %5314 = vmatprep.mubr.bf16.mxu0 %v6998_v58  ;;  %4404 = vmatpush1.bf16.msra.mxu1 %v8785_v59  ;;  %v146_v58 = vld [vmem:[%s11062_s0 + $0x420] sm:$0xff]  ;;  %v7086_v62 = vcombine.high %v142_v54, %v150_v57 }
  0x4c   :  { %5560 = vmatpush1.bf16.msra.mxu0 %v8786_v60  ;;  %4405 = vmatprep.subr.bf16.mxu1 %v8877_v0  ;;  %v154_v59 = vld [vmem:[%s11062_s0 + $0x460] sm:$0xff]  ;;  %v7069_v60 = vcombine.low %v126_v46, %v134_v47  ;;  %v8810_v46 = vld [vmem:[%s11061_s1 + $0x2f0] sm:$0xff]  }
  0x4d   :  { %5561 = vmatprep.subr.bf16.mxu0 %v8877_v0  ;;  %v7094_v63 = vcombine.high %v146_v58, %v154_v59  ;;  %v238_v47 = vld [vmem:[%s11062_s0 + $0x700] sm:$0xff] }
  0x4f   :  { %4406 = vmatpush1.bf16.msra.mxu1 %v8787_v2  ;;  %v166_v2 = vld [vmem:[%s11062_s0 + $0x4c0] sm:$0xff] }
  0x50   :  { %5562 = vmatpush1.bf16.msra.mxu0 %v8788_v3  ;;  %4407 = vmatprep.subr.bf16.mxu1 %v8877_v0  ;;  %v162_v3 = vld [vmem:[%s11062_s0 + $0x4a0] sm:$0xff] }
  0x51   :  { %4159 = vmatmul.mubr.bf16.gmra.mrb[8].mxu1 %v6989_v4  ;;  %5563 = vmatprep.subr.bf16.mxu0 %v8877_v0  ;;  %v170_v4 = vld [vmem:[%s11062_s0 + $0x4e0] sm:$0xff] }
  0x52   :  { %5315 = vmatmul.mubr.bf16.gmra.mrb[8].mxu0 %v6997_v6  ;;  %4166 = vmatprep.mubr.bf16.mxu1 %v7006_v7  ;;  %v7093_v6 = vcombine.low %v146_v58, %v154_v59  ;;  %v7102_v7 = vcombine.high %v158_v1, %v166_v2  ;;  %v266_v58 = vld [vmem:[%s11062_s0 + $0x7e0] sm:$0xff]  ;;  %v7181_v59 = vcombine.low %v238_v47, %v246_v48 }
  0x53   :  { %5322 = vmatprep.mubr.bf16.mxu0 %v7014_v9  ;;  %4408 = vmatpush1.bf16.msra.mxu1 %v8789_v5  ;;  %v7085_v5 = vcombine.low %v142_v54, %v150_v57  ;;  %v174_v9 = vld [vmem:[%s11062_s0 + $0x500] sm:$0xff] }
  0x54   :  { %5564 = vmatpush1.bf16.msra.mxu0 %v8790_v8  ;;  %4409 = vmatprep.subr.bf16.mxu1 %v8877_v0  ;;  %v7110_v8 = vcombine.high %v162_v3, %v170_v4  ;;  %v7117_v23 = vcombine.low %v174_v9, %v182_v12  ;;  %v258_v57 = vld [vmem:[%s11062_s0 + $0x7a0] sm:$0xff] }
  0x55   :  { %5565 = vmatprep.subr.bf16.mxu0 %v8877_v0 }
  0x57   :  { %4410 = vmatpush1.bf16.msra.mxu1 %v8791_v14  ;;  %v186_v14 = vld [vmem:[%s11062_s0 + $0x560] sm:$0xff] }
  0x58   :  { %5566 = vmatpush1.bf16.msra.mxu0 %v8792_v15  ;;  %4411 = vmatprep.subr.bf16.mxu1 %v8877_v0  ;;  %v7101_v15 = vcombine.low %v158_v1, %v166_v2  ;;  %v7125_v24 = vcombine.low %v178_v13, %v186_v14  ;;  %v8812_v1 = vld [vmem:[%s11061_s1 + $0x2f8] sm:$0xff]   ;;  %v270_v2 = vld [vmem:[%s11062_s0 + $0x800] sm:$0xff] }
  0x59   :  { %4167 = vmatmul.mubr.bf16.gmra.mrb[12].mxu1 %v7005_v16  ;;  %5567 = vmatprep.subr.bf16.mxu0 %v8877_v0  ;;  %v7109_v16 = vcombine.low %v162_v3, %v170_v4  ;;  %v278_v3 = vld [vmem:[%s11062_s0 + $0x840] sm:$0xff] }
  0x5a   :  { %5323 = vmatmul.mubr.bf16.gmra.mrb[12].mxu0 %v7013_v18  ;;  %4174 = vmatprep.mubr.bf16.mxu1 %v7022_v19  ;;  %v7126_v18 = vcombine.high %v178_v13, %v186_v14  ;;  %v190_v19 = vld [vmem:[%s11062_s0 + $0x580] sm:$0xff]  ;;  %v7213_v14 = vcombine.low %v270_v2, %v278_v3 }
  0x5b   :  { %5330 = vmatprep.mubr.bf16.mxu0 %v7030_v21  ;;  %4412 = vmatpush1.bf16.msra.mxu1 %v8793_v17  ;;  %v7118_v17 = vcombine.high %v174_v9, %v182_v12  ;;  %v194_v21 = vld [vmem:[%s11062_s0 + $0x5a0] sm:$0xff] }
  0x5c   :  { %5568 = vmatpush1.bf16.msra.mxu0 %v8794_v20  ;;  %4413 = vmatprep.subr.bf16.mxu1 %v8877_v0  ;;  %v198_v20 = vld [vmem:[%s11062_s0 + $0x5c0] sm:$0xff]  ;;  %v7141_v34 = vcombine.low %v194_v21, %v202_v22 }
  0x5d   :  { %5569 = vmatprep.subr.bf16.mxu0 %v8877_v0  ;;  %v7134_v25 = vcombine.high %v190_v19, %v198_v20  ;;  %v274_v4 = vld [vmem:[%s11062_s0 + $0x820] sm:$0xff] }
  0x5e   :  { %v290_v12 = vld [vmem:[%s11062_s0 + $0x8a0] sm:$0xff] }
  0x5f   :  { %4414 = vmatpush1.bf16.msra.mxu1 %v8795_v26  ;;  %v7142_v26 = vcombine.high %v194_v21, %v202_v22  ;;  %v298_v13 = vld [vmem:[%s11062_s0 + $0x8e0] sm:$0xff] }
  0x60   :  { %5570 = vmatpush1.bf16.msra.mxu0 %v8796_v27  ;;  %4415 = vmatprep.subr.bf16.mxu1 %v8877_v0  ;;  %v8807_v27 = vld [vmem:[%s11061_s1 + $0xe8] sm:$0xff]   ;;  %v314_v21 = vld [vmem:[%s11062_s0 + $0x960] sm:$0xff] }
  0x61   :  { %4175 = vmatmul.mubr.bf16.gmra.mrb[16].mxu1 %v7021_v28  ;;  %5571 = vmatprep.subr.bf16.mxu0 %v8877_v0  ;;  %v8808_v28 = vld [vmem:[%s11061_s1 + $0x2e8] sm:$0xff]  }
  0x62   :  { %5331 = vmatmul.mubr.bf16.gmra.mrb[16].mxu0 %v7029_v30  ;;  %4182 = vmatprep.mubr.bf16.mxu1 %v7038_v31  ;;  %v214_v30 = vld [vmem:[%s11062_s0 + $0x640] sm:$0xff] }
  0x63   :  { %5338 = vmatprep.mubr.bf16.mxu0 %v7046_v33  ;;  %4416 = vmatpush1.bf16.msra.mxu1 %v8797_v29  ;;  %v206_v29 = vld [vmem:[%s11062_s0 + $0x600] sm:$0xff]  ;;  %v7133_v33 = vcombine.low %v190_v19, %v198_v20 }
  0x64   :  { %5572 = vmatpush1.bf16.msra.mxu0 %v8798_v32  ;;  %4417 = vmatprep.subr.bf16.mxu1 %v8877_v0  ;;  %v210_v31 = vld [vmem:[%s11062_s0 + $0x620] sm:$0xff]  ;;  %v7150_v35 = vcombine.high %v206_v29, %v214_v30 }
  0x65   :  { %5573 = vmatprep.subr.bf16.mxu0 %v8877_v0  ;;  %v218_v32 = vld [vmem:[%s11062_s0 + $0x660] sm:$0xff] }
  0x66   :  { %v7158_v36 = vcombine.high %v210_v31, %v218_v32  ;;  %v310_v19 = vld [vmem:[%s11062_s0 + $0x940] sm:$0xff] }
  0x67   :  { %4418 = vmatpush1.bf16.msra.mxu1 %v8799_v38  ;;  %v230_v38 = vld [vmem:[%s11062_s0 + $0x6c0] sm:$0xff] }
  0x68   :  { %5574 = vmatpush1.bf16.msra.mxu0 %v8800_v39  ;;  %4419 = vmatprep.subr.bf16.mxu1 %v8877_v0  ;;  %v226_v39 = vld [vmem:[%s11062_s0 + $0x6a0] sm:$0xff] }
  0x69   :  { %4183 = vmatmul.mubr.bf16.gmra.mrb[20].mxu1 %v7037_v40  ;;  %5575 = vmatprep.subr.bf16.mxu0 %v8877_v0  ;;  %v234_v40 = vld [vmem:[%s11062_s0 + $0x6e0] sm:$0xff] }
  0x6a   :  { %5339 = vmatmul.mubr.bf16.gmra.mrb[20].mxu0 %v7045_v42  ;;  %4190 = vmatprep.mubr.bf16.mxu1 %v7054_v43  ;;  %v7157_v42 = vcombine.low %v210_v31, %v218_v32  ;;  %v7166_v43 = vcombine.high %v222_v37, %v230_v38  ;;  %v306_v20 = vld [vmem:[%s11062_s0 + $0x920] sm:$0xff] }
  0x6b   :  { %5346 = vmatprep.mubr.bf16.mxu0 %v7062_v45  ;;  %4420 = vmatpush1.bf16.msra.mxu1 %v8801_v41  ;;  %v7149_v41 = vcombine.low %v206_v29, %v214_v30  ;;  %v8809_v45 = vld [vmem:[%s11061_s1 + $0xf0] sm:$0xff]   ;;  %v330_v29 = vld [vmem:[%s11062_s0 + $0x9e0] sm:$0xff]  ;;  %v7253_v31 = vcombine.low %v306_v20, %v314_v21 }
  0x6c   :  { %5576 = vmatpush1.bf16.msra.mxu0 %v8802_v44  ;;  %4421 = vmatprep.subr.bf16.mxu1 %v8877_v0  ;;  %v7174_v44 = vcombine.high %v226_v39, %v234_v40 }
  0x6d   :  { %5577 = vmatprep.subr.bf16.mxu0 %v8877_v0 }
  0x6f   :  { %4422 = vmatpush1.bf16.msra.mxu1 %v8803_v55  ;;  %v254_v55 = vld [vmem:[%s11062_s0 + $0x780] sm:$0xff] }
  0x70   :  { %5578 = vmatpush1.bf16.msra.mxu0 %v8804_v56  ;;  %4423 = vmatprep.subr.bf16.mxu1 %v8877_v0  ;;  %v262_v56 = vld [vmem:[%s11062_s0 + $0x7c0] sm:$0xff] }
  0x71   :  { %4191 = vmatmul.mubr.bf16.gmra.mrb[24].mxu1 %v7053_v50  ;;  %5579 = vmatprep.subr.bf16.mxu0 %v8877_v0  ;;  %v250_v50 = vld [vmem:[%s11062_s0 + $0x760] sm:$0xff] }
  0x72   :  { %5347 = vmatmul.mubr.bf16.gmra.mrb[24].mxu0 %v7061_v51  ;;  %4198 = vmatprep.mubr.bf16.mxu1 %v7070_v52  ;;  %v7165_v51 = vcombine.low %v222_v37, %v230_v38  ;;  %v7173_v52 = vcombine.low %v226_v39, %v234_v40  ;;  %v7190_v54 = vcombine.high %v242_v49, %v250_v50  ;;  %v346_v37 = vld [vmem:[%s11062_s0 + $0xa60] sm:$0xff] }
  0x73   :  { %5354 = vmatprep.mubr.bf16.mxu0 %v7078_v53  ;;  %4424 = vmatpush1.bf16.msra.mxu1 %v8805_v10  ;;  %v7182_v53 = vcombine.high %v238_v47, %v246_v48  ;;  %v286_v10 = vld [vmem:[%s11062_s0 + $0x880] sm:$0xff] }
  0x74   :  { %5580 = vmatpush1.bf16.msra.mxu0 %v8806_v11  ;;  %4425 = vmatprep.subr.bf16.mxu1 %v8877_v0  ;;  %v294_v11 = vld [vmem:[%s11062_s0 + $0x8c0] sm:$0xff] }
  0x75   :  { %5581 = vmatprep.subr.bf16.mxu0 %v8877_v0  ;;  %v7229_v22 = vcombine.low %v286_v10, %v294_v11 }
  0x77   :  { %4426 = vmatpush1.bf16.msra.mxu1 %v8807_v27  ;;  %v326_v27 = vld [vmem:[%s11062_s0 + $0x9c0] sm:$0xff] }
  0x78   :  { %5582 = vmatpush1.bf16.msra.mxu0 %v8808_v28  ;;  %4427 = vmatprep.subr.bf16.mxu1 %v8877_v0  ;;  %v322_v28 = vld [vmem:[%s11062_s0 + $0x9a0] sm:$0xff] }
  0x79   :  { %4199 = vmatmul.mubr.bf16.gmra.mrb[28].mxu1 %v7069_v60  ;;  %5583 = vmatprep.subr.bf16.mxu0 %v8877_v0  ;;  %v7189_v60 = vcombine.low %v242_v49, %v250_v50  ;;  %v7269_v39 = vcombine.low %v322_v28, %v330_v29  ;;  %v366_v50 = vld [vmem:[%s11062_s0 + $0xb00] sm:$0xff] }
  0x7a   :  { %5355 = vmatmul.mubr.bf16.gmra.mrb[28].mxu0 %v7077_v61  ;;  %4206 = vmatprep.mubr.bf16.mxu1 %v7086_v62  ;;  %v7198_v61 = vcombine.high %v254_v55, %v262_v56  ;;  %v7206_v62 = vcombine.high %v258_v57, %v266_v58 }
  0x7b   :  { %5362 = vmatprep.mubr.bf16.mxu0 %v7094_v63  ;;  %4428 = vmatpush1.bf16.msra.mxu1 %v8809_v45  ;;  %v8811_v63 = vld [vmem:[%s11061_s1 + $0xf8] sm:$0xff]   ;;  %v362_v45 = vld [vmem:[%s11062_s0 + $0xae0] sm:$0xff] }
  0x7c   :  { %5584 = vmatpush1.bf16.msra.mxu0 %v8810_v46  ;;  %4429 = vmatprep.subr.bf16.mxu1 %v8877_v0 }
  0x7d   :  { %5585 = vmatprep.subr.bf16.mxu0 %v8877_v0 }
  0x7f   :  { %4430 = vmatpush1.bf16.msra.mxu1 %v8811_v63 }
  0x80   :  { %5586 = vmatpush1.bf16.msra.mxu0 %v8812_v1  ;;  %4688 = vmatprep.subr.bf16.mxu1 %v8877_v0 }
  0x81   :  { %4207 = vmatmul.mubr.bf16.gmra.mrb[32].mxu1 %v7085_v5  ;;  %v282_v5 = vld [vmem:[%s11062_s0 + $0x860] sm:$0xff]  ;;  %5844 = vmatprep.subr.bf16.mxu0 %v8877_v0 }
  0x82   :  { %5363 = vmatmul.mubr.bf16.gmra.mrb[32].mxu0 %v7093_v6  ;;  %4214 = vmatprep.mubr.bf16.mxu1 %v7102_v7  ;;  %v7197_v6 = vcombine.low %v254_v55, %v262_v56  ;;  %v7205_v7 = vcombine.low %v258_v57, %v266_v58  ;;  %v7222_v9 = vcombine.high %v274_v4, %v282_v5  ;;  %v382_v58 = vld [vmem:[%s11062_s0 + $0xb80] sm:$0xff] }
  0x83   :  { %5370 = vmatprep.mubr.bf16.mxu0 %v7110_v8  ;;  %v7214_v8 = vcombine.high %v270_v2, %v278_v3  ;;  %v398_v3 = vld [vmem:[%s11062_s0 + $0xc00] sm:$0xff] }
  0x89   :  { %4215 = vmatmul.mubr.bf16.gmra.mrb[36].mxu1 %v7101_v15  ;;  %v7221_v15 = vcombine.low %v274_v4, %v282_v5  ;;  %v406_v4 = vld [vmem:[%s11062_s0 + $0xc40] sm:$0xff] }
  0x8a   :  { %5371 = vmatmul.mubr.bf16.gmra.mrb[36].mxu0 %v7109_v16  ;;  %4222 = vmatprep.mubr.bf16.mxu1 %v7118_v17  ;;  %v7230_v16 = vcombine.high %v286_v10, %v294_v11  ;;  %v7238_v17 = vcombine.high %v290_v12, %v298_v13  ;;  %v402_v5 = vld [vmem:[%s11062_s0 + $0xc20] sm:$0xff] }
  0x8b   :  { %5378 = vmatprep.mubr.bf16.mxu0 %v7126_v18  ;;  %v302_v18 = vld [vmem:[%s11062_s0 + $0x900] sm:$0xff] }
  0x8c   :  { %v7245_v30 = vcombine.low %v302_v18, %v310_v19  ;;  %v414_v11 = vld [vmem:[%s11062_s0 + $0xc80] sm:$0xff] }
  0x91   :  { %4223 = vmatmul.mubr.bf16.gmra.mrb[40].mxu1 %v7117_v23  ;;  %v7237_v23 = vcombine.low %v290_v12, %v298_v13  ;;  %v422_v12 = vld [vmem:[%s11062_s0 + $0xcc0] sm:$0xff] }
  0x92   :  { %5379 = vmatmul.mubr.bf16.gmra.mrb[40].mxu0 %v7125_v24  ;;  %4230 = vmatprep.mubr.bf16.mxu1 %v7134_v25  ;;  %v7246_v24 = vcombine.high %v302_v18, %v310_v19  ;;  %v7254_v25 = vcombine.high %v306_v20, %v314_v21  ;;  %v418_v13 = vld [vmem:[%s11062_s0 + $0xca0] sm:$0xff] }
  0x93   :  { %5386 = vmatprep.mubr.bf16.mxu0 %v7142_v26  ;;  %v318_v26 = vld [vmem:[%s11062_s0 + $0x980] sm:$0xff] }
  0x94   :  { %v7262_v32 = vcombine.high %v318_v26, %v326_v27  ;;  %v7261_v38 = vcombine.low %v318_v26, %v326_v27  ;;  %v430_v19 = vld [vmem:[%s11062_s0 + $0xd00] sm:$0xff] }
  0x95   :  { %v438_v20 = vld [vmem:[%s11062_s0 + $0xd40] sm:$0xff] }
  0x96   :  { %v434_v21 = vld [vmem:[%s11062_s0 + $0xd20] sm:$0xff] }
  0x97   :  { %v446_v27 = vld [vmem:[%s11062_s0 + $0xd80] sm:$0xff] }
  0x99   :  { %4231 = vmatmul.mubr.bf16.gmra.mrb[44].mxu1 %v7133_v33  ;;  %v7270_v33 = vcombine.high %v322_v28, %v330_v29  ;;  %v454_v28 = vld [vmem:[%s11062_s0 + $0xdc0] sm:$0xff] }
  0x9a   :  { %5387 = vmatmul.mubr.bf16.gmra.mrb[44].mxu0 %v7141_v34  ;;  %4238 = vmatprep.mubr.bf16.mxu1 %v7150_v35  ;;  %v334_v34 = vld [vmem:[%s11062_s0 + $0xa00] sm:$0xff] }
  0x9b   :  { %5394 = vmatprep.mubr.bf16.mxu0 %v7158_v36  ;;  %v342_v35 = vld [vmem:[%s11062_s0 + $0xa40] sm:$0xff] }
  0x9c   :  { %v338_v36 = vld [vmem:[%s11062_s0 + $0xa20] sm:$0xff]  ;;  %v7278_v40 = vcombine.high %v334_v34, %v342_v35  ;;  %v7277_v46 = vcombine.low %v334_v34, %v342_v35 }
  0x9d   :  { %v7285_v47 = vcombine.low %v338_v36, %v346_v37  ;;  %v450_v29 = vld [vmem:[%s11062_s0 + $0xda0] sm:$0xff] }
  0x9e   :  { %v462_v35 = vld [vmem:[%s11062_s0 + $0xe00] sm:$0xff] }
  0xa1   :  { %4239 = vmatmul.mubr.bf16.gmra.mrb[48].mxu1 %v7149_v41  ;;  %v7286_v41 = vcombine.high %v338_v36, %v346_v37  ;;  %v470_v36 = vld [vmem:[%s11062_s0 + $0xe40] sm:$0xff] }
  0xa2   :  { %5395 = vmatmul.mubr.bf16.gmra.mrb[48].mxu0 %v7157_v42  ;;  %4246 = vmatprep.mubr.bf16.mxu1 %v7166_v43  ;;  %v350_v42 = vld [vmem:[%s11062_s0 + $0xa80] sm:$0xff] }
  0xa3   :  { %5402 = vmatprep.mubr.bf16.mxu0 %v7174_v44  ;;  %v358_v43 = vld [vmem:[%s11062_s0 + $0xac0] sm:$0xff] }
  0xa4   :  { %v354_v44 = vld [vmem:[%s11062_s0 + $0xaa0] sm:$0xff]  ;;  %v7294_v48 = vcombine.high %v350_v42, %v358_v43 }
  0xa5   :  { %v7302_v49 = vcombine.high %v354_v44, %v362_v45  ;;  %v7301_v55 = vcombine.low %v354_v44, %v362_v45  ;;  %v466_v37 = vld [vmem:[%s11062_s0 + $0xe20] sm:$0xff] }
  0xa6   :  { %v486_v44 = vld [vmem:[%s11062_s0 + $0xec0] sm:$0xff] }
  0xa7   :  { %v482_v45 = vld [vmem:[%s11062_s0 + $0xea0] sm:$0xff] }
  0xa9   :  { %4247 = vmatmul.mubr.bf16.gmra.mrb[52].mxu1 %v7165_v51  ;;  %v374_v51 = vld [vmem:[%s11062_s0 + $0xb40] sm:$0xff] }
  0xaa   :  { %5403 = vmatmul.mubr.bf16.gmra.mrb[52].mxu0 %v7173_v52  ;;  %4254 = vmatprep.mubr.bf16.mxu1 %v7182_v53  ;;  %v370_v52 = vld [vmem:[%s11062_s0 + $0xb20] sm:$0xff]  ;;  %v7310_v56 = vcombine.high %v366_v50, %v374_v51 }
  0xab   :  { %5410 = vmatprep.mubr.bf16.mxu0 %v7190_v54  ;;  %v378_v53 = vld [vmem:[%s11062_s0 + $0xb60] sm:$0xff]  ;;  %v7293_v54 = vcombine.low %v350_v42, %v358_v43 }
  0xac   :  { %v7318_v57 = vcombine.high %v370_v52, %v378_v53  ;;  %v7317_v63 = vcombine.low %v370_v52, %v378_v53  ;;  %v478_v43 = vld [vmem:[%s11062_s0 + $0xe80] sm:$0xff] }
  0xad   :  { %v502_v52 = vld [vmem:[%s11062_s0 + $0xf40] sm:$0xff] }
  0xae   :  { %v498_v53 = vld [vmem:[%s11062_s0 + $0xf20] sm:$0xff] }
  0xb1   :  { %4255 = vmatmul.mubr.bf16.gmra.mrb[56].mxu1 %v7181_v59  ;;  %v390_v59 = vld [vmem:[%s11062_s0 + $0xbc0] sm:$0xff] }
  0xb2   :  { %5411 = vmatmul.mubr.bf16.gmra.mrb[56].mxu0 %v7189_v60  ;;  %4262 = vmatprep.mubr.bf16.mxu1 %v7198_v61  ;;  %v386_v60 = vld [vmem:[%s11062_s0 + $0xba0] sm:$0xff]  ;;  %v7326_v1 = vcombine.high %v382_v58, %v390_v59 }
  0xb3   :  { %5418 = vmatprep.mubr.bf16.mxu0 %v7206_v62  ;;  %v394_v61 = vld [vmem:[%s11062_s0 + $0xbe0] sm:$0xff]  ;;  %v7309_v62 = vcombine.low %v366_v50, %v374_v51 }
  0xb4   :  { %v7334_v2 = vcombine.high %v386_v60, %v394_v61  ;;  %v494_v51 = vld [vmem:[%s11062_s0 + $0xf00] sm:$0xff] }
  0xb9   :  { %4263 = vmatmul.mubr.bf16.gmra.mrb[60].mxu1 %v7197_v6  ;;  %v410_v6 = vld [vmem:[%s11062_s0 + $0xc60] sm:$0xff] }
  0xba   :  { %5419 = vmatmul.mubr.bf16.gmra.mrb[60].mxu0 %v7205_v7  ;;  %4270 = vmatprep.mubr.bf16.mxu1 %v7214_v8  ;;  %v7325_v7 = vcombine.low %v382_v58, %v390_v59  ;;  %v7333_v8 = vcombine.low %v386_v60, %v394_v61  ;;  %v7350_v10 = vcombine.high %v402_v5, %v410_v6  ;;  %v510_v59 = vld [vmem:[%s11062_s0 + $0xf80] sm:$0xff] }
  0xbb   :  { %5426 = vmatprep.mubr.bf16.mxu0 %v7222_v9  ;;  %v7342_v9 = vcombine.high %v398_v3, %v406_v4  ;;  %v518_v60 = vld [vmem:[%s11062_s0 + $0xfc0] sm:$0xff] }
  0xbc   :  { %v514_v61 = vld [vmem:[%s11062_s0 + $0xfa0] sm:$0xff] }
  0xc1   :  { %4271 = vmatmul.mubr.bf16.gmra.mrb[64].mxu1 %v7213_v14  ;;  %v426_v14 = vld [vmem:[%s11062_s0 + $0xce0] sm:$0xff] }
  0xc2   :  { %5427 = vmatmul.mubr.bf16.gmra.mrb[64].mxu0 %v7221_v15  ;;  %4278 = vmatprep.mubr.bf16.mxu1 %v7230_v16  ;;  %v7341_v15 = vcombine.low %v398_v3, %v406_v4  ;;  %v7349_v16 = vcombine.low %v402_v5, %v410_v6  ;;  %v7366_v18 = vcombine.high %v418_v13, %v426_v14  ;;  %v15_v4 = vld [vmem:[%s11062_s0 + $0x8] sm:$0xff] }
  0xc3   :  { %5434 = vmatprep.mubr.bf16.mxu0 %v7238_v17  ;;  %v7358_v17 = vcombine.high %v414_v11, %v422_v12  ;;  %v23_v5 = vld [vmem:[%s11062_s0 + $0x48] sm:$0xff] }
  0xc4   :  { %v19_v6 = vld [vmem:[%s11062_s0 + $0x28] sm:$0xff] }
  0xc9   :  { %4279 = vmatmul.mubr.bf16.gmra.mrb[68].mxu1 %v7229_v22  ;;  %v442_v22 = vld [vmem:[%s11062_s0 + $0xd60] sm:$0xff] }
  0xca   :  { %5435 = vmatmul.mubr.bf16.gmra.mrb[68].mxu0 %v7237_v23  ;;  %4286 = vmatprep.mubr.bf16.mxu1 %v7246_v24  ;;  %v7357_v23 = vcombine.low %v414_v11, %v422_v12  ;;  %v7365_v24 = vcombine.low %v418_v13, %v426_v14  ;;  %v7382_v26 = vcombine.high %v434_v21, %v442_v22  ;;  %v31_v12 = vld [vmem:[%s11062_s0 + $0x88] sm:$0xff] }
  0xcb   :  { %5442 = vmatprep.mubr.bf16.mxu0 %v7254_v25  ;;  %v7374_v25 = vcombine.high %v430_v19, %v438_v20  ;;  %v39_v13 = vld [vmem:[%s11062_s0 + $0xc8] sm:$0xff]  ;;  %v6959_v14 = vcombine.low %v15_v4, %v23_v5 }
  0xd1   :  { %4287 = vmatmul.mubr.bf16.gmra.mrb[72].mxu1 %v7245_v30  ;;  %v458_v30 = vld [vmem:[%s11062_s0 + $0xde0] sm:$0xff] }
  0xd2   :  { %5443 = vmatmul.mubr.bf16.gmra.mrb[72].mxu0 %v7253_v31  ;;  %4294 = vmatprep.mubr.bf16.mxu1 %v7262_v32  ;;  %v7373_v31 = vcombine.low %v430_v19, %v438_v20  ;;  %v7381_v32 = vcombine.low %v434_v21, %v442_v22  ;;  %v7398_v34 = vcombine.high %v450_v29, %v458_v30  ;;  %v8814_v19 = vld [vmem:[%s11061_s1 + $0x300] sm:$0xff]   ;;  %v8815_v22 = vld [vmem:[%s11061_s1 + $0x108] sm:$0xff]  }
  0xd3   :  { %5450 = vmatprep.mubr.bf16.mxu0 %v7270_v33  ;;  %v7390_v33 = vcombine.high %v446_v27, %v454_v28  ;;  %v6976_v20 = vcombine.high %v31_v12, %v39_v13 }
  0xd9   :  { %4295 = vmatmul.mubr.bf16.gmra.mrb[76].mxu1 %v7261_v38  ;;  %v474_v38 = vld [vmem:[%s11062_s0 + $0xe60] sm:$0xff] }
  0xda   :  { %5451 = vmatmul.mubr.bf16.gmra.mrb[76].mxu0 %v7269_v39  ;;  %4302 = vmatprep.mubr.bf16.mxu1 %v7278_v40  ;;  %v7389_v39 = vcombine.low %v446_v27, %v454_v28  ;;  %v7397_v40 = vcombine.low %v450_v29, %v458_v30  ;;  %v7414_v42 = vcombine.high %v466_v37, %v474_v38  ;;  %v59_v27 = vld [vmem:[%s11062_s0 + $0x168] sm:$0xff] }
  0xdb   :  { %5458 = vmatprep.mubr.bf16.mxu0 %v7286_v41  ;;  %v7406_v41 = vcombine.high %v462_v35, %v470_v36  ;;  %v6975_v28 = vcombine.low %v31_v12, %v39_v13  ;;  %v8832_v12 = vld [vmem:[%s11061_s1 + $0x348] sm:$0xff]  }
  0xe1   :  { %4303 = vmatmul.mubr.bf16.gmra.mrb[80].mxu1 %v7277_v46  ;;  %v490_v46 = vld [vmem:[%s11062_s0 + $0xee0] sm:$0xff] }
  0xe2   :  { %5459 = vmatmul.mubr.bf16.gmra.mrb[80].mxu0 %v7285_v47  ;;  %4310 = vmatprep.mubr.bf16.mxu1 %v7294_v48  ;;  %v7405_v47 = vcombine.low %v462_v35, %v470_v36  ;;  %v7413_v48 = vcombine.low %v466_v37, %v474_v38  ;;  %v7430_v50 = vcombine.high %v482_v45, %v490_v46  ;;  %v71_v35 = vld [vmem:[%s11062_s0 + $0x1c8] sm:$0xff]  ;;  %v8819_v36 = vld [vmem:[%s11061_s1 + $0x118] sm:$0xff]  }
  0xe3   :  { %5466 = vmatprep.mubr.bf16.mxu0 %v7302_v49  ;;  %v7422_v49 = vcombine.high %v478_v43, %v486_v44  ;;  %v67_v37 = vld [vmem:[%s11062_s0 + $0x1a8] sm:$0xff] }
  0xe4   :  { %v75_v38 = vld [vmem:[%s11062_s0 + $0x1e8] sm:$0xff] }
  0xe9   :  { %4311 = vmatmul.mubr.bf16.gmra.mrb[84].mxu1 %v7293_v54  ;;  %v506_v54 = vld [vmem:[%s11062_s0 + $0xf60] sm:$0xff] }
  0xea   :  { %5467 = vmatmul.mubr.bf16.gmra.mrb[84].mxu0 %v7301_v55  ;;  %4318 = vmatprep.mubr.bf16.mxu1 %v7310_v56  ;;  %v7421_v55 = vcombine.low %v478_v43, %v486_v44  ;;  %v7429_v56 = vcombine.low %v482_v45, %v490_v46  ;;  %v7446_v58 = vcombine.high %v498_v53, %v506_v54  ;;  %v8821_v44 = vld [vmem:[%s11061_s1 + $0x120] sm:$0xff]   ;;  %v79_v46 = vld [vmem:[%s11062_s0 + $0x208] sm:$0xff] }
  0xeb   :  { %5474 = vmatprep.mubr.bf16.mxu0 %v7318_v57  ;;  %v7438_v57 = vcombine.high %v494_v51, %v502_v52  ;;  %v7016_v43 = vcombine.high %v67_v37, %v75_v38  ;;  %v8822_v45 = vld [vmem:[%s11061_s1 + $0x320] sm:$0xff]  }
  0xf1   :  { %4319 = vmatmul.mubr.bf16.gmra.mrb[88].mxu1 %v7309_v62  ;;  %v522_v62 = vld [vmem:[%s11062_s0 + $0xfe0] sm:$0xff] }
  0xf2   :  { %5475 = vmatmul.mubr.bf16.gmra.mrb[88].mxu0 %v7317_v63  ;;  %4326 = vmatprep.mubr.bf16.mxu1 %v7326_v1  ;;  %v7437_v63 = vcombine.low %v494_v51, %v502_v52  ;;  %v7445_v1 = vcombine.low %v498_v53, %v506_v54  ;;  %v7462_v3 = vcombine.high %v514_v61, %v522_v62  ;;  %v8824_v51 = vld [vmem:[%s11061_s1 + $0x328] sm:$0xff]  }
  0xf3   :  { %5482 = vmatprep.mubr.bf16.mxu0 %v7334_v2  ;;  %v7454_v2 = vcombine.high %v510_v59, %v518_v60  ;;  %v7015_v53 = vcombine.low %v67_v37, %v75_v38  ;;  %v159_v37 = vld [vmem:[%s11062_s0 + $0x488] sm:$0xff] }
  0xf4   :  { %v167_v38 = vld [vmem:[%s11062_s0 + $0x4c8] sm:$0xff] }
  0xf9   :  { %4327 = vmatmul.mubr.bf16.gmra.mrb[92].mxu1 %v7325_v7  ;;  %v27_v7 = vld [vmem:[%s11062_s0 + $0x68] sm:$0xff] }
  0xfa   :  { %5483 = vmatmul.mubr.bf16.gmra.mrb[92].mxu0 %v7333_v8  ;;  %4334 = vmatprep.mubr.bf16.mxu1 %v7342_v9  ;;  %v7453_v8 = vcombine.low %v510_v59, %v518_v60  ;;  %v7461_v9 = vcombine.low %v514_v61, %v522_v62  ;;  %v6968_v11 = vcombine.high %v19_v6, %v27_v7  ;;  %v103_v59 = vld [vmem:[%s11062_s0 + $0x2c8] sm:$0xff]  ;;  %v8827_v60 = vld [vmem:[%s11061_s1 + $0x138] sm:$0xff]  }
  0xfb   :  { %5490 = vmatprep.mubr.bf16.mxu0 %v7350_v10  ;;  %v6960_v10 = vcombine.high %v15_v4, %v23_v5  ;;  %v99_v61 = vld [vmem:[%s11062_s0 + $0x2a8] sm:$0xff]  ;;  %v8829_v5 = vld [vmem:[%s11061_s1 + $0x140] sm:$0xff]  }
  0xfc   :  { %v107_v62 = vld [vmem:[%s11062_s0 + $0x2e8] sm:$0xff] }
  0xfd   :  { %v7048_v4 = vcombine.high %v99_v61, %v107_v62 }
 0x101   :  { %4335 = vmatmul.mubr.bf16.gmra.mrb[96].mxu1 %v7341_v15  ;;  %v35_v15 = vld [vmem:[%s11062_s0 + $0xa8] sm:$0xff] }
 0x102   :  { %5491 = vmatmul.mubr.bf16.gmra.mrb[96].mxu0 %v7349_v16  ;;  %4342 = vmatprep.mubr.bf16.mxu1 %v7358_v17  ;;  %v43_v16 = vld [vmem:[%s11062_s0 + $0xe8] sm:$0xff]  ;;  %v6967_v17 = vcombine.low %v19_v6, %v27_v7  ;;  %v8830_v6 = vld [vmem:[%s11061_s1 + $0x340] sm:$0xff]  }
 0x103   :  { %5498 = vmatprep.mubr.bf16.mxu0 %v7366_v18  ;;  %v8813_v18 = vld [vmem:[%s11061_s1 + $0x100] sm:$0xff]   ;;  %v6984_v21 = vcombine.high %v35_v15, %v43_v16  ;;  %v6983_v29 = vcombine.low %v35_v15, %v43_v16  ;;  %v111_v7 = vld [vmem:[%s11062_s0 + $0x308] sm:$0xff] }
 0x109   :  { %4343 = vmatmul.mubr.bf16.gmra.mrb[100].mxu1 %v7357_v23  ;;  %v47_v23 = vld [vmem:[%s11062_s0 + $0x108] sm:$0xff] }
 0x10a   :  { %5499 = vmatmul.mubr.bf16.gmra.mrb[100].mxu0 %v7365_v24  ;;  %4350 = vmatprep.mubr.bf16.mxu1 %v7374_v25  ;;  %v55_v24 = vld [vmem:[%s11062_s0 + $0x148] sm:$0xff] }
 0x10b   :  { %5506 = vmatprep.mubr.bf16.mxu0 %v7382_v26  ;;  %v8816_v25 = vld [vmem:[%s11061_s1 + $0x308] sm:$0xff]   ;;  %v6992_v30 = vcombine.high %v47_v23, %v55_v24 }
 0x10c   :  { %v51_v26 = vld [vmem:[%s11062_s0 + $0x128] sm:$0xff] }
 0x111   :  { %4351 = vmatmul.mubr.bf16.gmra.mrb[104].mxu1 %v7373_v31  ;;  %v7000_v31 = vcombine.high %v51_v26, %v59_v27 }
 0x112   :  { %5507 = vmatmul.mubr.bf16.gmra.mrb[104].mxu0 %v7381_v32  ;;  %4358 = vmatprep.mubr.bf16.mxu1 %v7390_v33  ;;  %v8817_v32 = vld [vmem:[%s11061_s1 + $0x110] sm:$0xff]  }
 0x113   :  { %5514 = vmatprep.mubr.bf16.mxu0 %v7398_v34  ;;  %v8818_v33 = vld [vmem:[%s11061_s1 + $0x310] sm:$0xff]   ;;  %v63_v34 = vld [vmem:[%s11062_s0 + $0x188] sm:$0xff] }
 0x114   :  { %v7007_v52 = vcombine.low %v63_v34, %v71_v35 }
 0x119   :  { %4359 = vmatmul.mubr.bf16.gmra.mrb[108].mxu1 %v7389_v39  ;;  %v8820_v39 = vld [vmem:[%s11061_s1 + $0x318] sm:$0xff]  }
 0x11a   :  { %5515 = vmatmul.mubr.bf16.gmra.mrb[108].mxu0 %v7397_v40  ;;  %4366 = vmatprep.mubr.bf16.mxu1 %v7406_v41  ;;  %v6991_v40 = vcombine.low %v47_v23, %v55_v24  ;;  %v6999_v41 = vcombine.low %v51_v26, %v59_v27  ;;  %v8835_v27 = vld [vmem:[%s11061_s1 + $0x158] sm:$0xff]  }
 0x11b   :  { %5522 = vmatprep.mubr.bf16.mxu0 %v7414_v42  ;;  %v7008_v42 = vcombine.high %v63_v34, %v71_v35 }
 0x121   :  { %4367 = vmatmul.mubr.bf16.gmra.mrb[112].mxu1 %v7405_v47  ;;  %v87_v47 = vld [vmem:[%s11062_s0 + $0x248] sm:$0xff] }
 0x122   :  { %5523 = vmatmul.mubr.bf16.gmra.mrb[112].mxu0 %v7413_v48  ;;  %4374 = vmatprep.mubr.bf16.mxu1 %v7422_v49  ;;  %v8823_v48 = vld [vmem:[%s11061_s1 + $0x128] sm:$0xff]   ;;  %v7024_v54 = vcombine.high %v79_v46, %v87_v47 }
 0x123   :  { %5530 = vmatprep.mubr.bf16.mxu0 %v7430_v50  ;;  %v83_v49 = vld [vmem:[%s11062_s0 + $0x228] sm:$0xff] }
 0x124   :  { %v91_v50 = vld [vmem:[%s11062_s0 + $0x268] sm:$0xff] }
 0x129   :  { %4375 = vmatmul.mubr.bf16.gmra.mrb[116].mxu1 %v7421_v55  ;;  %v7032_v55 = vcombine.high %v83_v49, %v91_v50 }
 0x12a   :  { %5531 = vmatmul.mubr.bf16.gmra.mrb[116].mxu0 %v7429_v56  ;;  %4382 = vmatprep.mubr.bf16.mxu1 %v7438_v57  ;;  %v8825_v56 = vld [vmem:[%s11061_s1 + $0x130] sm:$0xff]  }
 0x12b   :  { %5538 = vmatprep.mubr.bf16.mxu0 %v7446_v58  ;;  %v8826_v57 = vld [vmem:[%s11061_s1 + $0x330] sm:$0xff]   ;;  %v95_v58 = vld [vmem:[%s11062_s0 + $0x288] sm:$0xff] }
 0x12c   :  { %v7039_v13 = vcombine.low %v95_v58, %v103_v59 }
 0x131   :  { %4383 = vmatmul.mubr.bf16.gmra.mrb[120].mxu1 %v7437_v63  ;;  %v8828_v63 = vld [vmem:[%s11061_s1 + $0x338] sm:$0xff]  }
 0x132   :  { %5539 = vmatmul.mubr.bf16.gmra.mrb[120].mxu0 %v7445_v1  ;;  %4390 = vmatprep.mubr.bf16.mxu1 %v7454_v2  ;;  %v7023_v1 = vcombine.low %v79_v46, %v87_v47  ;;  %v7031_v2 = vcombine.low %v83_v49, %v91_v50  ;;  %v8838_v46 = vld [vmem:[%s11061_s1 + $0x360] sm:$0xff]   ;;  %v175_v47 = vld [vmem:[%s11062_s0 + $0x508] sm:$0xff] }
 0x133   :  { %5546 = vmatprep.mubr.bf16.mxu0 %v7462_v3  ;;  %v7040_v3 = vcombine.high %v95_v58, %v103_v59  ;;  %v179_v49 = vld [vmem:[%s11062_s0 + $0x528] sm:$0xff] }
 0x134   :  { %v187_v50 = vld [vmem:[%s11062_s0 + $0x568] sm:$0xff] }
 0x135   :  { %v203_v58 = vld [vmem:[%s11062_s0 + $0x5e8] sm:$0xff] }
 0x139   :  { %4391 = vmatmul.mubr.bf16.gmra.mrb[124].mxu1 %v7453_v8  ;;  %v119_v8 = vld [vmem:[%s11062_s0 + $0x348] sm:$0xff] }
 0x13a   :  { %5547 = vmatmul.mubr.bf16.gmra.mrb[124].mxu0 %v7461_v9  ;;  %4431 = vmatprep.mubr.bf16.mxu1 %v6960_v10  ;;  %v8831_v9 = vld [vmem:[%s11061_s1 + $0x148] sm:$0xff]   ;;  %v7056_v15 = vcombine.high %v111_v7, %v119_v8  ;;  %v7055_v23 = vcombine.low %v111_v7, %v119_v8 }
 0x13b   :  { %5587 = vmatprep.mubr.bf16.mxu0 %v6968_v11  ;;  %v115_v10 = vld [vmem:[%s11062_s0 + $0x328] sm:$0xff] }
 0x13c   :  { %v123_v11 = vld [vmem:[%s11062_s0 + $0x368] sm:$0xff] }
 0x13d   :  { %v7064_v16 = vcombine.high %v115_v10, %v123_v11  ;;  %v7063_v24 = vcombine.low %v115_v10, %v123_v11  ;;  %v223_v10 = vld [vmem:[%s11062_s0 + $0x688] sm:$0xff] }
 0x13e   :  { %v231_v11 = vld [vmem:[%s11062_s0 + $0x6c8] sm:$0xff] }
 0x141   :  { %4432 = vmatmul.mubr.bf16.vlgmr.msra.gmra.mrb[0].mxu1 %v6959_v14  ;;  %v7047_v14 = vcombine.low %v99_v61, %v107_v62 }
 0x142   :  { %5588 = vmatmul.mubr.bf16.vlgmr.msra.gmra.mrb[0].mxu0 %v6967_v17  ;;  %4689 = vmatpush1.bf16.msra.mxu1 %v8813_v18  ;;  %v8833_v17 = vld [vmem:[%s11061_s1 + $0x150] sm:$0xff]  }
 0x143   :  { %5845 = vmatpush1.bf16.msra.mxu0 %v8814_v19  ;;  %4439 = vmatprep.mubr.bf16.mxu1 %v6976_v20  ;;  %v8834_v18 = vld [vmem:[%s11061_s1 + $0x350] sm:$0xff]   ;;  %v127_v19 = vld [vmem:[%s11062_s0 + $0x388] sm:$0xff] }
 0x144   :  { %5595 = vmatprep.mubr.bf16.mxu0 %v6984_v21  ;;  %4690 = vmatprep.subr.bf16.mxu1 %v8877_v0  ;;  %v135_v20 = vld [vmem:[%s11062_s0 + $0x3c8] sm:$0xff] }
 0x145   :  { %5846 = vmatprep.subr.bf16.mxu0 %v8877_v0  ;;  %v131_v21 = vld [vmem:[%s11062_s0 + $0x3a8] sm:$0xff] }
 0x146   :  { %4691 = vmatpush1.bf16.msra.mxu1 %v8815_v22  ;;  %v139_v22 = vld [vmem:[%s11062_s0 + $0x3e8] sm:$0xff] }
 0x147   :  { %5847 = vmatpush1.bf16.msra.mxu0 %v8816_v25  ;;  %4692 = vmatprep.subr.bf16.mxu1 %v8877_v0  ;;  %v7072_v25 = vcombine.high %v127_v19, %v135_v20  ;;  %v7080_v26 = vcombine.high %v131_v21, %v139_v22  ;;  %v7079_v34 = vcombine.low %v131_v21, %v139_v22  ;;  %v247_v21 = vld [vmem:[%s11062_s0 + $0x748] sm:$0xff] }
 0x148   :  { %5848 = vmatprep.subr.bf16.mxu0 %v8877_v0  ;;  %v243_v22 = vld [vmem:[%s11062_s0 + $0x728] sm:$0xff] }
 0x149   :  { %4440 = vmatmul.mubr.bf16.gmra.mrb[4].mxu1 %v6975_v28  ;;  %v8836_v28 = vld [vmem:[%s11061_s1 + $0x358] sm:$0xff]  }
 0x14a   :  { %5596 = vmatmul.mubr.bf16.gmra.mrb[4].mxu0 %v6983_v29  ;;  %4447 = vmatprep.mubr.bf16.mxu1 %v6992_v30  ;;  %v143_v29 = vld [vmem:[%s11062_s0 + $0x408] sm:$0xff] }
 0x14b   :  { %5603 = vmatprep.mubr.bf16.mxu0 %v7000_v31  ;;  %4693 = vmatpush1.bf16.msra.mxu1 %v8817_v32  ;;  %v151_v30 = vld [vmem:[%s11062_s0 + $0x448] sm:$0xff] }
 0x14c   :  { %5849 = vmatpush1.bf16.msra.mxu0 %v8818_v33  ;;  %4694 = vmatprep.subr.bf16.mxu1 %v8877_v0  ;;  %v147_v31 = vld [vmem:[%s11062_s0 + $0x428] sm:$0xff]  ;;  %v7071_v33 = vcombine.low %v127_v19, %v135_v20  ;;  %v7088_v35 = vcombine.high %v143_v29, %v151_v30  ;;  %v8842_v19 = vld [vmem:[%s11061_s1 + $0x370] sm:$0xff]  }
 0x14d   :  { %5850 = vmatprep.subr.bf16.mxu0 %v8877_v0  ;;  %v155_v32 = vld [vmem:[%s11062_s0 + $0x468] sm:$0xff] }
 0x14e   :  { %v239_v20 = vld [vmem:[%s11062_s0 + $0x708] sm:$0xff] }
 0x14f   :  { %4695 = vmatpush1.bf16.msra.mxu1 %v8819_v36  ;;  %v7096_v36 = vcombine.high %v147_v31, %v155_v32 }
 0x150   :  { %5851 = vmatpush1.bf16.msra.mxu0 %v8820_v39  ;;  %4696 = vmatprep.subr.bf16.mxu1 %v8877_v0  ;;  %v163_v39 = vld [vmem:[%s11062_s0 + $0x4a8] sm:$0xff] }
 0x151   :  { %4448 = vmatmul.mubr.bf16.gmra.mrb[8].mxu1 %v6991_v40  ;;  %5852 = vmatprep.subr.bf16.mxu0 %v8877_v0  ;;  %v171_v40 = vld [vmem:[%s11062_s0 + $0x4e8] sm:$0xff] }
 0x152   :  { %5604 = vmatmul.mubr.bf16.gmra.mrb[8].mxu0 %v6999_v41  ;;  %4455 = vmatprep.mubr.bf16.mxu1 %v7008_v42  ;;  %v7087_v41 = vcombine.low %v143_v29, %v151_v30  ;;  %v7095_v42 = vcombine.low %v147_v31, %v155_v32  ;;  %v263_v29 = vld [vmem:[%s11062_s0 + $0x7c8] sm:$0xff]  ;;  %v7183_v32 = vcombine.low %v239_v20, %v247_v21 }
 0x153   :  { %5611 = vmatprep.mubr.bf16.mxu0 %v7016_v43  ;;  %4697 = vmatpush1.bf16.msra.mxu1 %v8821_v44  ;;  %v7104_v43 = vcombine.high %v159_v37, %v167_v38  ;;  %v7112_v44 = vcombine.high %v163_v39, %v171_v40  ;;  %v259_v30 = vld [vmem:[%s11062_s0 + $0x7a8] sm:$0xff] }
 0x154   :  { %5853 = vmatpush1.bf16.msra.mxu0 %v8822_v45  ;;  %4698 = vmatprep.subr.bf16.mxu1 %v8877_v0  ;;  %v8837_v45 = vld [vmem:[%s11061_s1 + $0x160] sm:$0xff]   ;;  %v267_v31 = vld [vmem:[%s11062_s0 + $0x7e8] sm:$0xff] }
 0x155   :  { %5854 = vmatprep.subr.bf16.mxu0 %v8877_v0 }
 0x157   :  { %4699 = vmatpush1.bf16.msra.mxu1 %v8823_v48  ;;  %v183_v48 = vld [vmem:[%s11062_s0 + $0x548] sm:$0xff] }
 0x158   :  { %5855 = vmatpush1.bf16.msra.mxu0 %v8824_v51  ;;  %4700 = vmatprep.subr.bf16.mxu1 %v8877_v0  ;;  %v7103_v51 = vcombine.low %v159_v37, %v167_v38  ;;  %v7119_v59 = vcombine.low %v175_v47, %v183_v48  ;;  %v8844_v37 = vld [vmem:[%s11061_s1 + $0x378] sm:$0xff]   ;;  %v271_v38 = vld [vmem:[%s11062_s0 + $0x808] sm:$0xff] }
 0x159   :  { %4456 = vmatmul.mubr.bf16.gmra.mrb[12].mxu1 %v7007_v52  ;;  %5856 = vmatprep.subr.bf16.mxu0 %v8877_v0  ;;  %v7111_v52 = vcombine.low %v163_v39, %v171_v40  ;;  %v279_v39 = vld [vmem:[%s11062_s0 + $0x848] sm:$0xff] }
 0x15a   :  { %5612 = vmatmul.mubr.bf16.gmra.mrb[12].mxu0 %v7015_v53  ;;  %4463 = vmatprep.mubr.bf16.mxu1 %v7024_v54  ;;  %v7120_v53 = vcombine.high %v175_v47, %v183_v48  ;;  %v7128_v54 = vcombine.high %v179_v49, %v187_v50  ;;  %v275_v40 = vld [vmem:[%s11062_s0 + $0x828] sm:$0xff] }
 0x15b   :  { %5619 = vmatprep.mubr.bf16.mxu0 %v7032_v55  ;;  %4701 = vmatpush1.bf16.msra.mxu1 %v8825_v56  ;;  %v191_v55 = vld [vmem:[%s11062_s0 + $0x588] sm:$0xff] }
 0x15c   :  { %5857 = vmatpush1.bf16.msra.mxu0 %v8826_v57  ;;  %4702 = vmatprep.subr.bf16.mxu1 %v8877_v0  ;;  %v199_v56 = vld [vmem:[%s11062_s0 + $0x5c8] sm:$0xff] }
 0x15d   :  { %5858 = vmatprep.subr.bf16.mxu0 %v8877_v0  ;;  %v195_v57 = vld [vmem:[%s11062_s0 + $0x5a8] sm:$0xff]  ;;  %v7136_v61 = vcombine.high %v191_v55, %v199_v56 }
 0x15e   :  { %v7144_v62 = vcombine.high %v195_v57, %v203_v58  ;;  %v7143_v7 = vcombine.low %v195_v57, %v203_v58  ;;  %v295_v47 = vld [vmem:[%s11062_s0 + $0x8c8] sm:$0xff] }
 0x15f   :  { %4703 = vmatpush1.bf16.msra.mxu1 %v8827_v60  ;;  %v7127_v60 = vcombine.low %v179_v49, %v187_v50  ;;  %v291_v48 = vld [vmem:[%s11062_s0 + $0x8a8] sm:$0xff]  ;;  %v7215_v50 = vcombine.low %v271_v38, %v279_v39 }
 0x160   :  { %5859 = vmatpush1.bf16.msra.mxu0 %v8828_v63  ;;  %4704 = vmatprep.subr.bf16.mxu1 %v8877_v0  ;;  %v8839_v63 = vld [vmem:[%s11061_s1 + $0x168] sm:$0xff]  }
 0x161   :  { %4464 = vmatmul.mubr.bf16.gmra.mrb[16].mxu1 %v7023_v1  ;;  %5860 = vmatprep.subr.bf16.mxu0 %v8877_v0  ;;  %v8840_v1 = vld [vmem:[%s11061_s1 + $0x368] sm:$0xff]  }
 0x162   :  { %5620 = vmatmul.mubr.bf16.gmra.mrb[16].mxu0 %v7031_v2  ;;  %4471 = vmatprep.mubr.bf16.mxu1 %v7040_v3  ;;  %v207_v2 = vld [vmem:[%s11062_s0 + $0x608] sm:$0xff] }
 0x163   :  { %5627 = vmatprep.mubr.bf16.mxu0 %v7048_v4  ;;  %4705 = vmatpush1.bf16.msra.mxu1 %v8829_v5  ;;  %v215_v3 = vld [vmem:[%s11062_s0 + $0x648] sm:$0xff] }
 0x164   :  { %5861 = vmatpush1.bf16.msra.mxu0 %v8830_v6  ;;  %4706 = vmatprep.subr.bf16.mxu1 %v8877_v0  ;;  %v211_v4 = vld [vmem:[%s11062_s0 + $0x628] sm:$0xff]  ;;  %v7135_v6 = vcombine.low %v191_v55, %v199_v56  ;;  %v7152_v8 = vcombine.high %v207_v2, %v215_v3 }
 0x165   :  { %5862 = vmatprep.subr.bf16.mxu0 %v8877_v0  ;;  %v219_v5 = vld [vmem:[%s11062_s0 + $0x668] sm:$0xff] }
 0x166   :  { %v299_v49 = vld [vmem:[%s11062_s0 + $0x8e8] sm:$0xff] }
 0x167   :  { %4707 = vmatpush1.bf16.msra.mxu1 %v8831_v9  ;;  %v7160_v9 = vcombine.high %v211_v4, %v219_v5  ;;  %v311_v55 = vld [vmem:[%s11062_s0 + $0x948] sm:$0xff] }
 0x168   :  { %5863 = vmatpush1.bf16.msra.mxu0 %v8832_v12  ;;  %4708 = vmatprep.subr.bf16.mxu1 %v8877_v0  ;;  %v227_v12 = vld [vmem:[%s11062_s0 + $0x6a8] sm:$0xff] }
 0x169   :  { %4472 = vmatmul.mubr.bf16.gmra.mrb[20].mxu1 %v7039_v13  ;;  %5864 = vmatprep.subr.bf16.mxu0 %v8877_v0  ;;  %v235_v13 = vld [vmem:[%s11062_s0 + $0x6e8] sm:$0xff] }
 0x16a   :  { %5628 = vmatmul.mubr.bf16.gmra.mrb[20].mxu0 %v7047_v14  ;;  %4479 = vmatprep.mubr.bf16.mxu1 %v7056_v15  ;;  %v7151_v14 = vcombine.low %v207_v2, %v215_v3  ;;  %v7159_v15 = vcombine.low %v211_v4, %v219_v5  ;;  %v307_v56 = vld [vmem:[%s11062_s0 + $0x928] sm:$0xff] }
 0x16b   :  { %5635 = vmatprep.mubr.bf16.mxu0 %v7064_v16  ;;  %4709 = vmatpush1.bf16.msra.mxu1 %v8833_v17  ;;  %v7168_v16 = vcombine.high %v223_v10, %v231_v11  ;;  %v7176_v17 = vcombine.high %v227_v12, %v235_v13  ;;  %v315_v57 = vld [vmem:[%s11062_s0 + $0x968] sm:$0xff] }
 0x16c   :  { %5865 = vmatpush1.bf16.msra.mxu0 %v8834_v18  ;;  %4710 = vmatprep.subr.bf16.mxu1 %v8877_v0  ;;  %v8841_v18 = vld [vmem:[%s11061_s1 + $0x170] sm:$0xff]   ;;  %v331_v2 = vld [vmem:[%s11062_s0 + $0x9e8] sm:$0xff]  ;;  %v7255_v4 = vcombine.low %v307_v56, %v315_v57 }
 0x16d   :  { %5866 = vmatprep.subr.bf16.mxu0 %v8877_v0 }
 0x16f   :  { %4711 = vmatpush1.bf16.msra.mxu1 %v8835_v27 }
 0x170   :  { %5867 = vmatpush1.bf16.msra.mxu0 %v8836_v28  ;;  %4712 = vmatprep.subr.bf16.mxu1 %v8877_v0  ;;  %v255_v28 = vld [vmem:[%s11062_s0 + $0x788] sm:$0xff] }
 0x171   :  { %4480 = vmatmul.mubr.bf16.gmra.mrb[24].mxu1 %v7055_v23  ;;  %5868 = vmatprep.subr.bf16.mxu0 %v8877_v0  ;;  %v251_v23 = vld [vmem:[%s11062_s0 + $0x768] sm:$0xff] }
 0x172   :  { %5636 = vmatmul.mubr.bf16.gmra.mrb[24].mxu0 %v7063_v24  ;;  %4487 = vmatprep.mubr.bf16.mxu1 %v7072_v25  ;;  %v7167_v24 = vcombine.low %v223_v10, %v231_v11  ;;  %v7175_v25 = vcombine.low %v227_v12, %v235_v13  ;;  %v7192_v27 = vcombine.high %v243_v22, %v251_v23  ;;  %v347_v10 = vld [vmem:[%s11062_s0 + $0xa68] sm:$0xff] }
 0x173   :  { %5643 = vmatprep.mubr.bf16.mxu0 %v7080_v26  ;;  %4713 = vmatpush1.bf16.msra.mxu1 %v8837_v45  ;;  %v7184_v26 = vcombine.high %v239_v20, %v247_v21 }
 0x174   :  { %5869 = vmatpush1.bf16.msra.mxu0 %v8838_v46  ;;  %4714 = vmatprep.subr.bf16.mxu1 %v8877_v0  ;;  %v287_v46 = vld [vmem:[%s11062_s0 + $0x888] sm:$0xff] }
 0x175   :  { %5870 = vmatprep.subr.bf16.mxu0 %v8877_v0  ;;  %v7231_v58 = vcombine.low %v287_v46, %v295_v47 }
 0x177   :  { %4715 = vmatpush1.bf16.msra.mxu1 %v8839_v63  ;;  %v327_v63 = vld [vmem:[%s11062_s0 + $0x9c8] sm:$0xff] }
 0x178   :  { %5871 = vmatpush1.bf16.msra.mxu0 %v8840_v1  ;;  %4716 = vmatprep.subr.bf16.mxu1 %v8877_v0  ;;  %v323_v1 = vld [vmem:[%s11062_s0 + $0x9a8] sm:$0xff] }
 0x179   :  { %4488 = vmatmul.mubr.bf16.gmra.mrb[28].mxu1 %v7071_v33  ;;  %5872 = vmatprep.subr.bf16.mxu0 %v8877_v0  ;;  %v7191_v33 = vcombine.low %v243_v22, %v251_v23  ;;  %v7271_v12 = vcombine.low %v323_v1, %v331_v2  ;;  %v367_v23 = vld [vmem:[%s11062_s0 + $0xb08] sm:$0xff] }
 0x17a   :  { %5644 = vmatmul.mubr.bf16.gmra.mrb[28].mxu0 %v7079_v34  ;;  %4495 = vmatprep.mubr.bf16.mxu1 %v7088_v35  ;;  %v7200_v34 = vcombine.high %v255_v28, %v263_v29  ;;  %v7208_v35 = vcombine.high %v259_v30, %v267_v31 }
 0x17b   :  { %5651 = vmatprep.mubr.bf16.mxu0 %v7096_v36  ;;  %4717 = vmatpush1.bf16.msra.mxu1 %v8841_v18  ;;  %v8843_v36 = vld [vmem:[%s11061_s1 + $0x178] sm:$0xff]   ;;  %v363_v18 = vld [vmem:[%s11062_s0 + $0xae8] sm:$0xff] }
 0x17c   :  { %5873 = vmatpush1.bf16.msra.mxu0 %v8842_v19  ;;  %4718 = vmatprep.subr.bf16.mxu1 %v8877_v0 }
 0x17d   :  { %5874 = vmatprep.subr.bf16.mxu0 %v8877_v0 }
 0x17f   :  { %4719 = vmatpush1.bf16.msra.mxu1 %v8843_v36 }
 0x180   :  { %5875 = vmatpush1.bf16.msra.mxu0 %v8844_v37  ;;  %4977 = vmatprep.subr.bf16.mxu1 %v8877_v0 }
 0x181   :  { %4496 = vmatmul.mubr.bf16.gmra.mrb[32].mxu1 %v7087_v41  ;;  %v283_v41 = vld [vmem:[%s11062_s0 + $0x868] sm:$0xff]  ;;  %6133 = vmatprep.subr.bf16.mxu0 %v8877_v0 }
 0x182   :  { %5652 = vmatmul.mubr.bf16.gmra.mrb[32].mxu0 %v7095_v42  ;;  %4503 = vmatprep.mubr.bf16.mxu1 %v7104_v43  ;;  %v7199_v42 = vcombine.low %v255_v28, %v263_v29  ;;  %v7207_v43 = vcombine.low %v259_v30, %v267_v31  ;;  %v7224_v45 = vcombine.high %v275_v40, %v283_v41  ;;  %v383_v31 = vld [vmem:[%s11062_s0 + $0xb88] sm:$0xff] }
 0x183   :  { %5659 = vmatprep.mubr.bf16.mxu0 %v7112_v44  ;;  %v7216_v44 = vcombine.high %v271_v38, %v279_v39  ;;  %v399_v39 = vld [vmem:[%s11062_s0 + $0xc08] sm:$0xff] }
 0x189   :  { %4504 = vmatmul.mubr.bf16.gmra.mrb[36].mxu1 %v7103_v51  ;;  %v7223_v51 = vcombine.low %v275_v40, %v283_v41  ;;  %v407_v40 = vld [vmem:[%s11062_s0 + $0xc48] sm:$0xff] }
 0x18a   :  { %5660 = vmatmul.mubr.bf16.gmra.mrb[36].mxu0 %v7111_v52  ;;  %4511 = vmatprep.mubr.bf16.mxu1 %v7120_v53  ;;  %v7232_v52 = vcombine.high %v287_v46, %v295_v47  ;;  %v7240_v53 = vcombine.high %v291_v48, %v299_v49  ;;  %v403_v41 = vld [vmem:[%s11062_s0 + $0xc28] sm:$0xff] }
 0x18b   :  { %5667 = vmatprep.mubr.bf16.mxu0 %v7128_v54  ;;  %v303_v54 = vld [vmem:[%s11062_s0 + $0x908] sm:$0xff] }
 0x18c   :  { %v7247_v3 = vcombine.low %v303_v54, %v311_v55  ;;  %v415_v47 = vld [vmem:[%s11062_s0 + $0xc88] sm:$0xff] }
 0x191   :  { %4512 = vmatmul.mubr.bf16.gmra.mrb[40].mxu1 %v7119_v59  ;;  %v7239_v59 = vcombine.low %v291_v48, %v299_v49  ;;  %v423_v48 = vld [vmem:[%s11062_s0 + $0xcc8] sm:$0xff] }
 0x192   :  { %5668 = vmatmul.mubr.bf16.gmra.mrb[40].mxu0 %v7127_v60  ;;  %4519 = vmatprep.mubr.bf16.mxu1 %v7136_v61  ;;  %v7248_v60 = vcombine.high %v303_v54, %v311_v55  ;;  %v7256_v61 = vcombine.high %v307_v56, %v315_v57  ;;  %v419_v49 = vld [vmem:[%s11062_s0 + $0xca8] sm:$0xff] }
 0x193   :  { %5675 = vmatprep.mubr.bf16.mxu0 %v7144_v62  ;;  %v319_v62 = vld [vmem:[%s11062_s0 + $0x988] sm:$0xff] }
 0x194   :  { %v7264_v5 = vcombine.high %v319_v62, %v327_v63  ;;  %v7263_v11 = vcombine.low %v319_v62, %v327_v63  ;;  %v431_v55 = vld [vmem:[%s11062_s0 + $0xd08] sm:$0xff] }
 0x195   :  { %v439_v56 = vld [vmem:[%s11062_s0 + $0xd48] sm:$0xff] }
 0x196   :  { %v435_v57 = vld [vmem:[%s11062_s0 + $0xd28] sm:$0xff] }
 0x197   :  { %v447_v63 = vld [vmem:[%s11062_s0 + $0xd88] sm:$0xff] }
 0x199   :  { %4520 = vmatmul.mubr.bf16.gmra.mrb[44].mxu1 %v7135_v6  ;;  %v7272_v6 = vcombine.high %v323_v1, %v331_v2  ;;  %v455_v1 = vld [vmem:[%s11062_s0 + $0xdc8] sm:$0xff] }
 0x19a   :  { %5676 = vmatmul.mubr.bf16.gmra.mrb[44].mxu0 %v7143_v7  ;;  %4527 = vmatprep.mubr.bf16.mxu1 %v7152_v8  ;;  %v335_v7 = vld [vmem:[%s11062_s0 + $0xa08] sm:$0xff] }
 0x19b   :  { %5683 = vmatprep.mubr.bf16.mxu0 %v7160_v9  ;;  %v343_v8 = vld [vmem:[%s11062_s0 + $0xa48] sm:$0xff] }
 0x19c   :  { %v339_v9 = vld [vmem:[%s11062_s0 + $0xa28] sm:$0xff]  ;;  %v7280_v13 = vcombine.high %v335_v7, %v343_v8  ;;  %v7279_v19 = vcombine.low %v335_v7, %v343_v8 }
 0x19d   :  { %v7287_v20 = vcombine.low %v339_v9, %v347_v10  ;;  %v451_v2 = vld [vmem:[%s11062_s0 + $0xda8] sm:$0xff] }
 0x19e   :  { %v463_v8 = vld [vmem:[%s11062_s0 + $0xe08] sm:$0xff] }
 0x1a1   :  { %4528 = vmatmul.mubr.bf16.gmra.mrb[48].mxu1 %v7151_v14  ;;  %v7288_v14 = vcombine.high %v339_v9, %v347_v10  ;;  %v471_v9 = vld [vmem:[%s11062_s0 + $0xe48] sm:$0xff] }
 0x1a2   :  { %5684 = vmatmul.mubr.bf16.gmra.mrb[48].mxu0 %v7159_v15  ;;  %4535 = vmatprep.mubr.bf16.mxu1 %v7168_v16  ;;  %v351_v15 = vld [vmem:[%s11062_s0 + $0xa88] sm:$0xff] }
 0x1a3   :  { %5691 = vmatprep.mubr.bf16.mxu0 %v7176_v17  ;;  %v359_v16 = vld [vmem:[%s11062_s0 + $0xac8] sm:$0xff] }
 0x1a4   :  { %v355_v17 = vld [vmem:[%s11062_s0 + $0xaa8] sm:$0xff]  ;;  %v7296_v21 = vcombine.high %v351_v15, %v359_v16 }
 0x1a5   :  { %v7304_v22 = vcombine.high %v355_v17, %v363_v18  ;;  %v7303_v28 = vcombine.low %v355_v17, %v363_v18  ;;  %v467_v10 = vld [vmem:[%s11062_s0 + $0xe28] sm:$0xff] }
 0x1a6   :  { %v487_v17 = vld [vmem:[%s11062_s0 + $0xec8] sm:$0xff] }
 0x1a7   :  { %v483_v18 = vld [vmem:[%s11062_s0 + $0xea8] sm:$0xff] }
 0x1a9   :  { %4536 = vmatmul.mubr.bf16.gmra.mrb[52].mxu1 %v7167_v24  ;;  %v375_v24 = vld [vmem:[%s11062_s0 + $0xb48] sm:$0xff] }
 0x1aa   :  { %5692 = vmatmul.mubr.bf16.gmra.mrb[52].mxu0 %v7175_v25  ;;  %4543 = vmatprep.mubr.bf16.mxu1 %v7184_v26  ;;  %v371_v25 = vld [vmem:[%s11062_s0 + $0xb28] sm:$0xff]  ;;  %v7312_v29 = vcombine.high %v367_v23, %v375_v24 }
 0x1ab   :  { %5699 = vmatprep.mubr.bf16.mxu0 %v7192_v27  ;;  %v379_v26 = vld [vmem:[%s11062_s0 + $0xb68] sm:$0xff]  ;;  %v7295_v27 = vcombine.low %v351_v15, %v359_v16 }
 0x1ac   :  { %v7320_v30 = vcombine.high %v371_v25, %v379_v26  ;;  %v7319_v36 = vcombine.low %v371_v25, %v379_v26  ;;  %v479_v16 = vld [vmem:[%s11062_s0 + $0xe88] sm:$0xff] }
 0x1ad   :  { %v503_v25 = vld [vmem:[%s11062_s0 + $0xf48] sm:$0xff] }
 0x1ae   :  { %v499_v26 = vld [vmem:[%s11062_s0 + $0xf28] sm:$0xff] }
 0x1b1   :  { %4544 = vmatmul.mubr.bf16.gmra.mrb[56].mxu1 %v7183_v32  ;;  %v391_v32 = vld [vmem:[%s11062_s0 + $0xbc8] sm:$0xff] }
 0x1b2   :  { %5700 = vmatmul.mubr.bf16.gmra.mrb[56].mxu0 %v7191_v33  ;;  %4551 = vmatprep.mubr.bf16.mxu1 %v7200_v34  ;;  %v387_v33 = vld [vmem:[%s11062_s0 + $0xba8] sm:$0xff]  ;;  %v7328_v37 = vcombine.high %v383_v31, %v391_v32 }
 0x1b3   :  { %5707 = vmatprep.mubr.bf16.mxu0 %v7208_v35  ;;  %v395_v34 = vld [vmem:[%s11062_s0 + $0xbe8] sm:$0xff]  ;;  %v7311_v35 = vcombine.low %v367_v23, %v375_v24 }
 0x1b4   :  { %v7336_v38 = vcombine.high %v387_v33, %v395_v34  ;;  %v495_v24 = vld [vmem:[%s11062_s0 + $0xf08] sm:$0xff] }
 0x1b9   :  { %4552 = vmatmul.mubr.bf16.gmra.mrb[60].mxu1 %v7199_v42  ;;  %v411_v42 = vld [vmem:[%s11062_s0 + $0xc68] sm:$0xff] }
 0x1ba   :  { %5708 = vmatmul.mubr.bf16.gmra.mrb[60].mxu0 %v7207_v43  ;;  %4559 = vmatprep.mubr.bf16.mxu1 %v7216_v44  ;;  %v7327_v43 = vcombine.low %v383_v31, %v391_v32  ;;  %v7335_v44 = vcombine.low %v387_v33, %v395_v34  ;;  %v7352_v46 = vcombine.high %v403_v41, %v411_v42  ;;  %v511_v32 = vld [vmem:[%s11062_s0 + $0xf88] sm:$0xff] }
 0x1bb   :  { %5715 = vmatprep.mubr.bf16.mxu0 %v7224_v45  ;;  %v7344_v45 = vcombine.high %v399_v39, %v407_v40  ;;  %v519_v33 = vld [vmem:[%s11062_s0 + $0xfc8] sm:$0xff] }
 0x1bc   :  { %v515_v34 = vld [vmem:[%s11062_s0 + $0xfa8] sm:$0xff] }
 0x1c1   :  { %4560 = vmatmul.mubr.bf16.gmra.mrb[64].mxu1 %v7215_v50  ;;  %v427_v50 = vld [vmem:[%s11062_s0 + $0xce8] sm:$0xff] }
 0x1c2   :  { %5716 = vmatmul.mubr.bf16.gmra.mrb[64].mxu0 %v7223_v51  ;;  %4567 = vmatprep.mubr.bf16.mxu1 %v7232_v52  ;;  %v7343_v51 = vcombine.low %v399_v39, %v407_v40  ;;  %v7351_v52 = vcombine.low %v403_v41, %v411_v42  ;;  %v7368_v54 = vcombine.high %v419_v49, %v427_v50  ;;  %v16_v40 = vld [vmem:[%s11062_s0 + $0x10] sm:$0xff] }
 0x1c3   :  { %5723 = vmatprep.mubr.bf16.mxu0 %v7240_v53  ;;  %v7360_v53 = vcombine.high %v415_v47, %v423_v48  ;;  %v24_v41 = vld [vmem:[%s11062_s0 + $0x50] sm:$0xff] }
 0x1c4   :  { %v20_v42 = vld [vmem:[%s11062_s0 + $0x30] sm:$0xff] }
 0x1c9   :  { %4568 = vmatmul.mubr.bf16.gmra.mrb[68].mxu1 %v7231_v58  ;;  %v443_v58 = vld [vmem:[%s11062_s0 + $0xd68] sm:$0xff] }
 0x1ca   :  { %5724 = vmatmul.mubr.bf16.gmra.mrb[68].mxu0 %v7239_v59  ;;  %4575 = vmatprep.mubr.bf16.mxu1 %v7248_v60  ;;  %v7359_v59 = vcombine.low %v415_v47, %v423_v48  ;;  %v7367_v60 = vcombine.low %v419_v49, %v427_v50  ;;  %v7384_v62 = vcombine.high %v435_v57, %v443_v58  ;;  %v32_v48 = vld [vmem:[%s11062_s0 + $0x90] sm:$0xff] }
 0x1cb   :  { %5731 = vmatprep.mubr.bf16.mxu0 %v7256_v61  ;;  %v7376_v61 = vcombine.high %v431_v55, %v439_v56  ;;  %v40_v49 = vld [vmem:[%s11062_s0 + $0xd0] sm:$0xff]  ;;  %v6961_v50 = vcombine.low %v16_v40, %v24_v41 }
 0x1d1   :  { %4576 = vmatmul.mubr.bf16.gmra.mrb[72].mxu1 %v7247_v3  ;;  %v459_v3 = vld [vmem:[%s11062_s0 + $0xde8] sm:$0xff] }
 0x1d2   :  { %5732 = vmatmul.mubr.bf16.gmra.mrb[72].mxu0 %v7255_v4  ;;  %4583 = vmatprep.mubr.bf16.mxu1 %v7264_v5  ;;  %v7375_v4 = vcombine.low %v431_v55, %v439_v56  ;;  %v7383_v5 = vcombine.low %v435_v57, %v443_v58  ;;  %v7400_v7 = vcombine.high %v451_v2, %v459_v3  ;;  %v8846_v55 = vld [vmem:[%s11061_s1 + $0x380] sm:$0xff]   ;;  %v8847_v58 = vld [vmem:[%s11061_s1 + $0x188] sm:$0xff]  }
 0x1d3   :  { %5739 = vmatprep.mubr.bf16.mxu0 %v7272_v6  ;;  %v7392_v6 = vcombine.high %v447_v63, %v455_v1  ;;  %v6978_v56 = vcombine.high %v32_v48, %v40_v49 }
 0x1d9   :  { %4584 = vmatmul.mubr.bf16.gmra.mrb[76].mxu1 %v7263_v11  ;;  %v475_v11 = vld [vmem:[%s11062_s0 + $0xe68] sm:$0xff] }
 0x1da   :  { %5740 = vmatmul.mubr.bf16.gmra.mrb[76].mxu0 %v7271_v12  ;;  %4591 = vmatprep.mubr.bf16.mxu1 %v7280_v13  ;;  %v7391_v12 = vcombine.low %v447_v63, %v455_v1  ;;  %v7399_v13 = vcombine.low %v451_v2, %v459_v3  ;;  %v7416_v15 = vcombine.high %v467_v10, %v475_v11  ;;  %v60_v63 = vld [vmem:[%s11062_s0 + $0x170] sm:$0xff] }
 0x1db   :  { %5747 = vmatprep.mubr.bf16.mxu0 %v7288_v14  ;;  %v7408_v14 = vcombine.high %v463_v8, %v471_v9  ;;  %v6977_v1 = vcombine.low %v32_v48, %v40_v49  ;;  %v8864_v48 = vld [vmem:[%s11061_s1 + $0x3c8] sm:$0xff]  }
 0x1e1   :  { %4592 = vmatmul.mubr.bf16.gmra.mrb[80].mxu1 %v7279_v19  ;;  %v491_v19 = vld [vmem:[%s11062_s0 + $0xee8] sm:$0xff] }
 0x1e2   :  { %5748 = vmatmul.mubr.bf16.gmra.mrb[80].mxu0 %v7287_v20  ;;  %4599 = vmatprep.mubr.bf16.mxu1 %v7296_v21  ;;  %v7407_v20 = vcombine.low %v463_v8, %v471_v9  ;;  %v7415_v21 = vcombine.low %v467_v10, %v475_v11  ;;  %v7432_v23 = vcombine.high %v483_v18, %v491_v19  ;;  %v72_v8 = vld [vmem:[%s11062_s0 + $0x1d0] sm:$0xff]  ;;  %v8851_v9 = vld [vmem:[%s11061_s1 + $0x198] sm:$0xff]  }
 0x1e3   :  { %5755 = vmatprep.mubr.bf16.mxu0 %v7304_v22  ;;  %v7424_v22 = vcombine.high %v479_v16, %v487_v17  ;;  %v68_v10 = vld [vmem:[%s11062_s0 + $0x1b0] sm:$0xff] }
 0x1e4   :  { %v76_v11 = vld [vmem:[%s11062_s0 + $0x1f0] sm:$0xff] }
 0x1e9   :  { %4600 = vmatmul.mubr.bf16.gmra.mrb[84].mxu1 %v7295_v27  ;;  %v507_v27 = vld [vmem:[%s11062_s0 + $0xf68] sm:$0xff] }
 0x1ea   :  { %5756 = vmatmul.mubr.bf16.gmra.mrb[84].mxu0 %v7303_v28  ;;  %4607 = vmatprep.mubr.bf16.mxu1 %v7312_v29  ;;  %v7423_v28 = vcombine.low %v479_v16, %v487_v17  ;;  %v7431_v29 = vcombine.low %v483_v18, %v491_v19  ;;  %v7448_v31 = vcombine.high %v499_v26, %v507_v27  ;;  %v8853_v17 = vld [vmem:[%s11061_s1 + $0x1a0] sm:$0xff]   ;;  %v80_v19 = vld [vmem:[%s11062_s0 + $0x210] sm:$0xff] }
 0x1eb   :  { %5763 = vmatprep.mubr.bf16.mxu0 %v7320_v30  ;;  %v7440_v30 = vcombine.high %v495_v24, %v503_v25  ;;  %v7018_v16 = vcombine.high %v68_v10, %v76_v11  ;;  %v8854_v18 = vld [vmem:[%s11061_s1 + $0x3a0] sm:$0xff]  }
 0x1f1   :  { %4608 = vmatmul.mubr.bf16.gmra.mrb[88].mxu1 %v7311_v35  ;;  %v523_v35 = vld [vmem:[%s11062_s0 + $0xfe8] sm:$0xff] }
 0x1f2   :  { %5764 = vmatmul.mubr.bf16.gmra.mrb[88].mxu0 %v7319_v36  ;;  %4615 = vmatprep.mubr.bf16.mxu1 %v7328_v37  ;;  %v7439_v36 = vcombine.low %v495_v24, %v503_v25  ;;  %v7447_v37 = vcombine.low %v499_v26, %v507_v27  ;;  %v7464_v39 = vcombine.high %v515_v34, %v523_v35  ;;  %v8856_v24 = vld [vmem:[%s11061_s1 + $0x3a8] sm:$0xff]  }
 0x1f3   :  { %5771 = vmatprep.mubr.bf16.mxu0 %v7336_v38  ;;  %v7456_v38 = vcombine.high %v511_v32, %v519_v33  ;;  %v7017_v26 = vcombine.low %v68_v10, %v76_v11  ;;  %v160_v10 = vld [vmem:[%s11062_s0 + $0x490] sm:$0xff] }
 0x1f4   :  { %v168_v11 = vld [vmem:[%s11062_s0 + $0x4d0] sm:$0xff] }
 0x1f9   :  { %4616 = vmatmul.mubr.bf16.gmra.mrb[92].mxu1 %v7327_v43  ;;  %v28_v43 = vld [vmem:[%s11062_s0 + $0x70] sm:$0xff] }
 0x1fa   :  { %5772 = vmatmul.mubr.bf16.gmra.mrb[92].mxu0 %v7335_v44  ;;  %4623 = vmatprep.mubr.bf16.mxu1 %v7344_v45  ;;  %v7455_v44 = vcombine.low %v511_v32, %v519_v33  ;;  %v7463_v45 = vcombine.low %v515_v34, %v523_v35  ;;  %v6970_v47 = vcombine.high %v20_v42, %v28_v43  ;;  %v104_v32 = vld [vmem:[%s11062_s0 + $0x2d0] sm:$0xff]  ;;  %v8859_v33 = vld [vmem:[%s11061_s1 + $0x1b8] sm:$0xff]  }
 0x1fb   :  { %5779 = vmatprep.mubr.bf16.mxu0 %v7352_v46  ;;  %v6962_v46 = vcombine.high %v16_v40, %v24_v41  ;;  %v100_v34 = vld [vmem:[%s11062_s0 + $0x2b0] sm:$0xff]  ;;  %v8861_v41 = vld [vmem:[%s11061_s1 + $0x1c0] sm:$0xff]  }
 0x1fc   :  { %v108_v35 = vld [vmem:[%s11062_s0 + $0x2f0] sm:$0xff] }
 0x1fd   :  { %v7050_v40 = vcombine.high %v100_v34, %v108_v35 }
 0x201   :  { %4624 = vmatmul.mubr.bf16.gmra.mrb[96].mxu1 %v7343_v51  ;;  %v36_v51 = vld [vmem:[%s11062_s0 + $0xb0] sm:$0xff] }
 0x202   :  { %5780 = vmatmul.mubr.bf16.gmra.mrb[96].mxu0 %v7351_v52  ;;  %4631 = vmatprep.mubr.bf16.mxu1 %v7360_v53  ;;  %v44_v52 = vld [vmem:[%s11062_s0 + $0xf0] sm:$0xff]  ;;  %v6969_v53 = vcombine.low %v20_v42, %v28_v43  ;;  %v8862_v42 = vld [vmem:[%s11061_s1 + $0x3c0] sm:$0xff]  }
 0x203   :  { %5787 = vmatprep.mubr.bf16.mxu0 %v7368_v54  ;;  %v8845_v54 = vld [vmem:[%s11061_s1 + $0x180] sm:$0xff]   ;;  %v6986_v57 = vcombine.high %v36_v51, %v44_v52  ;;  %v6985_v2 = vcombine.low %v36_v51, %v44_v52  ;;  %v112_v43 = vld [vmem:[%s11062_s0 + $0x310] sm:$0xff] }
 0x209   :  { %4632 = vmatmul.mubr.bf16.gmra.mrb[100].mxu1 %v7359_v59  ;;  %v48_v59 = vld [vmem:[%s11062_s0 + $0x110] sm:$0xff] }
 0x20a   :  { %5788 = vmatmul.mubr.bf16.gmra.mrb[100].mxu0 %v7367_v60  ;;  %4639 = vmatprep.mubr.bf16.mxu1 %v7376_v61  ;;  %v56_v60 = vld [vmem:[%s11062_s0 + $0x150] sm:$0xff]  ;;  %v8848_v61 = vld [vmem:[%s11061_s1 + $0x388] sm:$0xff]  }
 0x20b   :  { %5795 = vmatprep.mubr.bf16.mxu0 %v7384_v62  ;;  %v52_v62 = vld [vmem:[%s11062_s0 + $0x130] sm:$0xff]  ;;  %v6994_v3 = vcombine.high %v48_v59, %v56_v60 }
 0x211   :  { %4640 = vmatmul.mubr.bf16.gmra.mrb[104].mxu1 %v7375_v4  ;;  %v7002_v4 = vcombine.high %v52_v62, %v60_v63 }
 0x212   :  { %5796 = vmatmul.mubr.bf16.gmra.mrb[104].mxu0 %v7383_v5  ;;  %4647 = vmatprep.mubr.bf16.mxu1 %v7392_v6  ;;  %v8849_v5 = vld [vmem:[%s11061_s1 + $0x190] sm:$0xff]  }
 0x213   :  { %5803 = vmatprep.mubr.bf16.mxu0 %v7400_v7  ;;  %v8850_v6 = vld [vmem:[%s11061_s1 + $0x390] sm:$0xff]  }
 0x214   :  { %v64_v7 = vld [vmem:[%s11062_s0 + $0x190] sm:$0xff] }
 0x215   :  { %v7009_v25 = vcombine.low %v64_v7, %v72_v8 }
 0x219   :  { %4648 = vmatmul.mubr.bf16.gmra.mrb[108].mxu1 %v7391_v12  ;;  %v8852_v12 = vld [vmem:[%s11061_s1 + $0x398] sm:$0xff]  }
 0x21a   :  { %5804 = vmatmul.mubr.bf16.gmra.mrb[108].mxu0 %v7399_v13  ;;  %4655 = vmatprep.mubr.bf16.mxu1 %v7408_v14  ;;  %v6993_v13 = vcombine.low %v48_v59, %v56_v60  ;;  %v7001_v14 = vcombine.low %v52_v62, %v60_v63  ;;  %v8867_v63 = vld [vmem:[%s11061_s1 + $0x1d8] sm:$0xff]  }
 0x21b   :  { %5811 = vmatprep.mubr.bf16.mxu0 %v7416_v15  ;;  %v7010_v15 = vcombine.high %v64_v7, %v72_v8 }
 0x221   :  { %4656 = vmatmul.mubr.bf16.gmra.mrb[112].mxu1 %v7407_v20  ;;  %v88_v20 = vld [vmem:[%s11062_s0 + $0x250] sm:$0xff] }
 0x222   :  { %5812 = vmatmul.mubr.bf16.gmra.mrb[112].mxu0 %v7415_v21  ;;  %4663 = vmatprep.mubr.bf16.mxu1 %v7424_v22  ;;  %v8855_v21 = vld [vmem:[%s11061_s1 + $0x1a8] sm:$0xff]   ;;  %v84_v22 = vld [vmem:[%s11062_s0 + $0x230] sm:$0xff]  ;;  %v7026_v27 = vcombine.high %v80_v19, %v88_v20 }
 0x223   :  { %5819 = vmatprep.mubr.bf16.mxu0 %v7432_v23  ;;  %v92_v23 = vld [vmem:[%s11062_s0 + $0x270] sm:$0xff] }
 0x229   :  { %4664 = vmatmul.mubr.bf16.gmra.mrb[116].mxu1 %v7423_v28  ;;  %v7034_v28 = vcombine.high %v84_v22, %v92_v23 }
 0x22a   :  { %5820 = vmatmul.mubr.bf16.gmra.mrb[116].mxu0 %v7431_v29  ;;  %4671 = vmatprep.mubr.bf16.mxu1 %v7440_v30  ;;  %v8857_v29 = vld [vmem:[%s11061_s1 + $0x1b0] sm:$0xff]  }
 0x22b   :  { %5827 = vmatprep.mubr.bf16.mxu0 %v7448_v31  ;;  %v8858_v30 = vld [vmem:[%s11061_s1 + $0x3b0] sm:$0xff]  }
 0x22c   :  { %v96_v31 = vld [vmem:[%s11062_s0 + $0x290] sm:$0xff] }
 0x22d   :  { %v7041_v49 = vcombine.low %v96_v31, %v104_v32 }
 0x231   :  { %4672 = vmatmul.mubr.bf16.gmra.mrb[120].mxu1 %v7439_v36  ;;  %v8860_v36 = vld [vmem:[%s11061_s1 + $0x3b8] sm:$0xff]  }
 0x232   :  { %5828 = vmatmul.mubr.bf16.gmra.mrb[120].mxu0 %v7447_v37  ;;  %4679 = vmatprep.mubr.bf16.mxu1 %v7456_v38  ;;  %v7025_v37 = vcombine.low %v80_v19, %v88_v20  ;;  %v7033_v38 = vcombine.low %v84_v22, %v92_v23  ;;  %v8870_v19 = vld [vmem:[%s11061_s1 + $0x3e0] sm:$0xff]   ;;  %v176_v20 = vld [vmem:[%s11062_s0 + $0x510] sm:$0xff] }
 0x233   :  { %5835 = vmatprep.mubr.bf16.mxu0 %v7464_v39  ;;  %v7042_v39 = vcombine.high %v96_v31, %v104_v32  ;;  %v180_v22 = vld [vmem:[%s11062_s0 + $0x530] sm:$0xff] }
 0x234   :  { %v188_v23 = vld [vmem:[%s11062_s0 + $0x570] sm:$0xff] }
 0x235   :  { %v204_v31 = vld [vmem:[%s11062_s0 + $0x5f0] sm:$0xff] }
 0x239   :  { %4680 = vmatmul.mubr.bf16.gmra.mrb[124].mxu1 %v7455_v44  ;;  %v120_v44 = vld [vmem:[%s11062_s0 + $0x350] sm:$0xff] }
 0x23a   :  { %5836 = vmatmul.mubr.bf16.gmra.mrb[124].mxu0 %v7463_v45  ;;  %4720 = vmatprep.mubr.bf16.mxu1 %v6962_v46  ;;  %v8863_v45 = vld [vmem:[%s11061_s1 + $0x1c8] sm:$0xff]   ;;  %v116_v46 = vld [vmem:[%s11062_s0 + $0x330] sm:$0xff]  ;;  %v7058_v51 = vcombine.high %v112_v43, %v120_v44  ;;  %v7057_v59 = vcombine.low %v112_v43, %v120_v44 }
 0x23b   :  { %5876 = vmatprep.mubr.bf16.mxu0 %v6970_v47  ;;  %v124_v47 = vld [vmem:[%s11062_s0 + $0x370] sm:$0xff] }
 0x23c   :  { %v7066_v52 = vcombine.high %v116_v46, %v124_v47  ;;  %v7065_v60 = vcombine.low %v116_v46, %v124_v47  ;;  %v224_v46 = vld [vmem:[%s11062_s0 + $0x690] sm:$0xff] }
 0x23d   :  { %v232_v47 = vld [vmem:[%s11062_s0 + $0x6d0] sm:$0xff] }
 0x241   :  { %4721 = vmatmul.mubr.bf16.vlgmr.msra.gmra.mrb[0].mxu1 %v6961_v50  ;;  %v7049_v50 = vcombine.low %v100_v34, %v108_v35 }
 0x242   :  { %5877 = vmatmul.mubr.bf16.vlgmr.msra.gmra.mrb[0].mxu0 %v6969_v53  ;;  %4978 = vmatpush1.bf16.msra.mxu1 %v8845_v54  ;;  %v8865_v53 = vld [vmem:[%s11061_s1 + $0x1d0] sm:$0xff]  }
 0x243   :  { %6134 = vmatpush1.bf16.msra.mxu0 %v8846_v55  ;;  %4728 = vmatprep.mubr.bf16.mxu1 %v6978_v56  ;;  %v8866_v54 = vld [vmem:[%s11061_s1 + $0x3d0] sm:$0xff]  }
 0x244   :  { %5884 = vmatprep.mubr.bf16.mxu0 %v6986_v57  ;;  %4979 = vmatprep.subr.bf16.mxu1 %v8877_v0  ;;  %v128_v55 = vld [vmem:[%s11062_s0 + $0x390] sm:$0xff] }
 0x245   :  { %6135 = vmatprep.subr.bf16.mxu0 %v8877_v0  ;;  %v136_v56 = vld [vmem:[%s11062_s0 + $0x3d0] sm:$0xff] }
 0x246   :  { %4980 = vmatpush1.bf16.msra.mxu1 %v8847_v58  ;;  %v132_v57 = vld [vmem:[%s11062_s0 + $0x3b0] sm:$0xff] }
 0x247   :  { %6136 = vmatpush1.bf16.msra.mxu0 %v8848_v61  ;;  %4981 = vmatprep.subr.bf16.mxu1 %v8877_v0  ;;  %v140_v58 = vld [vmem:[%s11062_s0 + $0x3f0] sm:$0xff]  ;;  %v7074_v61 = vcombine.high %v128_v55, %v136_v56 }
 0x248   :  { %6137 = vmatprep.subr.bf16.mxu0 %v8877_v0  ;;  %v7082_v62 = vcombine.high %v132_v57, %v140_v58  ;;  %v7081_v7 = vcombine.low %v132_v57, %v140_v58  ;;  %v248_v57 = vld [vmem:[%s11062_s0 + $0x750] sm:$0xff] }
 0x249   :  { %4729 = vmatmul.mubr.bf16.gmra.mrb[4].mxu1 %v6977_v1  ;;  %v8868_v1 = vld [vmem:[%s11061_s1 + $0x3d8] sm:$0xff]   ;;  %v244_v58 = vld [vmem:[%s11062_s0 + $0x730] sm:$0xff] }
 0x24a   :  { %5885 = vmatmul.mubr.bf16.gmra.mrb[4].mxu0 %v6985_v2  ;;  %4736 = vmatprep.mubr.bf16.mxu1 %v6994_v3  ;;  %v144_v2 = vld [vmem:[%s11062_s0 + $0x410] sm:$0xff] }
 0x24b   :  { %5892 = vmatprep.mubr.bf16.mxu0 %v7002_v4  ;;  %4982 = vmatpush1.bf16.msra.mxu1 %v8849_v5  ;;  %v152_v3 = vld [vmem:[%s11062_s0 + $0x450] sm:$0xff] }
 0x24c   :  { %6138 = vmatpush1.bf16.msra.mxu0 %v8850_v6  ;;  %4983 = vmatprep.subr.bf16.mxu1 %v8877_v0  ;;  %v148_v4 = vld [vmem:[%s11062_s0 + $0x430] sm:$0xff]  ;;  %v7073_v6 = vcombine.low %v128_v55, %v136_v56  ;;  %v7090_v8 = vcombine.high %v144_v2, %v152_v3 }
 0x24d   :  { %6139 = vmatprep.subr.bf16.mxu0 %v8877_v0  ;;  %v156_v5 = vld [vmem:[%s11062_s0 + $0x470] sm:$0xff] }
 0x24e   :  { %v8874_v55 = vld [vmem:[%s11061_s1 + $0x3f0] sm:$0xff]  }
 0x24f   :  { %4984 = vmatpush1.bf16.msra.mxu1 %v8851_v9  ;;  %v7098_v9 = vcombine.high %v148_v4, %v156_v5  ;;  %v240_v56 = vld [vmem:[%s11062_s0 + $0x710] sm:$0xff] }
 0x250   :  { %6140 = vmatpush1.bf16.msra.mxu0 %v8852_v12  ;;  %4985 = vmatprep.subr.bf16.mxu1 %v8877_v0  ;;  %v164_v12 = vld [vmem:[%s11062_s0 + $0x4b0] sm:$0xff] }
 0x251   :  { %4737 = vmatmul.mubr.bf16.gmra.mrb[8].mxu1 %v6993_v13  ;;  %6141 = vmatprep.subr.bf16.mxu0 %v8877_v0  ;;  %v172_v13 = vld [vmem:[%s11062_s0 + $0x4f0] sm:$0xff] }
 0x252   :  { %5893 = vmatmul.mubr.bf16.gmra.mrb[8].mxu0 %v7001_v14  ;;  %4744 = vmatprep.mubr.bf16.mxu1 %v7010_v15  ;;  %v7089_v14 = vcombine.low %v144_v2, %v152_v3  ;;  %v7097_v15 = vcombine.low %v148_v4, %v156_v5  ;;  %v264_v2 = vld [vmem:[%s11062_s0 + $0x7d0] sm:$0xff]  ;;  %v7185_v4 = vcombine.low %v240_v56, %v248_v57 }
 0x253   :  { %5900 = vmatprep.mubr.bf16.mxu0 %v7018_v16  ;;  %4986 = vmatpush1.bf16.msra.mxu1 %v8853_v17  ;;  %v7106_v16 = vcombine.high %v160_v10, %v168_v11  ;;  %v7114_v17 = vcombine.high %v164_v12, %v172_v13  ;;  %v260_v3 = vld [vmem:[%s11062_s0 + $0x7b0] sm:$0xff] }
 0x254   :  { %6142 = vmatpush1.bf16.msra.mxu0 %v8854_v18  ;;  %4987 = vmatprep.subr.bf16.mxu1 %v8877_v0  ;;  %v8869_v18 = vld [vmem:[%s11061_s1 + $0x1e0] sm:$0xff]  }
 0x255   :  { %6143 = vmatprep.subr.bf16.mxu0 %v8877_v0 }
 0x257   :  { %4988 = vmatpush1.bf16.msra.mxu1 %v8855_v21  ;;  %v184_v21 = vld [vmem:[%s11062_s0 + $0x550] sm:$0xff] }
 0x258   :  { %6144 = vmatpush1.bf16.msra.mxu0 %v8856_v24  ;;  %4989 = vmatprep.subr.bf16.mxu1 %v8877_v0  ;;  %v7105_v24 = vcombine.low %v160_v10, %v168_v11  ;;  %v7121_v32 = vcombine.low %v176_v20, %v184_v21  ;;  %v272_v10 = vld [vmem:[%s11062_s0 + $0x810] sm:$0xff] }
 0x259   :  { %4745 = vmatmul.mubr.bf16.gmra.mrb[12].mxu1 %v7009_v25  ;;  %6145 = vmatprep.subr.bf16.mxu0 %v8877_v0  ;;  %v7113_v25 = vcombine.low %v164_v12, %v172_v13  ;;  %v280_v11 = vld [vmem:[%s11062_s0 + $0x850] sm:$0xff] }
 0x25a   :  { %5901 = vmatmul.mubr.bf16.gmra.mrb[12].mxu0 %v7017_v26  ;;  %4752 = vmatprep.mubr.bf16.mxu1 %v7026_v27  ;;  %v7122_v26 = vcombine.high %v176_v20, %v184_v21  ;;  %v7130_v27 = vcombine.high %v180_v22, %v188_v23  ;;  %v276_v12 = vld [vmem:[%s11062_s0 + $0x830] sm:$0xff] }
 0x25b   :  { %5908 = vmatprep.mubr.bf16.mxu0 %v7034_v28  ;;  %4990 = vmatpush1.bf16.msra.mxu1 %v8857_v29  ;;  %v192_v28 = vld [vmem:[%s11062_s0 + $0x590] sm:$0xff] }
 0x25c   :  { %6146 = vmatpush1.bf16.msra.mxu0 %v8858_v30  ;;  %4991 = vmatprep.subr.bf16.mxu1 %v8877_v0  ;;  %v200_v29 = vld [vmem:[%s11062_s0 + $0x5d0] sm:$0xff] }
 0x25d   :  { %6147 = vmatprep.subr.bf16.mxu0 %v8877_v0  ;;  %v196_v30 = vld [vmem:[%s11062_s0 + $0x5b0] sm:$0xff]  ;;  %v7138_v34 = vcombine.high %v192_v28, %v200_v29 }
 0x25e   :  { %v7146_v35 = vcombine.high %v196_v30, %v204_v31  ;;  %v7145_v43 = vcombine.low %v196_v30, %v204_v31  ;;  %v284_v13 = vld [vmem:[%s11062_s0 + $0x870] sm:$0xff] }
 0x25f   :  { %4992 = vmatpush1.bf16.msra.mxu1 %v8859_v33  ;;  %v7129_v33 = vcombine.low %v180_v22, %v188_v23  ;;  %v292_v20 = vld [vmem:[%s11062_s0 + $0x8b0] sm:$0xff]  ;;  %v7217_v22 = vcombine.low %v272_v10, %v280_v11  ;;  %v7225_v23 = vcombine.low %v276_v12, %v284_v13 }
 0x260   :  { %6148 = vmatpush1.bf16.msra.mxu0 %v8860_v36  ;;  %4993 = vmatprep.subr.bf16.mxu1 %v8877_v0  ;;  %v8871_v36 = vld [vmem:[%s11061_s1 + $0x1e8] sm:$0xff]   ;;  %v300_v21 = vld [vmem:[%s11062_s0 + $0x8f0] sm:$0xff] }
 0x261   :  { %4753 = vmatmul.mubr.bf16.gmra.mrb[16].mxu1 %v7025_v37  ;;  %6149 = vmatprep.subr.bf16.mxu0 %v8877_v0  ;;  %v8872_v37 = vld [vmem:[%s11061_s1 + $0x3e8] sm:$0xff]   ;;  %v7241_v31 = vcombine.low %v292_v20, %v300_v21 }
 0x262   :  { %5909 = vmatmul.mubr.bf16.gmra.mrb[16].mxu0 %v7033_v38  ;;  %4760 = vmatprep.mubr.bf16.mxu1 %v7042_v39  ;;  %v208_v38 = vld [vmem:[%s11062_s0 + $0x610] sm:$0xff] }
 0x263   :  { %5916 = vmatprep.mubr.bf16.mxu0 %v7050_v40  ;;  %4994 = vmatpush1.bf16.msra.mxu1 %v8861_v41  ;;  %v216_v39 = vld [vmem:[%s11062_s0 + $0x650] sm:$0xff] }
 0x264   :  { %6150 = vmatpush1.bf16.msra.mxu0 %v8862_v42  ;;  %4995 = vmatprep.subr.bf16.mxu1 %v8877_v0  ;;  %v212_v40 = vld [vmem:[%s11062_s0 + $0x630] sm:$0xff]  ;;  %v7137_v42 = vcombine.low %v192_v28, %v200_v29  ;;  %v7154_v44 = vcombine.high %v208_v38, %v216_v39 }
 0x265   :  { %6151 = vmatprep.subr.bf16.mxu0 %v8877_v0  ;;  %v220_v41 = vld [vmem:[%s11062_s0 + $0x670] sm:$0xff] }
 0x266   :  { %v308_v28 = vld [vmem:[%s11062_s0 + $0x930] sm:$0xff] }
 0x267   :  { %4996 = vmatpush1.bf16.msra.mxu1 %v8863_v45  ;;  %v7162_v45 = vcombine.high %v212_v40, %v220_v41  ;;  %v316_v29 = vld [vmem:[%s11062_s0 + $0x970] sm:$0xff] }
 0x268   :  { %6152 = vmatpush1.bf16.msra.mxu0 %v8864_v48  ;;  %4997 = vmatprep.subr.bf16.mxu1 %v8877_v0  ;;  %v228_v48 = vld [vmem:[%s11062_s0 + $0x6b0] sm:$0xff] }
 0x269   :  { %4761 = vmatmul.mubr.bf16.gmra.mrb[20].mxu1 %v7041_v49  ;;  %6153 = vmatprep.subr.bf16.mxu0 %v8877_v0  ;;  %v236_v49 = vld [vmem:[%s11062_s0 + $0x6f0] sm:$0xff] }
 0x26a   :  { %5917 = vmatmul.mubr.bf16.gmra.mrb[20].mxu0 %v7049_v50  ;;  %4768 = vmatprep.mubr.bf16.mxu1 %v7058_v51  ;;  %v7153_v50 = vcombine.low %v208_v38, %v216_v39  ;;  %v7161_v51 = vcombine.low %v212_v40, %v220_v41  ;;  %v7257_v39 = vcombine.low %v308_v28, %v316_v29 }
 0x26b   :  { %5924 = vmatprep.mubr.bf16.mxu0 %v7066_v52  ;;  %4998 = vmatpush1.bf16.msra.mxu1 %v8865_v53  ;;  %v7170_v52 = vcombine.high %v224_v46, %v232_v47  ;;  %v7178_v53 = vcombine.high %v228_v48, %v236_v49 }
 0x26c   :  { %6154 = vmatpush1.bf16.msra.mxu0 %v8866_v54  ;;  %4999 = vmatprep.subr.bf16.mxu1 %v8877_v0  ;;  %v8873_v54 = vld [vmem:[%s11061_s1 + $0x1f0] sm:$0xff]  }
 0x26d   :  { %6155 = vmatprep.subr.bf16.mxu0 %v8877_v0 }
 0x26f   :  { %5000 = vmatpush1.bf16.msra.mxu1 %v8867_v63 }
 0x270   :  { %6156 = vmatpush1.bf16.msra.mxu0 %v8868_v1  ;;  %5001 = vmatprep.subr.bf16.mxu1 %v8877_v0  ;;  %v256_v1 = vld [vmem:[%s11062_s0 + $0x790] sm:$0xff] }
 0x271   :  { %4769 = vmatmul.mubr.bf16.gmra.mrb[24].mxu1 %v7057_v59  ;;  %6157 = vmatprep.subr.bf16.mxu0 %v8877_v0  ;;  %v252_v59 = vld [vmem:[%s11062_s0 + $0x770] sm:$0xff] }
 0x272   :  { %5925 = vmatmul.mubr.bf16.gmra.mrb[24].mxu0 %v7065_v60  ;;  %4776 = vmatprep.mubr.bf16.mxu1 %v7074_v61  ;;  %v7169_v60 = vcombine.low %v224_v46, %v232_v47  ;;  %v7177_v61 = vcombine.low %v228_v48, %v236_v49  ;;  %v7194_v63 = vcombine.high %v244_v58, %v252_v59 }
 0x273   :  { %5932 = vmatprep.mubr.bf16.mxu0 %v7082_v62  ;;  %5002 = vmatpush1.bf16.msra.mxu1 %v8869_v18  ;;  %v7186_v62 = vcombine.high %v240_v56, %v248_v57  ;;  %v7193_v5 = vcombine.low %v244_v58, %v252_v59  ;;  %v288_v18 = vld [vmem:[%s11062_s0 + $0x890] sm:$0xff] }
 0x274   :  { %6158 = vmatpush1.bf16.msra.mxu0 %v8870_v19  ;;  %5003 = vmatprep.subr.bf16.mxu1 %v8877_v0  ;;  %v296_v19 = vld [vmem:[%s11062_s0 + $0x8d0] sm:$0xff] }
 0x275   :  { %6159 = vmatprep.subr.bf16.mxu0 %v8877_v0  ;;  %v7233_v30 = vcombine.low %v288_v18, %v296_v19  ;;  %v368_v58 = vld [vmem:[%s11062_s0 + $0xb10] sm:$0xff] }
 0x276   :  { %v376_v59 = vld [vmem:[%s11062_s0 + $0xb50] sm:$0xff] }
 0x277   :  { %5004 = vmatpush1.bf16.msra.mxu1 %v8871_v36  ;;  %v324_v36 = vld [vmem:[%s11062_s0 + $0x9b0] sm:$0xff] }
 0x278   :  { %6160 = vmatpush1.bf16.msra.mxu0 %v8872_v37  ;;  %5005 = vmatprep.subr.bf16.mxu1 %v8877_v0  ;;  %v332_v37 = vld [vmem:[%s11062_s0 + $0x9f0] sm:$0xff] }
 0x279   :  { %4777 = vmatmul.mubr.bf16.gmra.mrb[28].mxu1 %v7073_v6  ;;  %6161 = vmatprep.subr.bf16.mxu0 %v8877_v0  ;;  %v7202_v6 = vcombine.high %v256_v1, %v264_v2  ;;  %v7274_v41 = vcombine.high %v324_v36, %v332_v37  ;;  %v7273_v47 = vcombine.low %v324_v36, %v332_v37  ;;  %v452_v36 = vld [vmem:[%s11062_s0 + $0xdb0] sm:$0xff] }
 0x27a   :  { %5933 = vmatmul.mubr.bf16.gmra.mrb[28].mxu0 %v7081_v7  ;;  %4784 = vmatprep.mubr.bf16.mxu1 %v7090_v8  ;;  %v8875_v8 = vld [vmem:[%s11061_s1 + $0x1f8] sm:$0xff]   ;;  %v460_v37 = vld [vmem:[%s11062_s0 + $0xdf0] sm:$0xff] }
 0x27b   :  { %5940 = vmatprep.mubr.bf16.mxu0 %v7098_v9  ;;  %5006 = vmatpush1.bf16.msra.mxu1 %v8873_v54  ;;  %v8876_v9 = vld [vmem:[%s11061_s1 + $0x3f8] sm:$0xff]  }
 0x27c   :  { %6162 = vmatpush1.bf16.msra.mxu0 %v8874_v55  ;;  %5007 = vmatprep.subr.bf16.mxu1 %v8877_v0 }
 0x27d   :  { %6163 = vmatprep.subr.bf16.mxu0 %v8877_v0  ;;  %v268_v0 = vld [vmem:[%s11062_s0 + $0x7f0] sm:$0xff] }
 0x27e   :  { %v7210_v7 = vcombine.high %v260_v3, %v268_v0 }
 0x27f   :  { %5008 = vmatpush1.bf16.msra.mxu1 %v8875_v8 }
 0x280   :  { %6164 = vmatpush1.bf16.msra.mxu0 %v8876_v9 }
 0x281   :  { %4785 = vmatmul.mubr.bf16.gmra.mrb[32].mxu1 %v7089_v14  ;;  %v7201_v14 = vcombine.low %v256_v1, %v264_v2  ;;  %v7314_v1 = vcombine.high %v368_v58, %v376_v59 }
 0x282   :  { %5941 = vmatmul.mubr.bf16.gmra.mrb[32].mxu0 %v7097_v15  ;;  %4792 = vmatprep.mubr.bf16.mxu1 %v7106_v16  ;;  %v7209_v15 = vcombine.low %v260_v3, %v268_v0  ;;  %v7218_v16 = vcombine.high %v272_v10, %v280_v11  ;;  %v384_v3 = vld [vmem:[%s11062_s0 + $0xb90] sm:$0xff] }
 0x283   :  { %5948 = vmatprep.mubr.bf16.mxu0 %v7114_v17  ;;  %v7226_v17 = vcombine.high %v276_v12, %v284_v13  ;;  %v392_v0 = vld [vmem:[%s11062_s0 + $0xbd0] sm:$0xff] }
 0x284   :  { %v7330_v8 = vcombine.high %v384_v3, %v392_v0  ;;  %v400_v10 = vld [vmem:[%s11062_s0 + $0xc10] sm:$0xff] }
 0x285   :  { %v408_v11 = vld [vmem:[%s11062_s0 + $0xc50] sm:$0xff] }
 0x286   :  { %v404_v12 = vld [vmem:[%s11062_s0 + $0xc30] sm:$0xff] }
 0x287   :  { %v412_v13 = vld [vmem:[%s11062_s0 + $0xc70] sm:$0xff] }
 0x289   :  { %4793 = vmatmul.mubr.bf16.gmra.mrb[36].mxu1 %v7105_v24  ;;  %v7234_v24 = vcombine.high %v288_v18, %v296_v19  ;;  %v416_v18 = vld [vmem:[%s11062_s0 + $0xc90] sm:$0xff] }
 0x28a   :  { %5949 = vmatmul.mubr.bf16.gmra.mrb[36].mxu0 %v7113_v25  ;;  %4800 = vmatprep.mubr.bf16.mxu1 %v7122_v26  ;;  %v7242_v25 = vcombine.high %v292_v20, %v300_v21  ;;  %v304_v26 = vld [vmem:[%s11062_s0 + $0x910] sm:$0xff] }
 0x28b   :  { %5956 = vmatprep.mubr.bf16.mxu0 %v7130_v27  ;;  %v312_v27 = vld [vmem:[%s11062_s0 + $0x950] sm:$0xff] }
 0x28c   :  { %v7249_v38 = vcombine.low %v304_v26, %v312_v27  ;;  %v424_v19 = vld [vmem:[%s11062_s0 + $0xcd0] sm:$0xff] }
 0x28d   :  { %v420_v20 = vld [vmem:[%s11062_s0 + $0xcb0] sm:$0xff] }
 0x28e   :  { %v428_v21 = vld [vmem:[%s11062_s0 + $0xcf0] sm:$0xff] }
 0x291   :  { %4801 = vmatmul.mubr.bf16.gmra.mrb[40].mxu1 %v7121_v32  ;;  %v7250_v32 = vcombine.high %v304_v26, %v312_v27  ;;  %v432_v26 = vld [vmem:[%s11062_s0 + $0xd10] sm:$0xff] }
 0x292   :  { %5957 = vmatmul.mubr.bf16.gmra.mrb[40].mxu0 %v7129_v33  ;;  %4808 = vmatprep.mubr.bf16.mxu1 %v7138_v34  ;;  %v7258_v33 = vcombine.high %v308_v28, %v316_v29  ;;  %v320_v34 = vld [vmem:[%s11062_s0 + $0x990] sm:$0xff] }
 0x293   :  { %5964 = vmatprep.mubr.bf16.mxu0 %v7146_v35  ;;  %v328_v35 = vld [vmem:[%s11062_s0 + $0x9d0] sm:$0xff] }
 0x294   :  { %v7266_v40 = vcombine.high %v320_v34, %v328_v35  ;;  %v7265_v46 = vcombine.low %v320_v34, %v328_v35  ;;  %v440_v27 = vld [vmem:[%s11062_s0 + $0xd50] sm:$0xff] }
 0x295   :  { %v436_v28 = vld [vmem:[%s11062_s0 + $0xd30] sm:$0xff] }
 0x296   :  { %v444_v29 = vld [vmem:[%s11062_s0 + $0xd70] sm:$0xff] }
 0x297   :  { %v448_v34 = vld [vmem:[%s11062_s0 + $0xd90] sm:$0xff] }
 0x298   :  { %v456_v35 = vld [vmem:[%s11062_s0 + $0xdd0] sm:$0xff] }
 0x299   :  { %4809 = vmatmul.mubr.bf16.gmra.mrb[44].mxu1 %v7137_v42  ;;  %v336_v42 = vld [vmem:[%s11062_s0 + $0xa10] sm:$0xff] }
 0x29a   :  { %5965 = vmatmul.mubr.bf16.gmra.mrb[44].mxu0 %v7145_v43  ;;  %4816 = vmatprep.mubr.bf16.mxu1 %v7154_v44  ;;  %v344_v43 = vld [vmem:[%s11062_s0 + $0xa50] sm:$0xff] }
 0x29b   :  { %5972 = vmatprep.mubr.bf16.mxu0 %v7162_v45  ;;  %v340_v44 = vld [vmem:[%s11062_s0 + $0xa30] sm:$0xff]  ;;  %v7282_v48 = vcombine.high %v336_v42, %v344_v43  ;;  %v7281_v54 = vcombine.low %v336_v42, %v344_v43 }
 0x29c   :  { %v348_v45 = vld [vmem:[%s11062_s0 + $0xa70] sm:$0xff] }
 0x29d   :  { %v7290_v49 = vcombine.high %v340_v44, %v348_v45  ;;  %v7289_v55 = vcombine.low %v340_v44, %v348_v45  ;;  %v464_v42 = vld [vmem:[%s11062_s0 + $0xe10] sm:$0xff] }
 0x29e   :  { %v472_v43 = vld [vmem:[%s11062_s0 + $0xe50] sm:$0xff] }
 0x29f   :  { %v468_v44 = vld [vmem:[%s11062_s0 + $0xe30] sm:$0xff] }
 0x2a0   :  { %v476_v45 = vld [vmem:[%s11062_s0 + $0xe70] sm:$0xff] }
 0x2a1   :  { %4817 = vmatmul.mubr.bf16.gmra.mrb[48].mxu1 %v7153_v50  ;;  %v352_v50 = vld [vmem:[%s11062_s0 + $0xa90] sm:$0xff] }
 0x2a2   :  { %5973 = vmatmul.mubr.bf16.gmra.mrb[48].mxu0 %v7161_v51  ;;  %4824 = vmatprep.mubr.bf16.mxu1 %v7170_v52  ;;  %v360_v51 = vld [vmem:[%s11062_s0 + $0xad0] sm:$0xff] }
 0x2a3   :  { %5980 = vmatprep.mubr.bf16.mxu0 %v7178_v53  ;;  %v356_v52 = vld [vmem:[%s11062_s0 + $0xab0] sm:$0xff]  ;;  %v7298_v56 = vcombine.high %v352_v50, %v360_v51 }
 0x2a4   :  { %v364_v53 = vld [vmem:[%s11062_s0 + $0xaf0] sm:$0xff] }
 0x2a5   :  { %v7306_v57 = vcombine.high %v356_v52, %v364_v53 }
 0x2a9   :  { %4825 = vmatmul.mubr.bf16.gmra.mrb[52].mxu1 %v7169_v60  ;;  %v372_v60 = vld [vmem:[%s11062_s0 + $0xb30] sm:$0xff] }
 0x2aa   :  { %5981 = vmatmul.mubr.bf16.gmra.mrb[52].mxu0 %v7177_v61  ;;  %4832 = vmatprep.mubr.bf16.mxu1 %v7186_v62  ;;  %v380_v61 = vld [vmem:[%s11062_s0 + $0xb70] sm:$0xff]  ;;  %v7297_v62 = vcombine.low %v352_v50, %v360_v51 }
 0x2ab   :  { %5988 = vmatprep.mubr.bf16.mxu0 %v7194_v63  ;;  %v7305_v63 = vcombine.low %v356_v52, %v364_v53  ;;  %v7322_v2 = vcombine.high %v372_v60, %v380_v61  ;;  %v480_v50 = vld [vmem:[%s11062_s0 + $0xe90] sm:$0xff] }
 0x2ac   :  { %v488_v51 = vld [vmem:[%s11062_s0 + $0xed0] sm:$0xff] }
 0x2ad   :  { %v484_v52 = vld [vmem:[%s11062_s0 + $0xeb0] sm:$0xff] }
 0x2ae   :  { %v492_v53 = vld [vmem:[%s11062_s0 + $0xef0] sm:$0xff] }
 0x2b1   :  { %4833 = vmatmul.mubr.bf16.gmra.mrb[56].mxu1 %v7185_v4  ;;  %v388_v4 = vld [vmem:[%s11062_s0 + $0xbb0] sm:$0xff] }
 0x2b2   :  { %5989 = vmatmul.mubr.bf16.gmra.mrb[56].mxu0 %v7193_v5  ;;  %4840 = vmatprep.mubr.bf16.mxu1 %v7202_v6  ;;  %v396_v5 = vld [vmem:[%s11062_s0 + $0xbf0] sm:$0xff]  ;;  %v7313_v6 = vcombine.low %v368_v58, %v376_v59 }
 0x2b3   :  { %5996 = vmatprep.mubr.bf16.mxu0 %v7210_v7  ;;  %v7321_v7 = vcombine.low %v372_v60, %v380_v61  ;;  %v7338_v9 = vcombine.high %v388_v4, %v396_v5  ;;  %v496_v58 = vld [vmem:[%s11062_s0 + $0xf10] sm:$0xff] }
 0x2b4   :  { %v504_v59 = vld [vmem:[%s11062_s0 + $0xf50] sm:$0xff] }
 0x2b5   :  { %v500_v60 = vld [vmem:[%s11062_s0 + $0xf30] sm:$0xff] }
 0x2b6   :  { %v508_v61 = vld [vmem:[%s11062_s0 + $0xf70] sm:$0xff] }
 0x2b9   :  { %4841 = vmatmul.mubr.bf16.gmra.mrb[60].mxu1 %v7201_v14  ;;  %v7329_v14 = vcombine.low %v384_v3, %v392_v0  ;;  %v512_v3 = vld [vmem:[%s11062_s0 + $0xf90] sm:$0xff] }
 0x2ba   :  { %5997 = vmatmul.mubr.bf16.gmra.mrb[60].mxu0 %v7209_v15  ;;  %4848 = vmatprep.mubr.bf16.mxu1 %v7218_v16  ;;  %v7337_v15 = vcombine.low %v388_v4, %v396_v5  ;;  %v7346_v16 = vcombine.high %v400_v10, %v408_v11  ;;  %v520_v0 = vld [vmem:[%s11062_s0 + $0xfd0] sm:$0xff] }
 0x2bb   :  { %6004 = vmatprep.mubr.bf16.mxu0 %v7226_v17  ;;  %v7354_v17 = vcombine.high %v404_v12, %v412_v13  ;;  %v516_v4 = vld [vmem:[%s11062_s0 + $0xfb0] sm:$0xff] }
 0x2bc   :  { %v524_v5 = vld [vmem:[%s11062_s0 + $0xff0] sm:$0xff] }
 0x2c1   :  { %4849 = vmatmul.mubr.bf16.gmra.mrb[64].mxu1 %v7217_v22  ;;  %v7345_v22 = vcombine.low %v400_v10, %v408_v11  ;;  %v17_v10 = vld [vmem:[%s11062_s0 + $0x18] sm:$0xff] }
 0x2c2   :  { %6005 = vmatmul.mubr.bf16.gmra.mrb[64].mxu0 %v7225_v23  ;;  %4856 = vmatprep.mubr.bf16.mxu1 %v7234_v24  ;;  %v7353_v23 = vcombine.low %v404_v12, %v412_v13  ;;  %v7362_v24 = vcombine.high %v416_v18, %v424_v19  ;;  %v25_v11 = vld [vmem:[%s11062_s0 + $0x58] sm:$0xff] }
 0x2c3   :  { %6012 = vmatprep.mubr.bf16.mxu0 %v7242_v25  ;;  %v7370_v25 = vcombine.high %v420_v20, %v428_v21  ;;  %v21_v12 = vld [vmem:[%s11062_s0 + $0x38] sm:$0xff] }
 0x2c4   :  { %v29_v13 = vld [vmem:[%s11062_s0 + $0x78] sm:$0xff] }
 0x2c9   :  { %4857 = vmatmul.mubr.bf16.gmra.mrb[68].mxu1 %v7233_v30  ;;  %v7361_v30 = vcombine.low %v416_v18, %v424_v19  ;;  %v33_v18 = vld [vmem:[%s11062_s0 + $0x98] sm:$0xff] }
 0x2ca   :  { %6013 = vmatmul.mubr.bf16.gmra.mrb[68].mxu0 %v7241_v31  ;;  %4864 = vmatprep.mubr.bf16.mxu1 %v7250_v32  ;;  %v7369_v31 = vcombine.low %v420_v20, %v428_v21  ;;  %v7378_v32 = vcombine.high %v432_v26, %v440_v27  ;;  %v41_v19 = vld [vmem:[%s11062_s0 + $0xd8] sm:$0xff] }
 0x2cb   :  { %6020 = vmatprep.mubr.bf16.mxu0 %v7258_v33  ;;  %v7386_v33 = vcombine.high %v436_v28, %v444_v29  ;;  %v37_v20 = vld [vmem:[%s11062_s0 + $0xb8] sm:$0xff] }
 0x2cc   :  { %v45_v21 = vld [vmem:[%s11062_s0 + $0xf8] sm:$0xff] }
 0x2d1   :  { %4865 = vmatmul.mubr.bf16.gmra.mrb[72].mxu1 %v7249_v38  ;;  %v7377_v38 = vcombine.low %v432_v26, %v440_v27  ;;  %v49_v26 = vld [vmem:[%s11062_s0 + $0x118] sm:$0xff] }
 0x2d2   :  { %6021 = vmatmul.mubr.bf16.gmra.mrb[72].mxu0 %v7257_v39  ;;  %4872 = vmatprep.mubr.bf16.mxu1 %v7266_v40  ;;  %v7385_v39 = vcombine.low %v436_v28, %v444_v29  ;;  %v7394_v40 = vcombine.high %v448_v34, %v456_v35  ;;  %v57_v27 = vld [vmem:[%s11062_s0 + $0x158] sm:$0xff] }
 0x2d3   :  { %6028 = vmatprep.mubr.bf16.mxu0 %v7274_v41  ;;  %v7402_v41 = vcombine.high %v452_v36, %v460_v37  ;;  %v53_v28 = vld [vmem:[%s11062_s0 + $0x138] sm:$0xff] }
 0x2d4   :  { %v61_v29 = vld [vmem:[%s11062_s0 + $0x178] sm:$0xff] }
 0x2d9   :  { %4873 = vmatmul.mubr.bf16.gmra.mrb[76].mxu1 %v7265_v46  ;;  %v7393_v46 = vcombine.low %v448_v34, %v456_v35  ;;  %v65_v34 = vld [vmem:[%s11062_s0 + $0x198] sm:$0xff] }
 0x2da   :  { %6029 = vmatmul.mubr.bf16.gmra.mrb[76].mxu0 %v7273_v47  ;;  %4880 = vmatprep.mubr.bf16.mxu1 %v7282_v48  ;;  %v7401_v47 = vcombine.low %v452_v36, %v460_v37  ;;  %v7410_v48 = vcombine.high %v464_v42, %v472_v43  ;;  %v73_v35 = vld [vmem:[%s11062_s0 + $0x1d8] sm:$0xff] }
 0x2db   :  { %6036 = vmatprep.mubr.bf16.mxu0 %v7290_v49  ;;  %v7418_v49 = vcombine.high %v468_v44, %v476_v45  ;;  %v69_v36 = vld [vmem:[%s11062_s0 + $0x1b8] sm:$0xff] }
 0x2dc   :  { %v77_v37 = vld [vmem:[%s11062_s0 + $0x1f8] sm:$0xff] }
 0x2e1   :  { %4881 = vmatmul.mubr.bf16.gmra.mrb[80].mxu1 %v7281_v54  ;;  %v7409_v54 = vcombine.low %v464_v42, %v472_v43  ;;  %v81_v42 = vld [vmem:[%s11062_s0 + $0x218] sm:$0xff] }
 0x2e2   :  { %6037 = vmatmul.mubr.bf16.gmra.mrb[80].mxu0 %v7289_v55  ;;  %4888 = vmatprep.mubr.bf16.mxu1 %v7298_v56  ;;  %v7417_v55 = vcombine.low %v468_v44, %v476_v45  ;;  %v7426_v56 = vcombine.high %v480_v50, %v488_v51  ;;  %v89_v43 = vld [vmem:[%s11062_s0 + $0x258] sm:$0xff] }
 0x2e3   :  { %6044 = vmatprep.mubr.bf16.mxu0 %v7306_v57  ;;  %v7434_v57 = vcombine.high %v484_v52, %v492_v53  ;;  %v85_v44 = vld [vmem:[%s11062_s0 + $0x238] sm:$0xff] }
 0x2e4   :  { %v93_v45 = vld [vmem:[%s11062_s0 + $0x278] sm:$0xff] }
 0x2e9   :  { %4889 = vmatmul.mubr.bf16.gmra.mrb[84].mxu1 %v7297_v62  ;;  %v7425_v62 = vcombine.low %v480_v50, %v488_v51  ;;  %v97_v50 = vld [vmem:[%s11062_s0 + $0x298] sm:$0xff] }
 0x2ea   :  { %6045 = vmatmul.mubr.bf16.gmra.mrb[84].mxu0 %v7305_v63  ;;  %4896 = vmatprep.mubr.bf16.mxu1 %v7314_v1  ;;  %v7433_v63 = vcombine.low %v484_v52, %v492_v53  ;;  %v7442_v1 = vcombine.high %v496_v58, %v504_v59  ;;  %v105_v51 = vld [vmem:[%s11062_s0 + $0x2d8] sm:$0xff] }
 0x2eb   :  { %6052 = vmatprep.mubr.bf16.mxu0 %v7322_v2  ;;  %v7450_v2 = vcombine.high %v500_v60, %v508_v61  ;;  %v101_v52 = vld [vmem:[%s11062_s0 + $0x2b8] sm:$0xff] }
 0x2ec   :  { %v109_v53 = vld [vmem:[%s11062_s0 + $0x2f8] sm:$0xff] }
 0x2f1   :  { %4897 = vmatmul.mubr.bf16.gmra.mrb[88].mxu1 %v7313_v6  ;;  %v7441_v6 = vcombine.low %v496_v58, %v504_v59  ;;  %v113_v58 = vld [vmem:[%s11062_s0 + $0x318] sm:$0xff] }
 0x2f2   :  { %6053 = vmatmul.mubr.bf16.gmra.mrb[88].mxu0 %v7321_v7  ;;  %4904 = vmatprep.mubr.bf16.mxu1 %v7330_v8  ;;  %v7449_v7 = vcombine.low %v500_v60, %v508_v61  ;;  %v7458_v8 = vcombine.high %v512_v3, %v520_v0  ;;  %v121_v59 = vld [vmem:[%s11062_s0 + $0x358] sm:$0xff] }
 0x2f3   :  { %6060 = vmatprep.mubr.bf16.mxu0 %v7338_v9  ;;  %v7466_v9 = vcombine.high %v516_v4, %v524_v5  ;;  %v117_v60 = vld [vmem:[%s11062_s0 + $0x338] sm:$0xff] }
 0x2f4   :  { %v125_v61 = vld [vmem:[%s11062_s0 + $0x378] sm:$0xff] }
 0x2f9   :  { %4905 = vmatmul.mubr.bf16.gmra.mrb[92].mxu1 %v7329_v14  ;;  %v7457_v14 = vcombine.low %v512_v3, %v520_v0  ;;  %v129_v3 = vld [vmem:[%s11062_s0 + $0x398] sm:$0xff] }
 0x2fa   :  { %6061 = vmatmul.mubr.bf16.gmra.mrb[92].mxu0 %v7337_v15  ;;  %4912 = vmatprep.mubr.bf16.mxu1 %v7346_v16  ;;  %v7465_v15 = vcombine.low %v516_v4, %v524_v5  ;;  %v6964_v16 = vcombine.high %v17_v10, %v25_v11  ;;  %v137_v0 = vld [vmem:[%s11062_s0 + $0x3d8] sm:$0xff] }
 0x2fb   :  { %6068 = vmatprep.mubr.bf16.mxu0 %v7354_v17  ;;  %v6972_v17 = vcombine.high %v21_v12, %v29_v13  ;;  %v133_v4 = vld [vmem:[%s11062_s0 + $0x3b8] sm:$0xff] }
 0x2fc   :  { %v141_v5 = vld [vmem:[%s11062_s0 + $0x3f8] sm:$0xff] }
 0x301   :  { %4913 = vmatmul.mubr.bf16.gmra.mrb[96].mxu1 %v7345_v22  ;;  %v6963_v22 = vcombine.low %v17_v10, %v25_v11  ;;  %v145_v10 = vld [vmem:[%s11062_s0 + $0x418] sm:$0xff] }
 0x302   :  { %6069 = vmatmul.mubr.bf16.gmra.mrb[96].mxu0 %v7353_v23  ;;  %4920 = vmatprep.mubr.bf16.mxu1 %v7362_v24  ;;  %v6971_v23 = vcombine.low %v21_v12, %v29_v13  ;;  %v6980_v24 = vcombine.high %v33_v18, %v41_v19  ;;  %v153_v11 = vld [vmem:[%s11062_s0 + $0x458] sm:$0xff] }
 0x303   :  { %6076 = vmatprep.mubr.bf16.mxu0 %v7370_v25  ;;  %v6988_v25 = vcombine.high %v37_v20, %v45_v21  ;;  %v149_v12 = vld [vmem:[%s11062_s0 + $0x438] sm:$0xff] }
 0x304   :  { %v157_v13 = vld [vmem:[%s11062_s0 + $0x478] sm:$0xff] }
 0x309   :  { %4921 = vmatmul.mubr.bf16.gmra.mrb[100].mxu1 %v7361_v30  ;;  %v6979_v30 = vcombine.low %v33_v18, %v41_v19  ;;  %v161_v18 = vld [vmem:[%s11062_s0 + $0x498] sm:$0xff] }
 0x30a   :  { %6077 = vmatmul.mubr.bf16.gmra.mrb[100].mxu0 %v7369_v31  ;;  %4928 = vmatprep.mubr.bf16.mxu1 %v7378_v32  ;;  %v6987_v31 = vcombine.low %v37_v20, %v45_v21  ;;  %v6996_v32 = vcombine.high %v49_v26, %v57_v27  ;;  %v169_v19 = vld [vmem:[%s11062_s0 + $0x4d8] sm:$0xff] }
 0x30b   :  { %6084 = vmatprep.mubr.bf16.mxu0 %v7386_v33  ;;  %v7004_v33 = vcombine.high %v53_v28, %v61_v29  ;;  %v165_v20 = vld [vmem:[%s11062_s0 + $0x4b8] sm:$0xff] }
 0x30c   :  { %v173_v21 = vld [vmem:[%s11062_s0 + $0x4f8] sm:$0xff] }
 0x311   :  { %4929 = vmatmul.mubr.bf16.gmra.mrb[104].mxu1 %v7377_v38  ;;  %v6995_v38 = vcombine.low %v49_v26, %v57_v27  ;;  %v177_v26 = vld [vmem:[%s11062_s0 + $0x518] sm:$0xff] }
 0x312   :  { %6085 = vmatmul.mubr.bf16.gmra.mrb[104].mxu0 %v7385_v39  ;;  %4936 = vmatprep.mubr.bf16.mxu1 %v7394_v40  ;;  %v7003_v39 = vcombine.low %v53_v28, %v61_v29  ;;  %v7012_v40 = vcombine.high %v65_v34, %v73_v35  ;;  %v185_v27 = vld [vmem:[%s11062_s0 + $0x558] sm:$0xff] }
 0x313   :  { %6092 = vmatprep.mubr.bf16.mxu0 %v7402_v41  ;;  %v7020_v41 = vcombine.high %v69_v36, %v77_v37  ;;  %v181_v28 = vld [vmem:[%s11062_s0 + $0x538] sm:$0xff] }
 0x314   :  { %v189_v29 = vld [vmem:[%s11062_s0 + $0x578] sm:$0xff] }
 0x319   :  { %4937 = vmatmul.mubr.bf16.gmra.mrb[108].mxu1 %v7393_v46  ;;  %v7011_v46 = vcombine.low %v65_v34, %v73_v35  ;;  %v193_v34 = vld [vmem:[%s11062_s0 + $0x598] sm:$0xff] }
 0x31a   :  { %6093 = vmatmul.mubr.bf16.gmra.mrb[108].mxu0 %v7401_v47  ;;  %4944 = vmatprep.mubr.bf16.mxu1 %v7410_v48  ;;  %v7019_v47 = vcombine.low %v69_v36, %v77_v37  ;;  %v7028_v48 = vcombine.high %v81_v42, %v89_v43  ;;  %v201_v35 = vld [vmem:[%s11062_s0 + $0x5d8] sm:$0xff] }
 0x31b   :  { %6100 = vmatprep.mubr.bf16.mxu0 %v7418_v49  ;;  %v7036_v49 = vcombine.high %v85_v44, %v93_v45  ;;  %v197_v36 = vld [vmem:[%s11062_s0 + $0x5b8] sm:$0xff] }
 0x31c   :  { %v205_v37 = vld [vmem:[%s11062_s0 + $0x5f8] sm:$0xff] }
 0x321   :  { %4945 = vmatmul.mubr.bf16.gmra.mrb[112].mxu1 %v7409_v54  ;;  %v7027_v54 = vcombine.low %v81_v42, %v89_v43  ;;  %v209_v42 = vld [vmem:[%s11062_s0 + $0x618] sm:$0xff] }
 0x322   :  { %6101 = vmatmul.mubr.bf16.gmra.mrb[112].mxu0 %v7417_v55  ;;  %4952 = vmatprep.mubr.bf16.mxu1 %v7426_v56  ;;  %v7035_v55 = vcombine.low %v85_v44, %v93_v45  ;;  %v7044_v56 = vcombine.high %v97_v50, %v105_v51  ;;  %v217_v43 = vld [vmem:[%s11062_s0 + $0x658] sm:$0xff] }
 0x323   :  { %6108 = vmatprep.mubr.bf16.mxu0 %v7434_v57  ;;  %v7052_v57 = vcombine.high %v101_v52, %v109_v53  ;;  %v213_v44 = vld [vmem:[%s11062_s0 + $0x638] sm:$0xff] }
 0x324   :  { %v221_v45 = vld [vmem:[%s11062_s0 + $0x678] sm:$0xff] }
 0x329   :  { %4953 = vmatmul.mubr.bf16.gmra.mrb[116].mxu1 %v7425_v62  ;;  %v7043_v62 = vcombine.low %v97_v50, %v105_v51  ;;  %v225_v50 = vld [vmem:[%s11062_s0 + $0x698] sm:$0xff] }
 0x32a   :  { %6109 = vmatmul.mubr.bf16.gmra.mrb[116].mxu0 %v7433_v63  ;;  %4960 = vmatprep.mubr.bf16.mxu1 %v7442_v1  ;;  %v7051_v63 = vcombine.low %v101_v52, %v109_v53  ;;  %v7060_v1 = vcombine.high %v113_v58, %v121_v59  ;;  %v233_v51 = vld [vmem:[%s11062_s0 + $0x6d8] sm:$0xff] }
 0x32b   :  { %6116 = vmatprep.mubr.bf16.mxu0 %v7450_v2  ;;  %v7068_v2 = vcombine.high %v117_v60, %v125_v61  ;;  %v229_v52 = vld [vmem:[%s11062_s0 + $0x6b8] sm:$0xff] }
 0x32c   :  { %v237_v53 = vld [vmem:[%s11062_s0 + $0x6f8] sm:$0xff] }
 0x331   :  { %4961 = vmatmul.mubr.bf16.gmra.mrb[120].mxu1 %v7441_v6  ;;  %v7059_v6 = vcombine.low %v113_v58, %v121_v59  ;;  %v241_v58 = vld [vmem:[%s11062_s0 + $0x718] sm:$0xff] }
 0x332   :  { %6117 = vmatmul.mubr.bf16.gmra.mrb[120].mxu0 %v7449_v7  ;;  %4968 = vmatprep.mubr.bf16.mxu1 %v7458_v8  ;;  %v7067_v7 = vcombine.low %v117_v60, %v125_v61  ;;  %v7076_v8 = vcombine.high %v129_v3, %v137_v0  ;;  %v249_v59 = vld [vmem:[%s11062_s0 + $0x758] sm:$0xff] }
 0x333   :  { %6124 = vmatprep.mubr.bf16.mxu0 %v7466_v9  ;;  %v7084_v9 = vcombine.high %v133_v4, %v141_v5  ;;  %v245_v60 = vld [vmem:[%s11062_s0 + $0x738] sm:$0xff] }
 0x334   :  { %v253_v61 = vld [vmem:[%s11062_s0 + $0x778] sm:$0xff] }
 0x339   :  { %4969 = vmatmul.mubr.bf16.gmra.mrb[124].mxu1 %v7457_v14  ;;  %v7075_v14 = vcombine.low %v129_v3, %v137_v0  ;;  %v257_v3 = vld [vmem:[%s11062_s0 + $0x798] sm:$0xff] }
 0x33a   :  { %6125 = vmatmul.mubr.bf16.gmra.mrb[124].mxu0 %v7465_v15  ;;  %5009 = vmatprep.mubr.bf16.mxu1 %v6964_v16  ;;  %v7083_v15 = vcombine.low %v133_v4, %v141_v5  ;;  %v7092_v16 = vcombine.high %v145_v10, %v153_v11  ;;  %v265_v0 = vld [vmem:[%s11062_s0 + $0x7d8] sm:$0xff] }
 0x33b   :  { %6165 = vmatprep.mubr.bf16.mxu0 %v6972_v17  ;;  %v7100_v17 = vcombine.high %v149_v12, %v157_v13  ;;  %v261_v4 = vld [vmem:[%s11062_s0 + $0x7b8] sm:$0xff] }
 0x33c   :  { %v269_v5 = vld [vmem:[%s11062_s0 + $0x7f8] sm:$0xff] }
 0x341   :  { %5010 = vmatmul.mubr.bf16.vlgmr.msra.gmra.mrb[0].mxu1 %v6963_v22  ;;  %v7091_v22 = vcombine.low %v145_v10, %v153_v11  ;;  %v273_v10 = vld [vmem:[%s11062_s0 + $0x818] sm:$0xff] }
 0x342   :  { %6166 = vmatmul.mubr.bf16.vlgmr.msra.gmra.mrb[0].mxu0 %v6971_v23  ;;  %5017 = vmatprep.mubr.bf16.mxu1 %v6980_v24  ;;  %v7099_v23 = vcombine.low %v149_v12, %v157_v13  ;;  %v7108_v24 = vcombine.high %v161_v18, %v169_v19  ;;  %v281_v11 = vld [vmem:[%s11062_s0 + $0x858] sm:$0xff] }
 0x343   :  { %6173 = vmatprep.mubr.bf16.mxu0 %v6988_v25  ;;  %v7116_v25 = vcombine.high %v165_v20, %v173_v21  ;;  %v277_v12 = vld [vmem:[%s11062_s0 + $0x838] sm:$0xff] }
 0x344   :  { %v285_v13 = vld [vmem:[%s11062_s0 + $0x878] sm:$0xff] }
 0x349   :  { %5018 = vmatmul.mubr.bf16.gmra.mrb[4].mxu1 %v6979_v30  ;;  %v7107_v30 = vcombine.low %v161_v18, %v169_v19  ;;  %v289_v18 = vld [vmem:[%s11062_s0 + $0x898] sm:$0xff] }
 0x34a   :  { %6174 = vmatmul.mubr.bf16.gmra.mrb[4].mxu0 %v6987_v31  ;;  %5025 = vmatprep.mubr.bf16.mxu1 %v6996_v32  ;;  %v7115_v31 = vcombine.low %v165_v20, %v173_v21  ;;  %v7124_v32 = vcombine.high %v177_v26, %v185_v27  ;;  %v297_v19 = vld [vmem:[%s11062_s0 + $0x8d8] sm:$0xff] }
 0x34b   :  { %6181 = vmatprep.mubr.bf16.mxu0 %v7004_v33  ;;  %v7132_v33 = vcombine.high %v181_v28, %v189_v29  ;;  %v293_v20 = vld [vmem:[%s11062_s0 + $0x8b8] sm:$0xff] }
 0x34c   :  { %v301_v21 = vld [vmem:[%s11062_s0 + $0x8f8] sm:$0xff] }
 0x351   :  { %5026 = vmatmul.mubr.bf16.gmra.mrb[8].mxu1 %v6995_v38  ;;  %v7123_v38 = vcombine.low %v177_v26, %v185_v27  ;;  %v305_v26 = vld [vmem:[%s11062_s0 + $0x918] sm:$0xff] }
 0x352   :  { %6182 = vmatmul.mubr.bf16.gmra.mrb[8].mxu0 %v7003_v39  ;;  %5033 = vmatprep.mubr.bf16.mxu1 %v7012_v40  ;;  %v7131_v39 = vcombine.low %v181_v28, %v189_v29  ;;  %v7140_v40 = vcombine.high %v193_v34, %v201_v35  ;;  %v313_v27 = vld [vmem:[%s11062_s0 + $0x958] sm:$0xff] }
 0x353   :  { %6189 = vmatprep.mubr.bf16.mxu0 %v7020_v41  ;;  %v7148_v41 = vcombine.high %v197_v36, %v205_v37  ;;  %v309_v28 = vld [vmem:[%s11062_s0 + $0x938] sm:$0xff] }
 0x354   :  { %v317_v29 = vld [vmem:[%s11062_s0 + $0x978] sm:$0xff] }
 0x359   :  { %5034 = vmatmul.mubr.bf16.gmra.mrb[12].mxu1 %v7011_v46  ;;  %v7139_v46 = vcombine.low %v193_v34, %v201_v35  ;;  %v321_v34 = vld [vmem:[%s11062_s0 + $0x998] sm:$0xff] }
 0x35a   :  { %6190 = vmatmul.mubr.bf16.gmra.mrb[12].mxu0 %v7019_v47  ;;  %5041 = vmatprep.mubr.bf16.mxu1 %v7028_v48  ;;  %v7147_v47 = vcombine.low %v197_v36, %v205_v37  ;;  %v7156_v48 = vcombine.high %v209_v42, %v217_v43  ;;  %v329_v35 = vld [vmem:[%s11062_s0 + $0x9d8] sm:$0xff] }
 0x35b   :  { %6197 = vmatprep.mubr.bf16.mxu0 %v7036_v49  ;;  %v7164_v49 = vcombine.high %v213_v44, %v221_v45  ;;  %v325_v36 = vld [vmem:[%s11062_s0 + $0x9b8] sm:$0xff] }
 0x35c   :  { %v333_v37 = vld [vmem:[%s11062_s0 + $0x9f8] sm:$0xff] }
 0x361   :  { %5042 = vmatmul.mubr.bf16.gmra.mrb[16].mxu1 %v7027_v54  ;;  %v7155_v54 = vcombine.low %v209_v42, %v217_v43  ;;  %v337_v42 = vld [vmem:[%s11062_s0 + $0xa18] sm:$0xff] }
 0x362   :  { %6198 = vmatmul.mubr.bf16.gmra.mrb[16].mxu0 %v7035_v55  ;;  %5049 = vmatprep.mubr.bf16.mxu1 %v7044_v56  ;;  %v7163_v55 = vcombine.low %v213_v44, %v221_v45  ;;  %v7172_v56 = vcombine.high %v225_v50, %v233_v51  ;;  %v345_v43 = vld [vmem:[%s11062_s0 + $0xa58] sm:$0xff] }
 0x363   :  { %6205 = vmatprep.mubr.bf16.mxu0 %v7052_v57  ;;  %v7180_v57 = vcombine.high %v229_v52, %v237_v53  ;;  %v341_v44 = vld [vmem:[%s11062_s0 + $0xa38] sm:$0xff] }
 0x364   :  { %v349_v45 = vld [vmem:[%s11062_s0 + $0xa78] sm:$0xff] }
 0x369   :  { %5050 = vmatmul.mubr.bf16.gmra.mrb[20].mxu1 %v7043_v62  ;;  %v7171_v62 = vcombine.low %v225_v50, %v233_v51  ;;  %v353_v50 = vld [vmem:[%s11062_s0 + $0xa98] sm:$0xff] }
 0x36a   :  { %6206 = vmatmul.mubr.bf16.gmra.mrb[20].mxu0 %v7051_v63  ;;  %5057 = vmatprep.mubr.bf16.mxu1 %v7060_v1  ;;  %v7179_v63 = vcombine.low %v229_v52, %v237_v53  ;;  %v7188_v1 = vcombine.high %v241_v58, %v249_v59  ;;  %v361_v51 = vld [vmem:[%s11062_s0 + $0xad8] sm:$0xff] }
 0x36b   :  { %6213 = vmatprep.mubr.bf16.mxu0 %v7068_v2  ;;  %v7196_v2 = vcombine.high %v245_v60, %v253_v61  ;;  %v357_v52 = vld [vmem:[%s11062_s0 + $0xab8] sm:$0xff] }
 0x36c   :  { %v365_v53 = vld [vmem:[%s11062_s0 + $0xaf8] sm:$0xff] }
 0x371   :  { %5058 = vmatmul.mubr.bf16.gmra.mrb[24].mxu1 %v7059_v6  ;;  %v7187_v6 = vcombine.low %v241_v58, %v249_v59  ;;  %v369_v58 = vld [vmem:[%s11062_s0 + $0xb18] sm:$0xff] }
 0x372   :  { %6214 = vmatmul.mubr.bf16.gmra.mrb[24].mxu0 %v7067_v7  ;;  %5065 = vmatprep.mubr.bf16.mxu1 %v7076_v8  ;;  %v7195_v7 = vcombine.low %v245_v60, %v253_v61  ;;  %v7204_v8 = vcombine.high %v257_v3, %v265_v0  ;;  %v377_v59 = vld [vmem:[%s11062_s0 + $0xb58] sm:$0xff] }
 0x373   :  { %6221 = vmatprep.mubr.bf16.mxu0 %v7084_v9  ;;  %v7212_v9 = vcombine.high %v261_v4, %v269_v5  ;;  %v373_v60 = vld [vmem:[%s11062_s0 + $0xb38] sm:$0xff] }
 0x374   :  { %v381_v61 = vld [vmem:[%s11062_s0 + $0xb78] sm:$0xff] }
 0x379   :  { %5066 = vmatmul.mubr.bf16.gmra.mrb[28].mxu1 %v7075_v14  ;;  %v7203_v14 = vcombine.low %v257_v3, %v265_v0  ;;  %v385_v3 = vld [vmem:[%s11062_s0 + $0xb98] sm:$0xff] }
 0x37a   :  { %6222 = vmatmul.mubr.bf16.gmra.mrb[28].mxu0 %v7083_v15  ;;  %5073 = vmatprep.mubr.bf16.mxu1 %v7092_v16  ;;  %v7211_v15 = vcombine.low %v261_v4, %v269_v5  ;;  %v7220_v16 = vcombine.high %v273_v10, %v281_v11  ;;  %v393_v0 = vld [vmem:[%s11062_s0 + $0xbd8] sm:$0xff] }
 0x37b   :  { %6229 = vmatprep.mubr.bf16.mxu0 %v7100_v17  ;;  %v7228_v17 = vcombine.high %v277_v12, %v285_v13  ;;  %v389_v4 = vld [vmem:[%s11062_s0 + $0xbb8] sm:$0xff] }
 0x37c   :  { %v397_v5 = vld [vmem:[%s11062_s0 + $0xbf8] sm:$0xff] }
 0x381   :  { %5074 = vmatmul.mubr.bf16.gmra.mrb[32].mxu1 %v7091_v22  ;;  %v7219_v22 = vcombine.low %v273_v10, %v281_v11  ;;  %v401_v10 = vld [vmem:[%s11062_s0 + $0xc18] sm:$0xff] }
 0x382   :  { %6230 = vmatmul.mubr.bf16.gmra.mrb[32].mxu0 %v7099_v23  ;;  %5081 = vmatprep.mubr.bf16.mxu1 %v7108_v24  ;;  %v7227_v23 = vcombine.low %v277_v12, %v285_v13  ;;  %v7236_v24 = vcombine.high %v289_v18, %v297_v19  ;;  %v409_v11 = vld [vmem:[%s11062_s0 + $0xc58] sm:$0xff] }
 0x383   :  { %6237 = vmatprep.mubr.bf16.mxu0 %v7116_v25  ;;  %v7244_v25 = vcombine.high %v293_v20, %v301_v21  ;;  %v405_v12 = vld [vmem:[%s11062_s0 + $0xc38] sm:$0xff] }
 0x384   :  { %v413_v13 = vld [vmem:[%s11062_s0 + $0xc78] sm:$0xff] }
 0x389   :  { %5082 = vmatmul.mubr.bf16.gmra.mrb[36].mxu1 %v7107_v30  ;;  %v7235_v30 = vcombine.low %v289_v18, %v297_v19  ;;  %v417_v18 = vld [vmem:[%s11062_s0 + $0xc98] sm:$0xff] }
 0x38a   :  { %6238 = vmatmul.mubr.bf16.gmra.mrb[36].mxu0 %v7115_v31  ;;  %5089 = vmatprep.mubr.bf16.mxu1 %v7124_v32  ;;  %v7243_v31 = vcombine.low %v293_v20, %v301_v21  ;;  %v7252_v32 = vcombine.high %v305_v26, %v313_v27  ;;  %v425_v19 = vld [vmem:[%s11062_s0 + $0xcd8] sm:$0xff] }
 0x38b   :  { %6245 = vmatprep.mubr.bf16.mxu0 %v7132_v33  ;;  %v7260_v33 = vcombine.high %v309_v28, %v317_v29  ;;  %v421_v20 = vld [vmem:[%s11062_s0 + $0xcb8] sm:$0xff] }
 0x38c   :  { %v429_v21 = vld [vmem:[%s11062_s0 + $0xcf8] sm:$0xff] }
 0x391   :  { %5090 = vmatmul.mubr.bf16.gmra.mrb[40].mxu1 %v7123_v38  ;;  %v7251_v38 = vcombine.low %v305_v26, %v313_v27  ;;  %v433_v26 = vld [vmem:[%s11062_s0 + $0xd18] sm:$0xff] }
 0x392   :  { %6246 = vmatmul.mubr.bf16.gmra.mrb[40].mxu0 %v7131_v39  ;;  %5097 = vmatprep.mubr.bf16.mxu1 %v7140_v40  ;;  %v7259_v39 = vcombine.low %v309_v28, %v317_v29  ;;  %v7268_v40 = vcombine.high %v321_v34, %v329_v35  ;;  %v441_v27 = vld [vmem:[%s11062_s0 + $0xd58] sm:$0xff] }
 0x393   :  { %6253 = vmatprep.mubr.bf16.mxu0 %v7148_v41  ;;  %v7276_v41 = vcombine.high %v325_v36, %v333_v37  ;;  %v437_v28 = vld [vmem:[%s11062_s0 + $0xd38] sm:$0xff] }
 0x394   :  { %v445_v29 = vld [vmem:[%s11062_s0 + $0xd78] sm:$0xff] }
 0x399   :  { %5098 = vmatmul.mubr.bf16.gmra.mrb[44].mxu1 %v7139_v46  ;;  %v7267_v46 = vcombine.low %v321_v34, %v329_v35  ;;  %v449_v34 = vld [vmem:[%s11062_s0 + $0xd98] sm:$0xff] }
 0x39a   :  { %6254 = vmatmul.mubr.bf16.gmra.mrb[44].mxu0 %v7147_v47  ;;  %5105 = vmatprep.mubr.bf16.mxu1 %v7156_v48  ;;  %v7275_v47 = vcombine.low %v325_v36, %v333_v37  ;;  %v7284_v48 = vcombine.high %v337_v42, %v345_v43  ;;  %v457_v35 = vld [vmem:[%s11062_s0 + $0xdd8] sm:$0xff] }
 0x39b   :  { %6261 = vmatprep.mubr.bf16.mxu0 %v7164_v49  ;;  %v7292_v49 = vcombine.high %v341_v44, %v349_v45  ;;  %v453_v36 = vld [vmem:[%s11062_s0 + $0xdb8] sm:$0xff] }
 0x39c   :  { %v461_v37 = vld [vmem:[%s11062_s0 + $0xdf8] sm:$0xff] }
 0x3a1   :  { %5106 = vmatmul.mubr.bf16.gmra.mrb[48].mxu1 %v7155_v54  ;;  %v7283_v54 = vcombine.low %v337_v42, %v345_v43  ;;  %v465_v42 = vld [vmem:[%s11062_s0 + $0xe18] sm:$0xff] }
 0x3a2   :  { %6262 = vmatmul.mubr.bf16.gmra.mrb[48].mxu0 %v7163_v55  ;;  %5113 = vmatprep.mubr.bf16.mxu1 %v7172_v56  ;;  %v7291_v55 = vcombine.low %v341_v44, %v349_v45  ;;  %v7300_v56 = vcombine.high %v353_v50, %v361_v51  ;;  %v473_v43 = vld [vmem:[%s11062_s0 + $0xe58] sm:$0xff] }
 0x3a3   :  { %6269 = vmatprep.mubr.bf16.mxu0 %v7180_v57  ;;  %v7308_v57 = vcombine.high %v357_v52, %v365_v53  ;;  %v469_v45 = vld [vmem:[%s11062_s0 + $0xe38] sm:$0xff] }
 0x3a9   :  { %5114 = vmatmul.mubr.bf16.gmra.mrb[52].mxu1 %v7171_v62  ;;  %v7299_v62 = vcombine.low %v353_v50, %v361_v51 }
 0x3aa   :  { %6270 = vmatmul.mubr.bf16.gmra.mrb[52].mxu0 %v7179_v63  ;;  %5121 = vmatprep.mubr.bf16.mxu1 %v7188_v1  ;;  %v7307_v63 = vcombine.low %v357_v52, %v365_v53  ;;  %v7316_v1 = vcombine.high %v369_v58, %v377_v59  ;;  %v7403_v53 = vcombine.low %v453_v36, %v461_v37 }
 0x3ab   :  { %6277 = vmatprep.mubr.bf16.mxu0 %v7196_v2  ;;  %v7324_v2 = vcombine.high %v373_v60, %v381_v61 }
 0x3b1   :  { %5122 = vmatmul.mubr.bf16.gmra.mrb[56].mxu1 %v7187_v6  ;;  %v7315_v6 = vcombine.low %v369_v58, %v377_v59 }
 0x3b2   :  { %6278 = vmatmul.mubr.bf16.gmra.mrb[56].mxu0 %v7195_v7  ;;  %5129 = vmatprep.mubr.bf16.mxu1 %v7204_v8  ;;  %v7323_v7 = vcombine.low %v373_v60, %v381_v61  ;;  %v7332_v8 = vcombine.high %v385_v3, %v393_v0 }
 0x3b3   :  { %6285 = vmatprep.mubr.bf16.mxu0 %v7212_v9  ;;  %v7340_v9 = vcombine.high %v389_v4, %v397_v5 }
 0x3b9   :  { %5130 = vmatmul.mubr.bf16.gmra.mrb[60].mxu1 %v7203_v14  ;;  %v7331_v14 = vcombine.low %v385_v3, %v393_v0  ;;  %v489_v0 = vld [vmem:[%s11062_s0 + $0xed8] sm:$0xff] }
 0x3ba   :  { %6286 = vmatmul.mubr.bf16.gmra.mrb[60].mxu0 %v7211_v15  ;;  %5137 = vmatprep.mubr.bf16.mxu1 %v7220_v16  ;;  %v7339_v15 = vcombine.low %v389_v4, %v397_v5  ;;  %v7348_v16 = vcombine.high %v401_v10, %v409_v11  ;;  %v485_v4 = vld [vmem:[%s11062_s0 + $0xeb8] sm:$0xff] }
 0x3bb   :  { %6293 = vmatprep.mubr.bf16.mxu0 %v7228_v17  ;;  %v7356_v17 = vcombine.high %v405_v12, %v413_v13  ;;  %v493_v5 = vld [vmem:[%s11062_s0 + $0xef8] sm:$0xff] }
 0x3c1   :  { %5138 = vmatmul.mubr.bf16.gmra.mrb[64].mxu1 %v7219_v22  ;;  %v7347_v22 = vcombine.low %v401_v10, %v409_v11 }
 0x3c2   :  { %6294 = vmatmul.mubr.bf16.gmra.mrb[64].mxu0 %v7227_v23  ;;  %5145 = vmatprep.mubr.bf16.mxu1 %v7236_v24  ;;  %v7355_v23 = vcombine.low %v405_v12, %v413_v13  ;;  %v7364_v24 = vcombine.high %v417_v18, %v425_v19 }
 0x3c3   :  { %6301 = vmatprep.mubr.bf16.mxu0 %v7244_v25  ;;  %v7372_v25 = vcombine.high %v421_v20, %v429_v21 }
 0x3c9   :  { %5146 = vmatmul.mubr.bf16.gmra.mrb[68].mxu1 %v7235_v30  ;;  %v7363_v30 = vcombine.low %v417_v18, %v425_v19 }
 0x3ca   :  { %6302 = vmatmul.mubr.bf16.gmra.mrb[68].mxu0 %v7243_v31  ;;  %5153 = vmatprep.mubr.bf16.mxu1 %v7252_v32  ;;  %v7371_v31 = vcombine.low %v421_v20, %v429_v21  ;;  %v7380_v32 = vcombine.high %v433_v26, %v441_v27 }
 0x3cb   :  { %6309 = vmatprep.mubr.bf16.mxu0 %v7260_v33  ;;  %v7388_v33 = vcombine.high %v437_v28, %v445_v29 }
 0x3d1   :  { %5154 = vmatmul.mubr.bf16.gmra.mrb[72].mxu1 %v7251_v38  ;;  %v7379_v38 = vcombine.low %v433_v26, %v441_v27 }
 0x3d2   :  { %6310 = vmatmul.mubr.bf16.gmra.mrb[72].mxu0 %v7259_v39  ;;  %5161 = vmatprep.mubr.bf16.mxu1 %v7268_v40  ;;  %v7387_v39 = vcombine.low %v437_v28, %v445_v29  ;;  %v7396_v40 = vcombine.high %v449_v34, %v457_v35  ;;  %v505_v28 = vld [vmem:[%s11062_s0 + $0xf58] sm:$0xff] }
 0x3d3   :  { %6317 = vmatprep.mubr.bf16.mxu0 %v7276_v41  ;;  %v7404_v41 = vcombine.high %v453_v36, %v461_v37  ;;  %v501_v29 = vld [vmem:[%s11062_s0 + $0xf38] sm:$0xff]  ;;  %v7435_v37 = vcombine.low %v485_v4, %v493_v5 }
 0x3d9   :  { %5162 = vmatmul.mubr.bf16.gmra.mrb[76].mxu1 %v7267_v46  ;;  %v477_v46 = vld [vmem:[%s11062_s0 + $0xe78] sm:$0xff] }
 0x3da   :  { %6318 = vmatmul.mubr.bf16.gmra.mrb[76].mxu0 %v7275_v47  ;;  %5169 = vmatprep.mubr.bf16.mxu1 %v7284_v48  ;;  %v7419_v12 = vcombine.low %v469_v45, %v477_v46 }
 0x3db   :  { %6325 = vmatprep.mubr.bf16.mxu0 %v7292_v49  ;;  %v7395_v49 = vcombine.low %v449_v34, %v457_v35 }
 0x3e1   :  { %5170 = vmatmul.mubr.bf16.gmra.mrb[80].mxu1 %v7283_v54  ;;  %v7412_v54 = vcombine.high %v465_v42, %v473_v43 }
 0x3e2   :  { %6326 = vmatmul.mubr.bf16.gmra.mrb[80].mxu0 %v7291_v55  ;;  %5177 = vmatprep.mubr.bf16.mxu1 %v7300_v56 }
 0x3e3   :  { %6333 = vmatprep.mubr.bf16.mxu0 %v7308_v57  ;;  %v7420_v57 = vcombine.high %v469_v45, %v477_v46 }
 0x3e9   :  { %5178 = vmatmul.mubr.bf16.gmra.mrb[84].mxu1 %v7299_v62 }
 0x3ea   :  { %6334 = vmatmul.mubr.bf16.gmra.mrb[84].mxu0 %v7307_v63  ;;  %5185 = vmatprep.mubr.bf16.mxu1 %v7316_v1  ;;  %v481_v1 = vld [vmem:[%s11062_s0 + $0xe98] sm:$0xff] }
 0x3eb   :  { %6341 = vmatprep.mubr.bf16.mxu0 %v7324_v2 }
 0x3f1   :  { %5186 = vmatmul.mubr.bf16.gmra.mrb[88].mxu1 %v7315_v6 }
 0x3f2   :  { %6342 = vmatmul.mubr.bf16.gmra.mrb[88].mxu0 %v7323_v7  ;;  %5193 = vmatprep.mubr.bf16.mxu1 %v7332_v8  ;;  %v7411_v8 = vcombine.low %v465_v42, %v473_v43 }
 0x3f3   :  { %6349 = vmatprep.mubr.bf16.mxu0 %v7340_v9 }
 0x3f9   :  { %5194 = vmatmul.mubr.bf16.gmra.mrb[92].mxu1 %v7331_v14 }
 0x3fa   :  { %6350 = vmatmul.mubr.bf16.gmra.mrb[92].mxu0 %v7339_v15  ;;  %5201 = vmatprep.mubr.bf16.mxu1 %v7348_v16  ;;  %v7428_v15 = vcombine.high %v481_v1, %v489_v0  ;;  %v7436_v16 = vcombine.high %v485_v4, %v493_v5 }
 0x3fb   :  { %6357 = vmatprep.mubr.bf16.mxu0 %v7356_v17 }
 0x401   :  { %5202 = vmatmul.mubr.bf16.gmra.mrb[96].mxu1 %v7347_v22 }
 0x402   :  { %6358 = vmatmul.mubr.bf16.gmra.mrb[96].mxu0 %v7355_v23  ;;  %5209 = vmatprep.mubr.bf16.mxu1 %v7364_v24 }
 0x403   :  { %6365 = vmatprep.mubr.bf16.mxu0 %v7372_v25  ;;  %v497_v25 = vld [vmem:[%s11062_s0 + $0xf18] sm:$0xff] }
 0x409   :  { %5210 = vmatmul.mubr.bf16.gmra.mrb[100].mxu1 %v7363_v30  ;;  %v509_v30 = vld [vmem:[%s11062_s0 + $0xf78] sm:$0xff] }
 0x40a   :  { %6366 = vmatmul.mubr.bf16.gmra.mrb[100].mxu0 %v7371_v31  ;;  %5217 = vmatprep.mubr.bf16.mxu1 %v7380_v32 }
 0x40b   :  { %6373 = vmatprep.mubr.bf16.mxu0 %v7388_v33  ;;  %v7427_v33 = vcombine.low %v481_v1, %v489_v0 }
 0x411   :  { %5218 = vmatmul.mubr.bf16.gmra.mrb[104].mxu1 %v7379_v38 }
 0x412   :  { %6374 = vmatmul.mubr.bf16.gmra.mrb[104].mxu0 %v7387_v39  ;;  %5225 = vmatprep.mubr.bf16.mxu1 %v7396_v40  ;;  %v7444_v40 = vcombine.high %v497_v25, %v505_v28 }
 0x413   :  { %6381 = vmatprep.mubr.bf16.mxu0 %v7404_v41  ;;  %v7452_v41 = vcombine.high %v501_v29, %v509_v30 }
 0x414   :  { %v5011_v44 = vpop.f32.mrb[0].mxu1 }
 0x415   :  { %v6167_v47 = vpop.f32.mrb[0].mxu0  ;;  %v5013_v48 = vpop.f32.mrb[1].mxu1 }
 0x416   :  { %v7916_v50 = vadd.f32 %v6167_v47, %v5011_v44  ;;  %v6169_v51 = vpop.f32.mrb[1].mxu0  ;;  %v5014_v52 = vpop.f32.mrb[2].mxu1 }
 0x417   :  { %v6170_v55 = vpop.f32.mrb[2].mxu0  ;;  %v5016_v56 = vpop.f32.mrb[3].mxu1 }
 0x418   :  { %v7917_v58 = vadd.f32 %v6170_v55, %v5014_v52  ;;  %v6172_v59 = vpop.f32.mrb[3].mxu0  ;;  %v6491_v60 = vmul.f32 %v7916_v50, %v7916_v50  ;;  %v525_v55 = vld [vmem:[%s11062_s0 + $0xff8] sm:$0xff] }
 0x419   :  { %5226 = vmatmul.mubr.bf16.gmra.mrb[108].mxu1 %v7395_v49 }
 0x41a   :  { %v6422_v61 = vadd.f32 %v7917_v58, %v7916_v50  ;;  %v6492_v62 = vmul.f32 %v7917_v58, %v7917_v58  ;;  %v7728_v63 = vpack.c.bf16 %v7917_v58, %v7916_v50  ;;  %6382 = vmatmul.mubr.bf16.gmra.mrb[108].mxu0 %v7403_v53  ;;  %5233 = vmatprep.mubr.bf16.mxu1 %v7412_v54  ;;  %v513_v50 = vld [vmem:[%s11062_s0 + $0xf98] sm:$0xff] }
 0x41b   :  { %6389 = vmatprep.mubr.bf16.mxu0 %v7420_v57  ;;  %v521_v53 = vld [vmem:[%s11062_s0 + $0xfd8] sm:$0xff]  ;;  %v7443_v58 = vcombine.low %v497_v25, %v505_v28 }
 0x41c   :  { %v6555_v2 = vadd.f32 %v6492_v62, %v6491_v60  ;;  %7729 = vst [vmem:[%s11063_s2] sm:$0xff] %v7728_v63   ;;  %v5019_v3 = vpop.f32.mrb[4].mxu1  ;;  %v517_v54 = vld [vmem:[%s11062_s0 + $0xfb8] sm:$0xff]  ;;  %v7451_v62 = vcombine.low %v501_v29, %v509_v30 }
 0x41d   :  { %v6175_v6 = vpop.f32.mrb[4].mxu0  ;;  %v5021_v7 = vpop.f32.mrb[5].mxu1 }
 0x41e   :  { %v7918_v9 = vadd.f32 %v6175_v6, %v5019_v3  ;;  %v6177_v10 = vpop.f32.mrb[5].mxu0  ;;  %v5022_v11 = vpop.f32.mrb[6].mxu1  ;;  %v7468_v3 = vcombine.high %v517_v54, %v525_v55 }
 0x41f   :  { %v6178_v13 = vpop.f32.mrb[6].mxu0  ;;  %v5024_v14 = vpop.f32.mrb[7].mxu1 }
 0x420   :  { %v6423_v17 = vadd.f32 %v7918_v9, %v6422_v61  ;;  %v6493_v18 = vmul.f32 %v7918_v9, %v7918_v9  ;;  %v7919_v19 = vadd.f32 %v6178_v13, %v5022_v11  ;;  %v6180_v20 = vpop.f32.mrb[7].mxu0 }
 0x421   :  { %5234 = vmatmul.mubr.bf16.gmra.mrb[112].mxu1 %v7411_v8 }
 0x422   :  { %v6556_v21 = vadd.f32 %v6555_v2, %v6493_v18  ;;  %v6424_v22 = vadd.f32 %v7919_v19, %v6423_v17  ;;  %v6494_v23 = vmul.f32 %v7919_v19, %v7919_v19  ;;  %v7733_v24 = vpack.c.bf16 %v7919_v19, %v7918_v9  ;;  %6390 = vmatmul.mubr.bf16.gmra.mrb[112].mxu0 %v7419_v12 }
 0x423   :  { %5241 = vmatprep.mubr.bf16.mxu1 %v7428_v15  ;;  %6397 = vmatprep.mubr.bf16.mxu0 %v7436_v16  ;;  %v7460_v2 = vcombine.high %v513_v50, %v521_v53  ;;  %v7459_v15 = vcombine.low %v513_v50, %v521_v53  ;;  %v7467_v19 = vcombine.low %v517_v54, %v525_v55 }
 0x424   :  { %v6557_v26 = vadd.f32 %v6556_v21, %v6494_v23  ;;  %7885 = vst [vmem:[%s11063_s2 + $0x8] sm:$0xff] %v7733_v24   ;;  %v5027_v27 = vpop.f32.mrb[8].mxu1 }
 0x425   :  { %v6183_v31 = vpop.f32.mrb[8].mxu0  ;;  %v5029_v32 = vpop.f32.mrb[9].mxu1 }
 0x426   :  { %v7920_v34 = vadd.f32 %v6183_v31, %v5027_v27  ;;  %v6185_v35 = vpop.f32.mrb[9].mxu0  ;;  %v5030_v36 = vpop.f32.mrb[10].mxu1 }
 0x427   :  { %v6186_v38 = vpop.f32.mrb[10].mxu0  ;;  %v5032_v39 = vpop.f32.mrb[11].mxu1 }
 0x428   :  { %v6425_v42 = vadd.f32 %v7920_v34, %v6424_v22  ;;  %v6495_v43 = vmul.f32 %v7920_v34, %v7920_v34  ;;  %v7921_v44 = vadd.f32 %v6186_v38, %v5030_v36  ;;  %v6188_v45 = vpop.f32.mrb[11].mxu0 }
 0x429   :  { %5242 = vmatmul.mubr.bf16.gmra.mrb[116].mxu1 %v7427_v33 }
 0x42a   :  { %v6558_v46 = vadd.f32 %v6557_v26, %v6495_v43  ;;  %v6426_v47 = vadd.f32 %v7921_v44, %v6425_v42  ;;  %v6496_v48 = vmul.f32 %v7921_v44, %v7921_v44  ;;  %v7738_v49 = vpack.c.bf16 %v7921_v44, %v7920_v34  ;;  %6398 = vmatmul.mubr.bf16.gmra.mrb[116].mxu0 %v7435_v37 }
 0x42b   :  { %5249 = vmatprep.mubr.bf16.mxu1 %v7444_v40  ;;  %6405 = vmatprep.mubr.bf16.mxu0 %v7452_v41 }
 0x42c   :  { %v6559_v51 = vadd.f32 %v6558_v46, %v6496_v48  ;;  %7886 = vst [vmem:[%s11063_s2 + $0x10] sm:$0xff] %v7738_v49   ;;  %v5035_v52 = vpop.f32.mrb[12].mxu1 }
 0x42d   :  { %v6191_v56 = vpop.f32.mrb[12].mxu0  ;;  %v5037_v57 = vpop.f32.mrb[13].mxu1 }
 0x42e   :  { %v7922_v59 = vadd.f32 %v6191_v56, %v5035_v52  ;;  %v6193_v60 = vpop.f32.mrb[13].mxu0  ;;  %v5038_v61 = vpop.f32.mrb[14].mxu1 }
 0x42f   :  { %v6194_v63 = vpop.f32.mrb[14].mxu0  ;;  %v5040_v1 = vpop.f32.mrb[15].mxu1 }
 0x430   :  { %v6427_v0 = vadd.f32 %v7922_v59, %v6426_v47  ;;  %v6497_v4 = vmul.f32 %v7922_v59, %v7922_v59  ;;  %v7923_v5 = vadd.f32 %v6194_v63, %v5038_v61  ;;  %v6196_v6 = vpop.f32.mrb[15].mxu0 }
 0x431   :  { %5250 = vmatmul.mubr.bf16.gmra.mrb[120].mxu1 %v7443_v58 }
 0x432   :  { %v6560_v7 = vadd.f32 %v6559_v51, %v6497_v4  ;;  %v6428_v8 = vadd.f32 %v7923_v5, %v6427_v0  ;;  %v6498_v9 = vmul.f32 %v7923_v5, %v7923_v5  ;;  %v7743_v10 = vpack.c.bf16 %v7923_v5, %v7922_v59  ;;  %6406 = vmatmul.mubr.bf16.gmra.mrb[120].mxu0 %v7451_v62 }
 0x433   :  { %5257 = vmatprep.mubr.bf16.mxu1 %v7460_v2  ;;  %6413 = vmatprep.mubr.bf16.mxu0 %v7468_v3 }
 0x434   :  { %v6561_v11 = vadd.f32 %v6560_v7, %v6498_v9  ;;  %7887 = vst [vmem:[%s11063_s2 + $0x18] sm:$0xff] %v7743_v10   ;;  %v5043_v12 = vpop.f32.mrb[16].mxu1 }
 0x435   :  { %v6199_v13 = vpop.f32.mrb[16].mxu0  ;;  %v5045_v14 = vpop.f32.mrb[17].mxu1 }
 0x436   :  { %v7924_v16 = vadd.f32 %v6199_v13, %v5043_v12  ;;  %v6201_v17 = vpop.f32.mrb[17].mxu0  ;;  %v5046_v18 = vpop.f32.mrb[18].mxu1 }
 0x437   :  { %v6202_v20 = vpop.f32.mrb[18].mxu0  ;;  %v5048_v21 = vpop.f32.mrb[19].mxu1 }
 0x438   :  { %v6429_v22 = vadd.f32 %v7924_v16, %v6428_v8  ;;  %v6499_v23 = vmul.f32 %v7924_v16, %v7924_v16  ;;  %v7925_v24 = vadd.f32 %v6202_v20, %v5046_v18  ;;  %v6204_v25 = vpop.f32.mrb[19].mxu0 }
 0x439   :  { %5258 = vmatmul.mubr.bf16.gmra.mrb[124].mxu1 %v7459_v15 }
 0x43a   :  { %v6562_v26 = vadd.f32 %v6561_v11, %v6499_v23  ;;  %v6430_v27 = vadd.f32 %v7925_v24, %v6429_v22  ;;  %v6500_v28 = vmul.f32 %v7925_v24, %v7925_v24  ;;  %v7748_v29 = vpack.c.bf16 %v7925_v24, %v7924_v16  ;;  %6414 = vmatmul.mubr.bf16.gmra.mrb[124].mxu0 %v7467_v19 }
 0x43c   :  { %v6563_v30 = vadd.f32 %v6562_v26, %v6500_v28  ;;  %7888 = vst [vmem:[%s11063_s2 + $0x20] sm:$0xff] %v7748_v29   ;;  %v5051_v31 = vpop.f32.mrb[20].mxu1 }
 0x43d   :  { %v6207_v32 = vpop.f32.mrb[20].mxu0  ;;  %v5053_v33 = vpop.f32.mrb[21].mxu1 }
 0x43e   :  { %v7926_v34 = vadd.f32 %v6207_v32, %v5051_v31  ;;  %v6209_v35 = vpop.f32.mrb[21].mxu0  ;;  %v5054_v36 = vpop.f32.mrb[22].mxu1 }
 0x43f   :  { %v6210_v37 = vpop.f32.mrb[22].mxu0  ;;  %v5056_v38 = vpop.f32.mrb[23].mxu1 }
 0x440   :  { %v6431_v39 = vadd.f32 %v7926_v34, %v6430_v27  ;;  %v6501_v40 = vmul.f32 %v7926_v34, %v7926_v34  ;;  %v7927_v41 = vadd.f32 %v6210_v37, %v5054_v36  ;;  %v6212_v42 = vpop.f32.mrb[23].mxu0 }
 0x442   :  { %v6564_v43 = vadd.f32 %v6563_v30, %v6501_v40  ;;  %v6432_v44 = vadd.f32 %v7927_v41, %v6431_v39  ;;  %v6502_v45 = vmul.f32 %v7927_v41, %v7927_v41  ;;  %v7753_v46 = vpack.c.bf16 %v7927_v41, %v7926_v34 }
 0x444   :  { %v6565_v47 = vadd.f32 %v6564_v43, %v6502_v45  ;;  %7889 = vst [vmem:[%s11063_s2 + $0x28] sm:$0xff] %v7753_v46   ;;  %v5059_v48 = vpop.f32.mrb[24].mxu1 }
 0x445   :  { %v6215_v49 = vpop.f32.mrb[24].mxu0  ;;  %v5061_v50 = vpop.f32.mrb[25].mxu1 }
 0x446   :  { %v7928_v51 = vadd.f32 %v6215_v49, %v5059_v48  ;;  %v6217_v52 = vpop.f32.mrb[25].mxu0  ;;  %v5062_v53 = vpop.f32.mrb[26].mxu1 }
 0x447   :  { %v6218_v54 = vpop.f32.mrb[26].mxu0  ;;  %v5064_v55 = vpop.f32.mrb[27].mxu1 }
 0x448   :  { %v6433_v56 = vadd.f32 %v7928_v51, %v6432_v44  ;;  %v6503_v57 = vmul.f32 %v7928_v51, %v7928_v51  ;;  %v7929_v58 = vadd.f32 %v6218_v54, %v5062_v53  ;;  %v6220_v59 = vpop.f32.mrb[27].mxu0 }
 0x44a   :  { %v6566_v60 = vadd.f32 %v6565_v47, %v6503_v57  ;;  %v6434_v61 = vadd.f32 %v7929_v58, %v6433_v56  ;;  %v6504_v62 = vmul.f32 %v7929_v58, %v7929_v58  ;;  %v7758_v63 = vpack.c.bf16 %v7929_v58, %v7928_v51 }
 0x44c   :  { %v6567_v1 = vadd.f32 %v6566_v60, %v6504_v62  ;;  %7890 = vst [vmem:[%s11063_s2 + $0x30] sm:$0xff] %v7758_v63   ;;  %v5067_v2 = vpop.f32.mrb[28].mxu1 }
 0x44d   :  { %v6223_v3 = vpop.f32.mrb[28].mxu0  ;;  %v5069_v0 = vpop.f32.mrb[29].mxu1 }
 0x44e   :  { %v7930_v4 = vadd.f32 %v6223_v3, %v5067_v2  ;;  %v6225_v5 = vpop.f32.mrb[29].mxu0  ;;  %v5070_v6 = vpop.f32.mrb[30].mxu1 }
 0x44f   :  { %v6226_v7 = vpop.f32.mrb[30].mxu0  ;;  %v5072_v8 = vpop.f32.mrb[31].mxu1 }
 0x450   :  { %v6435_v9 = vadd.f32 %v7930_v4, %v6434_v61  ;;  %v6505_v10 = vmul.f32 %v7930_v4, %v7930_v4  ;;  %v7931_v11 = vadd.f32 %v6226_v7, %v5070_v6  ;;  %v6228_v12 = vpop.f32.mrb[31].mxu0 }
 0x452   :  { %v6568_v13 = vadd.f32 %v6567_v1, %v6505_v10  ;;  %v6436_v14 = vadd.f32 %v7931_v11, %v6435_v9  ;;  %v6506_v15 = vmul.f32 %v7931_v11, %v7931_v11  ;;  %v7763_v16 = vpack.c.bf16 %v7931_v11, %v7930_v4 }
 0x454   :  { %v6569_v17 = vadd.f32 %v6568_v13, %v6506_v15  ;;  %7891 = vst [vmem:[%s11063_s2 + $0x38] sm:$0xff] %v7763_v16   ;;  %v5075_v18 = vpop.f32.mrb[32].mxu1 }
 0x455   :  { %v6231_v19 = vpop.f32.mrb[32].mxu0  ;;  %v5077_v20 = vpop.f32.mrb[33].mxu1 }
 0x456   :  { %v7932_v21 = vadd.f32 %v6231_v19, %v5075_v18  ;;  %v6233_v22 = vpop.f32.mrb[33].mxu0  ;;  %v5078_v23 = vpop.f32.mrb[34].mxu1 }
 0x457   :  { %v6234_v24 = vpop.f32.mrb[34].mxu0  ;;  %v5080_v25 = vpop.f32.mrb[35].mxu1 }
 0x458   :  { %v6437_v26 = vadd.f32 %v7932_v21, %v6436_v14  ;;  %v6507_v27 = vmul.f32 %v7932_v21, %v7932_v21  ;;  %v7933_v28 = vadd.f32 %v6234_v24, %v5078_v23  ;;  %v6236_v29 = vpop.f32.mrb[35].mxu0 }
 0x45a   :  { %v6570_v30 = vadd.f32 %v6569_v17, %v6507_v27  ;;  %v6438_v31 = vadd.f32 %v7933_v28, %v6437_v26  ;;  %v6508_v32 = vmul.f32 %v7933_v28, %v7933_v28  ;;  %v7768_v33 = vpack.c.bf16 %v7933_v28, %v7932_v21 }
 0x45c   :  { %v6571_v34 = vadd.f32 %v6570_v30, %v6508_v32  ;;  %7892 = vst [vmem:[%s11063_s2 + $0x40] sm:$0xff] %v7768_v33   ;;  %v5083_v35 = vpop.f32.mrb[36].mxu1 }
 0x45d   :  { %v6239_v36 = vpop.f32.mrb[36].mxu0  ;;  %v5085_v37 = vpop.f32.mrb[37].mxu1 }
 0x45e   :  { %v7934_v38 = vadd.f32 %v6239_v36, %v5083_v35  ;;  %v6241_v39 = vpop.f32.mrb[37].mxu0  ;;  %v5086_v40 = vpop.f32.mrb[38].mxu1 }
 0x45f   :  { %v6242_v41 = vpop.f32.mrb[38].mxu0  ;;  %v5088_v42 = vpop.f32.mrb[39].mxu1 }
 0x460   :  { %v6439_v43 = vadd.f32 %v7934_v38, %v6438_v31  ;;  %v6509_v44 = vmul.f32 %v7934_v38, %v7934_v38  ;;  %v7935_v45 = vadd.f32 %v6242_v41, %v5086_v40  ;;  %v6244_v46 = vpop.f32.mrb[39].mxu0 }
 0x462   :  { %v6572_v47 = vadd.f32 %v6571_v34, %v6509_v44  ;;  %v6440_v48 = vadd.f32 %v7935_v45, %v6439_v43  ;;  %v6510_v49 = vmul.f32 %v7935_v45, %v7935_v45  ;;  %v7773_v50 = vpack.c.bf16 %v7935_v45, %v7934_v38 }
 0x464   :  { %v6573_v51 = vadd.f32 %v6572_v47, %v6510_v49  ;;  %7893 = vst [vmem:[%s11063_s2 + $0x48] sm:$0xff] %v7773_v50   ;;  %v5091_v52 = vpop.f32.mrb[40].mxu1 }
 0x465   :  { %v6247_v53 = vpop.f32.mrb[40].mxu0  ;;  %v5093_v54 = vpop.f32.mrb[41].mxu1 }
 0x466   :  { %v7936_v55 = vadd.f32 %v6247_v53, %v5091_v52  ;;  %v6249_v56 = vpop.f32.mrb[41].mxu0  ;;  %v5094_v57 = vpop.f32.mrb[42].mxu1 }
 0x467   :  { %v6250_v58 = vpop.f32.mrb[42].mxu0  ;;  %v5096_v59 = vpop.f32.mrb[43].mxu1 }
 0x468   :  { %v6441_v60 = vadd.f32 %v7936_v55, %v6440_v48  ;;  %v6511_v61 = vmul.f32 %v7936_v55, %v7936_v55  ;;  %v7937_v62 = vadd.f32 %v6250_v58, %v5094_v57  ;;  %v6252_v63 = vpop.f32.mrb[43].mxu0 }
 0x46a   :  { %v6574_v1 = vadd.f32 %v6573_v51, %v6511_v61  ;;  %v6442_v2 = vadd.f32 %v7937_v62, %v6441_v60  ;;  %v6512_v3 = vmul.f32 %v7937_v62, %v7937_v62  ;;  %v7778_v0 = vpack.c.bf16 %v7937_v62, %v7936_v55 }
 0x46c   :  { %v6575_v4 = vadd.f32 %v6574_v1, %v6512_v3  ;;  %7894 = vst [vmem:[%s11063_s2 + $0x50] sm:$0xff] %v7778_v0   ;;  %v5099_v5 = vpop.f32.mrb[44].mxu1 }
 0x46d   :  { %v6255_v6 = vpop.f32.mrb[44].mxu0  ;;  %v5101_v7 = vpop.f32.mrb[45].mxu1 }
 0x46e   :  { %v7938_v8 = vadd.f32 %v6255_v6, %v5099_v5  ;;  %v6257_v9 = vpop.f32.mrb[45].mxu0  ;;  %v5102_v10 = vpop.f32.mrb[46].mxu1 }
 0x46f   :  { %v6258_v11 = vpop.f32.mrb[46].mxu0  ;;  %v5104_v12 = vpop.f32.mrb[47].mxu1 }
 0x470   :  { %v6443_v13 = vadd.f32 %v7938_v8, %v6442_v2  ;;  %v6513_v14 = vmul.f32 %v7938_v8, %v7938_v8  ;;  %v7939_v15 = vadd.f32 %v6258_v11, %v5102_v10  ;;  %v6260_v16 = vpop.f32.mrb[47].mxu0 }
 0x472   :  { %v6576_v17 = vadd.f32 %v6575_v4, %v6513_v14  ;;  %v6444_v18 = vadd.f32 %v7939_v15, %v6443_v13  ;;  %v6514_v19 = vmul.f32 %v7939_v15, %v7939_v15  ;;  %v7783_v20 = vpack.c.bf16 %v7939_v15, %v7938_v8 }
 0x474   :  { %v6577_v21 = vadd.f32 %v6576_v17, %v6514_v19  ;;  %7895 = vst [vmem:[%s11063_s2 + $0x58] sm:$0xff] %v7783_v20   ;;  %v5107_v22 = vpop.f32.mrb[48].mxu1 }
 0x475   :  { %v6263_v23 = vpop.f32.mrb[48].mxu0  ;;  %v5109_v24 = vpop.f32.mrb[49].mxu1 }
 0x476   :  { %v7940_v25 = vadd.f32 %v6263_v23, %v5107_v22  ;;  %v6265_v26 = vpop.f32.mrb[49].mxu0  ;;  %v5110_v27 = vpop.f32.mrb[50].mxu1 }
 0x477   :  { %v6266_v28 = vpop.f32.mrb[50].mxu0  ;;  %v5112_v29 = vpop.f32.mrb[51].mxu1 }
 0x478   :  { %v6445_v30 = vadd.f32 %v7940_v25, %v6444_v18  ;;  %v6515_v31 = vmul.f32 %v7940_v25, %v7940_v25  ;;  %v7941_v32 = vadd.f32 %v6266_v28, %v5110_v27  ;;  %v6268_v33 = vpop.f32.mrb[51].mxu0 }
 0x47a   :  { %v6578_v34 = vadd.f32 %v6577_v21, %v6515_v31  ;;  %v6446_v35 = vadd.f32 %v7941_v32, %v6445_v30  ;;  %v6516_v36 = vmul.f32 %v7941_v32, %v7941_v32  ;;  %v7788_v37 = vpack.c.bf16 %v7941_v32, %v7940_v25 }
 0x47c   :  { %v6579_v38 = vadd.f32 %v6578_v34, %v6516_v36  ;;  %7896 = vst [vmem:[%s11063_s2 + $0x60] sm:$0xff] %v7788_v37   ;;  %v5115_v39 = vpop.f32.mrb[52].mxu1 }
 0x47d   :  { %v6271_v40 = vpop.f32.mrb[52].mxu0  ;;  %v5117_v41 = vpop.f32.mrb[53].mxu1 }
 0x47e   :  { %v7942_v42 = vadd.f32 %v6271_v40, %v5115_v39  ;;  %v6273_v43 = vpop.f32.mrb[53].mxu0  ;;  %v5118_v44 = vpop.f32.mrb[54].mxu1 }
 0x47f   :  { %v6274_v45 = vpop.f32.mrb[54].mxu0  ;;  %v5120_v46 = vpop.f32.mrb[55].mxu1 }
 0x480   :  { %v6447_v47 = vadd.f32 %v7942_v42, %v6446_v35  ;;  %v6517_v48 = vmul.f32 %v7942_v42, %v7942_v42  ;;  %v7943_v49 = vadd.f32 %v6274_v45, %v5118_v44  ;;  %v6276_v50 = vpop.f32.mrb[55].mxu0 }
 0x482   :  { %v6580_v51 = vadd.f32 %v6579_v38, %v6517_v48  ;;  %v6448_v52 = vadd.f32 %v7943_v49, %v6447_v47  ;;  %v6518_v53 = vmul.f32 %v7943_v49, %v7943_v49  ;;  %v7793_v54 = vpack.c.bf16 %v7943_v49, %v7942_v42 }
 0x484   :  { %v6581_v55 = vadd.f32 %v6580_v51, %v6518_v53  ;;  %7897 = vst [vmem:[%s11063_s2 + $0x68] sm:$0xff] %v7793_v54   ;;  %v5123_v56 = vpop.f32.mrb[56].mxu1 }
 0x485   :  { %v6279_v57 = vpop.f32.mrb[56].mxu0  ;;  %v5125_v58 = vpop.f32.mrb[57].mxu1 }
 0x486   :  { %v7944_v59 = vadd.f32 %v6279_v57, %v5123_v56  ;;  %v6281_v60 = vpop.f32.mrb[57].mxu0  ;;  %v5126_v61 = vpop.f32.mrb[58].mxu1 }
 0x487   :  { %v6282_v62 = vpop.f32.mrb[58].mxu0  ;;  %v5128_v63 = vpop.f32.mrb[59].mxu1 }
 0x488   :  { %v6449_v1 = vadd.f32 %v7944_v59, %v6448_v52  ;;  %v6519_v2 = vmul.f32 %v7944_v59, %v7944_v59  ;;  %v7945_v3 = vadd.f32 %v6282_v62, %v5126_v61  ;;  %v6284_v0 = vpop.f32.mrb[59].mxu0 }
 0x48a   :  { %v6582_v4 = vadd.f32 %v6581_v55, %v6519_v2  ;;  %v6450_v5 = vadd.f32 %v7945_v3, %v6449_v1  ;;  %v6520_v6 = vmul.f32 %v7945_v3, %v7945_v3  ;;  %v7798_v7 = vpack.c.bf16 %v7945_v3, %v7944_v59 }
 0x48c   :  { %v6583_v8 = vadd.f32 %v6582_v4, %v6520_v6  ;;  %7898 = vst [vmem:[%s11063_s2 + $0x70] sm:$0xff] %v7798_v7   ;;  %v5131_v9 = vpop.f32.mrb[60].mxu1 }
 0x48d   :  { %v6287_v10 = vpop.f32.mrb[60].mxu0  ;;  %v5133_v11 = vpop.f32.mrb[61].mxu1 }
 0x48e   :  { %v7946_v12 = vadd.f32 %v6287_v10, %v5131_v9  ;;  %v6289_v13 = vpop.f32.mrb[61].mxu0  ;;  %v5134_v14 = vpop.f32.mrb[62].mxu1 }
 0x48f   :  { %v6290_v15 = vpop.f32.mrb[62].mxu0  ;;  %v5136_v16 = vpop.f32.mrb[63].mxu1 }
 0x490   :  { %v6451_v17 = vadd.f32 %v7946_v12, %v6450_v5  ;;  %v6521_v18 = vmul.f32 %v7946_v12, %v7946_v12  ;;  %v7947_v19 = vadd.f32 %v6290_v15, %v5134_v14  ;;  %v6292_v20 = vpop.f32.mrb[63].mxu0 }
 0x492   :  { %v6584_v21 = vadd.f32 %v6583_v8, %v6521_v18  ;;  %v6452_v22 = vadd.f32 %v7947_v19, %v6451_v17  ;;  %v6522_v23 = vmul.f32 %v7947_v19, %v7947_v19  ;;  %v7803_v24 = vpack.c.bf16 %v7947_v19, %v7946_v12 }
 0x494   :  { %v6585_v25 = vadd.f32 %v6584_v21, %v6522_v23  ;;  %7899 = vst [vmem:[%s11063_s2 + $0x78] sm:$0xff] %v7803_v24   ;;  %v5139_v26 = vpop.f32.mrb[64].mxu1 }
 0x495   :  { %v6295_v27 = vpop.f32.mrb[64].mxu0  ;;  %v5141_v28 = vpop.f32.mrb[65].mxu1 }
 0x496   :  { %v7948_v29 = vadd.f32 %v6295_v27, %v5139_v26  ;;  %v6297_v30 = vpop.f32.mrb[65].mxu0  ;;  %v5142_v31 = vpop.f32.mrb[66].mxu1 }
 0x497   :  { %v6298_v32 = vpop.f32.mrb[66].mxu0  ;;  %v5144_v33 = vpop.f32.mrb[67].mxu1 }
 0x498   :  { %v6453_v34 = vadd.f32 %v7948_v29, %v6452_v22  ;;  %v6523_v35 = vmul.f32 %v7948_v29, %v7948_v29  ;;  %v7949_v36 = vadd.f32 %v6298_v32, %v5142_v31  ;;  %v6300_v37 = vpop.f32.mrb[67].mxu0 }
 0x49a   :  { %v6586_v38 = vadd.f32 %v6585_v25, %v6523_v35  ;;  %v6454_v39 = vadd.f32 %v7949_v36, %v6453_v34  ;;  %v6524_v40 = vmul.f32 %v7949_v36, %v7949_v36  ;;  %v7808_v41 = vpack.c.bf16 %v7949_v36, %v7948_v29 }
 0x49c   :  { %v6587_v42 = vadd.f32 %v6586_v38, %v6524_v40  ;;  %7900 = vst [vmem:[%s11063_s2 + $0x80] sm:$0xff] %v7808_v41   ;;  %v5147_v43 = vpop.f32.mrb[68].mxu1 }
 0x49d   :  { %v6303_v44 = vpop.f32.mrb[68].mxu0  ;;  %v5149_v45 = vpop.f32.mrb[69].mxu1 }
 0x49e   :  { %v7950_v46 = vadd.f32 %v6303_v44, %v5147_v43  ;;  %v6305_v47 = vpop.f32.mrb[69].mxu0  ;;  %v5150_v48 = vpop.f32.mrb[70].mxu1 }
 0x49f   :  { %v6306_v49 = vpop.f32.mrb[70].mxu0  ;;  %v5152_v50 = vpop.f32.mrb[71].mxu1 }
 0x4a0   :  { %v6455_v51 = vadd.f32 %v7950_v46, %v6454_v39  ;;  %v6525_v52 = vmul.f32 %v7950_v46, %v7950_v46  ;;  %v7951_v53 = vadd.f32 %v6306_v49, %v5150_v48  ;;  %v6308_v54 = vpop.f32.mrb[71].mxu0 }
 0x4a2   :  { %v6588_v55 = vadd.f32 %v6587_v42, %v6525_v52  ;;  %v6456_v56 = vadd.f32 %v7951_v53, %v6455_v51  ;;  %v6526_v57 = vmul.f32 %v7951_v53, %v7951_v53  ;;  %v7813_v58 = vpack.c.bf16 %v7951_v53, %v7950_v46 }
 0x4a4   :  { %v6589_v59 = vadd.f32 %v6588_v55, %v6526_v57  ;;  %7901 = vst [vmem:[%s11063_s2 + $0x88] sm:$0xff] %v7813_v58   ;;  %v5155_v60 = vpop.f32.mrb[72].mxu1 }
 0x4a5   :  { %v6311_v61 = vpop.f32.mrb[72].mxu0  ;;  %v5157_v62 = vpop.f32.mrb[73].mxu1 }
 0x4a6   :  { %v7952_v63 = vadd.f32 %v6311_v61, %v5155_v60  ;;  %v6313_v1 = vpop.f32.mrb[73].mxu0  ;;  %v5158_v2 = vpop.f32.mrb[74].mxu1 }
 0x4a7   :  { %v6314_v3 = vpop.f32.mrb[74].mxu0  ;;  %v5160_v0 = vpop.f32.mrb[75].mxu1 }
 0x4a8   :  { %v6457_v4 = vadd.f32 %v7952_v63, %v6456_v56  ;;  %v6527_v5 = vmul.f32 %v7952_v63, %v7952_v63  ;;  %v7953_v6 = vadd.f32 %v6314_v3, %v5158_v2  ;;  %v6316_v7 = vpop.f32.mrb[75].mxu0 }
 0x4aa   :  { %v6590_v8 = vadd.f32 %v6589_v59, %v6527_v5  ;;  %v6458_v9 = vadd.f32 %v7953_v6, %v6457_v4  ;;  %v6528_v10 = vmul.f32 %v7953_v6, %v7953_v6  ;;  %v7818_v11 = vpack.c.bf16 %v7953_v6, %v7952_v63 }
 0x4ac   :  { %v6591_v12 = vadd.f32 %v6590_v8, %v6528_v10  ;;  %7902 = vst [vmem:[%s11063_s2 + $0x90] sm:$0xff] %v7818_v11   ;;  %v5163_v13 = vpop.f32.mrb[76].mxu1 }
 0x4ad   :  { %v6319_v14 = vpop.f32.mrb[76].mxu0  ;;  %v5165_v15 = vpop.f32.mrb[77].mxu1 }
 0x4ae   :  { %v7954_v16 = vadd.f32 %v6319_v14, %v5163_v13  ;;  %v6321_v17 = vpop.f32.mrb[77].mxu0  ;;  %v5166_v18 = vpop.f32.mrb[78].mxu1 }
 0x4af   :  { %v6322_v19 = vpop.f32.mrb[78].mxu0  ;;  %v5168_v20 = vpop.f32.mrb[79].mxu1 }
 0x4b0   :  { %v6459_v21 = vadd.f32 %v7954_v16, %v6458_v9  ;;  %v6529_v22 = vmul.f32 %v7954_v16, %v7954_v16  ;;  %v7955_v23 = vadd.f32 %v6322_v19, %v5166_v18  ;;  %v6324_v24 = vpop.f32.mrb[79].mxu0 }
 0x4b2   :  { %v6592_v25 = vadd.f32 %v6591_v12, %v6529_v22  ;;  %v6460_v26 = vadd.f32 %v7955_v23, %v6459_v21  ;;  %v6530_v27 = vmul.f32 %v7955_v23, %v7955_v23  ;;  %v7823_v28 = vpack.c.bf16 %v7955_v23, %v7954_v16 }
 0x4b4   :  { %v6593_v29 = vadd.f32 %v6592_v25, %v6530_v27  ;;  %7903 = vst [vmem:[%s11063_s2 + $0x98] sm:$0xff] %v7823_v28   ;;  %v5171_v30 = vpop.f32.mrb[80].mxu1 }
 0x4b5   :  { %v6327_v31 = vpop.f32.mrb[80].mxu0  ;;  %v5173_v32 = vpop.f32.mrb[81].mxu1 }
 0x4b6   :  { %v7956_v33 = vadd.f32 %v6327_v31, %v5171_v30  ;;  %v6329_v34 = vpop.f32.mrb[81].mxu0  ;;  %v5174_v35 = vpop.f32.mrb[82].mxu1 }
 0x4b7   :  { %v6330_v36 = vpop.f32.mrb[82].mxu0  ;;  %v5176_v37 = vpop.f32.mrb[83].mxu1 }
 0x4b8   :  { %v6461_v38 = vadd.f32 %v7956_v33, %v6460_v26  ;;  %v6531_v39 = vmul.f32 %v7956_v33, %v7956_v33  ;;  %v7957_v40 = vadd.f32 %v6330_v36, %v5174_v35  ;;  %v6332_v41 = vpop.f32.mrb[83].mxu0 }
 0x4ba   :  { %v6594_v42 = vadd.f32 %v6593_v29, %v6531_v39  ;;  %v6462_v43 = vadd.f32 %v7957_v40, %v6461_v38  ;;  %v6532_v44 = vmul.f32 %v7957_v40, %v7957_v40  ;;  %v7828_v45 = vpack.c.bf16 %v7957_v40, %v7956_v33 }
 0x4bc   :  { %v6595_v46 = vadd.f32 %v6594_v42, %v6532_v44  ;;  %7904 = vst [vmem:[%s11063_s2 + $0xa0] sm:$0xff] %v7828_v45   ;;  %v5179_v47 = vpop.f32.mrb[84].mxu1 }
 0x4bd   :  { %v6335_v48 = vpop.f32.mrb[84].mxu0  ;;  %v5181_v49 = vpop.f32.mrb[85].mxu1 }
 0x4be   :  { %v7958_v50 = vadd.f32 %v6335_v48, %v5179_v47  ;;  %v6337_v51 = vpop.f32.mrb[85].mxu0  ;;  %v5182_v52 = vpop.f32.mrb[86].mxu1 }
 0x4bf   :  { %v6338_v53 = vpop.f32.mrb[86].mxu0  ;;  %v5184_v54 = vpop.f32.mrb[87].mxu1 }
 0x4c0   :  { %v6463_v55 = vadd.f32 %v7958_v50, %v6462_v43  ;;  %v6533_v56 = vmul.f32 %v7958_v50, %v7958_v50  ;;  %v7959_v57 = vadd.f32 %v6338_v53, %v5182_v52  ;;  %v6340_v58 = vpop.f32.mrb[87].mxu0 }
 0x4c2   :  { %v6596_v59 = vadd.f32 %v6595_v46, %v6533_v56  ;;  %v6464_v60 = vadd.f32 %v7959_v57, %v6463_v55  ;;  %v6534_v61 = vmul.f32 %v7959_v57, %v7959_v57  ;;  %v7833_v62 = vpack.c.bf16 %v7959_v57, %v7958_v50 }
 0x4c4   :  { %v6597_v63 = vadd.f32 %v6596_v59, %v6534_v61  ;;  %7905 = vst [vmem:[%s11063_s2 + $0xa8] sm:$0xff] %v7833_v62   ;;  %v5187_v1 = vpop.f32.mrb[88].mxu1 }
 0x4c5   :  { %v6343_v2 = vpop.f32.mrb[88].mxu0  ;;  %v5189_v3 = vpop.f32.mrb[89].mxu1 }
 0x4c6   :  { %v7960_v0 = vadd.f32 %v6343_v2, %v5187_v1  ;;  %v6345_v4 = vpop.f32.mrb[89].mxu0  ;;  %v5190_v5 = vpop.f32.mrb[90].mxu1 }
 0x4c7   :  { %v6346_v6 = vpop.f32.mrb[90].mxu0  ;;  %v5192_v7 = vpop.f32.mrb[91].mxu1 }
 0x4c8   :  { %v6465_v8 = vadd.f32 %v7960_v0, %v6464_v60  ;;  %v6535_v9 = vmul.f32 %v7960_v0, %v7960_v0  ;;  %v7961_v10 = vadd.f32 %v6346_v6, %v5190_v5  ;;  %v6348_v11 = vpop.f32.mrb[91].mxu0 }
 0x4ca   :  { %v6598_v12 = vadd.f32 %v6597_v63, %v6535_v9  ;;  %v6466_v13 = vadd.f32 %v7961_v10, %v6465_v8  ;;  %v6536_v14 = vmul.f32 %v7961_v10, %v7961_v10  ;;  %v7838_v15 = vpack.c.bf16 %v7961_v10, %v7960_v0 }
 0x4cc   :  { %v6599_v16 = vadd.f32 %v6598_v12, %v6536_v14  ;;  %7906 = vst [vmem:[%s11063_s2 + $0xb0] sm:$0xff] %v7838_v15   ;;  %v5195_v17 = vpop.f32.mrb[92].mxu1 }
 0x4cd   :  { %v6351_v18 = vpop.f32.mrb[92].mxu0  ;;  %v5197_v19 = vpop.f32.mrb[93].mxu1 }
 0x4ce   :  { %v7962_v20 = vadd.f32 %v6351_v18, %v5195_v17  ;;  %v6353_v21 = vpop.f32.mrb[93].mxu0  ;;  %v5198_v22 = vpop.f32.mrb[94].mxu1 }
 0x4cf   :  { %v6354_v23 = vpop.f32.mrb[94].mxu0  ;;  %v5200_v24 = vpop.f32.mrb[95].mxu1 }
 0x4d0   :  { %v6467_v25 = vadd.f32 %v7962_v20, %v6466_v13  ;;  %v6537_v26 = vmul.f32 %v7962_v20, %v7962_v20  ;;  %v7963_v27 = vadd.f32 %v6354_v23, %v5198_v22  ;;  %v6356_v28 = vpop.f32.mrb[95].mxu0 }
 0x4d2   :  { %v6600_v29 = vadd.f32 %v6599_v16, %v6537_v26  ;;  %v6468_v30 = vadd.f32 %v7963_v27, %v6467_v25  ;;  %v6538_v31 = vmul.f32 %v7963_v27, %v7963_v27  ;;  %v7843_v32 = vpack.c.bf16 %v7963_v27, %v7962_v20 }
 0x4d4   :  { %v6601_v33 = vadd.f32 %v6600_v29, %v6538_v31  ;;  %7907 = vst [vmem:[%s11063_s2 + $0xb8] sm:$0xff] %v7843_v32   ;;  %v5203_v34 = vpop.f32.mrb[96].mxu1 }
 0x4d5   :  { %v6359_v35 = vpop.f32.mrb[96].mxu0  ;;  %v5205_v36 = vpop.f32.mrb[97].mxu1 }
 0x4d6   :  { %v7964_v37 = vadd.f32 %v6359_v35, %v5203_v34  ;;  %v6361_v38 = vpop.f32.mrb[97].mxu0  ;;  %v5206_v39 = vpop.f32.mrb[98].mxu1 }
 0x4d7   :  { %v6362_v40 = vpop.f32.mrb[98].mxu0  ;;  %v5208_v41 = vpop.f32.mrb[99].mxu1 }
 0x4d8   :  { %v6469_v42 = vadd.f32 %v7964_v37, %v6468_v30  ;;  %v6539_v43 = vmul.f32 %v7964_v37, %v7964_v37  ;;  %v7965_v44 = vadd.f32 %v6362_v40, %v5206_v39  ;;  %v6364_v45 = vpop.f32.mrb[99].mxu0 }
 0x4da   :  { %v6602_v46 = vadd.f32 %v6601_v33, %v6539_v43  ;;  %v6470_v47 = vadd.f32 %v7965_v44, %v6469_v42  ;;  %v6540_v48 = vmul.f32 %v7965_v44, %v7965_v44  ;;  %v7848_v49 = vpack.c.bf16 %v7965_v44, %v7964_v37 }
 0x4dc   :  { %v6603_v50 = vadd.f32 %v6602_v46, %v6540_v48  ;;  %7908 = vst [vmem:[%s11063_s2 + $0xc0] sm:$0xff] %v7848_v49   ;;  %v5211_v51 = vpop.f32.mrb[100].mxu1 }
 0x4dd   :  { %v6367_v52 = vpop.f32.mrb[100].mxu0  ;;  %v5213_v53 = vpop.f32.mrb[101].mxu1 }
 0x4de   :  { %v7966_v54 = vadd.f32 %v6367_v52, %v5211_v51  ;;  %v6369_v55 = vpop.f32.mrb[101].mxu0  ;;  %v5214_v56 = vpop.f32.mrb[102].mxu1 }
 0x4df   :  { %v6370_v57 = vpop.f32.mrb[102].mxu0  ;;  %v5216_v58 = vpop.f32.mrb[103].mxu1 }
 0x4e0   :  { %v6471_v59 = vadd.f32 %v7966_v54, %v6470_v47  ;;  %v6541_v60 = vmul.f32 %v7966_v54, %v7966_v54  ;;  %v7967_v61 = vadd.f32 %v6370_v57, %v5214_v56  ;;  %v6372_v62 = vpop.f32.mrb[103].mxu0 }
 0x4e2   :  { %v6604_v63 = vadd.f32 %v6603_v50, %v6541_v60  ;;  %v6472_v1 = vadd.f32 %v7967_v61, %v6471_v59  ;;  %v6542_v2 = vmul.f32 %v7967_v61, %v7967_v61  ;;  %v7853_v3 = vpack.c.bf16 %v7967_v61, %v7966_v54 }
 0x4e4   :  { %v6605_v0 = vadd.f32 %v6604_v63, %v6542_v2  ;;  %7909 = vst [vmem:[%s11063_s2 + $0xc8] sm:$0xff] %v7853_v3   ;;  %v5219_v4 = vpop.f32.mrb[104].mxu1 }
 0x4e5   :  { %v6375_v5 = vpop.f32.mrb[104].mxu0  ;;  %v5221_v6 = vpop.f32.mrb[105].mxu1 }
 0x4e6   :  { %v7968_v7 = vadd.f32 %v6375_v5, %v5219_v4  ;;  %v6377_v8 = vpop.f32.mrb[105].mxu0  ;;  %v5222_v9 = vpop.f32.mrb[106].mxu1 }
 0x4e7   :  { %v6378_v10 = vpop.f32.mrb[106].mxu0  ;;  %v5224_v11 = vpop.f32.mrb[107].mxu1 }
 0x4e8   :  { %v6473_v12 = vadd.f32 %v7968_v7, %v6472_v1  ;;  %v6543_v13 = vmul.f32 %v7968_v7, %v7968_v7  ;;  %v7969_v14 = vadd.f32 %v6378_v10, %v5222_v9  ;;  %v6380_v15 = vpop.f32.mrb[107].mxu0 }
 0x4ea   :  { %v6606_v16 = vadd.f32 %v6605_v0, %v6543_v13  ;;  %v6474_v17 = vadd.f32 %v7969_v14, %v6473_v12  ;;  %v6544_v18 = vmul.f32 %v7969_v14, %v7969_v14  ;;  %v7858_v19 = vpack.c.bf16 %v7969_v14, %v7968_v7 }
 0x4ec   :  { %v6607_v20 = vadd.f32 %v6606_v16, %v6544_v18  ;;  %7910 = vst [vmem:[%s11063_s2 + $0xd0] sm:$0xff] %v7858_v19   ;;  %v5227_v21 = vpop.f32.mrb[108].mxu1 }
 0x4ed   :  { %v6383_v22 = vpop.f32.mrb[108].mxu0  ;;  %v5229_v23 = vpop.f32.mrb[109].mxu1 }
 0x4ee   :  { %v7970_v24 = vadd.f32 %v6383_v22, %v5227_v21  ;;  %v6385_v25 = vpop.f32.mrb[109].mxu0  ;;  %v5230_v26 = vpop.f32.mrb[110].mxu1 }
 0x4ef   :  { %v6386_v27 = vpop.f32.mrb[110].mxu0  ;;  %v5232_v28 = vpop.f32.mrb[111].mxu1 }
 0x4f0   :  { %v6475_v29 = vadd.f32 %v7970_v24, %v6474_v17  ;;  %v6545_v30 = vmul.f32 %v7970_v24, %v7970_v24  ;;  %v7971_v31 = vadd.f32 %v6386_v27, %v5230_v26  ;;  %v6388_v32 = vpop.f32.mrb[111].mxu0 }
 0x4f2   :  { %v6608_v33 = vadd.f32 %v6607_v20, %v6545_v30  ;;  %v6476_v34 = vadd.f32 %v7971_v31, %v6475_v29  ;;  %v6546_v35 = vmul.f32 %v7971_v31, %v7971_v31  ;;  %v7863_v36 = vpack.c.bf16 %v7971_v31, %v7970_v24 }
 0x4f4   :  { %v6609_v37 = vadd.f32 %v6608_v33, %v6546_v35  ;;  %7911 = vst [vmem:[%s11063_s2 + $0xd8] sm:$0xff] %v7863_v36   ;;  %v5235_v38 = vpop.f32.mrb[112].mxu1 }
 0x4f5   :  { %v6391_v39 = vpop.f32.mrb[112].mxu0  ;;  %v5237_v40 = vpop.f32.mrb[113].mxu1 }
 0x4f6   :  { %v7972_v41 = vadd.f32 %v6391_v39, %v5235_v38  ;;  %v6393_v42 = vpop.f32.mrb[113].mxu0  ;;  %v5238_v43 = vpop.f32.mrb[114].mxu1 }
 0x4f7   :  { %v6394_v44 = vpop.f32.mrb[114].mxu0  ;;  %v5240_v45 = vpop.f32.mrb[115].mxu1 }
 0x4f8   :  { %v6477_v46 = vadd.f32 %v7972_v41, %v6476_v34  ;;  %v6547_v47 = vmul.f32 %v7972_v41, %v7972_v41  ;;  %v7973_v48 = vadd.f32 %v6394_v44, %v5238_v43  ;;  %v6396_v49 = vpop.f32.mrb[115].mxu0 }
 0x4fa   :  { %v6610_v50 = vadd.f32 %v6609_v37, %v6547_v47  ;;  %v6478_v51 = vadd.f32 %v7973_v48, %v6477_v46  ;;  %v6548_v52 = vmul.f32 %v7973_v48, %v7973_v48  ;;  %v7868_v53 = vpack.c.bf16 %v7973_v48, %v7972_v41 }
 0x4fc   :  { %v6611_v54 = vadd.f32 %v6610_v50, %v6548_v52  ;;  %7912 = vst [vmem:[%s11063_s2 + $0xe0] sm:$0xff] %v7868_v53   ;;  %v5243_v55 = vpop.f32.mrb[116].mxu1 }
 0x4fd   :  { %v6399_v56 = vpop.f32.mrb[116].mxu0  ;;  %v5245_v57 = vpop.f32.mrb[117].mxu1 }
 0x4fe   :  { %v7974_v58 = vadd.f32 %v6399_v56, %v5243_v55  ;;  %v6401_v59 = vpop.f32.mrb[117].mxu0  ;;  %v5246_v60 = vpop.f32.mrb[118].mxu1 }
 0x4ff   :  { %v6402_v61 = vpop.f32.mrb[118].mxu0  ;;  %v5248_v62 = vpop.f32.mrb[119].mxu1 }
 0x500   :  { %v6479_v63 = vadd.f32 %v7974_v58, %v6478_v51  ;;  %v6549_v1 = vmul.f32 %v7974_v58, %v7974_v58  ;;  %v7975_v2 = vadd.f32 %v6402_v61, %v5246_v60  ;;  %v6404_v3 = vpop.f32.mrb[119].mxu0 }
 0x502   :  { %v6612_v0 = vadd.f32 %v6611_v54, %v6549_v1  ;;  %v6480_v4 = vadd.f32 %v7975_v2, %v6479_v63  ;;  %v6550_v5 = vmul.f32 %v7975_v2, %v7975_v2  ;;  %v7873_v6 = vpack.c.bf16 %v7975_v2, %v7974_v58 }
 0x504   :  { %v6613_v7 = vadd.f32 %v6612_v0, %v6550_v5  ;;  %7913 = vst [vmem:[%s11063_s2 + $0xe8] sm:$0xff] %v7873_v6   ;;  %v5251_v8 = vpop.f32.mrb[120].mxu1 }
 0x505   :  { %v6407_v9 = vpop.f32.mrb[120].mxu0  ;;  %v5253_v10 = vpop.f32.mrb[121].mxu1 }
 0x506   :  { %v7976_v11 = vadd.f32 %v6407_v9, %v5251_v8  ;;  %v6409_v12 = vpop.f32.mrb[121].mxu0  ;;  %v5254_v13 = vpop.f32.mrb[122].mxu1 }
 0x507   :  { %v6410_v14 = vpop.f32.mrb[122].mxu0  ;;  %v5256_v15 = vpop.f32.mrb[123].mxu1 }
 0x508   :  { %v6481_v16 = vadd.f32 %v7976_v11, %v6480_v4  ;;  %v6551_v17 = vmul.f32 %v7976_v11, %v7976_v11  ;;  %v7977_v18 = vadd.f32 %v6410_v14, %v5254_v13  ;;  %v6412_v19 = vpop.f32.mrb[123].mxu0 }
 0x50a   :  { %v6614_v20 = vadd.f32 %v6613_v7, %v6551_v17  ;;  %v6482_v21 = vadd.f32 %v7977_v18, %v6481_v16  ;;  %v6552_v22 = vmul.f32 %v7977_v18, %v7977_v18  ;;  %v7878_v23 = vpack.c.bf16 %v7977_v18, %v7976_v11 }
 0x50c   :  { %v6615_v24 = vadd.f32 %v6614_v20, %v6552_v22  ;;  %7914 = vst [vmem:[%s11063_s2 + $0xf0] sm:$0xff] %v7878_v23   ;;  %v5259_v25 = vpop.f32.mrb[124].mxu1 }
 0x50d   :  { %v6415_v26 = vpop.f32.mrb[124].mxu0  ;;  %v5261_v27 = vpop.f32.mrb[125].mxu1 }
 0x50e   :  { %v7978_v28 = vadd.f32 %v6415_v26, %v5259_v25  ;;  %v6417_v29 = vpop.f32.mrb[125].mxu0  ;;  %v5262_v30 = vpop.f32.mrb[126].mxu1 }
 0x50f   :  { %v6418_v31 = vpop.f32.mrb[126].mxu0  ;;  %v5264_v32 = vpop.f32.mrb[127].mxu1 }
 0x510   :  { %v6483_v33 = vadd.f32 %v7978_v28, %v6482_v21  ;;  %v6553_v34 = vmul.f32 %v7978_v28, %v7978_v28  ;;  %v7979_v35 = vadd.f32 %v6418_v31, %v5262_v30  ;;  %v6420_v36 = vpop.f32.mrb[127].mxu0 }
 0x512   :  { %v6616_v37 = vadd.f32 %v6615_v24, %v6553_v34  ;;  %v6484_v38 = vadd.f32 %v7979_v35, %v6483_v33  ;;  %v6554_v39 = vmul.f32 %v7979_v35, %v7979_v35  ;;  %v7883_v40 = vpack.c.bf16 %v7979_v35, %v7978_v28 }
 0x514   :  { %v6485_v41 = vrot.slane %v6484_v38, 4  ;;  %v6617_v42 = vadd.f32 %v6616_v37, %v6554_v39  ;;  %7915 = vst [vmem:[%s11063_s2 + $0xf8] sm:$0xff] %v7883_v40  }
 0x516   :  { %v6486_v43 = vadd.f32 %v6485_v41, %v6484_v38  ;;  %v6618_v44 = vrot.slane %v6617_v42, 4 }
 0x518   :  { %v6487_v45 = vrot.slane %v6486_v43, 2  ;;  %v6619_v46 = vadd.f32 %v6618_v44, %v6617_v42 }
 0x51a   :  { %v6488_v47 = vadd.f32 %v6487_v45, %v6486_v43  ;;  %v6620_v48 = vrot.slane %v6619_v46, 2 }
 0x51c   :  { %v6489_v49 = vrot.slane %v6488_v47, 1  ;;  %v6621_v50 = vadd.f32 %v6620_v48, %v6619_v46 }
 0x51e   :  { %v6622_v51 = vrot.slane %v6621_v50, 1  ;;  %v6490_v52 = vadd.f32 %v6489_v49, %v6488_v47 }
 0x520   :  { %v6623_v53 = vadd.f32 %v6622_v51, %v6621_v50 }
 0x522   :  { %v6625_v54 = vsel %vm6624_vm0, %v6490_v52, %v6623_v53 }
 0x523   :  { %v6627_v55 = vsel %vm6626_vm1, %v6625_v54, 0.0 }
 0x524   :  { %6628 = vst [vmem:[%s11064_s3] sm:$0xff] %v6627_v55 }

// kernel: discriminator_forward.7
= control target key start
LH: loop header
LB: loop body
LE: loop exit
PB: predicated region body
PF: predicated region fallthrough
CT: control target
= control target key end

     0   :  { %v4772_v22 = vmov 1966171168   ;;  %v157_v24 = vlaneseq  ;;  %vm3683_vm0 = vcmask 1040384   ;;  %vm3685_vm1 = vcmask 1041408   ;;  %s7077_s1 = inlined_call_operand.vmem [shape: bf16[2048,128], index: 1, kind: input, shape index: {}]   ;;  %s7078_s2 = inlined_call_operand.vmem [shape: bf16[1,2048], index: 2, kind: input, shape index: {}]   ;;  %s7079_s3 = inlined_call_operand.vmem [shape: bf16[1,2048], index: 3, kind: input, shape index: {}]   ;;  %s7080_s0 = inlined_call_operand.vmem [shape: bf16[128,2048], index: 0, kind: input, shape index: {}]   ;;  %s7081_s4 = inlined_call_operand.vmem [shape: bf16[128,128], index: 4, kind: output, shape index: {0}]   ;;  %s7082_s5 = inlined_call_operand.vmem [shape: f32[8,128], index: 5, kind: output, shape index: {1}]  }
   0x1   :  { %v4640_v0 = vld [vmem:[%s7077_s1 + $0x40] sm:$0xff]   ;;  %v4644_v4 = vld [vmem:[%s7077_s1 + $0x48] sm:$0xff]   ;;  %v4648_v8 = vld [vmem:[%s7077_s1 + $0x50] sm:$0xff]   ;;  %v155_v23 = vunpack.c.l.s4 %v4772_v22 }
   0x2   :  { %v4641_v1 = vld [vmem:[%s7077_s1 + $0xc0] sm:$0xff]   ;;  %4127 = vmatprep.subr.bf16.mxu0 %v4640_v0  ;;  %v4645_v5 = vld [vmem:[%s7077_s1 + $0xc8] sm:$0xff]   ;;  %v4649_v9 = vld [vmem:[%s7077_s1 + $0xd0] sm:$0xff]   ;;  %v158_v30 = vshrl.u32 %v157_v24, 7 }
   0x3   :  { %v4642_v2 = vld [vmem:[%s7077_s1] sm:$0xff]   ;;  %4191 = vmatprep.subr.bf16.mxu1 %v4641_v1  ;;  %v4646_v6 = vld [vmem:[%s7077_s1 + $0x8] sm:$0xff]   ;;  %v4650_v10 = vld [vmem:[%s7077_s1 + $0x10] sm:$0xff]   ;;  %v156_v29 = vunpack.c.0.s8 %v155_v23 }
   0x4   :  { %v4643_v3 = vld [vmem:[%s7077_s1 + $0x80] sm:$0xff]   ;;  %4128 = vmatpush3.bf16.msra.mxu0 %v4642_v2  ;;  %v4647_v7 = vld [vmem:[%s7077_s1 + $0x88] sm:$0xff]   ;;  %v4651_v11 = vld [vmem:[%s7077_s1 + $0x90] sm:$0xff]   ;;  %v4910_v42 = vsub.s32 0, %v158_v30 }
   0x5   :  { %4192 = vmatpush3.bf16.msra.mxu1 %v4643_v3  ;;  %4129 = vmatprep.subr.bf16.mxu0 %v4644_v4  ;;  %v4652_v12 = vld [vmem:[%s7077_s1 + $0x58] sm:$0xff]   ;;  %v4656_v16 = vld [vmem:[%s7077_s1 + $0x60] sm:$0xff]   ;;  %v4660_v20 = vld [vmem:[%s7077_s1 + $0x68] sm:$0xff]   ;;  %v4893_v35 = vsub.s32 %v156_v29, %v158_v30 }
   0x6   :  { %4193 = vmatprep.subr.bf16.mxu1 %v4645_v5  ;;  %v4653_v13 = vld [vmem:[%s7077_s1 + $0xd8] sm:$0xff]   ;;  %v4657_v17 = vld [vmem:[%s7077_s1 + $0xe0] sm:$0xff]   ;;  %v4661_v21 = vld [vmem:[%s7077_s1 + $0xe8] sm:$0xff]  }
   0x7   :  { %v4654_v14 = vld [vmem:[%s7077_s1 + $0x18] sm:$0xff]   ;;  %v4658_v18 = vld [vmem:[%s7077_s1 + $0x20] sm:$0xff]   ;;  %v4662_v25 = vld [vmem:[%s7077_s1 + $0x28] sm:$0xff]  }
   0x8   :  { %4130 = vmatpush3.bf16.msra.mxu0 %v4646_v6  ;;  %v4655_v15 = vld [vmem:[%s7077_s1 + $0x98] sm:$0xff]   ;;  %v4659_v19 = vld [vmem:[%s7077_s1 + $0xa0] sm:$0xff]   ;;  %v4663_v26 = vld [vmem:[%s7077_s1 + $0xa8] sm:$0xff]  }
   0x9   :  { %4194 = vmatpush3.bf16.msra.mxu1 %v4647_v7  ;;  %4131 = vmatprep.subr.bf16.mxu0 %v4648_v8  ;;  %v4664_v27 = vld [vmem:[%s7077_s1 + $0x70] sm:$0xff]   ;;  %v4668_v33 = vld [vmem:[%s7077_s1 + $0x78] sm:$0xff]   ;;  %v149_v38 = vld [vmem:[%s7078_s2] sm:$0xff] }
   0xa   :  { %4195 = vmatprep.subr.bf16.mxu1 %v4649_v9  ;;  %v4665_v28 = vld [vmem:[%s7077_s1 + $0xf0] sm:$0xff]   ;;  %v4669_v34 = vld [vmem:[%s7077_s1 + $0xf8] sm:$0xff]   ;;  %v4907_v39 = vld [vmem:[%s7078_s2 + $0x8] sm:$0xff]  ;;  %v153_v40 = vcombine.high %v149_v38, %v149_v38  ;;  %v160_v41 = vrot.slane %v149_v38, %v4893_v35 }
   0xb   :  { %v4666_v31 = vld [vmem:[%s7077_s1 + $0x30] sm:$0xff]   ;;  %v4670_v36 = vld [vmem:[%s7077_s1 + $0x38] sm:$0xff]   ;;  %v539_v43 = vld [vmem:[%s7079_s3] sm:$0xff]  ;;  %v202_v45 = vcombine.high %v4907_v39, %v4907_v39  ;;  %v4932_v53 = vrot.slane %v4907_v39, %v4893_v35 }
   0xc   :  { %4132 = vmatpush3.bf16.msra.mxu0 %v4650_v10  ;;  %v4667_v32 = vld [vmem:[%s7077_s1 + $0xb0] sm:$0xff]   ;;  %v4671_v37 = vld [vmem:[%s7077_s1 + $0xb8] sm:$0xff]   ;;  %v4918_v44 = vld [vmem:[%s7079_s3 + $0x8] sm:$0xff]  ;;  %v543_v46 = vcombine.high %v539_v43, %v539_v43  ;;  %v550_v47 = vrot.slane %v539_v43, %v4893_v35  ;;  %v168_v49 = vcombine.high %v160_v41, %v160_v41  ;;  %v176_v50 = vrot.slane %v160_v41, %v4893_v35 }
   0xd   :  { %4196 = vmatpush3.bf16.msra.mxu1 %v4651_v11  ;;  %4133 = vmatprep.subr.bf16.mxu0 %v4652_v12  ;;  %v592_v48 = vcombine.high %v4918_v44, %v4918_v44  ;;  %v4676_v51 = vld [vmem:[%s7077_s1 + $0x140] sm:$0xff]   ;;  %v167_v52 = vrot.slane %v153_v40, %v4893_v35  ;;  %v4940_v57 = vrot.slane %v4918_v44, %v4893_v35  ;;  %v46_v43 = vld [vmem:[%s7080_s0 + $0xc8] sm:$0xff] }
   0xe   :  { %4197 = vmatprep.subr.bf16.mxu1 %v4653_v13  ;;  %v558_v54 = vcombine.high %v550_v47, %v550_v47  ;;  %v566_v55 = vrot.slane %v550_v47, %v4893_v35  ;;  %v4936_v56 = vrot.slane %v543_v46, %v4893_v35  ;;  %v190_v58 = vrot.slane %v168_v49, %v4893_v35  ;;  %v4678_v61 = vld [vmem:[%s7077_s1 + $0x1c0] sm:$0xff]  }
   0xf   :  { %v252_v59 = vpack.i.b16 %v176_v50, %v176_v50  ;;  %v198_v60 = vcombine.high %v176_v50, %v176_v50  ;;  %v169_v62 = vcombine.high %v167_v52, %v167_v52  ;;  %v4948_v2 = vrot.slane %v167_v52, %v4893_v35  ;;  %v21_v7 = vld [vmem:[%s7080_s0] sm:$0xff] }
  0x10   :  { %4134 = vmatpush3.bf16.msra.mxu0 %v4654_v14  ;;  %v580_v63 = vrot.slane %v558_v54, %v4893_v35  ;;  %v642_v0 = vpack.i.b16 %v566_v55, %v566_v55  ;;  %v588_v1 = vcombine.high %v566_v55, %v566_v55  ;;  %v259_v4 = vpack.i.b16 %v190_v58, %v190_v58  ;;  %v29_v12 = vld [vmem:[%s7080_s0 + $0x40] sm:$0xff] }
  0x11   :  { %4198 = vmatpush3.bf16.msra.mxu1 %v4655_v15  ;;  %4135 = vmatprep.subr.bf16.mxu0 %v4656_v16  ;;  %v257_v3 = vrot.slane %v252_v59, %v4910_v42  ;;  %v200_v5 = vcombine.high %v190_v58, %v190_v58  ;;  %v266_v6 = vpack.i.b16 %v198_v60, %v198_v60  ;;  %v37_v22 = vld [vmem:[%s7080_s0 + $0x80] sm:$0xff] }
  0x12   :  { %4199 = vmatprep.subr.bf16.mxu1 %v4657_v17  ;;  %v647_v8 = vrot.slane %v642_v0, %v4910_v42  ;;  %v649_v9 = vpack.i.b16 %v580_v63, %v580_v63  ;;  %v590_v10 = vcombine.high %v580_v63, %v580_v63  ;;  %v656_v11 = vpack.i.b16 %v588_v1, %v588_v1 }
  0x13   :  { %v264_v13 = vrot.slane %v259_v4, %v4910_v42  ;;  %v271_v14 = vrot.slane %v266_v6, %v4910_v42  ;;  %v273_v15 = vpack.i.b16 %v200_v5, %v200_v5  ;;  %v4961_v16 = vrot.slane %v169_v62, %v4893_v35 }
  0x14   :  { %4136 = vmatpush3.bf16.msra.mxu0 %v4658_v18  ;;  %v654_v17 = vrot.slane %v649_v9, %v4910_v42  ;;  %v22_v18 = vld [vmem:[%s7080_s0 + $0x8] sm:$0xff]  ;;  %v280_v23 = vpack.i.b16 %v4948_v2, %v4948_v2  ;;  %v5919_v39 = vrot.slane %v592_v48, %v4893_v35 }
  0x15   :  { %4200 = vmatpush3.bf16.msra.mxu1 %v4659_v19  ;;  %4137 = vmatprep.subr.bf16.mxu0 %v4660_v20  ;;  %v30_v19 = vld [vmem:[%s7080_s0 + $0x48] sm:$0xff]  ;;  %v661_v20 = vrot.slane %v656_v11, %v4910_v42  ;;  %v4976_v24 = vcombine.low %v257_v3, %v264_v13  ;;  %v4677_v11 = vld [vmem:[%s7077_s1 + $0x100] sm:$0xff]  }
  0x16   :  { %4201 = vmatprep.subr.bf16.mxu1 %v4661_v21  ;;  %v663_v21 = vpack.i.b16 %v590_v10, %v590_v10  ;;  %v4986_v29 = vcombine.low %v647_v8, %v654_v17  ;;  %v62_v13 = vld [vmem:[%s7080_s0 + $0x148] sm:$0xff] }
  0x17   :  { %v419_v38 = vmul.bf16 %v4976_v24, %v29_v12  ;;  %v427_v41 = vmul.bf16 %v4976_v24, %v37_v22  ;;  %v54_v12 = vld [vmem:[%s7080_s0 + $0x108] sm:$0xff] }
  0x18   :  { %4138 = vmatpush3.bf16.msra.mxu0 %v4662_v25  ;;  %v278_v25 = vrot.slane %v273_v15, %v4910_v42  ;;  %v668_v30 = vrot.slane %v663_v21, %v4910_v42 }
  0x19   :  { %4202 = vmatpush3.bf16.msra.mxu1 %v4663_v26  ;;  %4139 = vmatprep.subr.bf16.mxu0 %v4664_v27  ;;  %v45_v26 = vld [vmem:[%s7080_s0 + $0xc0] sm:$0xff]  ;;  %v287_v27 = vpack.i.b16 %v4961_v16, %v4961_v16  ;;  %v809_v52 = vadd.bf16 %v4986_v29, %v419_v38  ;;  %v817_v58 = vadd.bf16 %v4986_v29, %v427_v41 }
  0x1a   :  { %4203 = vmatprep.subr.bf16.mxu1 %v4665_v28  ;;  %v559_v28 = vcombine.high %v4936_v56, %v4936_v56  ;;  %v5007_v40 = vcombine.low %v271_v14, %v278_v25  ;;  %v5013_v46 = vcombine.low %v661_v20, %v668_v30  ;;  %v435_v47 = vmul.bf16 %v4976_v24, %v45_v26  ;;  %v4679_v25 = vld [vmem:[%s7077_s1 + $0x180] sm:$0xff]  }
  0x1b   :  { %v937_v63 = vmul.bf16 1045249613, %v809_v52  ;;  %v945_v3 = vmul.bf16 1045249613, %v817_v58 }
  0x1c   :  { %4140 = vmatpush3.bf16.msra.mxu0 %v4666_v31  ;;  %v38_v31 = vld [vmem:[%s7080_s0 + $0x88] sm:$0xff]  ;;  %v412_v54 = vmul.bf16 %v5007_v40, %v22_v18  ;;  %v420_v55 = vmul.bf16 %v5007_v40, %v30_v19  ;;  %v825_v59 = vadd.bf16 %v4986_v29, %v435_v47  ;;  %v69_v19 = vld [vmem:[%s7080_s0 + $0x180] sm:$0xff] }
  0x1d   :  { %4204 = vmatpush3.bf16.msra.mxu1 %v4667_v32  ;;  %4141 = vmatprep.subr.bf16.mxu0 %v4668_v33  ;;  %v53_v32 = vld [vmem:[%s7080_s0 + $0x100] sm:$0xff]  ;;  %v428_v60 = vmul.bf16 %v5007_v40, %v38_v31  ;;  %v1065_v8 = vmax.bf16 %v937_v63, %v809_v52  ;;  %v5039_v14 = vmax.bf16 %v945_v3, %v817_v58  ;;  %v70_v47 = vld [vmem:[%s7080_s0 + $0x188] sm:$0xff] }
  0x1e   :  { %4205 = vmatprep.subr.bf16.mxu1 %v4669_v34  ;;  %v61_v33 = vld [vmem:[%s7080_s0 + $0x140] sm:$0xff]  ;;  %v4999_v34 = vrot.slane %v280_v23, %v4910_v42  ;;  %v443_v49 = vmul.bf16 %v4976_v24, %v53_v32  ;;  %v802_v0 = vadd.bf16 %v5013_v46, %v412_v54  ;;  %v810_v1 = vadd.bf16 %v5013_v46, %v420_v55  ;;  %v4680_v54 = vld [vmem:[%s7077_s1 + $0x148] sm:$0xff]  }
  0x1f   :  { %v451_v50 = vmul.bf16 %v4976_v24, %v61_v33  ;;  %v953_v4 = vmul.bf16 1045249613, %v825_v59  ;;  %v818_v5 = vadd.bf16 %v5013_v46, %v428_v60  ;;  %v77_v33 = vld [vmem:[%s7080_s0 + $0x1c0] sm:$0xff]  ;;  %v444_v55 = vmul.bf16 %v5007_v40, %v54_v12 }
  0x20   :  { %4142 = vmatpush3.bf16.msra.mxu0 %v4670_v36  ;;  %v5003_v36 = vrot.slane %v4936_v56, %v4893_v35  ;;  %v930_v9 = vmul.bf16 1045249613, %v802_v0  ;;  %v938_v10 = vmul.bf16 1045249613, %v810_v1  ;;  %v833_v41 = vadd.bf16 %v4986_v29, %v443_v49  ;;  %v4681_v49 = vld [vmem:[%s7077_s1 + $0x108] sm:$0xff]   ;;  %v93_v12 = vld [vmem:[%s7080_s0 + $0x240] sm:$0xff] }
  0x21   :  { %4206 = vmatpush3.bf16.msra.mxu1 %v4671_v37  ;;  %4255 = vmatprep.subr.bf16.mxu0 %v4676_v51  ;;  %v411_v37 = vmul.bf16 %v4976_v24, %v21_v7  ;;  %v5041_v15 = vmax.bf16 %v953_v4, %v825_v59  ;;  %v946_v17 = vmul.bf16 1045249613, %v818_v5  ;;  %v452_v58 = vmul.bf16 %v5007_v40, %v62_v13  ;;  %v4683_v59 = vld [vmem:[%s7077_s1 + $0x188] sm:$0xff]  }
  0x22   :  { %4319 = vmatprep.subr.bf16.mxu1 %v4678_v61  ;;  %v436_v61 = vmul.bf16 %v5007_v40, %v46_v43  ;;  %v1058_v21 = vmax.bf16 %v930_v9, %v802_v0  ;;  %v1066_v22 = vmax.bf16 %v938_v10, %v810_v1  ;;  %v841_v43 = vadd.bf16 %v4986_v29, %v451_v50  ;;  %v4682_v50 = vld [vmem:[%s7077_s1 + $0x1c8] sm:$0xff]   ;;  %v4685_v10 = vld [vmem:[%s7077_s1 + $0x110] sm:$0xff]  }
  0x23   :  { %v801_v51 = vadd.bf16 %v4986_v29, %v411_v37  ;;  %v3809_v26 = vcombine.high %v5039_v14, %v5041_v15  ;;  %v5051_v30 = vmax.bf16 %v946_v17, %v818_v5  ;;  %v3808_v32 = vcombine.low %v5039_v14, %v5041_v15  ;;  %v78_v1 = vld [vmem:[%s7080_s0 + $0x1c8] sm:$0xff]  ;;  %v4686_v5 = vld [vmem:[%s7077_s1 + $0x1d0] sm:$0xff]   ;;  %v4691_v15 = vld [vmem:[%s7077_s1 + $0x198] sm:$0xff]  }
  0x24   :  { %v826_v6 = vadd.bf16 %v5013_v46, %v436_v61  ;;  %v3795_v37 = vcombine.high %v1058_v21, %v1066_v22  ;;  %v3794_v38 = vcombine.low %v1058_v21, %v1066_v22  ;;  %v961_v60 = vmul.bf16 1045249613, %v833_v41  ;;  %v4687_v22 = vld [vmem:[%s7077_s1 + $0x190] sm:$0xff]  }
  0x25   :  { %v929_v62 = vmul.bf16 1045249613, %v801_v51  ;;  %v969_v61 = vmul.bf16 1045249613, %v841_v43  ;;  %v459_v63 = vmul.bf16 %v4976_v24, %v69_v19  ;;  %v467_v0 = vmul.bf16 %v4976_v24, %v77_v33 }
  0x26   :  { %v954_v18 = vmul.bf16 1045249613, %v826_v6  ;;  %2978 = vmatprep.mubr.bf16.mxu1 %v3795_v37  ;;  %v834_v3 = vadd.bf16 %v5013_v46, %v444_v55  ;;  %v842_v4 = vadd.bf16 %v5013_v46, %v452_v58  ;;  %v468_v19 = vmul.bf16 %v5007_v40, %v78_v1  ;;  %v86_v55 = vld [vmem:[%s7080_s0 + $0x208] sm:$0xff] }
  0x27   :  { %v1057_v7 = vmax.bf16 %v929_v62, %v801_v51  ;;  %v4684_v62 = vld [vmem:[%s7077_s1 + $0x150] sm:$0xff]   ;;  %2979 = vmatmul.mubr.bf16.vlgmr.msra.gmra.mrb[0].mxu1 %v3794_v38  ;;  %v5102_v9 = vmax.bf16 %v969_v61, %v841_v43  ;;  %v94_v58 = vld [vmem:[%s7080_s0 + $0x248] sm:$0xff]  ;;  %v589_v56 = vcombine.high %v5003_v36, %v5003_v36 }
  0x28   :  { %v5053_v31 = vmax.bf16 %v954_v18, %v826_v6  ;;  %v460_v6 = vmul.bf16 %v5007_v40, %v70_v47  ;;  %4320 = vmatpush3.bf16.msra.mxu1 %v4679_v25  ;;  %v962_v13 = vmul.bf16 1045249613, %v834_v3  ;;  %v970_v17 = vmul.bf16 1045249613, %v842_v4 }
  0x29   :  { %v3793_v20 = vcombine.high %v1057_v7, %v1065_v8  ;;  %v3792_v23 = vcombine.low %v1057_v7, %v1065_v8  ;;  %v85_v7 = vld [vmem:[%s7080_s0 + $0x200] sm:$0xff]  ;;  %v5100_v8 = vmax.bf16 %v961_v60, %v833_v41  ;;  %4321 = vmatprep.subr.bf16.mxu1 %v4682_v50  ;;  %v857_v18 = vadd.bf16 %v4986_v29, %v467_v0 }
  0x2a   :  { %v3811_v51 = vcombine.high %v5051_v30, %v5053_v31  ;;  %v3810_v52 = vcombine.low %v5051_v30, %v5053_v31  ;;  %v850_v25 = vadd.bf16 %v5013_v46, %v460_v6  ;;  %v5124_v33 = vmax.bf16 %v962_v13, %v834_v3  ;;  %v109_v0 = vld [vmem:[%s7080_s0 + $0x2c0] sm:$0xff] }
  0x2b   :  { %2881 = vmatprep.mubr.bf16.mxu0 %v3793_v20  ;;  %v3825_v20 = vcombine.high %v5100_v8, %v5102_v9  ;;  %v3824_v21 = vcombine.low %v5100_v8, %v5102_v9  ;;  %v5126_v37 = vmax.bf16 %v970_v17, %v842_v4  ;;  %v985_v38 = vmul.bf16 1045249613, %v857_v18  ;;  %v4692_v6 = vld [vmem:[%s7077_s1 + $0x160] sm:$0xff]   ;;  %v118_v9 = vld [vmem:[%s7080_s0 + $0x308] sm:$0xff] }
  0x2c   :  { %2882 = vmatmul.mubr.bf16.vlgmr.msra.gmra.mrb[0].mxu0 %v3792_v23  ;;  %2986 = vmatprep.mubr.bf16.mxu1 %v3811_v51  ;;  %v858_v41 = vadd.bf16 %v5013_v46, %v468_v19  ;;  %v978_v47 = vmul.bf16 1045249613, %v850_v25  ;;  %v4689_v51 = vld [vmem:[%s7077_s1 + $0x118] sm:$0xff]   ;;  %v483_v50 = vmul.bf16 %v4976_v24, %v93_v12  ;;  %v476_v30 = vmul.bf16 %v5007_v40, %v86_v55  ;;  %v110_v12 = vld [vmem:[%s7080_s0 + $0x2c8] sm:$0xff] }
  0x2d   :  { %4256 = vmatpush3.bf16.msra.mxu0 %v4677_v11  ;;  %2889 = vmatprep.mubr.bf16.mxu0 %v3809_v26  ;;  %v849_v11 = vadd.bf16 %v4986_v29, %v459_v63  ;;  %v4688_v26 = vld [vmem:[%s7077_s1 + $0x158] sm:$0xff]   ;;  %v3826_v60 = vcombine.low %v5124_v33, %v5126_v37  ;;  %v5152_v61 = vmax.bf16 %v985_v38, %v857_v18  ;;  %v101_v63 = vld [vmem:[%s7080_s0 + $0x280] sm:$0xff]  ;;  %v4698_v55 = vld [vmem:[%s7077_s1 + $0x1e8] sm:$0xff]  }
  0x2e   :  { %4257 = vmatprep.subr.bf16.mxu0 %v4680_v54  ;;  %4322 = vmatpush3.bf16.msra.mxu1 %v4683_v59  ;;  %v4690_v54 = vld [vmem:[%s7077_s1 + $0x1d8] sm:$0xff]   ;;  %v3827_v59 = vcombine.high %v5124_v33, %v5126_v37  ;;  %v5160_v14 = vmax.bf16 %v978_v47, %v850_v25  ;;  %v873_v1 = vadd.bf16 %v4986_v29, %v483_v50  ;;  %v4694_v18 = vld [vmem:[%s7077_s1 + $0x1e0] sm:$0xff]  }
  0x2f   :  { %v977_v23 = vmul.bf16 1045249613, %v849_v11  ;;  %4323 = vmatprep.subr.bf16.mxu1 %v4686_v5  ;;  %2987 = vmatmul.mubr.bf16.gmra.mrb[4].mxu1 %v3810_v52  ;;  %v484_v31 = vmul.bf16 %v5007_v40, %v94_v58  ;;  %v4693_v52 = vld [vmem:[%s7077_s1 + $0x120] sm:$0xff]   ;;  %v491_v19 = vmul.bf16 %v4976_v24, %v101_v63  ;;  %v866_v25 = vadd.bf16 %v5013_v46, %v476_v30 }
  0x30   :  { %2994 = vmatprep.mubr.bf16.mxu1 %v3827_v59  ;;  %v4695_v38 = vld [vmem:[%s7077_s1 + $0x1a0] sm:$0xff]   ;;  %v500_v50 = vmul.bf16 %v5007_v40, %v110_v12  ;;  %v126_v12 = vld [vmem:[%s7080_s0 + $0x348] sm:$0xff] }
  0x31   :  { %4258 = vmatpush3.bf16.msra.mxu0 %v4681_v49  ;;  %v5129_v43 = vmax.bf16 %v977_v23, %v849_v11  ;;  %v475_v49 = vmul.bf16 %v4976_v24, %v85_v7  ;;  %v102_v11 = vld [vmem:[%s7080_s0 + $0x288] sm:$0xff]  ;;  %v117_v47 = vld [vmem:[%s7080_s0 + $0x300] sm:$0xff] }
  0x32   :  { %4259 = vmatprep.subr.bf16.mxu0 %v4684_v62  ;;  %v986_v62 = vmul.bf16 1045249613, %v858_v41  ;;  %4324 = vmatpush3.bf16.msra.mxu1 %v4687_v22  ;;  %v125_v58 = vld [vmem:[%s7080_s0 + $0x340] sm:$0xff]  ;;  %v507_v8 = vmul.bf16 %v4976_v24, %v117_v47 }
  0x33   :  { %v3841_v3 = vcombine.high %v5129_v43, %v5152_v61  ;;  %v3840_v5 = vcombine.low %v5129_v43, %v5152_v61  ;;  %4325 = vmatprep.subr.bf16.mxu1 %v4690_v54  ;;  %v141_v47 = vld [vmem:[%s7080_s0 + $0x3c0] sm:$0xff] }
  0x34   :  { %2890 = vmatmul.mubr.bf16.gmra.mrb[4].mxu0 %v3808_v32  ;;  %v865_v32 = vadd.bf16 %v4986_v29, %v475_v49  ;;  %v5172_v4 = vmax.bf16 %v986_v62, %v858_v41  ;;  %v4696_v41 = vld [vmem:[%s7077_s1 + $0x168] sm:$0xff]   ;;  %v492_v49 = vmul.bf16 %v5007_v40, %v102_v11  ;;  %v994_v62 = vmul.bf16 1045249613, %v866_v25 }
  0x35   :  { %2897 = vmatprep.mubr.bf16.mxu0 %v3825_v20  ;;  %4260 = vmatpush3.bf16.msra.mxu0 %v4685_v10  ;;  %v1001_v10 = vmul.bf16 1045249613, %v873_v1  ;;  %v499_v20 = vmul.bf16 %v4976_v24, %v109_v0 }
  0x36   :  { %4261 = vmatprep.subr.bf16.mxu0 %v4688_v26  ;;  %v993_v7 = vmul.bf16 1045249613, %v865_v32  ;;  %v3843_v13 = vcombine.high %v5160_v14, %v5172_v4  ;;  %v3842_v17 = vcombine.low %v5160_v14, %v5172_v4  ;;  %v874_v26 = vadd.bf16 %v5013_v46, %v484_v31  ;;  %4326 = vmatpush3.bf16.msra.mxu1 %v4691_v15  ;;  %v4699_v31 = vld [vmem:[%s7077_s1 + $0x1a8] sm:$0xff]   ;;  %v4707_v14 = vld [vmem:[%s7077_s1 + $0x1b8] sm:$0xff]  }
  0x37   :  { %v5201_v23 = vmax.bf16 %v1001_v10, %v873_v1  ;;  %v889_v54 = vadd.bf16 %v4986_v29, %v499_v20  ;;  %4327 = vmatprep.subr.bf16.mxu1 %v4694_v18  ;;  %v882_v15 = vadd.bf16 %v5013_v46, %v492_v49  ;;  %v5236_v10 = vmax.bf16 %v994_v62, %v866_v25  ;;  %v4700_v18 = vld [vmem:[%s7077_s1 + $0x170] sm:$0xff]   ;;  %v133_v20 = vld [vmem:[%s7080_s0 + $0x380] sm:$0xff] }
  0x38   :  { %v5199_v22 = vmax.bf16 %v993_v7, %v865_v32  ;;  %v1002_v63 = vmul.bf16 1045249613, %v874_v26  ;;  %v4697_v32 = vld [vmem:[%s7077_s1 + $0x128] sm:$0xff]   ;;  %v890_v7 = vadd.bf16 %v5013_v46, %v500_v50  ;;  %2995 = vmatmul.mubr.bf16.gmra.mrb[8].mxu1 %v3826_v60  ;;  %v515_v60 = vmul.bf16 %v4976_v24, %v125_v58 }
  0x39   :  { %4262 = vmatpush3.bf16.msra.mxu0 %v4689_v51  ;;  %v881_v51 = vadd.bf16 %v4986_v29, %v491_v19  ;;  %v1010_v11 = vmul.bf16 1045249613, %v882_v15  ;;  %3002 = vmatprep.mubr.bf16.mxu1 %v3843_v13  ;;  %v4701_v19 = vld [vmem:[%s7077_s1 + $0x130] sm:$0xff]   ;;  %v508_v50 = vmul.bf16 %v5007_v40, %v118_v9  ;;  %v142_v58 = vld [vmem:[%s7080_s0 + $0x3c8] sm:$0xff] }
  0x3a   :  { %4263 = vmatprep.subr.bf16.mxu0 %v4692_v6  ;;  %v3857_v59 = vcombine.high %v5199_v22, %v5201_v23  ;;  %v3856_v0 = vcombine.low %v5199_v22, %v5201_v23  ;;  %v1017_v6 = vmul.bf16 1045249613, %v889_v54  ;;  %v5238_v30 = vmax.bf16 %v1002_v63, %v874_v26  ;;  %4328 = vmatpush3.bf16.msra.mxu1 %v4695_v38 }
  0x3b   :  { %v1009_v1 = vmul.bf16 1045249613, %v881_v51  ;;  %v5273_v25 = vmax.bf16 %v1010_v11, %v882_v15  ;;  %4329 = vmatprep.subr.bf16.mxu1 %v4698_v55  ;;  %v905_v49 = vadd.bf16 %v4986_v29, %v515_v60  ;;  %v516_v55 = vmul.bf16 %v5007_v40, %v126_v12  ;;  %v4704_v15 = vld [vmem:[%s7077_s1 + $0x178] sm:$0xff]  }
  0x3c   :  { %2898 = vmatmul.mubr.bf16.gmra.mrb[8].mxu0 %v3824_v21  ;;  %v3859_v33 = vcombine.high %v5236_v10, %v5238_v30  ;;  %v3858_v37 = vcombine.low %v5236_v10, %v5238_v30  ;;  %v898_v9 = vadd.bf16 %v5013_v46, %v508_v50  ;;  %v684_v30 = vpack.i.b16 %v589_v56, %v589_v56  ;;  %v63_v56 = vld [vmem:[%s7080_s0 + $0x150] sm:$0xff] }
  0x3d   :  { %2905 = vmatprep.mubr.bf16.mxu0 %v3841_v3  ;;  %4264 = vmatpush3.bf16.msra.mxu0 %v4693_v52  ;;  %v5250_v21 = vmax.bf16 %v1009_v1, %v881_v51  ;;  %v5252_v3 = vmax.bf16 %v1017_v6, %v889_v54  ;;  %v1018_v52 = vmul.bf16 1045249613, %v890_v7  ;;  %v134_v51 = vld [vmem:[%s7080_s0 + $0x388] sm:$0xff]  ;;  %v897_v54 = vadd.bf16 %v4986_v29, %v507_v8 }
  0x3e   :  { %4265 = vmatprep.subr.bf16.mxu0 %v4696_v41  ;;  %v4702_v41 = vld [vmem:[%s7077_s1 + $0x1f0] sm:$0xff]   ;;  %v523_v1 = vmul.bf16 %v4976_v24, %v133_v20  ;;  %v531_v6 = vmul.bf16 %v4976_v24, %v141_v47  ;;  %4330 = vmatpush3.bf16.msra.mxu1 %v4699_v31  ;;  %v1033_v8 = vmul.bf16 1045249613, %v905_v49  ;;  %v906_v11 = vadd.bf16 %v5013_v46, %v516_v55 }
  0x3f   :  { %v3873_v13 = vcombine.high %v5250_v21, %v5252_v3  ;;  %v5275_v26 = vmax.bf16 %v1018_v52, %v890_v7  ;;  %v3872_v38 = vcombine.low %v5250_v21, %v5252_v3  ;;  %v1025_v7 = vmul.bf16 1045249613, %v897_v54  ;;  %v4705_v52 = vld [vmem:[%s7077_s1 + $0x138] sm:$0xff]   ;;  %4331 = vmatprep.subr.bf16.mxu1 %v4702_v41 }
  0x40   :  { %v913_v24 = vadd.bf16 %v4986_v29, %v523_v1  ;;  %v921_v12 = vadd.bf16 %v4986_v29, %v531_v6  ;;  %v524_v31 = vmul.bf16 %v5007_v40, %v134_v51  ;;  %v5326_v20 = vmax.bf16 %v1033_v8, %v905_v49  ;;  %3003 = vmatmul.mubr.bf16.gmra.mrb[12].mxu1 %v3842_v17  ;;  %v23_v49 = vld [vmem:[%s7080_s0 + $0x10] sm:$0xff] }
  0x41   :  { %4266 = vmatpush3.bf16.msra.mxu0 %v4697_v32  ;;  %v3875_v62 = vcombine.high %v5273_v25, %v5275_v26  ;;  %v3874_v63 = vcombine.low %v5273_v25, %v5275_v26  ;;  %v4703_v32 = vld [vmem:[%s7077_s1 + $0x1b0] sm:$0xff]   ;;  %v5324_v60 = vmax.bf16 %v1025_v7, %v897_v54  ;;  %v1026_v43 = vmul.bf16 1045249613, %v898_v9  ;;  %3010 = vmatprep.mubr.bf16.mxu1 %v3859_v33 }
  0x42   :  { %4267 = vmatprep.subr.bf16.mxu0 %v4700_v18  ;;  %v4706_v18 = vld [vmem:[%s7077_s1 + $0x1f8] sm:$0xff]   ;;  %v1034_v61 = vmul.bf16 1045249613, %v906_v11  ;;  %v1041_v29 = vmul.bf16 1045249613, %v913_v24  ;;  %v532_v41 = vmul.bf16 %v5007_v40, %v142_v58  ;;  %v914_v47 = vadd.bf16 %v5013_v46, %v524_v31  ;;  %4332 = vmatpush3.bf16.msra.mxu1 %v4703_v32  ;;  %v31_v7 = vld [vmem:[%s7080_s0 + $0x50] sm:$0xff] }
  0x43   :  { %v5335_v51 = vmax.bf16 %v1026_v43, %v898_v9  ;;  %4333 = vmatprep.subr.bf16.mxu1 %v4706_v18  ;;  %v292_v58 = vrot.slane %v287_v27, %v4910_v42  ;;  %v4710_v27 = vld [vmem:[%s7077_s1 + $0x2c0] sm:$0xff]   ;;  %v587_v9 = vrot.slane %v559_v28, %v4893_v35  ;;  %v24_v43 = vld [vmem:[%s7080_s0 + $0x18] sm:$0xff] }
  0x44   :  { %2906 = vmatmul.mubr.bf16.gmra.mrb[12].mxu0 %v3840_v5  ;;  %v1049_v5 = vmul.bf16 1045249613, %v921_v12  ;;  %v5337_v54 = vmax.bf16 %v1034_v61, %v906_v11  ;;  %v5344_v40 = vmax.bf16 %v1041_v29, %v913_v24  ;;  %v922_v17 = vadd.bf16 %v5013_v46, %v532_v41  ;;  %v4708_v46 = vld [vmem:[%s7077_s1 + $0x240] sm:$0xff]  }
  0x45   :  { %2913 = vmatprep.mubr.bf16.mxu0 %v3857_v59  ;;  %4268 = vmatpush3.bf16.msra.mxu0 %v4701_v19  ;;  %v3889_v59 = vcombine.high %v5324_v60, %v5326_v20  ;;  %v3888_v19 = vcombine.low %v5324_v60, %v5326_v20  ;;  %v1042_v33 = vmul.bf16 1045249613, %v914_v47  ;;  %v5376_v8 = vcombine.low %v4999_v34, %v292_v58 }
  0x46   :  { %4269 = vmatprep.subr.bf16.mxu0 %v4704_v15  ;;  %v5346_v4 = vmax.bf16 %v1049_v5, %v921_v12  ;;  %v3891_v50 = vcombine.high %v5335_v51, %v5337_v54  ;;  %v3890_v55 = vcombine.low %v5335_v51, %v5337_v54  ;;  %v1050_v1 = vmul.bf16 1045249613, %v922_v17  ;;  %4334 = vmatpush3.bf16.msra.mxu1 %v4707_v14 }
  0x47   :  { %v5365_v6 = vmax.bf16 %v1042_v33, %v914_v47  ;;  %v670_v11 = vpack.i.b16 %v5003_v36, %v5003_v36  ;;  %v201_v34 = vcombine.high %v4961_v16, %v4961_v16  ;;  %v421_v28 = vmul.bf16 %v5376_v8, %v31_v7  ;;  %v47_v16 = vld [vmem:[%s7080_s0 + $0xd0] sm:$0xff]  ;;  %4447 = vmatprep.subr.bf16.mxu1 %v4710_v27 }
  0x48   :  { %v3905_v32 = vcombine.high %v5344_v40, %v5346_v4  ;;  %v3904_v15 = vcombine.low %v5344_v40, %v5346_v4  ;;  %v5389_v24 = vmax.bf16 %v1050_v1, %v922_v17  ;;  %v677_v23 = vpack.i.b16 %v587_v9, %v587_v9  ;;  %3011 = vmatmul.mubr.bf16.gmra.mrb[16].mxu1 %v3858_v37  ;;  %v32_v37 = vld [vmem:[%s7080_s0 + $0x58] sm:$0xff]  ;;  %v55_v33 = vld [vmem:[%s7080_s0 + $0x110] sm:$0xff] }
  0x49   :  { %4270 = vmatpush3.bf16.msra.mxu0 %v4705_v52  ;;  %v199_v52 = vcombine.high %v4948_v2, %v4948_v2  ;;  %v413_v2 = vmul.bf16 %v5376_v8, %v23_v49  ;;  %v675_v22 = vrot.slane %v670_v11, %v4910_v42  ;;  %v301_v31 = vpack.i.b16 %v201_v34, %v201_v34  ;;  %v40_v17 = vld [vmem:[%s7080_s0 + $0x98] sm:$0xff] }
  0x4a   :  { %4383 = vmatprep.subr.bf16.mxu0 %v4708_v46  ;;  %v3907_v36 = vcombine.high %v5365_v6, %v5389_v24  ;;  %3018 = vmatprep.mubr.bf16.mxu1 %v3875_v62  ;;  %v682_v18 = vrot.slane %v677_v23, %v4910_v42  ;;  %v591_v10 = vcombine.high %v587_v9, %v587_v9  ;;  %v48_v46 = vld [vmem:[%s7080_s0 + $0xd8] sm:$0xff] }
  0x4b   :  { %v294_v12 = vpack.i.b16 %v199_v52, %v199_v52  ;;  %v306_v29 = vrot.slane %v301_v31, %v4910_v42  ;;  %v437_v62 = vmul.bf16 %v5376_v8, %v47_v16  ;;  %v689_v47 = vrot.slane %v684_v30, %v4910_v42 }
  0x4c   :  { %2914 = vmatmul.mubr.bf16.gmra.mrb[16].mxu0 %v3856_v0  ;;  %v39_v0 = vld [vmem:[%s7080_s0 + $0x90] sm:$0xff]  ;;  %v5428_v41 = vcombine.low %v675_v22, %v682_v18  ;;  %v691_v14 = vpack.i.b16 %v591_v10, %v591_v10  ;;  %v217_v49 = vcombine.high %v4932_v53, %v4932_v53  ;;  %v445_v1 = vmul.bf16 %v5376_v8, %v55_v33 }
  0x4d   :  { %2921 = vmatprep.mubr.bf16.mxu0 %v3873_v13  ;;  %v3906_v13 = vcombine.low %v5365_v6, %v5389_v24  ;;  %v299_v61 = vrot.slane %v294_v12, %v4910_v42  ;;  %v429_v5 = vmul.bf16 %v5376_v8, %v39_v0  ;;  %v5447_v7 = vrot.slane %v4932_v53, %v4893_v35  ;;  %v104_v6 = vld [vmem:[%s7080_s0 + $0x298] sm:$0xff]  ;;  %v4709_v24 = vld [vmem:[%s7077_s1 + $0x200] sm:$0xff]   ;;  %v119_v53 = vld [vmem:[%s7080_s0 + $0x310] sm:$0xff] }
  0x4e   :  { %v607_v27 = vcombine.high %v4940_v57, %v4940_v57  ;;  %v803_v9 = vadd.bf16 %v5428_v41, %v413_v2  ;;  %v811_v11 = vadd.bf16 %v5428_v41, %v421_v28  ;;  %v696_v52 = vrot.slane %v691_v14, %v4910_v42 }
  0x4f   :  { %v5439_v58 = vcombine.low %v299_v61, %v306_v29  ;;  %v819_v34 = vadd.bf16 %v5428_v41, %v429_v5  ;;  %v827_v2 = vadd.bf16 %v5428_v41, %v437_v62  ;;  %v835_v18 = vadd.bf16 %v5428_v41, %v445_v1  ;;  %v56_v62 = vld [vmem:[%s7080_s0 + $0x118] sm:$0xff]  ;;  %v71_v1 = vld [vmem:[%s7080_s0 + $0x190] sm:$0xff] }
  0x50   :  { %v931_v0 = vmul.bf16 1045249613, %v803_v9  ;;  %v939_v16 = vmul.bf16 1045249613, %v811_v11  ;;  %v5468_v12 = vcombine.low %v689_v47, %v696_v52  ;;  %3019 = vmatmul.mubr.bf16.gmra.mrb[20].mxu1 %v3874_v63  ;;  %v64_v47 = vld [vmem:[%s7080_s0 + $0x158] sm:$0xff]  ;;  %v461_v54 = vmul.bf16 %v5376_v8, %v71_v1 }
  0x51   :  { %v414_v22 = vmul.bf16 %v5439_v58, %v24_v43  ;;  %v422_v23 = vmul.bf16 %v5439_v58, %v32_v37  ;;  %v430_v28 = vmul.bf16 %v5439_v58, %v40_v17  ;;  %v947_v31 = vmul.bf16 1045249613, %v819_v34  ;;  %3026 = vmatprep.mubr.bf16.mxu1 %v3891_v50 }
  0x52   :  { %v955_v21 = vmul.bf16 1045249613, %v827_v2  ;;  %v438_v3 = vmul.bf16 %v5439_v58, %v48_v46  ;;  %v5481_v43 = vmax.bf16 %v939_v16, %v811_v11 }
  0x53   :  { %v804_v10 = vadd.bf16 %v5468_v12, %v414_v22  ;;  %v812_v25 = vadd.bf16 %v5468_v12, %v422_v23  ;;  %v5485_v26 = vmax.bf16 %v947_v31, %v819_v34  ;;  %v820_v30 = vadd.bf16 %v5468_v12, %v430_v28  ;;  %v72_v22 = vld [vmem:[%s7080_s0 + $0x198] sm:$0xff] }
  0x54   :  { %2922 = vmatmul.mubr.bf16.gmra.mrb[20].mxu0 %v3872_v38  ;;  %v453_v38 = vmul.bf16 %v5376_v8, %v63_v56  ;;  %v5487_v63 = vmax.bf16 %v955_v21, %v827_v2  ;;  %v828_v37 = vadd.bf16 %v5468_v12, %v438_v3  ;;  %v963_v34 = vmul.bf16 1045249613, %v835_v18  ;;  %v79_v56 = vld [vmem:[%s7080_s0 + $0x1d0] sm:$0xff] }
  0x55   :  { %2929 = vmatprep.mubr.bf16.mxu0 %v3889_v59  ;;  %v5479_v59 = vmax.bf16 %v931_v0, %v803_v9  ;;  %v932_v29 = vmul.bf16 1045249613, %v804_v10  ;;  %v940_v5 = vmul.bf16 1045249613, %v812_v25  ;;  %v948_v17 = vmul.bf16 1045249613, %v820_v30 }
  0x56   :  { %v3813_v14 = vcombine.high %v5485_v26, %v5487_v63  ;;  %v956_v33 = vmul.bf16 1045249613, %v828_v37  ;;  %v3812_v46 = vcombine.low %v5485_v26, %v5487_v63  ;;  %v843_v52 = vadd.bf16 %v5428_v41, %v453_v38  ;;  %v4723_v26 = vld [vmem:[%s7077_s1 + $0x298] sm:$0xff]  }
  0x57   :  { %v3796_v61 = vcombine.low %v5479_v59, %v5481_v43  ;;  %v3797_v50 = vcombine.high %v5479_v59, %v5481_v43  ;;  %v5508_v9 = vmax.bf16 %v932_v29, %v804_v10  ;;  %v5510_v11 = vmax.bf16 %v940_v5, %v812_v25  ;;  %v95_v25 = vld [vmem:[%s7080_s0 + $0x250] sm:$0xff]  ;;  %v120_v59 = vld [vmem:[%s7080_s0 + $0x318] sm:$0xff] }
  0x58   :  { %v5522_v23 = vmax.bf16 %v948_v17, %v820_v30  ;;  %v5524_v2 = vmax.bf16 %v956_v33, %v828_v37  ;;  %v446_v28 = vmul.bf16 %v5439_v58, %v56_v62  ;;  %v454_v0 = vmul.bf16 %v5439_v58, %v64_v47  ;;  %3027 = vmatmul.mubr.bf16.gmra.mrb[24].mxu1 %v3890_v55  ;;  %v88_v33 = vld [vmem:[%s7080_s0 + $0x218] sm:$0xff] }
  0x59   :  { %v3798_v16 = vcombine.low %v5508_v9, %v5510_v11  ;;  %v3799_v31 = vcombine.high %v5508_v9, %v5510_v11  ;;  %v971_v60 = vmul.bf16 1045249613, %v843_v52  ;;  %v5535_v20 = vmax.bf16 %v963_v34, %v835_v18  ;;  %v87_v18 = vld [vmem:[%s7080_s0 + $0x210] sm:$0xff]  ;;  %3034 = vmatprep.mubr.bf16.mxu1 %v3907_v36  ;;  %v128_v43 = vld [vmem:[%s7080_s0 + $0x358] sm:$0xff] }
  0x5a   :  { %v3814_v21 = vcombine.low %v5522_v23, %v5524_v2  ;;  %v836_v3 = vadd.bf16 %v5468_v12, %v446_v28  ;;  %v844_v38 = vadd.bf16 %v5468_v12, %v454_v0  ;;  %v469_v55 = vmul.bf16 %v5376_v8, %v79_v56 }
  0x5b   :  { %v5555_v51 = vmax.bf16 %v971_v60, %v843_v52  ;;  %v462_v10 = vmul.bf16 %v5439_v58, %v72_v22  ;;  %v477_v5 = vmul.bf16 %v5376_v8, %v87_v18  ;;  %v851_v47 = vadd.bf16 %v5428_v41, %v461_v54  ;;  %v96_v22 = vld [vmem:[%s7080_s0 + $0x258] sm:$0xff] }
  0x5c   :  { %2930 = vmatmul.mubr.bf16.gmra.mrb[24].mxu0 %v3888_v19  ;;  %v80_v19 = vld [vmem:[%s7080_s0 + $0x1d8] sm:$0xff]  ;;  %v964_v30 = vmul.bf16 1045249613, %v836_v3  ;;  %v972_v37 = vmul.bf16 1045249613, %v844_v38  ;;  %v859_v17 = vadd.bf16 %v5428_v41, %v469_v55  ;;  %v485_v60 = vmul.bf16 %v5376_v8, %v95_v25 }
  0x5d   :  { %2937 = vmatprep.mubr.bf16.mxu0 %v3905_v32  ;;  %v3815_v32 = vcombine.high %v5522_v23, %v5524_v2  ;;  %v470_v29 = vmul.bf16 %v5439_v58, %v80_v19  ;;  %v3829_v36 = vcombine.high %v5535_v20, %v5555_v51  ;;  %v3828_v62 = vcombine.low %v5535_v20, %v5555_v51 }
  0x5e   :  { %v5574_v1 = vmax.bf16 %v964_v30, %v836_v3  ;;  %v5576_v52 = vmax.bf16 %v972_v37, %v844_v38  ;;  %v852_v34 = vadd.bf16 %v5468_v12, %v462_v10  ;;  %v979_v28 = vmul.bf16 1045249613, %v851_v47 }
  0x5f   :  { %v860_v56 = vadd.bf16 %v5468_v12, %v470_v29  ;;  %v987_v0 = vmul.bf16 1045249613, %v859_v17  ;;  %v867_v19 = vadd.bf16 %v5428_v41, %v477_v5  ;;  %v875_v25 = vadd.bf16 %v5428_v41, %v485_v60  ;;  %v111_v29 = vld [vmem:[%s7080_s0 + $0x2d0] sm:$0xff] }
  0x60   :  { %v3831_v3 = vcombine.high %v5574_v1, %v5576_v52  ;;  %v3830_v38 = vcombine.low %v5574_v1, %v5576_v52  ;;  %v980_v18 = vmul.bf16 1045249613, %v852_v34  ;;  %v5592_v55 = vmax.bf16 %v979_v28, %v851_v47  ;;  %3035 = vmatmul.mubr.bf16.gmra.mrb[28].mxu1 %v3906_v13  ;;  %v4711_v28 = vld [vmem:[%s7077_s1 + $0x280] sm:$0xff]   ;;  %v4731_v1 = vld [vmem:[%s7077_s1 + $0x2a8] sm:$0xff]   ;;  %v4733_v52 = vld [vmem:[%s7077_s1 + $0x230] sm:$0xff]  }
  0x61   :  { %v988_v54 = vmul.bf16 1045249613, %v860_v56  ;;  %v5594_v10 = vmax.bf16 %v987_v0, %v859_v17  ;;  %v995_v30 = vmul.bf16 1045249613, %v867_v19  ;;  %v486_v37 = vmul.bf16 %v5439_v58, %v96_v22  ;;  %3172 = vmatprep.mubr.bf16.mxu1 %v3799_v31 }
  0x62   :  { %v5600_v40 = vmax.bf16 %v980_v18, %v852_v34  ;;  %v1003_v47 = vmul.bf16 1045249613, %v875_v25  ;;  %v494_v18 = vmul.bf16 %v5439_v58, %v104_v6  ;;  %v127_v6 = vld [vmem:[%s7080_s0 + $0x350] sm:$0xff] }
  0x63   :  { %v5602_v4 = vmax.bf16 %v988_v54, %v860_v56  ;;  %v3845_v13 = vcombine.high %v5592_v55, %v5594_v10  ;;  %v5622_v17 = vmax.bf16 %v995_v30, %v867_v19  ;;  %v876_v22 = vadd.bf16 %v5468_v12, %v486_v37  ;;  %v4712_v54 = vld [vmem:[%s7077_s1 + $0x248] sm:$0xff]  }
  0x64   :  { %2938 = vmatmul.mubr.bf16.gmra.mrb[28].mxu0 %v3904_v15  ;;  %v478_v15 = vmul.bf16 %v5439_v58, %v88_v33  ;;  %v112_v33 = vld [vmem:[%s7080_s0 + $0x2d8] sm:$0xff]  ;;  %v5636_v0 = vmax.bf16 %v1003_v47, %v875_v25  ;;  %v501_v19 = vmul.bf16 %v5376_v8, %v111_v29  ;;  %v4714_v30 = vld [vmem:[%s7077_s1 + $0x2c8] sm:$0xff]   ;;  %v5652_v25 = vrot.slane %v217_v49, %v4893_v35  ;;  %v4716_v49 = vld [vmem:[%s7077_s1 + $0x250] sm:$0xff]  }
  0x65   :  { %3075 = vmatprep.mubr.bf16.mxu0 %v3797_v50  ;;  %v103_v50 = vld [vmem:[%s7080_s0 + $0x290] sm:$0xff]  ;;  %v3847_v31 = vcombine.high %v5600_v40, %v5602_v4  ;;  %v1004_v37 = vmul.bf16 1045249613, %v876_v22  ;;  %v502_v34 = vmul.bf16 %v5439_v58, %v112_v33  ;;  %v7083_v44 = vcombine.low %v5592_v55, %v5594_v10  ;;  %v57_v55 = vld [vmem:[%s7080_s0 + $0x120] sm:$0xff] }
  0x66   :  { %v868_v56 = vadd.bf16 %v5468_v12, %v478_v15  ;;  %v493_v60 = vmul.bf16 %v5376_v8, %v103_v50  ;;  %v4713_v50 = vld [vmem:[%s7077_s1 + $0x208] sm:$0xff]   ;;  %v891_v33 = vadd.bf16 %v5428_v41, %v501_v19  ;;  %v7084_v10 = vcombine.high %v5622_v17, %v5636_v0 }
  0x67   :  { %v5674_v5 = vmax.bf16 %v1004_v37, %v876_v22  ;;  %v892_v19 = vadd.bf16 %v5468_v12, %v502_v34  ;;  %v509_v22 = vmul.bf16 %v5376_v8, %v119_v53 }
  0x68   :  { %v996_v15 = vmul.bf16 1045249613, %v868_v56  ;;  %v883_v47 = vadd.bf16 %v5428_v41, %v493_v60  ;;  %v884_v60 = vadd.bf16 %v5468_v12, %v494_v18  ;;  %v517_v18 = vmul.bf16 %v5376_v8, %v127_v6  ;;  %3173 = vmatmul.mubr.bf16.vlgmr.msra.gmra.mrb[32].mxu1 %v3798_v16  ;;  %v4717_v6 = vld [vmem:[%s7077_s1 + $0x210] sm:$0xff]  }
  0x69   :  { %v1020_v37 = vmul.bf16 1045249613, %v892_v19  ;;  %4448 = vmatpush3.bf16.msra.mxu1 %v4711_v28  ;;  %3180 = vmatprep.mubr.bf16.mxu1 %v3815_v32  ;;  %v899_v16 = vadd.bf16 %v5428_v41, %v509_v22 }
  0x6a   :  { %v5672_v29 = vmax.bf16 %v996_v15, %v868_v56  ;;  %v1011_v34 = vmul.bf16 1045249613, %v883_v47  ;;  %v1019_v56 = vmul.bf16 1045249613, %v891_v33  ;;  %v1012_v15 = vmul.bf16 1045249613, %v884_v60  ;;  %4449 = vmatprep.subr.bf16.mxu1 %v4714_v30 }
  0x6b   :  { %v5718_v53 = vmax.bf16 %v1020_v37, %v892_v19  ;;  %v907_v32 = vadd.bf16 %v5428_v41, %v517_v18  ;;  %v4720_v30 = vld [vmem:[%s7077_s1 + $0x258] sm:$0xff]   ;;  %v1027_v19 = vmul.bf16 1045249613, %v899_v16  ;;  %v135_v18 = vld [vmem:[%s7080_s0 + $0x390] sm:$0xff] }
  0x6c   :  { %3076 = vmatmul.mubr.bf16.vlgmr.msra.gmra.mrb[32].mxu0 %v3796_v61  ;;  %v4715_v61 = vld [vmem:[%s7077_s1 + $0x288] sm:$0xff]   ;;  %v5708_v9 = vmax.bf16 %v1011_v34, %v883_v47  ;;  %v5710_v11 = vmax.bf16 %v1019_v56, %v891_v33  ;;  %v5716_v28 = vmax.bf16 %v1012_v15, %v884_v60  ;;  %v4719_v47 = vld [vmem:[%s7077_s1 + $0x290] sm:$0xff]   ;;  %v518_v34 = vmul.bf16 %v5439_v58, %v128_v43  ;;  %v144_v60 = vld [vmem:[%s7080_s0 + $0x3d8] sm:$0xff] }
  0x6d   :  { %4384 = vmatpush3.bf16.msra.mxu0 %v4709_v24  ;;  %3083 = vmatprep.mubr.bf16.mxu0 %v3813_v14  ;;  %v3863_v24 = vcombine.high %v5672_v29, %v5674_v5  ;;  %v510_v14 = vmul.bf16 %v5439_v58, %v120_v59  ;;  %v1035_v56 = vmul.bf16 1045249613, %v907_v32  ;;  %v143_v15 = vld [vmem:[%s7080_s0 + $0x3d0] sm:$0xff]  ;;  %v5744_v43 = vmax.bf16 %v1027_v19, %v899_v16 }
  0x6e   :  { %4385 = vmatprep.subr.bf16.mxu0 %v4712_v54  ;;  %v4718_v54 = vld [vmem:[%s7077_s1 + $0x2d0] sm:$0xff]   ;;  %v3877_v33 = vcombine.high %v5708_v9, %v5710_v11  ;;  %4450 = vmatpush3.bf16.msra.mxu1 %v4715_v61  ;;  %v525_v37 = vmul.bf16 %v5376_v8, %v135_v18  ;;  %v533_v59 = vmul.bf16 %v5376_v8, %v143_v15  ;;  %v4721_v61 = vld [vmem:[%s7077_s1 + $0x218] sm:$0xff]   ;;  %v4727_v15 = vld [vmem:[%s7077_s1 + $0x2a0] sm:$0xff]  }
  0x6f   :  { %v900_v22 = vadd.bf16 %v5468_v12, %v510_v14  ;;  %v136_v14 = vld [vmem:[%s7080_s0 + $0x398] sm:$0xff]  ;;  %4451 = vmatprep.subr.bf16.mxu1 %v4718_v54  ;;  %v5764_v16 = vmax.bf16 %v1035_v56, %v907_v32  ;;  %v534_v18 = vmul.bf16 %v5439_v58, %v144_v60  ;;  %v308_v32 = vpack.i.b16 %v5447_v7, %v5447_v7  ;;  %v4726_v60 = vld [vmem:[%s7077_s1 + $0x2e0] sm:$0xff]  }
  0x70   :  { %v4722_v8 = vld [vmem:[%s7077_s1 + $0x2d8] sm:$0xff]   ;;  %v923_v54 = vadd.bf16 %v5428_v41, %v533_v59  ;;  %3181 = vmatmul.mubr.bf16.gmra.mrb[36].mxu1 %v3814_v21 }
  0x71   :  { %4386 = vmatpush3.bf16.msra.mxu0 %v4713_v50  ;;  %v3879_v50 = vcombine.high %v5716_v28, %v5718_v53  ;;  %v1028_v19 = vmul.bf16 1045249613, %v900_v22  ;;  %3188 = vmatprep.mubr.bf16.mxu1 %v3831_v3  ;;  %v924_v59 = vadd.bf16 %v5468_v12, %v534_v18  ;;  %v313_v56 = vrot.slane %v308_v32, %v4910_v42  ;;  %v25_v32 = vld [vmem:[%s7080_s0 + $0x20] sm:$0xff] }
  0x72   :  { %4387 = vmatprep.subr.bf16.mxu0 %v4716_v49  ;;  %v908_v49 = vadd.bf16 %v5468_v12, %v518_v34  ;;  %v526_v34 = vmul.bf16 %v5439_v58, %v136_v14  ;;  %v4724_v58 = vld [vmem:[%s7077_s1 + $0x260] sm:$0xff]   ;;  %4452 = vmatpush3.bf16.msra.mxu1 %v4719_v47  ;;  %v1051_v21 = vmul.bf16 1045249613, %v923_v54  ;;  %v615_v3 = vrot.slane %v4940_v57, %v4893_v35 }
  0x73   :  { %4453 = vmatprep.subr.bf16.mxu1 %v4722_v8  ;;  %v4725_v47 = vld [vmem:[%s7077_s1 + $0x220] sm:$0xff]   ;;  %v4730_v8 = vld [vmem:[%s7077_s1 + $0x2e8] sm:$0xff]  }
  0x74   :  { %3084 = vmatmul.mubr.bf16.gmra.mrb[36].mxu0 %v3812_v46  ;;  %v1036_v63 = vmul.bf16 1045249613, %v908_v49  ;;  %v915_v46 = vadd.bf16 %v5428_v41, %v525_v37  ;;  %v3892_v41 = vcombine.low %v5744_v43, %v5764_v16 }
  0x75   :  { %3091 = vmatprep.mubr.bf16.mxu0 %v3829_v36  ;;  %4388 = vmatpush3.bf16.msra.mxu0 %v4717_v6  ;;  %v3893_v36 = vcombine.high %v5744_v43, %v5764_v16  ;;  %v5786_v6 = vmax.bf16 %v1028_v19, %v900_v22  ;;  %v315_v22 = vpack.i.b16 %v5652_v25, %v5652_v25  ;;  %v121_v16 = vld [vmem:[%s7080_s0 + $0x320] sm:$0xff] }
  0x76   :  { %4389 = vmatprep.subr.bf16.mxu0 %v4720_v30  ;;  %v5793_v23 = vmax.bf16 %v1036_v63, %v908_v49  ;;  %v1043_v2 = vmul.bf16 1045249613, %v915_v46  ;;  %v916_v30 = vadd.bf16 %v5468_v12, %v526_v34  ;;  %v4728_v12 = vld [vmem:[%s7077_s1 + $0x268] sm:$0xff]   ;;  %v1052_v34 = vmul.bf16 1045249613, %v924_v59  ;;  %4454 = vmatpush3.bf16.msra.mxu1 %v4723_v26  ;;  %v33_v26 = vld [vmem:[%s7080_s0 + $0x60] sm:$0xff] }
  0x77   :  { %v320_v18 = vrot.slane %v315_v22, %v4910_v42  ;;  %v629_v63 = vrot.slane %v607_v27, %v4893_v35  ;;  %4455 = vmatprep.subr.bf16.mxu1 %v4726_v60 }
  0x78   :  { %v3895_v49 = vcombine.high %v5786_v6, %v5793_v23  ;;  %v3894_v37 = vcombine.low %v5786_v6, %v5793_v23  ;;  %v5818_v14 = vmax.bf16 %v1043_v2, %v915_v46  ;;  %v1044_v19 = vmul.bf16 1045249613, %v916_v30  ;;  %3189 = vmatmul.mubr.bf16.gmra.mrb[40].mxu1 %v3830_v38 }
  0x79   :  { %4390 = vmatpush3.bf16.msra.mxu0 %v4721_v61  ;;  %v5820_v61 = vmax.bf16 %v1051_v21, %v923_v54  ;;  %v247_v2 = vcombine.high %v5447_v7, %v5447_v7  ;;  %v5844_v27 = vmax.bf16 %v1052_v34, %v924_v59  ;;  %v5849_v21 = vcombine.low %v313_v56, %v320_v18  ;;  %v4729_v7 = vld [vmem:[%s7077_s1 + $0x228] sm:$0xff]   ;;  %v4735_v18 = vld [vmem:[%s7077_s1 + $0x2b0] sm:$0xff]  }
  0x7a   :  { %4391 = vmatprep.subr.bf16.mxu0 %v4724_v58  ;;  %v698_v58 = vpack.i.b16 %v615_v3, %v615_v3  ;;  %v5842_v57 = vmax.bf16 %v1044_v19, %v916_v30  ;;  %v705_v51 = vpack.i.b16 %v629_v63, %v629_v63  ;;  %3196 = vmatprep.mubr.bf16.mxu1 %v3847_v31  ;;  %v4734_v31 = vld [vmem:[%s7077_s1 + $0x2f0] sm:$0xff]  }
  0x7b   :  { %v3909_v46 = vcombine.high %v5818_v14, %v5820_v61  ;;  %v3908_v54 = vcombine.low %v5818_v14, %v5820_v61  ;;  %v415_v59 = vmul.bf16 %v5849_v21, %v25_v32  ;;  %4456 = vmatpush3.bf16.msra.mxu1 %v4727_v15  ;;  %v423_v38 = vmul.bf16 %v5849_v21, %v33_v26  ;;  %v4736_v32 = vld [vmem:[%s7077_s1 + $0x278] sm:$0xff]   ;;  %v26_v26 = vld [vmem:[%s7080_s0 + $0x28] sm:$0xff] }
  0x7c   :  { %3092 = vmatmul.mubr.bf16.gmra.mrb[40].mxu0 %v3828_v62  ;;  %v703_v20 = vrot.slane %v698_v58, %v4910_v42  ;;  %v249_v62 = vcombine.high %v5652_v25, %v5652_v25  ;;  %v3911_v30 = vcombine.high %v5842_v57, %v5844_v27  ;;  %v3910_v60 = vcombine.low %v5842_v57, %v5844_v27  ;;  %v41_v25 = vld [vmem:[%s7080_s0 + $0xa0] sm:$0xff] }
  0x7d   :  { %3099 = vmatprep.mubr.bf16.mxu0 %v3845_v13  ;;  %4392 = vmatpush3.bf16.msra.mxu0 %v4725_v47  ;;  %v4732_v13 = vld [vmem:[%s7077_s1 + $0x270] sm:$0xff]   ;;  %v710_v56 = vrot.slane %v705_v51, %v4910_v42  ;;  %v322_v22 = vpack.i.b16 %v247_v2, %v247_v2  ;;  %v49_v47 = vld [vmem:[%s7080_s0 + $0xe0] sm:$0xff]  ;;  %v639_v19 = vcombine.high %v629_v63, %v629_v63  ;;  %v4738_v63 = vld [vmem:[%s7077_s1 + $0x2f8] sm:$0xff]  }
  0x7e   :  { %4393 = vmatprep.subr.bf16.mxu0 %v4728_v12  ;;  %4457 = vmatprep.subr.bf16.mxu1 %v4730_v8  ;;  %v329_v15 = vpack.i.b16 %v249_v62, %v249_v62  ;;  %v637_v12 = vcombine.high %v615_v3, %v615_v3  ;;  %v431_v34 = vmul.bf16 %v5849_v21, %v41_v25  ;;  %v34_v25 = vld [vmem:[%s7080_s0 + $0x68] sm:$0xff] }
  0x7f   :  { %v5898_v58 = vcombine.low %v703_v20, %v710_v56  ;;  %v327_v8 = vrot.slane %v322_v22, %v4910_v42  ;;  %v439_v2 = vmul.bf16 %v5849_v21, %v49_v47  ;;  %v5906_v3 = vrot.slane %v202_v45, %v4893_v35  ;;  %4458 = vmatpush3.bf16.msra.mxu1 %v4731_v1  ;;  %v4737_v45 = vld [vmem:[%s7077_s1 + $0x238] sm:$0xff]   ;;  %v42_v47 = vld [vmem:[%s7080_s0 + $0xa8] sm:$0xff] }
  0x80   :  { %v712_v20 = vpack.i.b16 %v637_v12, %v637_v12  ;;  %v719_v51 = vpack.i.b16 %v639_v19, %v639_v19  ;;  %4459 = vmatprep.subr.bf16.mxu1 %v4734_v31  ;;  %v4739_v31 = vld [vmem:[%s7077_s1 + $0x2b8] sm:$0xff]   ;;  %v608_v14 = vcombine.high %v5919_v39, %v5919_v39 }
  0x81   :  { %4394 = vmatpush3.bf16.msra.mxu0 %v4729_v7  ;;  %v334_v7 = vrot.slane %v329_v15, %v4910_v42  ;;  %v805_v62 = vadd.bf16 %v5898_v58, %v415_v59  ;;  %v821_v56 = vadd.bf16 %v5898_v58, %v431_v34  ;;  %v829_v22 = vadd.bf16 %v5898_v58, %v439_v2 }
  0x82   :  { %4395 = vmatprep.subr.bf16.mxu0 %v4732_v13  ;;  %v813_v13 = vadd.bf16 %v5898_v58, %v423_v38  ;;  %v717_v1 = vrot.slane %v712_v20, %v4910_v42  ;;  %v724_v59 = vrot.slane %v719_v51, %v4910_v42  ;;  %v4740_v38 = vld [vmem:[%s7077_s1 + $0x340] sm:$0xff]   ;;  %v447_v34 = vmul.bf16 %v5849_v21, %v57_v55  ;;  %v50_v51 = vld [vmem:[%s7080_s0 + $0xe8] sm:$0xff] }
  0x83   :  { %v5934_v48 = vcombine.low %v327_v8, %v334_v7  ;;  %v933_v15 = vmul.bf16 1045249613, %v805_v62  ;;  %v949_v19 = vmul.bf16 1045249613, %v821_v56  ;;  %v7085_v8 = vcombine.low %v5600_v40, %v5602_v4  ;;  %4460 = vmatpush3.bf16.msra.mxu1 %v4735_v18 }
  0x84   :  { %3100 = vmatmul.mubr.bf16.gmra.mrb[44].mxu0 %v7083_v44  ;;  %v941_v12 = vmul.bf16 1045249613, %v813_v13  ;;  %v5959_v20 = vcombine.low %v717_v1, %v724_v59  ;;  %v65_v44 = vld [vmem:[%s7080_s0 + $0x160] sm:$0xff]  ;;  %4461 = vmatprep.subr.bf16.mxu1 %v4738_v63 }
  0x85   :  { %3107 = vmatprep.mubr.bf16.mxu0 %v7084_v10  ;;  %4396 = vmatpush3.bf16.msra.mxu0 %v4733_v52  ;;  %v416_v2 = vmul.bf16 %v5934_v48, %v26_v26  ;;  %v424_v7 = vmul.bf16 %v5934_v48, %v34_v25  ;;  %v957_v52 = vmul.bf16 1045249613, %v829_v22  ;;  %v5970_v40 = vmax.bf16 %v933_v15, %v805_v62  ;;  %v4742_v1 = vld [vmem:[%s7077_s1 + $0x3c0] sm:$0xff]   ;;  %v66_v10 = vld [vmem:[%s7080_s0 + $0x168] sm:$0xff] }
  0x86   :  { %3197 = vmatmul.mubr.bf16.gmra.mrb[44].mxu1 %v7085_v8  ;;  %4397 = vmatprep.subr.bf16.mxu0 %v4736_v32  ;;  %v5972_v4 = vmax.bf16 %v941_v12, %v813_v13  ;;  %v5974_v32 = vmax.bf16 %v949_v19, %v821_v56  ;;  %v440_v63 = vmul.bf16 %v5934_v48, %v50_v51  ;;  %v58_v56 = vld [vmem:[%s7080_s0 + $0x128] sm:$0xff] }
  0x87   :  { %3204 = vmatprep.mubr.bf16.mxu1 %v3863_v24  ;;  %v806_v26 = vadd.bf16 %v5959_v20, %v416_v2  ;;  %v814_v25 = vadd.bf16 %v5959_v20, %v424_v7  ;;  %v5981_v59 = vmax.bf16 %v957_v52, %v829_v22  ;;  %v432_v24 = vmul.bf16 %v5934_v48, %v42_v47  ;;  %v81_v2 = vld [vmem:[%s7080_s0 + $0x1e0] sm:$0xff] }
  0x88   :  { %v3800_v18 = vcombine.low %v5970_v40, %v5972_v4  ;;  %v3801_v62 = vcombine.high %v5970_v40, %v5972_v4  ;;  %v455_v13 = vmul.bf16 %v5849_v21, %v65_v44  ;;  %4462 = vmatpush3.bf16.msra.mxu1 %v4739_v31  ;;  %v830_v15 = vadd.bf16 %v5959_v20, %v440_v63  ;;  %v74_v31 = vld [vmem:[%s7080_s0 + $0x1a8] sm:$0xff] }
  0x89   :  { %4398 = vmatpush3.bf16.msra.mxu0 %v4737_v45  ;;  %v934_v55 = vmul.bf16 1045249613, %v806_v26  ;;  %v942_v22 = vmul.bf16 1045249613, %v814_v25  ;;  %v3817_v45 = vcombine.high %v5974_v32, %v5981_v59  ;;  %v822_v47 = vadd.bf16 %v5959_v20, %v432_v24  ;;  %4575 = vmatprep.subr.bf16.mxu1 %v4742_v1  ;;  %v4745_v40 = vld [vmem:[%s7077_s1 + $0x308] sm:$0xff]  }
  0x8a   :  { %4511 = vmatprep.subr.bf16.mxu0 %v4740_v38  ;;  %v837_v19 = vadd.bf16 %v5898_v58, %v447_v34  ;;  %v845_v8 = vadd.bf16 %v5898_v58, %v455_v13  ;;  %v73_v38 = vld [vmem:[%s7080_s0 + $0x1a0] sm:$0xff]  ;;  %v7086_v7 = vcombine.low %v5622_v17, %v5636_v0  ;;  %v448_v44 = vmul.bf16 %v5934_v48, %v58_v56 }
  0x8b   :  { %v6016_v52 = vmax.bf16 %v934_v55, %v806_v26  ;;  %v6018_v34 = vmax.bf16 %v942_v22, %v814_v25  ;;  %v950_v51 = vmul.bf16 1045249613, %v822_v47  ;;  %v958_v24 = vmul.bf16 1045249613, %v830_v15 }
  0x8c   :  { %3108 = vmatmul.mubr.bf16.gmra.mrb[48].mxu0 %v7086_v7  ;;  %v965_v63 = vmul.bf16 1045249613, %v837_v19  ;;  %v973_v13 = vmul.bf16 1045249613, %v845_v8  ;;  %v456_v12 = vmul.bf16 %v5934_v48, %v66_v10  ;;  %v7087_v17 = vcombine.low %v5672_v29, %v5674_v5  ;;  %v82_v10 = vld [vmem:[%s7080_s0 + $0x1e8] sm:$0xff] }
  0x8d   :  { %3115 = vmatprep.mubr.bf16.mxu0 %v3877_v33  ;;  %v3802_v0 = vcombine.low %v6016_v52, %v6018_v34  ;;  %v3803_v26 = vcombine.high %v6016_v52, %v6018_v34  ;;  %v6032_v25 = vmax.bf16 %v950_v51, %v822_v47  ;;  %v838_v1 = vadd.bf16 %v5959_v20, %v448_v44  ;;  %v6329_v52 = vld [vmem:[%s7080_s0 + $0xf0] sm:$0xff]  ;;  %v4747_v34 = vld [vmem:[%s7077_s1 + $0x388] sm:$0xff]  }
  0x8e   :  { %3205 = vmatmul.mubr.bf16.gmra.mrb[48].mxu1 %v7087_v17  ;;  %v6038_v33 = vmax.bf16 %v958_v24, %v830_v15  ;;  %v6040_v56 = vmax.bf16 %v965_v63, %v837_v19  ;;  %v6042_v5 = vmax.bf16 %v973_v13, %v845_v8  ;;  %v846_v29 = vadd.bf16 %v5959_v20, %v456_v12  ;;  %v89_v8 = vld [vmem:[%s7080_s0 + $0x220] sm:$0xff]  ;;  %v90_v24 = vld [vmem:[%s7080_s0 + $0x228] sm:$0xff] }
  0x8f   :  { %3212 = vmatprep.mubr.bf16.mxu1 %v3879_v50  ;;  %v966_v55 = vmul.bf16 1045249613, %v838_v1  ;;  %v463_v22 = vmul.bf16 %v5849_v21, %v73_v38  ;;  %v471_v47 = vmul.bf16 %v5849_v21, %v81_v2  ;;  %v464_v7 = vmul.bf16 %v5934_v48, %v74_v31  ;;  %v97_v38 = vld [vmem:[%s7080_s0 + $0x260] sm:$0xff] }
  0x90   :  { %v3819_v50 = vcombine.high %v6032_v25, %v6038_v33  ;;  %v3833_v12 = vcombine.high %v6040_v56, %v6042_v5  ;;  %v974_v19 = vmul.bf16 1045249613, %v846_v29  ;;  %v472_v13 = vmul.bf16 %v5934_v48, %v82_v10 }
  0x91   :  { %v6063_v2 = vmax.bf16 %v966_v55, %v838_v1  ;;  %v853_v51 = vadd.bf16 %v5898_v58, %v463_v22  ;;  %v861_v44 = vadd.bf16 %v5898_v58, %v471_v47  ;;  %v854_v17 = vadd.bf16 %v5959_v20, %v464_v7  ;;  %v98_v55 = vld [vmem:[%s7080_s0 + $0x268] sm:$0xff] }
  0x92   :  { %v6072_v63 = vmax.bf16 %v974_v19, %v846_v29  ;;  %v479_v1 = vmul.bf16 %v5849_v21, %v89_v8  ;;  %v7088_v22 = vcombine.low %v5708_v9, %v5710_v11  ;;  %v487_v15 = vmul.bf16 %v5849_v21, %v97_v38 }
  0x93   :  { %v981_v47 = vmul.bf16 1045249613, %v853_v51  ;;  %v989_v31 = vmul.bf16 1045249613, %v861_v44  ;;  %v480_v29 = vmul.bf16 %v5934_v48, %v90_v24  ;;  %v862_v19 = vadd.bf16 %v5959_v20, %v472_v13 }
  0x94   :  { %3116 = vmatmul.mubr.bf16.gmra.mrb[52].mxu0 %v7088_v22  ;;  %v982_v9 = vmul.bf16 1045249613, %v854_v17  ;;  %v7089_v11 = vcombine.low %v5716_v28, %v5718_v53  ;;  %v869_v24 = vadd.bf16 %v5898_v58, %v479_v1  ;;  %v488_v13 = vmul.bf16 %v5934_v48, %v98_v55  ;;  %v105_v53 = vld [vmem:[%s7080_s0 + $0x2a0] sm:$0xff] }
  0x95   :  { %3123 = vmatprep.mubr.bf16.mxu0 %v3893_v36  ;;  %v6096_v8 = vmax.bf16 %v981_v47, %v853_v51  ;;  %v6098_v38 = vmax.bf16 %v989_v31, %v861_v44  ;;  %v877_v36 = vadd.bf16 %v5898_v58, %v487_v15  ;;  %v990_v22 = vmul.bf16 1045249613, %v862_v19  ;;  %v113_v31 = vld [vmem:[%s7080_s0 + $0x2e0] sm:$0xff] }
  0x96   :  { %3213 = vmatmul.mubr.bf16.gmra.mrb[52].mxu1 %v7089_v11  ;;  %v6105_v7 = vmax.bf16 %v982_v9, %v854_v17  ;;  %v870_v28 = vadd.bf16 %v5959_v20, %v480_v29  ;;  %v997_v51 = vmul.bf16 1045249613, %v869_v24  ;;  %v106_v17 = vld [vmem:[%s7080_s0 + $0x2a8] sm:$0xff]  ;;  %v878_v55 = vadd.bf16 %v5959_v20, %v488_v13 }
  0x97   :  { %3220 = vmatprep.mubr.bf16.mxu1 %v3895_v49  ;;  %v1005_v44 = vmul.bf16 1045249613, %v877_v36  ;;  %v6122_v1 = vmax.bf16 %v990_v22, %v862_v19  ;;  %v495_v29 = vmul.bf16 %v5849_v21, %v105_v53  ;;  %v503_v15 = vmul.bf16 %v5849_v21, %v113_v31  ;;  %v114_v49 = vld [vmem:[%s7080_s0 + $0x2e8] sm:$0xff] }
  0x98   :  { %v998_v47 = vmul.bf16 1045249613, %v870_v28  ;;  %v6126_v9 = vmax.bf16 %v997_v51, %v869_v24  ;;  %v496_v10 = vmul.bf16 %v5934_v48, %v106_v17  ;;  %v1006_v13 = vmul.bf16 1045249613, %v878_v55 }
  0x99   :  { %v6128_v11 = vmax.bf16 %v1005_v44, %v877_v36  ;;  %v3851_v19 = vcombine.high %v6105_v7, %v6122_v1  ;;  %v885_v31 = vadd.bf16 %v5898_v58, %v495_v29  ;;  %v893_v51 = vadd.bf16 %v5898_v58, %v503_v15 }
  0x9a   :  { %v6139_v53 = vmax.bf16 %v998_v47, %v870_v28  ;;  %v6153_v28 = vmax.bf16 %v1006_v13, %v878_v55  ;;  %v504_v44 = vmul.bf16 %v5934_v48, %v114_v49  ;;  %v886_v43 = vadd.bf16 %v5959_v20, %v496_v10  ;;  %v122_v55 = vld [vmem:[%s7080_s0 + $0x328] sm:$0xff] }
  0x9b   :  { %v218_v15 = vcombine.high %v5906_v3, %v5906_v3  ;;  %v1021_v17 = vmul.bf16 1045249613, %v893_v51  ;;  %v511_v49 = vmul.bf16 %v5849_v21, %v121_v16  ;;  %v130_v47 = vld [vmem:[%s7080_s0 + $0x368] sm:$0xff] }
  0x9c   :  { %3124 = vmatmul.mubr.bf16.gmra.mrb[56].mxu0 %v3892_v41  ;;  %v129_v41 = vld [vmem:[%s7080_s0 + $0x360] sm:$0xff]  ;;  %v1014_v29 = vmul.bf16 1045249613, %v886_v43  ;;  %v520_v6 = vmul.bf16 %v5934_v48, %v130_v47 }
  0x9d   :  { %3131 = vmatprep.mubr.bf16.mxu0 %v3909_v46  ;;  %v1013_v46 = vmul.bf16 1045249613, %v885_v31  ;;  %v519_v10 = vmul.bf16 %v5849_v21, %v129_v41  ;;  %v6186_v16 = vmax.bf16 %v1021_v17, %v893_v51  ;;  %v901_v41 = vadd.bf16 %v5898_v58, %v511_v49  ;;  %v145_v47 = vld [vmem:[%s7080_s0 + $0x3e0] sm:$0xff] }
  0x9e   :  { %3221 = vmatmul.mubr.bf16.gmra.mrb[56].mxu1 %v3894_v37  ;;  %v894_v37 = vadd.bf16 %v5959_v20, %v504_v44  ;;  %v6190_v24 = vmax.bf16 %v1014_v29, %v886_v43  ;;  %v910_v49 = vadd.bf16 %v5959_v20, %v520_v6  ;;  %v232_v43 = vrot.slane %v5906_v3, %v4893_v35  ;;  %v138_v3 = vld [vmem:[%s7080_s0 + $0x3a8] sm:$0xff] }
  0x9f   :  { %3228 = vmatprep.mubr.bf16.mxu1 %v3911_v30  ;;  %v6184_v13 = vmax.bf16 %v1013_v46, %v885_v31  ;;  %v909_v36 = vadd.bf16 %v5898_v58, %v519_v10  ;;  %v512_v30 = vmul.bf16 %v5934_v48, %v122_v55  ;;  %v1029_v44 = vmul.bf16 1045249613, %v901_v41 }
  0xa0   :  { %v1022_v22 = vmul.bf16 1045249613, %v894_v37  ;;  %v6221_v6 = vrot.slane %v218_v15, %v4893_v35  ;;  %v146_v15 = vld [vmem:[%s7080_s0 + $0x3e8] sm:$0xff]  ;;  %v528_v57 = vmul.bf16 %v5934_v48, %v138_v3 }
  0xa1   :  { %v3881_v23 = vcombine.high %v6184_v13, %v6186_v16  ;;  %v1037_v51 = vmul.bf16 1045249613, %v909_v36  ;;  %v902_v17 = vadd.bf16 %v5959_v20, %v512_v30  ;;  %v6207_v10 = vmax.bf16 %v1029_v44, %v901_v41 }
  0xa2   :  { %v6198_v46 = vmax.bf16 %v1022_v22, %v894_v37  ;;  %v137_v22 = vld [vmem:[%s7080_s0 + $0x3a0] sm:$0xff]  ;;  %v1038_v37 = vmul.bf16 1045249613, %v910_v49  ;;  %v535_v30 = vmul.bf16 %v5849_v21, %v145_v47  ;;  %v536_v27 = vmul.bf16 %v5934_v48, %v146_v15 }
  0xa3   :  { %v6209_v55 = vmax.bf16 %v1037_v51, %v909_v36  ;;  %v1030_v36 = vmul.bf16 1045249613, %v902_v17  ;;  %v527_v41 = vmul.bf16 %v5849_v21, %v137_v22  ;;  %v343_v21 = vpack.i.b16 %v6221_v6, %v6221_v6  ;;  %v4743_v15 = vld [vmem:[%s7077_s1 + $0x380] sm:$0xff]  }
  0xa4   :  { %3132 = vmatmul.mubr.bf16.gmra.mrb[60].mxu0 %v3908_v54  ;;  %v6249_v51 = vmax.bf16 %v1038_v37, %v910_v49  ;;  %v336_v54 = vpack.i.b16 %v232_v43, %v232_v43  ;;  %v918_v48 = vadd.bf16 %v5959_v20, %v528_v57  ;;  %v926_v22 = vadd.bf16 %v5959_v20, %v536_v27  ;;  %v6277_v20 = vld [vmem:[%s7080_s0 + $0x30] sm:$0xff] }
  0xa5   :  { %3269 = vmatprep.mubr.bf16.mxu0 %v3801_v62  ;;  %v6247_v44 = vmax.bf16 %v1030_v36, %v902_v17  ;;  %v925_v62 = vadd.bf16 %v5898_v58, %v535_v30  ;;  %v348_v37 = vrot.slane %v343_v21, %v4910_v42  ;;  %v622_v57 = vrot.slane %v5919_v39, %v4893_v35  ;;  %v6295_v17 = vld [vmem:[%s7080_s0 + $0x70] sm:$0xff] }
  0xa6   :  { %3229 = vmatmul.mubr.bf16.gmra.mrb[60].mxu1 %v3910_v60  ;;  %v917_v60 = vadd.bf16 %v5898_v58, %v527_v41  ;;  %v4744_v58 = vld [vmem:[%s7077_s1 + $0x348] sm:$0xff]   ;;  %v341_v36 = vrot.slane %v336_v54, %v4910_v42  ;;  %v1046_v41 = vmul.bf16 1045249613, %v918_v48  ;;  %v1054_v30 = vmul.bf16 1045249613, %v926_v22 }
  0xa7   :  { %3366 = vmatprep.mubr.bf16.mxu1 %v3803_v26  ;;  %v4741_v26 = vld [vmem:[%s7077_s1 + $0x300] sm:$0xff]   ;;  %v1053_v3 = vmul.bf16 1045249613, %v925_v62  ;;  %v636_v27 = vrot.slane %v608_v14, %v4893_v35  ;;  %v4746_v54 = vld [vmem:[%s7077_s1 + $0x3c8] sm:$0xff]   ;;  %v248_v35 = vcombine.high %v232_v43, %v232_v43  ;;  %v726_v14 = vpack.i.b16 %v622_v57, %v622_v57  ;;  %v4748_v43 = vld [vmem:[%s7077_s1 + $0x350] sm:$0xff]  }
  0xa8   :  { %v1045_v47 = vmul.bf16 1045249613, %v917_v60  ;;  %v6297_v39 = vcombine.low %v341_v36, %v348_v37  ;;  %v6305_v4 = vmax.bf16 %v1046_v41, %v918_v48  ;;  %v250_v36 = vcombine.high %v6221_v6, %v6221_v6  ;;  %v4749_v41 = vld [vmem:[%s7077_s1 + $0x310] sm:$0xff]  }
  0xa9   :  { %v6290_v49 = vmax.bf16 %v1053_v3, %v925_v62  ;;  %v733_v3 = vpack.i.b16 %v636_v27, %v636_v27  ;;  %v350_v37 = vpack.i.b16 %v248_v35, %v248_v35  ;;  %v6374_v35 = vld [vmem:[%s7080_s0 + $0x1f0] sm:$0xff] }
  0xaa   :  { %v6288_v21 = vmax.bf16 %v1045_v47, %v917_v60  ;;  %v417_v60 = vmul.bf16 %v6297_v39, %v6277_v20  ;;  %v731_v47 = vrot.slane %v726_v14, %v4910_v42  ;;  %v640_v20 = vcombine.high %v636_v27, %v636_v27 }
  0xab   :  { %v738_v14 = vrot.slane %v733_v3, %v4910_v42  ;;  %v357_v27 = vpack.i.b16 %v250_v36, %v250_v36 }
  0xac   :  { %3270 = vmatmul.mubr.bf16.vlgmr.msra.gmra.mrb[64].mxu0 %v3800_v18  ;;  %v6307_v18 = vmax.bf16 %v1054_v30, %v926_v22  ;;  %v425_v22 = vmul.bf16 %v6297_v39, %v6295_v17  ;;  %v6357_v17 = vld [vmem:[%s7080_s0 + $0x170] sm:$0xff]  ;;  %v638_v30 = vcombine.high %v622_v57, %v622_v57  ;;  %v355_v57 = vrot.slane %v350_v37, %v4910_v42 }
  0xad   :  { %4512 = vmatpush3.bf16.msra.mxu0 %v4741_v26  ;;  %3277 = vmatprep.mubr.bf16.mxu0 %v3817_v45  ;;  %v6324_v26 = vld [vmem:[%s7080_s0 + $0xb0] sm:$0xff]  ;;  %v747_v62 = vpack.i.b16 %v640_v20, %v640_v20  ;;  %v457_v3 = vmul.bf16 %v6297_v39, %v6357_v17  ;;  %v7090_v37 = vcombine.low %v5974_v32, %v5981_v59  ;;  %v4753_v32 = vld [vmem:[%s7077_s1 + $0x318] sm:$0xff]  }
  0xae   :  { %3367 = vmatmul.mubr.bf16.vlgmr.msra.gmra.mrb[64].mxu1 %v3802_v0  ;;  %4513 = vmatprep.subr.bf16.mxu0 %v4744_v58  ;;  %v6346_v58 = vld [vmem:[%s7080_s0 + $0x130] sm:$0xff]  ;;  %v433_v6 = vmul.bf16 %v6297_v39, %v6324_v26  ;;  %v740_v48 = vpack.i.b16 %v638_v30, %v638_v30  ;;  %v6401_v0 = vcombine.low %v731_v47, %v738_v14  ;;  %v28_v59 = vld [vmem:[%s7080_s0 + $0x38] sm:$0xff] }
  0xaf   :  { %4576 = vmatpush3.bf16.msra.mxu1 %v4743_v15  ;;  %3374 = vmatprep.mubr.bf16.mxu1 %v3819_v50  ;;  %v4750_v50 = vld [vmem:[%s7077_s1 + $0x3d0] sm:$0xff]   ;;  %v449_v26 = vmul.bf16 %v6297_v39, %v6346_v58  ;;  %v362_v30 = vrot.slane %v357_v27, %v4910_v42  ;;  %v473_v20 = vmul.bf16 %v6297_v39, %v6374_v35  ;;  %v4756_v27 = vld [vmem:[%s7077_s1 + $0x360] sm:$0xff]   ;;  %v76_v17 = vld [vmem:[%s7080_s0 + $0x1b8] sm:$0xff] }
  0xb0   :  { %4577 = vmatprep.subr.bf16.mxu1 %v4746_v54  ;;  %v6362_v15 = vld [vmem:[%s7080_s0 + $0x1b0] sm:$0xff]  ;;  %v441_v54 = vmul.bf16 %v6297_v39, %v6329_v52  ;;  %v745_v47 = vrot.slane %v740_v48, %v4910_v42  ;;  %v752_v14 = vrot.slane %v747_v62, %v4910_v42  ;;  %v815_v45 = vadd.bf16 %v6401_v0, %v425_v22  ;;  %v44_v42 = vld [vmem:[%s7080_s0 + $0xb8] sm:$0xff] }
  0xb1   :  { %4514 = vmatpush3.bf16.msra.mxu0 %v4745_v40  ;;  %v4752_v40 = vld [vmem:[%s7077_s1 + $0x358] sm:$0xff]   ;;  %v6386_v52 = vld [vmem:[%s7080_s0 + $0x230] sm:$0xff]  ;;  %v465_v36 = vmul.bf16 %v6297_v39, %v6362_v15  ;;  %v6430_v29 = vcombine.low %v355_v57, %v362_v30  ;;  %v823_v48 = vadd.bf16 %v6401_v0, %v433_v6  ;;  %v847_v58 = vadd.bf16 %v6401_v0, %v457_v3 }
  0xb2   :  { %4515 = vmatprep.subr.bf16.mxu0 %v4748_v43  ;;  %v4751_v43 = vld [vmem:[%s7077_s1 + $0x390] sm:$0xff]   ;;  %v4755_v62 = vld [vmem:[%s7077_s1 + $0x398] sm:$0xff]   ;;  %v831_v22 = vadd.bf16 %v6401_v0, %v441_v54  ;;  %v943_v30 = vmul.bf16 1045249613, %v815_v45  ;;  %v7096_v35 = vcombine.low %v6096_v8, %v6098_v38 }
  0xb3   :  { %4578 = vmatpush3.bf16.msra.mxu1 %v4747_v34  ;;  %v4754_v34 = vld [vmem:[%s7077_s1 + $0x3d8] sm:$0xff]   ;;  %v434_v54 = vmul.bf16 %v6430_v29, %v44_v42  ;;  %v4759_v42 = vld [vmem:[%s7077_s1 + $0x3a0] sm:$0xff]  }
  0xb4   :  { %3278 = vmatmul.mubr.bf16.gmra.mrb[68].mxu0 %v7090_v37  ;;  %4579 = vmatprep.subr.bf16.mxu1 %v4750_v50  ;;  %v36_v50 = vld [vmem:[%s7080_s0 + $0x78] sm:$0xff]  ;;  %v807_v37 = vadd.bf16 %v6401_v0, %v417_v60  ;;  %v6444_v60 = vcombine.low %v745_v47, %v752_v14  ;;  %v4757_v47 = vld [vmem:[%s7077_s1 + $0x320] sm:$0xff]   ;;  %v951_v14 = vmul.bf16 1045249613, %v823_v48  ;;  %v959_v6 = vmul.bf16 1045249613, %v831_v22 }
  0xb5   :  { %3285 = vmatprep.mubr.bf16.mxu0 %v3833_v12  ;;  %4516 = vmatpush3.bf16.msra.mxu0 %v4749_v41  ;;  %v481_v12 = vmul.bf16 %v6297_v39, %v6386_v52  ;;  %v7091_v41 = vcombine.low %v6032_v25, %v6038_v33  ;;  %v52_v25 = vld [vmem:[%s7080_s0 + $0xf8] sm:$0xff]  ;;  %v7092_v33 = vcombine.high %v6063_v2, %v6072_v63  ;;  %v107_v52 = vld [vmem:[%s7080_s0 + $0x2b0] sm:$0xff] }
  0xb6   :  { %4517 = vmatprep.subr.bf16.mxu0 %v4752_v40  ;;  %v4758_v40 = vld [vmem:[%s7077_s1 + $0x3e0] sm:$0xff]   ;;  %v935_v57 = vmul.bf16 1045249613, %v807_v37  ;;  %v6470_v61 = vmax.bf16 %v951_v14, %v823_v48  ;;  %v68_v14 = vld [vmem:[%s7080_s0 + $0x178] sm:$0xff] }
  0xb7   :  { %3375 = vmatmul.mubr.bf16.gmra.mrb[68].mxu1 %v7091_v41  ;;  %v418_v41 = vmul.bf16 %v6430_v29, %v28_v59  ;;  %v6463_v59 = vmax.bf16 %v943_v30, %v815_v45  ;;  %v7093_v45 = vcombine.low %v6040_v56, %v6042_v5  ;;  %v4761_v56 = vld [vmem:[%s7077_s1 + $0x328] sm:$0xff]   ;;  %v84_v3 = vld [vmem:[%s7080_s0 + $0x1f8] sm:$0xff] }
  0xb8   :  { %3382 = vmatprep.mubr.bf16.mxu1 %v7092_v33  ;;  %4580 = vmatpush3.bf16.msra.mxu1 %v4751_v43  ;;  %v426_v43 = vmul.bf16 %v6430_v29, %v36_v50  ;;  %v4760_v33 = vld [vmem:[%s7077_s1 + $0x368] sm:$0xff]   ;;  %v6461_v31 = vmax.bf16 %v935_v57, %v807_v37 }
  0xb9   :  { %4581 = vmatprep.subr.bf16.mxu1 %v4754_v34  ;;  %4518 = vmatpush3.bf16.msra.mxu0 %v4753_v32  ;;  %v442_v34 = vmul.bf16 %v6430_v29, %v52_v25  ;;  %v808_v32 = vadd.bf16 %v6444_v60, %v418_v41  ;;  %v824_v25 = vadd.bf16 %v6444_v60, %v434_v54 }
  0xba   :  { %4519 = vmatprep.subr.bf16.mxu0 %v4756_v27  ;;  %v816_v50 = vadd.bf16 %v6444_v60, %v426_v43  ;;  %v6472_v27 = vmax.bf16 %v959_v6, %v831_v22  ;;  %v3804_v57 = vcombine.low %v6461_v31, %v6463_v59  ;;  %v3805_v48 = vcombine.high %v6461_v31, %v6463_v59  ;;  %v60_v6 = vld [vmem:[%s7080_s0 + $0x138] sm:$0xff] }
  0xbb   :  { %v832_v37 = vadd.bf16 %v6444_v60, %v442_v34  ;;  %v936_v22 = vmul.bf16 1045249613, %v808_v32  ;;  %v7094_v41 = vcombine.high %v6096_v8, %v6098_v38  ;;  %v7095_v54 = vcombine.low %v6063_v2, %v6072_v63  ;;  %v4763_v2 = vld [vmem:[%s7077_s1 + $0x3a8] sm:$0xff]  }
  0xbc   :  { %4582 = vmatpush3.bf16.msra.mxu1 %v4755_v62  ;;  %3286 = vmatmul.mubr.bf16.gmra.mrb[72].mxu0 %v7093_v45  ;;  %v4762_v62 = vld [vmem:[%s7077_s1 + $0x3e8] sm:$0xff]   ;;  %v944_v30 = vmul.bf16 1045249613, %v816_v50  ;;  %v3821_v5 = vcombine.high %v6470_v61, %v6472_v27 }
  0xbd   :  { %4583 = vmatprep.subr.bf16.mxu1 %v4758_v40  ;;  %3293 = vmatprep.mubr.bf16.mxu0 %v7094_v41  ;;  %v952_v40 = vmul.bf16 1045249613, %v824_v25  ;;  %v960_v43 = vmul.bf16 1045249613, %v832_v37  ;;  %v6505_v34 = vmax.bf16 %v936_v22, %v808_v32  ;;  %v839_v41 = vadd.bf16 %v6401_v0, %v449_v26  ;;  %v4766_v26 = vld [vmem:[%s7077_s1 + $0x3f0] sm:$0xff]  }
  0xbe   :  { %4520 = vmatpush3.bf16.msra.mxu0 %v4757_v47  ;;  %v4764_v47 = vld [vmem:[%s7077_s1 + $0x370] sm:$0xff]   ;;  %v6507_v45 = vmax.bf16 %v944_v30, %v816_v50  ;;  %v975_v22 = vmul.bf16 1045249613, %v847_v58  ;;  %v458_v30 = vmul.bf16 %v6430_v29, %v68_v14  ;;  %v863_v14 = vadd.bf16 %v6401_v0, %v473_v20 }
  0xbf   :  { %3383 = vmatmul.mubr.bf16.gmra.mrb[72].mxu1 %v7095_v54  ;;  %4521 = vmatprep.subr.bf16.mxu0 %v4760_v33  ;;  %v6522_v63 = vmax.bf16 %v952_v40, %v824_v25  ;;  %v6524_v33 = vmax.bf16 %v960_v43, %v832_v37  ;;  %v967_v50 = vmul.bf16 1045249613, %v839_v41  ;;  %v4765_v25 = vld [vmem:[%s7077_s1 + $0x330] sm:$0xff]   ;;  %v855_v54 = vadd.bf16 %v6401_v0, %v465_v36 }
  0xc0   :  { %3390 = vmatprep.mubr.bf16.mxu1 %v3851_v19  ;;  %4584 = vmatpush3.bf16.msra.mxu1 %v4759_v42  ;;  %v3806_v19 = vcombine.low %v6505_v34, %v6507_v45  ;;  %v3807_v32 = vcombine.high %v6505_v34, %v6507_v45  ;;  %v450_v42 = vmul.bf16 %v6430_v29, %v60_v6  ;;  %v99_v40 = vld [vmem:[%s7080_s0 + $0x270] sm:$0xff] }
  0xc1   :  { %4585 = vmatprep.subr.bf16.mxu1 %v4762_v62  ;;  %v6558_v43 = vmax.bf16 %v967_v50, %v839_v41  ;;  %v4770_v41 = vld [vmem:[%s7077_s1 + $0x3f8] sm:$0xff]   ;;  %v6575_v50 = vmax.bf16 %v975_v22, %v847_v58  ;;  %v848_v15 = vadd.bf16 %v6444_v60, %v458_v30  ;;  %v466_v36 = vmul.bf16 %v6430_v29, %v76_v17 }
  0xc2   :  { %4522 = vmatpush3.bf16.msra.mxu0 %v4761_v56  ;;  %v4768_v56 = vld [vmem:[%s7077_s1 + $0x378] sm:$0xff]   ;;  %v840_v6 = vadd.bf16 %v6444_v60, %v450_v42  ;;  %v474_v42 = vmul.bf16 %v6430_v29, %v84_v3  ;;  %v991_v62 = vmul.bf16 1045249613, %v863_v14  ;;  %v489_v37 = vmul.bf16 %v6297_v39, %v99_v40 }
  0xc3   :  { %4523 = vmatprep.subr.bf16.mxu0 %v4764_v47  ;;  %v4767_v47 = vld [vmem:[%s7077_s1 + $0x3b0] sm:$0xff]   ;;  %v7097_v58 = vcombine.high %v6126_v9, %v6128_v11  ;;  %v4769_v17 = vld [vmem:[%s7077_s1 + $0x338] sm:$0xff]   ;;  %v3837_v3 = vcombine.high %v6558_v43, %v6575_v50  ;;  %v976_v8 = vmul.bf16 1045249613, %v848_v15  ;;  %v7115_v31 = vcombine.low %v6522_v63, %v6524_v33 }
  0xc4   :  { %4586 = vmatpush3.bf16.msra.mxu1 %v4763_v2  ;;  %3294 = vmatmul.mubr.bf16.gmra.mrb[76].mxu0 %v7096_v35  ;;  %v968_v20 = vmul.bf16 1045249613, %v840_v6  ;;  %v983_v2 = vmul.bf16 1045249613, %v855_v54  ;;  %v92_v22 = vld [vmem:[%s7080_s0 + $0x238] sm:$0xff]  ;;  %v6605_v35 = vmax.bf16 %v991_v62, %v863_v14  ;;  %v871_v62 = vadd.bf16 %v6401_v0, %v481_v12  ;;  %v115_v12 = vld [vmem:[%s7080_s0 + $0x2f0] sm:$0xff] }
  0xc5   :  { %4587 = vmatprep.subr.bf16.mxu1 %v4766_v26  ;;  %3301 = vmatprep.mubr.bf16.mxu0 %v7097_v58  ;;  %v856_v26 = vadd.bf16 %v6444_v60, %v466_v36  ;;  %v7099_v58 = vcombine.high %v6139_v53, %v6153_v28  ;;  %v4771_v36 = vld [vmem:[%s7077_s1 + $0x3b8] sm:$0xff]   ;;  %v6613_v38 = vmax.bf16 %v976_v8, %v848_v15 }
  0xc6   :  { %4524 = vmatpush3.bf16.msra.mxu0 %v4765_v25  ;;  %v7098_v25 = vcombine.low %v6105_v7, %v6122_v1  ;;  %v6601_v30 = vmax.bf16 %v968_v20, %v840_v6  ;;  %v6603_v40 = vmax.bf16 %v983_v2, %v855_v54  ;;  %v864_v7 = vadd.bf16 %v6444_v60, %v474_v42 }
  0xc7   :  { %4525 = vmatprep.subr.bf16.mxu0 %v4768_v56  ;;  %v984_v1 = vmul.bf16 1045249613, %v856_v26  ;;  %v100_v56 = vld [vmem:[%s7080_s0 + $0x278] sm:$0xff]  ;;  %v879_v14 = vadd.bf16 %v6401_v0, %v489_v37  ;;  %v999_v2 = vmul.bf16 1045249613, %v871_v62  ;;  %v505_v54 = vmul.bf16 %v6297_v39, %v115_v12 }
  0xc8   :  { %3391 = vmatmul.mubr.bf16.gmra.mrb[76].mxu1 %v7098_v25  ;;  %v992_v42 = vmul.bf16 1045249613, %v864_v7  ;;  %v7100_v37 = vcombine.low %v6126_v9, %v6128_v11  ;;  %v7101_v12 = vcombine.low %v6139_v53, %v6153_v28  ;;  %v7104_v15 = vcombine.high %v6207_v10, %v6209_v55 }
  0xc9   :  { %3398 = vmatprep.mubr.bf16.mxu1 %v7099_v58  ;;  %4588 = vmatpush3.bf16.msra.mxu1 %v4767_v47  ;;  %v482_v47 = vmul.bf16 %v6430_v29, %v92_v22  ;;  %v6642_v20 = vmax.bf16 %v984_v1, %v856_v26  ;;  %v1007_v8 = vmul.bf16 1045249613, %v879_v14  ;;  %v490_v22 = vmul.bf16 %v6430_v29, %v100_v56 }
  0xca   :  { %4589 = vmatprep.subr.bf16.mxu1 %v4770_v41  ;;  %v108_v41 = vld [vmem:[%s7080_s0 + $0x2b8] sm:$0xff]  ;;  %4526 = vmatpush3.bf16.msra.mxu0 %v4769_v17  ;;  %v6646_v58 = vmax.bf16 %v992_v42, %v864_v7  ;;  %v497_v17 = vmul.bf16 %v6297_v39, %v107_v52  ;;  %v6654_v26 = vmax.bf16 %v999_v2, %v871_v62  ;;  %v131_v52 = vld [vmem:[%s7080_s0 + $0x370] sm:$0xff] }
  0xcb   :  { %v872_v25 = vadd.bf16 %v6444_v60, %v482_v47  ;;  %v498_v6 = vmul.bf16 %v6430_v29, %v108_v41  ;;  %v6656_v1 = vmax.bf16 %v1007_v8, %v879_v14  ;;  %v880_v56 = vadd.bf16 %v6444_v60, %v490_v22  ;;  %v123_v14 = vld [vmem:[%s7080_s0 + $0x330] sm:$0xff] }
  0xcc   :  { %3302 = vmatmul.mubr.bf16.gmra.mrb[80].mxu0 %v7100_v37  ;;  %v887_v11 = vadd.bf16 %v6401_v0, %v497_v17  ;;  %v895_v62 = vadd.bf16 %v6401_v0, %v505_v54  ;;  %v7102_v2 = vcombine.high %v6190_v24, %v6198_v46 }
  0xcd   :  { %4590 = vmatpush3.bf16.msra.mxu1 %v4771_v36  ;;  %v1000_v47 = vmul.bf16 1045249613, %v872_v25  ;;  %v116_v36 = vld [vmem:[%s7080_s0 + $0x2f8] sm:$0xff]  ;;  %3309 = vmatprep.mubr.bf16.mxu0 %v3881_v23  ;;  %v1008_v54 = vmul.bf16 1045249613, %v880_v56  ;;  %v888_v53 = vadd.bf16 %v6444_v60, %v498_v6 }
  0xce   :  { %v124_v23 = vld [vmem:[%s7080_s0 + $0x338] sm:$0xff]  ;;  %v1015_v8 = vmul.bf16 1045249613, %v887_v11  ;;  %v1023_v22 = vmul.bf16 1045249613, %v895_v62  ;;  %v506_v17 = vmul.bf16 %v6430_v29, %v116_v36 }
  0xcf   :  { %v6685_v37 = vmax.bf16 %v1000_v47, %v872_v25  ;;  %v6694_v28 = vmax.bf16 %v1008_v54, %v880_v56  ;;  %v521_v25 = vmul.bf16 %v6297_v39, %v131_v52  ;;  %v514_v47 = vmul.bf16 %v6430_v29, %v124_v23  ;;  %v132_v36 = vld [vmem:[%s7080_s0 + $0x378] sm:$0xff]  ;;  %v147_v52 = vld [vmem:[%s7080_s0 + $0x3f0] sm:$0xff] }
  0xd0   :  { %3399 = vmatmul.mubr.bf16.gmra.mrb[80].mxu1 %v7101_v12  ;;  %v513_v12 = vmul.bf16 %v6297_v39, %v123_v14  ;;  %v6699_v9 = vmax.bf16 %v1015_v8, %v887_v11  ;;  %v6701_v42 = vmax.bf16 %v1023_v22, %v895_v62  ;;  %v1016_v41 = vmul.bf16 1045249613, %v888_v53  ;;  %v139_v62 = vld [vmem:[%s7080_s0 + $0x3b0] sm:$0xff]  ;;  %v140_v23 = vld [vmem:[%s7080_s0 + $0x3b8] sm:$0xff] }
  0xd1   :  { %3406 = vmatprep.mubr.bf16.mxu1 %v7102_v2  ;;  %v896_v2 = vadd.bf16 %v6444_v60, %v506_v17  ;;  %v911_v11 = vadd.bf16 %v6401_v0, %v521_v25  ;;  %v522_v6 = vmul.bf16 %v6430_v29, %v132_v36  ;;  %v904_v7 = vadd.bf16 %v6444_v60, %v514_v47 }
  0xd2   :  { %v903_v14 = vadd.bf16 %v6401_v0, %v513_v12  ;;  %v6724_v22 = vmax.bf16 %v1016_v41, %v888_v53  ;;  %v7103_v12 = vcombine.low %v6184_v13, %v6186_v16  ;;  %v529_v41 = vmul.bf16 %v6297_v39, %v139_v62 }
  0xd3   :  { %v1024_v8 = vmul.bf16 1045249613, %v896_v2  ;;  %v1039_v56 = vmul.bf16 1045249613, %v911_v11  ;;  %v537_v53 = vmul.bf16 %v6297_v39, %v147_v52  ;;  %v530_v17 = vmul.bf16 %v6430_v29, %v140_v23 }
  0xd4   :  { %3310 = vmatmul.mubr.bf16.gmra.mrb[84].mxu0 %v7103_v12  ;;  %v1031_v25 = vmul.bf16 1045249613, %v903_v14  ;;  %v7105_v13 = vcombine.low %v6190_v24, %v6198_v46  ;;  %v912_v47 = vadd.bf16 %v6444_v60, %v522_v6  ;;  %v1032_v12 = vmul.bf16 1045249613, %v904_v7 }
  0xd5   :  { %3317 = vmatprep.mubr.bf16.mxu0 %v7104_v15  ;;  %v6736_v54 = vmax.bf16 %v1024_v8, %v896_v2  ;;  %v6746_v36 = vmax.bf16 %v1039_v56, %v911_v11  ;;  %v148_v15 = vld [vmem:[%s7080_s0 + $0x3f8] sm:$0xff]  ;;  %v7106_v39 = vcombine.high %v6247_v44, %v6249_v51  ;;  %v919_v46 = vadd.bf16 %v6401_v0, %v529_v41 }
  0xd6   :  { %v6744_v16 = vmax.bf16 %v1031_v25, %v903_v14  ;;  %v927_v56 = vadd.bf16 %v6401_v0, %v537_v53  ;;  %v1040_v14 = vmul.bf16 1045249613, %v912_v47  ;;  %v6763_v11 = vmax.bf16 %v1032_v12, %v904_v7 }
  0xd7   :  { %v3887_v2 = vcombine.high %v6724_v22, %v6736_v54  ;;  %v3886_v24 = vcombine.low %v6724_v22, %v6736_v54  ;;  %v1047_v52 = vmul.bf16 1045249613, %v919_v46  ;;  %v538_v8 = vmul.bf16 %v6430_v29, %v148_v15 }
  0xd8   :  { %3407 = vmatmul.mubr.bf16.gmra.mrb[84].mxu1 %v7105_v13  ;;  %v3901_v6 = vcombine.high %v6744_v16, %v6746_v36  ;;  %v3900_v62 = vcombine.low %v6744_v16, %v6746_v36  ;;  %v1055_v23 = vmul.bf16 1045249613, %v927_v56  ;;  %v920_v25 = vadd.bf16 %v6444_v60, %v530_v17 }
  0xd9   :  { %3414 = vmatprep.mubr.bf16.mxu1 %v7106_v39  ;;  %v6769_v13 = vmax.bf16 %v1040_v14, %v912_v47  ;;  %v6771_v41 = vmax.bf16 %v1047_v52, %v919_v46  ;;  %v928_v53 = vadd.bf16 %v6444_v60, %v538_v8  ;;  %v7107_v7 = vcombine.low %v6207_v10, %v6209_v55 }
  0xda   :  { %v6773_v0 = vmax.bf16 %v1055_v23, %v927_v56  ;;  %v1048_v39 = vmul.bf16 1045249613, %v920_v25  ;;  %v7108_v17 = vcombine.high %v6288_v21, %v6290_v49  ;;  %v7109_v55 = vcombine.low %v6247_v44, %v6249_v51 }
  0xdb   :  { %v3903_v12 = vcombine.high %v6763_v11, %v6769_v13  ;;  %v3902_v29 = vcombine.low %v6763_v11, %v6769_v13  ;;  %v1056_v15 = vmul.bf16 1045249613, %v928_v53  ;;  %v7110_v46 = vcombine.high %v6305_v4, %v6307_v18 }
  0xdc   :  { %3318 = vmatmul.mubr.bf16.gmra.mrb[88].mxu0 %v7107_v7  ;;  %v3917_v47 = vcombine.high %v6771_v41, %v6773_v0  ;;  %v6788_v60 = vmax.bf16 %v1048_v39, %v920_v25  ;;  %v3916_v10 = vcombine.low %v6771_v41, %v6773_v0  ;;  %v7111_v23 = vcombine.low %v6288_v21, %v6290_v49 }
  0xdd   :  { %3325 = vmatprep.mubr.bf16.mxu0 %v7108_v17  ;;  %v6798_v56 = vmax.bf16 %v1056_v15, %v928_v53  ;;  %v7112_v44 = vcombine.low %v6305_v4, %v6307_v18  ;;  %v7113_v51 = vcombine.high %v6522_v63, %v6524_v33  ;;  %v7114_v49 = vcombine.low %v6470_v61, %v6472_v27 }
  0xde   :  { %v7116_v21 = vcombine.high %v6601_v30, %v6613_v38  ;;  %v7117_v4 = vcombine.low %v6558_v43, %v6575_v50  ;;  %v7118_v61 = vcombine.high %v6603_v40, %v6605_v35  ;;  %v7119_v18 = vcombine.low %v6601_v30, %v6613_v38 }
  0xdf   :  { %v3919_v14 = vcombine.high %v6788_v60, %v6798_v56  ;;  %v3918_v52 = vcombine.low %v6788_v60, %v6798_v56  ;;  %v7120_v27 = vcombine.high %v6642_v20, %v6646_v58  ;;  %v7121_v50 = vcombine.low %v6603_v40, %v6605_v35 }
  0xe0   :  { %3415 = vmatmul.mubr.bf16.gmra.mrb[88].mxu1 %v7109_v55  ;;  %v7122_v30 = vcombine.high %v6654_v26, %v6656_v1  ;;  %v7123_v8 = vcombine.low %v6642_v20, %v6646_v58  ;;  %v7124_v39 = vcombine.high %v6685_v37, %v6694_v28  ;;  %v7125_v20 = vcombine.low %v6654_v26, %v6656_v1 }
  0xe1   :  { %3422 = vmatprep.mubr.bf16.mxu1 %v7110_v46 }
  0xe4   :  { %3326 = vmatmul.mubr.bf16.gmra.mrb[92].mxu0 %v7111_v23 }
  0xe5   :  { %3463 = vmatprep.mubr.bf16.mxu0 %v3805_v48 }
  0xe8   :  { %3423 = vmatmul.mubr.bf16.gmra.mrb[92].mxu1 %v7112_v44 }
  0xe9   :  { %3560 = vmatprep.mubr.bf16.mxu1 %v3807_v32 }
  0xec   :  { %3464 = vmatmul.mubr.bf16.vlgmr.msra.gmra.mrb[96].mxu0 %v3804_v57 }
  0xed   :  { %3471 = vmatprep.mubr.bf16.mxu0 %v3821_v5 }
  0xf0   :  { %3561 = vmatmul.mubr.bf16.vlgmr.msra.gmra.mrb[96].mxu1 %v3806_v19 }
  0xf1   :  { %3568 = vmatprep.mubr.bf16.mxu1 %v7113_v51 }
  0xf4   :  { %3472 = vmatmul.mubr.bf16.gmra.mrb[100].mxu0 %v7114_v49 }
  0xf5   :  { %3479 = vmatprep.mubr.bf16.mxu0 %v3837_v3 }
  0xf8   :  { %3569 = vmatmul.mubr.bf16.gmra.mrb[100].mxu1 %v7115_v31  ;;  %v7126_v31 = vcombine.high %v6699_v9, %v6701_v42 }
  0xf9   :  { %3576 = vmatprep.mubr.bf16.mxu1 %v7116_v21  ;;  %v7127_v21 = vcombine.low %v6685_v37, %v6694_v28  ;;  %v7128_v37 = vcombine.low %v6699_v9, %v6701_v42 }
  0xfa   :  { %v4207_v48 = vpop.f32.mrb[0].mxu1 }
  0xfb   :  { %v4208_v45 = vpop.f32.mrb[1].mxu1 }
  0xfc   :  { %3480 = vmatmul.mubr.bf16.gmra.mrb[104].mxu0 %v7117_v4  ;;  %v4209_v33 = vadd.f32 %v4208_v45, %v4207_v48  ;;  %v4210_v19 = vpop.f32.mrb[2].mxu1 }
  0xfd   :  { %3487 = vmatprep.mubr.bf16.mxu0 %v7118_v61  ;;  %v4211_v43 = vpop.f32.mrb[3].mxu1 }
  0xfe   :  { %v4212_v38 = vadd.f32 %v4211_v43, %v4210_v19 }
  0xff   :  { %v4143_v59 = vpop.f32.mrb[0].mxu0 }
 0x100   :  { %3577 = vmatmul.mubr.bf16.gmra.mrb[104].mxu1 %v7119_v18  ;;  %v4144_v57 = vpop.f32.mrb[1].mxu0 }
 0x101   :  { %3584 = vmatprep.mubr.bf16.mxu1 %v7120_v27  ;;  %v4145_v5 = vadd.f32 %v4144_v57, %v4143_v59  ;;  %v4146_v34 = vpop.f32.mrb[2].mxu0 }
 0x102   :  { %v4147_v63 = vpop.f32.mrb[3].mxu0  ;;  %v4213_v35 = vpop.f32.mrb[4].mxu1 }
 0x103   :  { %v4148_v32 = vadd.f32 %v4147_v63, %v4146_v34  ;;  %v6855_v3 = vadd.f32 %v4209_v33, %v4145_v5  ;;  %v4214_v15 = vpop.f32.mrb[5].mxu1 }
 0x104   :  { %3488 = vmatmul.mubr.bf16.gmra.mrb[108].mxu0 %v7121_v50  ;;  %v4215_v46 = vadd.f32 %v4214_v15, %v4213_v35  ;;  %v4216_v23 = vpop.f32.mrb[6].mxu1 }
 0x105   :  { %3495 = vmatprep.mubr.bf16.mxu0 %v7122_v30  ;;  %v6863_v25 = vadd.f32 %v4212_v38, %v4148_v32  ;;  %v4217_v51 = vpop.f32.mrb[7].mxu1 }
 0x106   :  { %v4218_v49 = vadd.f32 %v4217_v51, %v4216_v23 }
 0x107   :  { %v4149_v53 = vpop.f32.mrb[4].mxu0 }
 0x108   :  { %3585 = vmatmul.mubr.bf16.gmra.mrb[108].mxu1 %v7123_v8  ;;  %v4150_v40 = vpop.f32.mrb[5].mxu0 }
 0x109   :  { %3592 = vmatprep.mubr.bf16.mxu1 %v7124_v39  ;;  %v4151_v7 = vadd.f32 %v4150_v40, %v4149_v53  ;;  %v4152_v17 = vpop.f32.mrb[6].mxu0 }
 0x10a   :  { %v4153_v55 = vpop.f32.mrb[7].mxu0 }
 0x10b   :  { %v4154_v44 = vadd.f32 %v4153_v55, %v4152_v17  ;;  %v6871_v58 = vadd.f32 %v4215_v46, %v4151_v7  ;;  %v4219_v1 = vpop.f32.mrb[8].mxu1 }
 0x10c   :  { %3496 = vmatmul.mubr.bf16.gmra.mrb[112].mxu0 %v7125_v20  ;;  %v4220_v27 = vpop.f32.mrb[9].mxu1 }
 0x10d   :  { %3503 = vmatprep.mubr.bf16.mxu0 %v7126_v31  ;;  %v6879_v4 = vadd.f32 %v4218_v49, %v4154_v44  ;;  %v4221_v48 = vadd.f32 %v4220_v27, %v4219_v1  ;;  %v4222_v5 = vpop.f32.mrb[10].mxu1 }
 0x10e   :  { %v4223_v45 = vpop.f32.mrb[11].mxu1 }
 0x10f   :  { %v4155_v61 = vpop.f32.mrb[8].mxu0  ;;  %v4224_v63 = vadd.f32 %v4223_v45, %v4222_v5 }
 0x110   :  { %3593 = vmatmul.mubr.bf16.gmra.mrb[112].mxu1 %v7127_v21  ;;  %v4156_v26 = vpop.f32.mrb[9].mxu0 }
 0x111   :  { %3600 = vmatprep.mubr.bf16.mxu1 %v3887_v2  ;;  %v4157_v18 = vadd.f32 %v4156_v26, %v4155_v61  ;;  %v4158_v59 = vpop.f32.mrb[10].mxu0 }
 0x112   :  { %v4159_v57 = vpop.f32.mrb[11].mxu0 }
 0x113   :  { %v4160_v34 = vadd.f32 %v4159_v57, %v4158_v59  ;;  %v6887_v28 = vadd.f32 %v4221_v48, %v4157_v18  ;;  %v4225_v42 = vpop.f32.mrb[12].mxu1 }
 0x114   :  { %3504 = vmatmul.mubr.bf16.gmra.mrb[116].mxu0 %v7128_v37  ;;  %v4226_v43 = vpop.f32.mrb[13].mxu1 }
 0x115   :  { %3511 = vmatprep.mubr.bf16.mxu0 %v3901_v6  ;;  %v6895_v2 = vadd.f32 %v4224_v63, %v4160_v34  ;;  %v4227_v38 = vadd.f32 %v4226_v43, %v4225_v42  ;;  %v4228_v30 = vpop.f32.mrb[14].mxu1 }
 0x116   :  { %v4229_v8 = vpop.f32.mrb[15].mxu1 }
 0x117   :  { %v4161_v33 = vpop.f32.mrb[12].mxu0  ;;  %v4230_v22 = vadd.f32 %v4229_v8, %v4228_v30 }
 0x118   :  { %3601 = vmatmul.mubr.bf16.gmra.mrb[116].mxu1 %v3886_v24  ;;  %v4162_v9 = vpop.f32.mrb[13].mxu0 }
 0x119   :  { %3608 = vmatprep.mubr.bf16.mxu1 %v3903_v12  ;;  %v4163_v19 = vadd.f32 %v4162_v9, %v4161_v33  ;;  %v4164_v32 = vpop.f32.mrb[14].mxu0 }
 0x11a   :  { %v4165_v50 = vpop.f32.mrb[15].mxu0 }
 0x11b   :  { %v4166_v6 = vadd.f32 %v4165_v50, %v4164_v32  ;;  %v6903_v54 = vadd.f32 %v4227_v38, %v4163_v19  ;;  %v4231_v36 = vpop.f32.mrb[16].mxu1 }
 0x11c   :  { %3512 = vmatmul.mubr.bf16.gmra.mrb[120].mxu0 %v3900_v62  ;;  %v4232_v39 = vpop.f32.mrb[17].mxu1 }
 0x11d   :  { %3519 = vmatprep.mubr.bf16.mxu0 %v3917_v47  ;;  %v6911_v24 = vadd.f32 %v4230_v22, %v4166_v6  ;;  %v4233_v35 = vadd.f32 %v4232_v39, %v4231_v36  ;;  %v4234_v7 = vpop.f32.mrb[18].mxu1 }
 0x11e   :  { %v4235_v17 = vpop.f32.mrb[19].mxu1 }
 0x11f   :  { %v4167_v12 = vpop.f32.mrb[16].mxu0  ;;  %v4236_v13 = vadd.f32 %v4235_v17, %v4234_v7 }
 0x120   :  { %3609 = vmatmul.mubr.bf16.gmra.mrb[120].mxu1 %v3902_v29  ;;  %v4168_v16 = vpop.f32.mrb[17].mxu0 }
 0x121   :  { %3616 = vmatprep.mubr.bf16.mxu1 %v3919_v14  ;;  %v4169_v62 = vadd.f32 %v4168_v16, %v4167_v12  ;;  %v4170_v53 = vpop.f32.mrb[18].mxu0 }
 0x122   :  { %v4171_v40 = vpop.f32.mrb[19].mxu0 }
 0x123   :  { %v4172_v47 = vadd.f32 %v4171_v40, %v4170_v53  ;;  %v6919_v11 = vadd.f32 %v4233_v35, %v4169_v62  ;;  %v4237_v55 = vpop.f32.mrb[20].mxu1 }
 0x124   :  { %3520 = vmatmul.mubr.bf16.gmra.mrb[124].mxu0 %v3916_v10  ;;  %v4238_v44 = vpop.f32.mrb[21].mxu1 }
 0x125   :  { %v6924_v29 = vadd.f32 %v4236_v13, %v4172_v47  ;;  %v4239_v20 = vadd.f32 %v4238_v44, %v4237_v55  ;;  %v4240_v49 = vpop.f32.mrb[22].mxu1 }
 0x126   :  { %v4241_v0 = vpop.f32.mrb[23].mxu1 }
 0x127   :  { %v4173_v14 = vpop.f32.mrb[20].mxu0  ;;  %v4242_v31 = vadd.f32 %v4241_v0, %v4240_v49 }
 0x128   :  { %3617 = vmatmul.mubr.bf16.gmra.mrb[124].mxu1 %v3918_v52  ;;  %v4174_v15 = vpop.f32.mrb[21].mxu0 }
 0x129   :  { %v4175_v46 = vadd.f32 %v4174_v15, %v4173_v14  ;;  %v4176_v23 = vpop.f32.mrb[22].mxu0 }
 0x12a   :  { %v4177_v51 = vpop.f32.mrb[23].mxu0 }
 0x12b   :  { %v4178_v41 = vadd.f32 %v4177_v51, %v4176_v23  ;;  %v6926_v10 = vadd.f32 %v4239_v20, %v4175_v46  ;;  %v4243_v52 = vpop.f32.mrb[24].mxu1 }
 0x12c   :  { %v4244_v1 = vpop.f32.mrb[25].mxu1 }
 0x12d   :  { %v6928_v21 = vadd.f32 %v4242_v31, %v4178_v41  ;;  %v4245_v59 = vadd.f32 %v4244_v1, %v4243_v52  ;;  %v4246_v27 = vpop.f32.mrb[26].mxu1 }
 0x12e   :  { %v4247_v48 = vpop.f32.mrb[27].mxu1 }
 0x12f   :  { %v4179_v60 = vpop.f32.mrb[24].mxu0  ;;  %v4248_v34 = vadd.f32 %v4247_v48, %v4246_v27 }
 0x130   :  { %v4180_v56 = vpop.f32.mrb[25].mxu0 }
 0x131   :  { %v4181_v61 = vadd.f32 %v4180_v56, %v4179_v60  ;;  %v4182_v26 = vpop.f32.mrb[26].mxu0 }
 0x132   :  { %v4183_v18 = vpop.f32.mrb[27].mxu0 }
 0x133   :  { %v4184_v57 = vadd.f32 %v4183_v18, %v4182_v26  ;;  %v6930_v5 = vadd.f32 %v4245_v59, %v4181_v61  ;;  %v4249_v33 = vpop.f32.mrb[28].mxu1 }
 0x134   :  { %v4250_v19 = vpop.f32.mrb[29].mxu1 }
 0x135   :  { %v6932_v45 = vadd.f32 %v4248_v34, %v4184_v57  ;;  %v4251_v43 = vadd.f32 %v4250_v19, %v4249_v33  ;;  %v4252_v50 = vpop.f32.mrb[30].mxu1 }
 0x136   :  { %v4253_v30 = vpop.f32.mrb[31].mxu1 }
 0x137   :  { %v4185_v37 = vpop.f32.mrb[28].mxu0  ;;  %v4254_v8 = vadd.f32 %v4253_v30, %v4252_v50 }
 0x138   :  { %v4186_v63 = vpop.f32.mrb[29].mxu0 }
 0x139   :  { %v4187_v9 = vadd.f32 %v4186_v63, %v4185_v37  ;;  %v4188_v42 = vpop.f32.mrb[30].mxu0 }
 0x13a   :  { %v4189_v32 = vpop.f32.mrb[31].mxu0 }
 0x13b   :  { %v4190_v38 = vadd.f32 %v4189_v32, %v4188_v42  ;;  %v6934_v6 = vadd.f32 %v4251_v43, %v4187_v9  ;;  %v4335_v36 = vpop.f32.mrb[32].mxu1 }
 0x13c   :  { %v4336_v39 = vpop.f32.mrb[33].mxu1 }
 0x13d   :  { %v6936_v22 = vadd.f32 %v4254_v8, %v4190_v38  ;;  %v4337_v7 = vadd.f32 %v4336_v39, %v4335_v36  ;;  %v4338_v47 = vpop.f32.mrb[34].mxu1 }
 0x13e   :  { %v4339_v13 = vpop.f32.mrb[35].mxu1 }
 0x13f   :  { %v4271_v12 = vpop.f32.mrb[32].mxu0  ;;  %v4340_v55 = vadd.f32 %v4339_v13, %v4338_v47 }
 0x140   :  { %v4272_v16 = vpop.f32.mrb[33].mxu0 }
 0x141   :  { %v4273_v62 = vadd.f32 %v4272_v16, %v4271_v12  ;;  %v4274_v53 = vpop.f32.mrb[34].mxu0 }
 0x142   :  { %v4275_v40 = vpop.f32.mrb[35].mxu0 }
 0x143   :  { %v3078_v35 = vadd.f32 %v4273_v62, %v6855_v3  ;;  %v4276_v17 = vadd.f32 %v4275_v40, %v4274_v53  ;;  %v4341_v51 = vpop.f32.mrb[36].mxu1 }
 0x144   :  { %v4342_v41 = vpop.f32.mrb[37].mxu1 }
 0x145   :  { %v6939_v14 = vadd.f32 %v4337_v7, %v3078_v35  ;;  %v3081_v15 = vadd.f32 %v4276_v17, %v6863_v25  ;;  %v4343_v31 = vadd.f32 %v4342_v41, %v4341_v51  ;;  %v4344_v60 = vpop.f32.mrb[38].mxu1 }
 0x146   :  { %v4345_v52 = vpop.f32.mrb[39].mxu1 }
 0x147   :  { %v6942_v46 = vadd.f32 %v4340_v55, %v3081_v15  ;;  %v4277_v23 = vpop.f32.mrb[36].mxu0  ;;  %v4346_v26 = vadd.f32 %v4345_v52, %v4344_v60 }
 0x148   :  { %v4278_v44 = vpop.f32.mrb[37].mxu0 }
 0x149   :  { %v4279_v20 = vadd.f32 %v4278_v44, %v4277_v23  ;;  %v4280_v49 = vpop.f32.mrb[38].mxu0 }
 0x14a   :  { %v4281_v0 = vpop.f32.mrb[39].mxu0 }
 0x14b   :  { %v3086_v3 = vadd.f32 %v4279_v20, %v6871_v58  ;;  %v4282_v56 = vadd.f32 %v4281_v0, %v4280_v49  ;;  %v4347_v27 = vpop.f32.mrb[40].mxu1 }
 0x14c   :  { %v4348_v34 = vpop.f32.mrb[41].mxu1 }
 0x14d   :  { %v6945_v61 = vadd.f32 %v4343_v31, %v3086_v3  ;;  %v3089_v25 = vadd.f32 %v4282_v56, %v6879_v4  ;;  %v4349_v63 = vadd.f32 %v4348_v34, %v4347_v27  ;;  %v4350_v33 = vpop.f32.mrb[42].mxu1 }
 0x14e   :  { %v4351_v42 = vpop.f32.mrb[43].mxu1 }
 0x14f   :  { %v6948_v1 = vadd.f32 %v4346_v26, %v3089_v25  ;;  %v4283_v18 = vpop.f32.mrb[40].mxu0  ;;  %v4352_v32 = vadd.f32 %v4351_v42, %v4350_v33 }
 0x150   :  { %v4284_v59 = vpop.f32.mrb[41].mxu0 }
 0x151   :  { %v4285_v57 = vadd.f32 %v4284_v59, %v4283_v18  ;;  %v4286_v48 = vpop.f32.mrb[42].mxu0 }
 0x152   :  { %v4287_v37 = vpop.f32.mrb[43].mxu0 }
 0x153   :  { %v3094_v58 = vadd.f32 %v4285_v57, %v6887_v28  ;;  %v4288_v9 = vadd.f32 %v4287_v37, %v4286_v48 }
 0x155   :  { %v6951_v19 = vadd.f32 %v4349_v63, %v3094_v58  ;;  %v3097_v4 = vadd.f32 %v4288_v9, %v6895_v2 }
 0x157   :  { %v6954_v43 = vadd.f32 %v4352_v32, %v3097_v4  ;;  %v4289_v50 = vpop.f32.mrb[44].mxu0 }
 0x158   :  { %v4290_v38 = vpop.f32.mrb[45].mxu0 }
 0x159   :  { %v4353_v30 = vpop.f32.mrb[44].mxu1  ;;  %v4291_v8 = vadd.f32 %v4290_v38, %v4289_v50  ;;  %v4292_v12 = vpop.f32.mrb[46].mxu0 }
 0x15a   :  { %v4354_v16 = vpop.f32.mrb[45].mxu1  ;;  %v4293_v36 = vpop.f32.mrb[47].mxu0 }
 0x15b   :  { %v3102_v28 = vadd.f32 %v4291_v8, %v6903_v54  ;;  %v4355_v62 = vadd.f32 %v4354_v16, %v4353_v30  ;;  %v4356_v53 = vpop.f32.mrb[46].mxu1  ;;  %v4294_v39 = vadd.f32 %v4293_v36, %v4292_v12 }
 0x15c   :  { %v4357_v40 = vpop.f32.mrb[47].mxu1 }
 0x15d   :  { %v6957_v35 = vadd.f32 %v4355_v62, %v3102_v28  ;;  %v3105_v2 = vadd.f32 %v4294_v39, %v6911_v24  ;;  %v4358_v7 = vadd.f32 %v4357_v40, %v4356_v53 }
 0x15f   :  { %v6960_v47 = vadd.f32 %v4358_v7, %v3105_v2  ;;  %v4295_v17 = vpop.f32.mrb[48].mxu0 }
 0x160   :  { %v4296_v13 = vpop.f32.mrb[49].mxu0 }
 0x161   :  { %v4359_v15 = vpop.f32.mrb[48].mxu1  ;;  %v4297_v55 = vadd.f32 %v4296_v13, %v4295_v17  ;;  %v4298_v23 = vpop.f32.mrb[50].mxu0 }
 0x162   :  { %v4360_v44 = vpop.f32.mrb[49].mxu1  ;;  %v4299_v51 = vpop.f32.mrb[51].mxu0 }
 0x163   :  { %v3110_v54 = vadd.f32 %v4297_v55, %v6919_v11  ;;  %v4361_v20 = vadd.f32 %v4360_v44, %v4359_v15  ;;  %v4362_v49 = vpop.f32.mrb[50].mxu1  ;;  %v4300_v41 = vadd.f32 %v4299_v51, %v4298_v23 }
 0x164   :  { %v4363_v0 = vpop.f32.mrb[51].mxu1 }
 0x165   :  { %v6963_v3 = vadd.f32 %v4361_v20, %v3110_v54  ;;  %v3113_v24 = vadd.f32 %v4300_v41, %v6924_v29  ;;  %v4364_v31 = vadd.f32 %v4363_v0, %v4362_v49 }
 0x167   :  { %v6966_v60 = vadd.f32 %v4364_v31, %v3113_v24  ;;  %v4301_v56 = vpop.f32.mrb[52].mxu0 }
 0x168   :  { %v4302_v52 = vpop.f32.mrb[53].mxu0 }
 0x169   :  { %v4365_v25 = vpop.f32.mrb[52].mxu1  ;;  %v4303_v26 = vadd.f32 %v4302_v52, %v4301_v56  ;;  %v4304_v18 = vpop.f32.mrb[54].mxu0 }
 0x16a   :  { %v4366_v59 = vpop.f32.mrb[53].mxu1  ;;  %v4305_v27 = vpop.f32.mrb[55].mxu0 }
 0x16b   :  { %v3118_v11 = vadd.f32 %v4303_v26, %v6926_v10  ;;  %v4367_v57 = vadd.f32 %v4366_v59, %v4365_v25  ;;  %v4368_v48 = vpop.f32.mrb[54].mxu1  ;;  %v4306_v34 = vadd.f32 %v4305_v27, %v4304_v18 }
 0x16c   :  { %v4369_v37 = vpop.f32.mrb[55].mxu1 }
 0x16d   :  { %v6969_v58 = vadd.f32 %v4367_v57, %v3118_v11  ;;  %v3121_v29 = vadd.f32 %v4306_v34, %v6928_v21  ;;  %v4370_v63 = vadd.f32 %v4369_v37, %v4368_v48 }
 0x16f   :  { %v6972_v33 = vadd.f32 %v4370_v63, %v3121_v29  ;;  %v4307_v9 = vpop.f32.mrb[56].mxu0 }
 0x170   :  { %v4308_v42 = vpop.f32.mrb[57].mxu0 }
 0x171   :  { %v4371_v4 = vpop.f32.mrb[56].mxu1  ;;  %v4309_v32 = vadd.f32 %v4308_v42, %v4307_v9  ;;  %v4310_v50 = vpop.f32.mrb[58].mxu0 }
 0x172   :  { %v4372_v38 = vpop.f32.mrb[57].mxu1  ;;  %v4311_v30 = vpop.f32.mrb[59].mxu0 }
 0x173   :  { %v3126_v10 = vadd.f32 %v4309_v32, %v6930_v5  ;;  %v4373_v8 = vadd.f32 %v4372_v38, %v4371_v4  ;;  %v4374_v12 = vpop.f32.mrb[58].mxu1  ;;  %v4312_v16 = vadd.f32 %v4311_v30, %v4310_v50 }
 0x174   :  { %v4375_v36 = vpop.f32.mrb[59].mxu1 }
 0x175   :  { %v6975_v28 = vadd.f32 %v4373_v8, %v3126_v10  ;;  %v3129_v21 = vadd.f32 %v4312_v16, %v6932_v45  ;;  %v4376_v62 = vadd.f32 %v4375_v36, %v4374_v12 }
 0x177   :  { %v6978_v53 = vadd.f32 %v4376_v62, %v3129_v21  ;;  %v4313_v39 = vpop.f32.mrb[60].mxu0 }
 0x178   :  { %v4314_v40 = vpop.f32.mrb[61].mxu0 }
 0x179   :  { %v4377_v2 = vpop.f32.mrb[60].mxu1  ;;  %v4315_v7 = vadd.f32 %v4314_v40, %v4313_v39  ;;  %v4316_v17 = vpop.f32.mrb[62].mxu0 }
 0x17a   :  { %v4378_v13 = vpop.f32.mrb[61].mxu1  ;;  %v4317_v15 = vpop.f32.mrb[63].mxu0 }
 0x17b   :  { %v3134_v5 = vadd.f32 %v4315_v7, %v6934_v6  ;;  %v4379_v55 = vadd.f32 %v4378_v13, %v4377_v2  ;;  %v4380_v23 = vpop.f32.mrb[62].mxu1  ;;  %v4318_v44 = vadd.f32 %v4317_v15, %v4316_v17 }
 0x17c   :  { %v4381_v51 = vpop.f32.mrb[63].mxu1 }
 0x17d   :  { %v6981_v54 = vadd.f32 %v4379_v55, %v3134_v5  ;;  %v3137_v45 = vadd.f32 %v4318_v44, %v6936_v22  ;;  %v4382_v20 = vadd.f32 %v4381_v51, %v4380_v23 }
 0x17f   :  { %v6984_v49 = vadd.f32 %v4382_v20, %v3137_v45  ;;  %v4399_v41 = vpop.f32.mrb[64].mxu0 }
 0x180   :  { %v4400_v0 = vpop.f32.mrb[65].mxu0 }
 0x181   :  { %v4463_v24 = vpop.f32.mrb[64].mxu1  ;;  %v4401_v31 = vadd.f32 %v4400_v0, %v4399_v41  ;;  %v4402_v56 = vpop.f32.mrb[66].mxu0 }
 0x182   :  { %v4464_v52 = vpop.f32.mrb[65].mxu1  ;;  %v4403_v25 = vpop.f32.mrb[67].mxu0 }
 0x183   :  { %v3272_v6 = vadd.f32 %v4401_v31, %v6939_v14  ;;  %v4465_v26 = vadd.f32 %v4464_v52, %v4463_v24  ;;  %v4466_v18 = vpop.f32.mrb[66].mxu1  ;;  %v4404_v59 = vadd.f32 %v4403_v25, %v4402_v56 }
 0x184   :  { %v4467_v27 = vpop.f32.mrb[67].mxu1 }
 0x185   :  { %v6987_v11 = vadd.f32 %v4465_v26, %v3272_v6  ;;  %v3275_v22 = vadd.f32 %v4404_v59, %v6942_v46  ;;  %v4468_v57 = vadd.f32 %v4467_v27, %v4466_v18 }
 0x187   :  { %v6990_v48 = vadd.f32 %v4468_v57, %v3275_v22  ;;  %v4405_v34 = vpop.f32.mrb[68].mxu0 }
 0x188   :  { %v4406_v37 = vpop.f32.mrb[69].mxu0 }
 0x189   :  { %v4407_v63 = vadd.f32 %v4406_v37, %v4405_v34  ;;  %v4408_v9 = vpop.f32.mrb[70].mxu0 }
 0x18a   :  { %v4469_v29 = vpop.f32.mrb[68].mxu1  ;;  %v4409_v4 = vpop.f32.mrb[71].mxu0 }
 0x18b   :  { %v4470_v42 = vpop.f32.mrb[69].mxu1  ;;  %v3280_v14 = vadd.f32 %v4407_v63, %v6945_v61  ;;  %v4410_v38 = vadd.f32 %v4409_v4, %v4408_v9 }
 0x18c   :  { %v4471_v32 = vadd.f32 %v4470_v42, %v4469_v29  ;;  %v4472_v50 = vpop.f32.mrb[70].mxu1 }
 0x18d   :  { %v4473_v30 = vpop.f32.mrb[71].mxu1  ;;  %v3283_v46 = vadd.f32 %v4410_v38, %v6948_v1 }
 0x18e   :  { %v6993_v10 = vadd.f32 %v4471_v32, %v3280_v14  ;;  %v4474_v8 = vadd.f32 %v4473_v30, %v4472_v50 }
 0x18f   :  { %v4411_v16 = vpop.f32.mrb[72].mxu0 }
 0x190   :  { %v6996_v12 = vadd.f32 %v4474_v8, %v3283_v46  ;;  %v4412_v36 = vpop.f32.mrb[73].mxu0 }
 0x191   :  { %v4413_v62 = vadd.f32 %v4412_v36, %v4411_v16  ;;  %v4414_v39 = vpop.f32.mrb[74].mxu0 }
 0x192   :  { %v4475_v21 = vpop.f32.mrb[72].mxu1  ;;  %v4415_v2 = vpop.f32.mrb[75].mxu0 }
 0x193   :  { %v4476_v40 = vpop.f32.mrb[73].mxu1  ;;  %v3288_v61 = vadd.f32 %v4413_v62, %v6951_v19  ;;  %v4416_v13 = vadd.f32 %v4415_v2, %v4414_v39 }
 0x194   :  { %v4477_v7 = vadd.f32 %v4476_v40, %v4475_v21  ;;  %v4478_v17 = vpop.f32.mrb[74].mxu1 }
 0x195   :  { %v4479_v15 = vpop.f32.mrb[75].mxu1  ;;  %v3291_v1 = vadd.f32 %v4416_v13, %v6954_v43 }
 0x196   :  { %v6999_v5 = vadd.f32 %v4477_v7, %v3288_v61  ;;  %v4480_v55 = vadd.f32 %v4479_v15, %v4478_v17 }
 0x197   :  { %v4417_v44 = vpop.f32.mrb[76].mxu0 }
 0x198   :  { %v7002_v23 = vadd.f32 %v4480_v55, %v3291_v1  ;;  %v4418_v51 = vpop.f32.mrb[77].mxu0 }
 0x199   :  { %v4419_v20 = vadd.f32 %v4418_v51, %v4417_v44  ;;  %v4420_v41 = vpop.f32.mrb[78].mxu0 }
 0x19a   :  { %v4421_v24 = vpop.f32.mrb[79].mxu0 }
 0x19b   :  { %v4481_v45 = vpop.f32.mrb[76].mxu1  ;;  %v3296_v19 = vadd.f32 %v4419_v20, %v6957_v35  ;;  %v4422_v52 = vadd.f32 %v4421_v24, %v4420_v41 }
 0x19c   :  { %v4482_v0 = vpop.f32.mrb[77].mxu1 }
 0x19d   :  { %v4483_v31 = vadd.f32 %v4482_v0, %v4481_v45  ;;  %v4484_v56 = vpop.f32.mrb[78].mxu1  ;;  %v3299_v43 = vadd.f32 %v4422_v52, %v6960_v47 }
 0x19e   :  { %v4485_v25 = vpop.f32.mrb[79].mxu1 }
 0x19f   :  { %v7005_v6 = vadd.f32 %v4483_v31, %v3296_v19  ;;  %v4486_v26 = vadd.f32 %v4485_v25, %v4484_v56  ;;  %v4423_v59 = vpop.f32.mrb[80].mxu0 }
 0x1a0   :  { %v4424_v27 = vpop.f32.mrb[81].mxu0 }
 0x1a1   :  { %v7008_v18 = vadd.f32 %v4486_v26, %v3299_v43  ;;  %v4425_v57 = vadd.f32 %v4424_v27, %v4423_v59  ;;  %v4426_v34 = vpop.f32.mrb[82].mxu0 }
 0x1a2   :  { %v4427_v29 = vpop.f32.mrb[83].mxu0 }
 0x1a3   :  { %v4487_v22 = vpop.f32.mrb[80].mxu1  ;;  %v3304_v35 = vadd.f32 %v4425_v57, %v6963_v3  ;;  %v4428_v42 = vadd.f32 %v4427_v29, %v4426_v34 }
 0x1a4   :  { %v4488_v37 = vpop.f32.mrb[81].mxu1 }
 0x1a5   :  { %v4489_v63 = vadd.f32 %v4488_v37, %v4487_v22  ;;  %v4490_v9 = vpop.f32.mrb[82].mxu1  ;;  %v3307_v47 = vadd.f32 %v4428_v42, %v6966_v60 }
 0x1a6   :  { %v4491_v4 = vpop.f32.mrb[83].mxu1 }
 0x1a7   :  { %v7011_v14 = vadd.f32 %v4489_v63, %v3304_v35  ;;  %v4492_v32 = vadd.f32 %v4491_v4, %v4490_v9  ;;  %v4429_v38 = vpop.f32.mrb[84].mxu0 }
 0x1a8   :  { %v4430_v30 = vpop.f32.mrb[85].mxu0 }
 0x1a9   :  { %v7014_v50 = vadd.f32 %v4492_v32, %v3307_v47  ;;  %v4431_v8 = vadd.f32 %v4430_v30, %v4429_v38  ;;  %v4432_v16 = vpop.f32.mrb[86].mxu0 }
 0x1aa   :  { %v4433_v21 = vpop.f32.mrb[87].mxu0 }
 0x1ab   :  { %v4493_v46 = vpop.f32.mrb[84].mxu1  ;;  %v3312_v3 = vadd.f32 %v4431_v8, %v6969_v58  ;;  %v4434_v40 = vadd.f32 %v4433_v21, %v4432_v16 }
 0x1ac   :  { %v4494_v36 = vpop.f32.mrb[85].mxu1 }
 0x1ad   :  { %v4495_v62 = vadd.f32 %v4494_v36, %v4493_v46  ;;  %v4496_v39 = vpop.f32.mrb[86].mxu1  ;;  %v3315_v60 = vadd.f32 %v4434_v40, %v6972_v33 }
 0x1ae   :  { %v4497_v2 = vpop.f32.mrb[87].mxu1 }
 0x1af   :  { %v7017_v61 = vadd.f32 %v4495_v62, %v3312_v3  ;;  %v4498_v7 = vadd.f32 %v4497_v2, %v4496_v39  ;;  %v4435_v13 = vpop.f32.mrb[88].mxu0 }
 0x1b0   :  { %v4436_v15 = vpop.f32.mrb[89].mxu0 }
 0x1b1   :  { %v7020_v17 = vadd.f32 %v4498_v7, %v3315_v60  ;;  %v4437_v55 = vadd.f32 %v4436_v15, %v4435_v13  ;;  %v4438_v44 = vpop.f32.mrb[90].mxu0 }
 0x1b2   :  { %v4439_v45 = vpop.f32.mrb[91].mxu0 }
 0x1b3   :  { %v4499_v1 = vpop.f32.mrb[88].mxu1  ;;  %v3320_v58 = vadd.f32 %v4437_v55, %v6975_v28  ;;  %v4440_v0 = vadd.f32 %v4439_v45, %v4438_v44 }
 0x1b4   :  { %v4500_v51 = vpop.f32.mrb[89].mxu1 }
 0x1b5   :  { %v4501_v20 = vadd.f32 %v4500_v51, %v4499_v1  ;;  %v4502_v41 = vpop.f32.mrb[90].mxu1  ;;  %v3323_v33 = vadd.f32 %v4440_v0, %v6978_v53 }
 0x1b6   :  { %v4503_v24 = vpop.f32.mrb[91].mxu1 }
 0x1b7   :  { %v7023_v19 = vadd.f32 %v4501_v20, %v3320_v58  ;;  %v4504_v31 = vadd.f32 %v4503_v24, %v4502_v41  ;;  %v4441_v52 = vpop.f32.mrb[92].mxu0 }
 0x1b8   :  { %v4442_v25 = vpop.f32.mrb[93].mxu0 }
 0x1b9   :  { %v7026_v56 = vadd.f32 %v4504_v31, %v3323_v33  ;;  %v4443_v26 = vadd.f32 %v4442_v25, %v4441_v52  ;;  %v4444_v59 = vpop.f32.mrb[94].mxu0 }
 0x1ba   :  { %v4445_v22 = vpop.f32.mrb[95].mxu0 }
 0x1bb   :  { %v4505_v43 = vpop.f32.mrb[92].mxu1  ;;  %v3328_v28 = vadd.f32 %v4443_v26, %v6981_v54  ;;  %v4446_v37 = vadd.f32 %v4445_v22, %v4444_v59 }
 0x1bc   :  { %v4506_v27 = vpop.f32.mrb[93].mxu1 }
 0x1bd   :  { %v4507_v57 = vadd.f32 %v4506_v27, %v4505_v43  ;;  %v4508_v34 = vpop.f32.mrb[94].mxu1  ;;  %v3331_v53 = vadd.f32 %v4446_v37, %v6984_v49 }
 0x1be   :  { %v4509_v29 = vpop.f32.mrb[95].mxu1 }
 0x1bf   :  { %v7029_v35 = vadd.f32 %v4507_v57, %v3328_v28  ;;  %v4510_v63 = vadd.f32 %v4509_v29, %v4508_v34  ;;  %v4527_v42 = vpop.f32.mrb[96].mxu0 }
 0x1c0   :  { %v4528_v4 = vpop.f32.mrb[97].mxu0 }
 0x1c1   :  { %v7032_v9 = vadd.f32 %v4510_v63, %v3331_v53  ;;  %v4529_v32 = vadd.f32 %v4528_v4, %v4527_v42  ;;  %v4530_v38 = vpop.f32.mrb[98].mxu0 }
 0x1c2   :  { %v4531_v46 = vpop.f32.mrb[99].mxu0 }
 0x1c3   :  { %v4591_v47 = vpop.f32.mrb[96].mxu1  ;;  %v3466_v54 = vadd.f32 %v4529_v32, %v6987_v11  ;;  %v4532_v36 = vadd.f32 %v4531_v46, %v4530_v38 }
 0x1c4   :  { %v4592_v30 = vpop.f32.mrb[97].mxu1 }
 0x1c5   :  { %v4593_v8 = vadd.f32 %v4592_v30, %v4591_v47  ;;  %v4594_v16 = vpop.f32.mrb[98].mxu1  ;;  %v3469_v62 = vadd.f32 %v4532_v36, %v6990_v48 }
 0x1c6   :  { %v4595_v21 = vpop.f32.mrb[99].mxu1 }
 0x1c7   :  { %v3563_v3 = vadd.f32 %v4593_v8, %v3466_v54  ;;  %v4596_v49 = vadd.f32 %v4595_v21, %v4594_v16  ;;  %v4533_v40 = vpop.f32.mrb[100].mxu0 }
 0x1c8   :  { %v4534_v60 = vpop.f32.mrb[101].mxu0 }
 0x1c9   :  { %v3566_v39 = vadd.f32 %v4596_v49, %v3469_v62  ;;  %v3646_v2 = vmul.f32 %v3563_v3, %v3563_v3  ;;  %v4535_v55 = vadd.f32 %v4534_v60, %v4533_v40  ;;  %v4536_v44 = vpop.f32.mrb[102].mxu0 }
 0x1ca   :  { %v4537_v11 = vpop.f32.mrb[103].mxu0 }
 0x1cb   :  { %v3625_v7 = vadd.f32 %v3566_v39, %v3563_v3  ;;  %v3647_v13 = vmul.f32 %v3566_v39, %v3566_v39  ;;  %v4083_v15 = vpack.c.bf16 %v3566_v39, %v3563_v3  ;;  %v4597_v1 = vpop.f32.mrb[100].mxu1  ;;  %v3474_v48 = vadd.f32 %v4535_v55, %v6993_v10 }
 0x1cc   :  { %v4598_v51 = vpop.f32.mrb[101].mxu1  ;;  %v4538_v41 = vadd.f32 %v4537_v11, %v4536_v44 }
 0x1cd   :  { %v3662_v45 = vadd.f32 %v3647_v13, %v3646_v2  ;;  %4084 = vst [vmem:[%s7081_s4] sm:$0xff] %v4083_v15   ;;  %v4599_v58 = vadd.f32 %v4598_v51, %v4597_v1  ;;  %v4600_v20 = vpop.f32.mrb[102].mxu1 }
 0x1ce   :  { %v4601_v0 = vpop.f32.mrb[103].mxu1  ;;  %v3477_v33 = vadd.f32 %v4538_v41, %v6996_v12 }
 0x1cf   :  { %v3571_v24 = vadd.f32 %v4599_v58, %v3474_v48  ;;  %v4602_v31 = vadd.f32 %v4601_v0, %v4600_v20  ;;  %v4539_v26 = vpop.f32.mrb[104].mxu0 }
 0x1d0   :  { %v4540_v59 = vpop.f32.mrb[105].mxu0 }
 0x1d1   :  { %v3626_v52 = vadd.f32 %v3625_v7, %v3571_v24  ;;  %v3648_v25 = vmul.f32 %v3571_v24, %v3571_v24  ;;  %v3574_v43 = vadd.f32 %v4602_v31, %v3477_v33  ;;  %v4542_v37 = vpop.f32.mrb[106].mxu0  ;;  %v4541_v10 = vadd.f32 %v4540_v59, %v4539_v26 }
 0x1d2   :  { %v4543_v53 = vpop.f32.mrb[107].mxu0 }
 0x1d3   :  { %v3663_v27 = vadd.f32 %v3662_v45, %v3648_v25  ;;  %v3627_v22 = vadd.f32 %v3626_v52, %v3574_v43  ;;  %v3649_v28 = vmul.f32 %v3574_v43, %v3574_v43  ;;  %v4088_v57 = vpack.c.bf16 %v3574_v43, %v3571_v24  ;;  %v4603_v34 = vpop.f32.mrb[104].mxu1 }
 0x1d4   :  { %v4604_v29 = vpop.f32.mrb[105].mxu1  ;;  %v4544_v4 = vadd.f32 %v4543_v53, %v4542_v37  ;;  %v3482_v47 = vadd.f32 %v4541_v10, %v6999_v5 }
 0x1d5   :  { %v3664_v63 = vadd.f32 %v3663_v27, %v3649_v28  ;;  %4120 = vst [vmem:[%s7081_s4 + $0x8] sm:$0xff] %v4088_v57   ;;  %v4605_v12 = vadd.f32 %v4604_v29, %v4603_v34  ;;  %v4606_v42 = vpop.f32.mrb[106].mxu1 }
 0x1d6   :  { %v4607_v32 = vpop.f32.mrb[107].mxu1  ;;  %v3485_v38 = vadd.f32 %v4544_v4, %v7002_v23 }
 0x1d7   :  { %v4608_v30 = vadd.f32 %v4607_v32, %v4606_v42  ;;  %v3579_v46 = vadd.f32 %v4605_v12, %v3482_v47  ;;  %v4545_v8 = vpop.f32.mrb[108].mxu0 }
 0x1d8   :  { %v4546_v21 = vpop.f32.mrb[109].mxu0 }
 0x1d9   :  { %v3582_v54 = vadd.f32 %v4608_v30, %v3485_v38  ;;  %v3628_v16 = vadd.f32 %v3627_v22, %v3579_v46  ;;  %v3650_v36 = vmul.f32 %v3579_v46, %v3579_v46  ;;  %v4547_v39 = vadd.f32 %v4546_v21, %v4545_v8  ;;  %v4548_v40 = vpop.f32.mrb[110].mxu0 }
 0x1da   :  { %v4549_v13 = vpop.f32.mrb[111].mxu0 }
 0x1db   :  { %v3651_v3 = vmul.f32 %v3582_v54, %v3582_v54  ;;  %v4093_v62 = vpack.c.bf16 %v3582_v54, %v3579_v46  ;;  %v4609_v49 = vpop.f32.mrb[108].mxu1  ;;  %v3665_v2 = vadd.f32 %v3664_v63, %v3650_v36  ;;  %v3629_v60 = vadd.f32 %v3628_v16, %v3582_v54 }
 0x1dc   :  { %v4610_v7 = vpop.f32.mrb[109].mxu1  ;;  %v3490_v5 = vadd.f32 %v4547_v39, %v7005_v6  ;;  %v4550_v1 = vadd.f32 %v4549_v13, %v4548_v40 }
 0x1dd   :  { %4121 = vst [vmem:[%s7081_s4 + $0x10] sm:$0xff] %v4093_v62   ;;  %v4611_v23 = vadd.f32 %v4610_v7, %v4609_v49  ;;  %v4612_v15 = vpop.f32.mrb[110].mxu1  ;;  %v3666_v55 = vadd.f32 %v3665_v2, %v3651_v3 }
 0x1de   :  { %v4613_v44 = vpop.f32.mrb[111].mxu1  ;;  %v3493_v11 = vadd.f32 %v4550_v1, %v7008_v18 }
 0x1df   :  { %v3587_v51 = vadd.f32 %v4611_v23, %v3490_v5  ;;  %v4614_v45 = vadd.f32 %v4613_v44, %v4612_v15  ;;  %v4551_v41 = vpop.f32.mrb[112].mxu0 }
 0x1e0   :  { %v4552_v0 = vpop.f32.mrb[113].mxu0 }
 0x1e1   :  { %v3630_v48 = vadd.f32 %v3629_v60, %v3587_v51  ;;  %v3652_v58 = vmul.f32 %v3587_v51, %v3587_v51  ;;  %v3590_v20 = vadd.f32 %v4614_v45, %v3493_v11  ;;  %v4554_v6 = vpop.f32.mrb[114].mxu0  ;;  %v4553_v43 = vadd.f32 %v4552_v0, %v4551_v41 }
 0x1e2   :  { %v4555_v59 = vpop.f32.mrb[115].mxu0 }
 0x1e3   :  { %v3667_v24 = vadd.f32 %v3666_v55, %v3652_v58  ;;  %v3631_v33 = vadd.f32 %v3630_v48, %v3590_v20  ;;  %v3653_v31 = vmul.f32 %v3590_v20, %v3590_v20  ;;  %v4098_v52 = vpack.c.bf16 %v3590_v20, %v3587_v51  ;;  %v4615_v25 = vpop.f32.mrb[112].mxu1 }
 0x1e4   :  { %v4616_v26 = vpop.f32.mrb[113].mxu1  ;;  %v4556_v28 = vadd.f32 %v4555_v59, %v4554_v6  ;;  %v3498_v57 = vadd.f32 %v4553_v43, %v7011_v14 }
 0x1e5   :  { %v3668_v27 = vadd.f32 %v3667_v24, %v3653_v31  ;;  %4122 = vst [vmem:[%s7081_s4 + $0x18] sm:$0xff] %v4098_v52   ;;  %v4617_v18 = vadd.f32 %v4616_v26, %v4615_v25  ;;  %v4618_v22 = vpop.f32.mrb[114].mxu1 }
 0x1e6   :  { %v4619_v34 = vpop.f32.mrb[115].mxu1  ;;  %v3501_v37 = vadd.f32 %v4556_v28, %v7014_v50 }
 0x1e7   :  { %v4620_v10 = vadd.f32 %v4619_v34, %v4618_v22  ;;  %v3595_v29 = vadd.f32 %v4617_v18, %v3498_v57  ;;  %v4557_v63 = vpop.f32.mrb[116].mxu0 }
 0x1e8   :  { %v4558_v4 = vpop.f32.mrb[117].mxu0 }
 0x1e9   :  { %v3598_v53 = vadd.f32 %v4620_v10, %v3501_v37  ;;  %v3632_v12 = vadd.f32 %v3631_v33, %v3595_v29  ;;  %v3654_v42 = vmul.f32 %v3595_v29, %v3595_v29  ;;  %v4559_v30 = vadd.f32 %v4558_v4, %v4557_v63  ;;  %v4560_v46 = vpop.f32.mrb[118].mxu0 }
 0x1ea   :  { %v4561_v36 = vpop.f32.mrb[119].mxu0 }
 0x1eb   :  { %v3655_v47 = vmul.f32 %v3598_v53, %v3598_v53  ;;  %v4103_v32 = vpack.c.bf16 %v3598_v53, %v3595_v29  ;;  %v4621_v38 = vpop.f32.mrb[116].mxu1  ;;  %v3669_v54 = vadd.f32 %v3668_v27, %v3654_v42  ;;  %v3633_v8 = vadd.f32 %v3632_v12, %v3598_v53 }
 0x1ec   :  { %v4622_v16 = vpop.f32.mrb[117].mxu1  ;;  %v3506_v14 = vadd.f32 %v4559_v30, %v7017_v61  ;;  %v4562_v3 = vadd.f32 %v4561_v36, %v4560_v46 }
 0x1ed   :  { %4123 = vst [vmem:[%s7081_s4 + $0x20] sm:$0xff] %v4103_v32   ;;  %v4623_v50 = vadd.f32 %v4622_v16, %v4621_v38  ;;  %v4624_v21 = vpop.f32.mrb[118].mxu1  ;;  %v3670_v62 = vadd.f32 %v3669_v54, %v3655_v47 }
 0x1ee   :  { %v4625_v49 = vpop.f32.mrb[119].mxu1  ;;  %v3509_v40 = vadd.f32 %v4562_v3, %v7020_v17 }
 0x1ef   :  { %v3603_v39 = vadd.f32 %v4623_v50, %v3506_v14  ;;  %v4626_v2 = vadd.f32 %v4625_v49, %v4624_v21  ;;  %v4563_v5 = vpop.f32.mrb[120].mxu0 }
 0x1f0   :  { %v4564_v23 = vpop.f32.mrb[121].mxu0 }
 0x1f1   :  { %v3634_v60 = vadd.f32 %v3633_v8, %v3603_v39  ;;  %v3656_v7 = vmul.f32 %v3603_v39, %v3603_v39  ;;  %v3606_v13 = vadd.f32 %v4626_v2, %v3509_v40  ;;  %v4566_v61 = vpop.f32.mrb[122].mxu0  ;;  %v4565_v11 = vadd.f32 %v4564_v23, %v4563_v5 }
 0x1f2   :  { %v4567_v48 = vpop.f32.mrb[123].mxu0 }
 0x1f3   :  { %v3671_v15 = vadd.f32 %v3670_v62, %v3656_v7  ;;  %v3635_v1 = vadd.f32 %v3634_v60, %v3606_v13  ;;  %v3657_v55 = vmul.f32 %v3606_v13, %v3606_v13  ;;  %v4108_v44 = vpack.c.bf16 %v3606_v13, %v3603_v39  ;;  %v4627_v51 = vpop.f32.mrb[120].mxu1 }
 0x1f4   :  { %v4628_v45 = vpop.f32.mrb[121].mxu1  ;;  %v4568_v41 = vadd.f32 %v4567_v48, %v4566_v61  ;;  %v3514_v0 = vadd.f32 %v4565_v11, %v7023_v19 }
 0x1f5   :  { %v3672_v58 = vadd.f32 %v3671_v15, %v3657_v55  ;;  %4124 = vst [vmem:[%s7081_s4 + $0x28] sm:$0xff] %v4108_v44   ;;  %v4629_v17 = vadd.f32 %v4628_v45, %v4627_v51  ;;  %v4630_v20 = vpop.f32.mrb[122].mxu1 }
 0x1f6   :  { %v4631_v24 = vpop.f32.mrb[123].mxu1  ;;  %v3517_v33 = vadd.f32 %v4568_v41, %v7026_v56 }
 0x1f7   :  { %v4632_v31 = vadd.f32 %v4631_v24, %v4630_v20  ;;  %v3611_v52 = vadd.f32 %v4629_v17, %v3514_v0  ;;  %v4569_v6 = vpop.f32.mrb[124].mxu0 }
 0x1f8   :  { %v4570_v59 = vpop.f32.mrb[125].mxu0 }
 0x1f9   :  { %v3614_v25 = vadd.f32 %v4632_v31, %v3517_v33  ;;  %v3636_v43 = vadd.f32 %v3635_v1, %v3611_v52  ;;  %v3658_v26 = vmul.f32 %v3611_v52, %v3611_v52  ;;  %v4571_v28 = vadd.f32 %v4570_v59, %v4569_v6  ;;  %v4572_v57 = vpop.f32.mrb[126].mxu0 }
 0x1fa   :  { %v4573_v29 = vpop.f32.mrb[127].mxu0 }
 0x1fb   :  { %v3659_v27 = vmul.f32 %v3614_v25, %v3614_v25  ;;  %v4113_v18 = vpack.c.bf16 %v3614_v25, %v3611_v52  ;;  %v4633_v22 = vpop.f32.mrb[124].mxu1  ;;  %v3673_v34 = vadd.f32 %v3672_v58, %v3658_v26  ;;  %v3637_v37 = vadd.f32 %v3636_v43, %v3614_v25 }
 0x1fc   :  { %v4634_v10 = vpop.f32.mrb[125].mxu1  ;;  %v3522_v19 = vadd.f32 %v4571_v28, %v7029_v35  ;;  %v4574_v63 = vadd.f32 %v4573_v29, %v4572_v57 }
 0x1fd   :  { %4125 = vst [vmem:[%s7081_s4 + $0x30] sm:$0xff] %v4113_v18   ;;  %v4635_v56 = vadd.f32 %v4634_v10, %v4633_v22  ;;  %v4636_v53 = vpop.f32.mrb[126].mxu1  ;;  %v3674_v12 = vadd.f32 %v3673_v34, %v3659_v27 }
 0x1fe   :  { %v4637_v42 = vpop.f32.mrb[127].mxu1  ;;  %v3525_v47 = vadd.f32 %v4574_v63, %v7032_v9 }
 0x1ff   :  { %v3619_v4 = vadd.f32 %v4635_v56, %v3522_v19  ;;  %v4638_v32 = vadd.f32 %v4637_v42, %v4636_v53 }
 0x201   :  { %v3638_v38 = vadd.f32 %v3637_v37, %v3619_v4  ;;  %v3660_v30 = vmul.f32 %v3619_v4, %v3619_v4  ;;  %v3622_v46 = vadd.f32 %v4638_v32, %v3525_v47 }
 0x203   :  { %v3675_v54 = vadd.f32 %v3674_v12, %v3660_v30  ;;  %v3639_v8 = vadd.f32 %v3638_v38, %v3622_v46  ;;  %v3661_v16 = vmul.f32 %v3622_v46, %v3622_v46  ;;  %v4118_v36 = vpack.c.bf16 %v3622_v46, %v3619_v4 }
 0x205   :  { %v3640_v14 = vrot.slane %v3639_v8, 4  ;;  %v3676_v50 = vadd.f32 %v3675_v54, %v3661_v16  ;;  %4126 = vst [vmem:[%s7081_s4 + $0x38] sm:$0xff] %v4118_v36  }
 0x207   :  { %v3641_v35 = vadd.f32 %v3640_v14, %v3639_v8  ;;  %v3677_v21 = vrot.slane %v3676_v50, 4 }
 0x209   :  { %v3642_v3 = vrot.slane %v3641_v35, 2  ;;  %v3678_v62 = vadd.f32 %v3677_v21, %v3676_v50 }
 0x20b   :  { %v3643_v49 = vadd.f32 %v3642_v3, %v3641_v35  ;;  %v3679_v9 = vrot.slane %v3678_v62, 2 }
 0x20d   :  { %v3644_v39 = vrot.slane %v3643_v49, 1  ;;  %v3680_v40 = vadd.f32 %v3679_v9, %v3678_v62 }
 0x20f   :  { %v3681_v2 = vrot.slane %v3680_v40, 1  ;;  %v3645_v60 = vadd.f32 %v3644_v39, %v3643_v49 }
 0x211   :  { %v3682_v7 = vadd.f32 %v3681_v2, %v3680_v40 }
 0x213   :  { %v3684_v13 = vsel %vm3683_vm0, %v3645_v60, %v3682_v7 }
 0x214   :  { %v3686_v5 = vsel %vm3685_vm1, %v3684_v13, 0.0 }
 0x215   :  { %3687 = vst [vmem:[%s7082_s5] sm:$0xff] %v3686_v5 }

// kernel: discriminator_forward.8
= control target key start
LH: loop header
LB: loop body
LE: loop exit
PB: predicated region body
PF: predicated region fallthrough
CT: control target
= control target key end

     0   :  { %v2888_v22 = vmov 1966171168   ;;  %v61_v24 = vlaneseq  ;;  %vm2303_vm0 = vcmask 1040384   ;;  %vm2305_vm1 = vcmask 1041408   ;;  %s3612_s1 = inlined_call_operand.vmem [shape: bf16[2048,128], index: 1, kind: input, shape index: {}]   ;;  %s3613_s2 = inlined_call_operand.vmem [shape: bf16[1,2048], index: 2, kind: input, shape index: {}]   ;;  %s3614_s3 = inlined_call_operand.vmem [shape: bf16[1,2048], index: 3, kind: input, shape index: {}]   ;;  %s3615_s0 = inlined_call_operand.vmem [shape: bf16[32,2048], index: 0, kind: input, shape index: {}]   ;;  %s3616_s4 = inlined_call_operand.vmem [shape: bf16[32,128], index: 4, kind: output, shape index: {0}]   ;;  %s3617_s5 = inlined_call_operand.vmem [shape: f32[8,128], index: 5, kind: output, shape index: {1}]  }
   0x1   :  { %v2756_v0 = vld [vmem:[%s3612_s1 + $0x40] sm:$0xff]   ;;  %v2760_v4 = vld [vmem:[%s3612_s1 + $0x48] sm:$0xff]   ;;  %v2764_v8 = vld [vmem:[%s3612_s1 + $0x50] sm:$0xff]   ;;  %v59_v23 = vunpack.c.l.s4 %v2888_v22 }
   0x2   :  { %v2757_v1 = vld [vmem:[%s3612_s1 + $0xc0] sm:$0xff]   ;;  %2531 = vmatprep.subr.bf16.mxu0 %v2756_v0  ;;  %v2761_v5 = vld [vmem:[%s3612_s1 + $0xc8] sm:$0xff]   ;;  %v2765_v9 = vld [vmem:[%s3612_s1 + $0xd0] sm:$0xff]   ;;  %v62_v30 = vshrl.u32 %v61_v24, 7 }
   0x3   :  { %v2758_v2 = vld [vmem:[%s3612_s1] sm:$0xff]   ;;  %2559 = vmatprep.subr.bf16.mxu1 %v2757_v1  ;;  %v2762_v6 = vld [vmem:[%s3612_s1 + $0x8] sm:$0xff]   ;;  %v2766_v10 = vld [vmem:[%s3612_s1 + $0x10] sm:$0xff]   ;;  %v60_v29 = vunpack.c.0.s8 %v59_v23 }
   0x4   :  { %v2759_v3 = vld [vmem:[%s3612_s1 + $0x80] sm:$0xff]   ;;  %2532 = vmatpush3.bf16.msra.mxu0 %v2758_v2  ;;  %v2763_v7 = vld [vmem:[%s3612_s1 + $0x88] sm:$0xff]   ;;  %v2767_v11 = vld [vmem:[%s3612_s1 + $0x90] sm:$0xff]   ;;  %v3029_v43 = vsub.s32 0, %v62_v30 }
   0x5   :  { %2560 = vmatpush3.bf16.msra.mxu1 %v2759_v3  ;;  %2533 = vmatprep.subr.bf16.mxu0 %v2760_v4  ;;  %v2768_v12 = vld [vmem:[%s3612_s1 + $0x58] sm:$0xff]   ;;  %v2772_v16 = vld [vmem:[%s3612_s1 + $0x60] sm:$0xff]   ;;  %v2776_v20 = vld [vmem:[%s3612_s1 + $0x68] sm:$0xff]   ;;  %v3009_v35 = vsub.s32 %v60_v29, %v62_v30 }
   0x6   :  { %2561 = vmatprep.subr.bf16.mxu1 %v2761_v5  ;;  %v2769_v13 = vld [vmem:[%s3612_s1 + $0xd8] sm:$0xff]   ;;  %v2773_v17 = vld [vmem:[%s3612_s1 + $0xe0] sm:$0xff]   ;;  %v2777_v21 = vld [vmem:[%s3612_s1 + $0xe8] sm:$0xff]  }
   0x7   :  { %v2770_v14 = vld [vmem:[%s3612_s1 + $0x18] sm:$0xff]   ;;  %v2774_v18 = vld [vmem:[%s3612_s1 + $0x20] sm:$0xff]   ;;  %v2778_v25 = vld [vmem:[%s3612_s1 + $0x28] sm:$0xff]  }
   0x8   :  { %2534 = vmatpush3.bf16.msra.mxu0 %v2762_v6  ;;  %v2771_v15 = vld [vmem:[%s3612_s1 + $0x98] sm:$0xff]   ;;  %v2775_v19 = vld [vmem:[%s3612_s1 + $0xa0] sm:$0xff]   ;;  %v2779_v26 = vld [vmem:[%s3612_s1 + $0xa8] sm:$0xff]  }
   0x9   :  { %2562 = vmatpush3.bf16.msra.mxu1 %v2763_v7  ;;  %2535 = vmatprep.subr.bf16.mxu0 %v2764_v8  ;;  %v2780_v27 = vld [vmem:[%s3612_s1 + $0x70] sm:$0xff]   ;;  %v2784_v33 = vld [vmem:[%s3612_s1 + $0x78] sm:$0xff]   ;;  %v53_v38 = vld [vmem:[%s3613_s2] sm:$0xff] }
   0xa   :  { %2563 = vmatprep.subr.bf16.mxu1 %v2765_v9  ;;  %v2781_v28 = vld [vmem:[%s3612_s1 + $0xf0] sm:$0xff]   ;;  %v2785_v34 = vld [vmem:[%s3612_s1 + $0xf8] sm:$0xff]   ;;  %v57_v39 = vcombine.high %v53_v38, %v53_v38  ;;  %v64_v40 = vrot.slane %v53_v38, %v3009_v35  ;;  %v347_v41 = vld [vmem:[%s3614_s3] sm:$0xff] }
   0xb   :  { %v2782_v31 = vld [vmem:[%s3612_s1 + $0x30] sm:$0xff]   ;;  %v2786_v36 = vld [vmem:[%s3612_s1 + $0x38] sm:$0xff]   ;;  %v3027_v42 = vld [vmem:[%s3613_s2 + $0x8] sm:$0xff]  ;;  %v351_v45 = vcombine.high %v347_v41, %v347_v41  ;;  %v358_v46 = vrot.slane %v347_v41, %v3009_v35 }
   0xc   :  { %2536 = vmatpush3.bf16.msra.mxu0 %v2766_v10  ;;  %v2783_v32 = vld [vmem:[%s3612_s1 + $0xb0] sm:$0xff]   ;;  %v2787_v37 = vld [vmem:[%s3612_s1 + $0xb8] sm:$0xff]   ;;  %v3034_v44 = vld [vmem:[%s3614_s3 + $0x8] sm:$0xff]  ;;  %v72_v47 = vcombine.high %v64_v40, %v64_v40  ;;  %v80_v48 = vrot.slane %v64_v40, %v3009_v35  ;;  %v106_v49 = vcombine.high %v3027_v42, %v3027_v42  ;;  %v71_v51 = vrot.slane %v57_v39, %v3009_v35 }
   0xd   :  { %2564 = vmatpush3.bf16.msra.mxu1 %v2767_v11  ;;  %2537 = vmatprep.subr.bf16.mxu0 %v2768_v12  ;;  %v2792_v50 = vld [vmem:[%s3612_s1 + $0x140] sm:$0xff]   ;;  %v366_v52 = vcombine.high %v358_v46, %v358_v46  ;;  %v374_v53 = vrot.slane %v358_v46, %v3009_v35  ;;  %v400_v54 = vcombine.high %v3034_v44, %v3034_v44 }
   0xe   :  { %2565 = vmatprep.subr.bf16.mxu1 %v2769_v13  ;;  %v2793_v55 = vld [vmem:[%s3612_s1 + $0x1c0] sm:$0xff]   ;;  %v365_v56 = vrot.slane %v351_v45, %v3009_v35  ;;  %v94_v57 = vrot.slane %v72_v47, %v3009_v35  ;;  %v156_v58 = vpack.i.b16 %v80_v48, %v80_v48  ;;  %v102_v59 = vcombine.high %v80_v48, %v80_v48 }
   0xf   :  { %v73_v60 = vcombine.high %v71_v51, %v71_v51  ;;  %v388_v61 = vrot.slane %v366_v52, %v3009_v35  ;;  %v450_v62 = vpack.i.b16 %v374_v53, %v374_v53  ;;  %v396_v63 = vcombine.high %v374_v53, %v374_v53  ;;  %v21_v9 = vld [vmem:[%s3615_s0] sm:$0xff] }
  0x10   :  { %2538 = vmatpush3.bf16.msra.mxu0 %v2770_v14  ;;  %v87_v0 = vrot.slane %v71_v51, %v3009_v35  ;;  %v161_v1 = vrot.slane %v156_v58, %v3029_v43  ;;  %v163_v2 = vpack.i.b16 %v94_v57, %v94_v57  ;;  %v104_v3 = vcombine.high %v94_v57, %v94_v57  ;;  %v29_v14 = vld [vmem:[%s3615_s0 + $0x40] sm:$0xff] }
  0x11   :  { %2566 = vmatpush3.bf16.msra.mxu1 %v2771_v15  ;;  %2539 = vmatprep.subr.bf16.mxu0 %v2772_v16  ;;  %v170_v4 = vpack.i.b16 %v102_v59, %v102_v59  ;;  %v455_v5 = vrot.slane %v450_v62, %v3029_v43  ;;  %v457_v6 = vpack.i.b16 %v388_v61, %v388_v61 }
  0x12   :  { %2567 = vmatprep.subr.bf16.mxu1 %v2773_v17  ;;  %v398_v7 = vcombine.high %v388_v61, %v388_v61  ;;  %v464_v8 = vpack.i.b16 %v396_v63, %v396_v63  ;;  %v168_v10 = vrot.slane %v163_v2, %v3029_v43  ;;  %v177_v12 = vpack.i.b16 %v104_v3, %v104_v3  ;;  %v2794_v63 = vld [vmem:[%s3612_s1 + $0x100] sm:$0xff]  }
  0x13   :  { %v175_v11 = vrot.slane %v170_v4, %v3029_v43  ;;  %v101_v13 = vrot.slane %v73_v60, %v3009_v35  ;;  %v462_v15 = vrot.slane %v457_v6, %v3029_v43  ;;  %v113_v23 = vrot.slane %v3027_v42, %v3009_v35 }
  0x14   :  { %2540 = vmatpush3.bf16.msra.mxu0 %v2774_v18  ;;  %v469_v16 = vrot.slane %v464_v8, %v3029_v43  ;;  %v471_v17 = vpack.i.b16 %v398_v7, %v398_v7  ;;  %v184_v18 = vpack.i.b16 %v87_v0, %v87_v0  ;;  %v2795_v8 = vld [vmem:[%s3612_s1 + $0x180] sm:$0xff]  }
  0x15   :  { %2568 = vmatpush3.bf16.msra.mxu1 %v2775_v19  ;;  %2541 = vmatprep.subr.bf16.mxu0 %v2776_v20  ;;  %v3067_v19 = vcombine.low %v161_v1, %v168_v10  ;;  %v22_v20 = vld [vmem:[%s3615_s0 + $0x8] sm:$0xff]  ;;  %v191_v22 = vpack.i.b16 %v101_v13, %v101_v13  ;;  %v3075_v24 = vcombine.low %v455_v5, %v462_v15 }
  0x16   :  { %2569 = vmatprep.subr.bf16.mxu1 %v2777_v21  ;;  %v182_v21 = vrot.slane %v177_v12, %v3029_v43  ;;  %v105_v48 = vcombine.high %v101_v13, %v101_v13  ;;  %v121_v13 = vcombine.high %v113_v23, %v113_v23 }
  0x17   :  { %v315_v29 = vmul.bf16 %v3067_v19, %v21_v9  ;;  %v323_v30 = vmul.bf16 %v3067_v19, %v29_v14  ;;  %v2796_v9 = vld [vmem:[%s3612_s1 + $0x148] sm:$0xff]  }
  0x18   :  { %2542 = vmatpush3.bf16.msra.mxu0 %v2778_v25  ;;  %v30_v25 = vld [vmem:[%s3615_s0 + $0x48] sm:$0xff]  ;;  %v205_v57 = vpack.i.b16 %v105_v48, %v105_v48 }
  0x19   :  { %2570 = vmatpush3.bf16.msra.mxu1 %v2779_v26  ;;  %2543 = vmatprep.subr.bf16.mxu0 %v2780_v27  ;;  %v476_v26 = vrot.slane %v471_v17, %v3029_v43  ;;  %v189_v27 = vrot.slane %v184_v18, %v3029_v43  ;;  %v609_v38 = vadd.bf16 %v3075_v24, %v315_v29 }
  0x1a   :  { %2571 = vmatprep.subr.bf16.mxu1 %v2781_v28  ;;  %v367_v28 = vcombine.high %v365_v56, %v365_v56  ;;  %v617_v39 = vadd.bf16 %v3075_v24, %v323_v30  ;;  %v210_v2 = vrot.slane %v205_v57, %v3029_v43  ;;  %v129_v17 = vrot.slane %v113_v23, %v3009_v35  ;;  %v2799_v23 = vld [vmem:[%s3612_s1 + $0x188] sm:$0xff]  }
  0x1c   :  { %2544 = vmatpush3.bf16.msra.mxu0 %v2782_v31  ;;  %v3084_v31 = vcombine.low %v175_v11, %v182_v21  ;;  %v395_v46 = vrot.slane %v367_v28, %v3009_v35  ;;  %v649_v51 = vmul.bf16 1045249613, %v617_v39  ;;  %v37_v28 = vld [vmem:[%s3615_s0 + $0x80] sm:$0xff]  ;;  %v212_v29 = vpack.i.b16 %v129_v17, %v129_v17 }
  0x1d   :  { %2572 = vmatpush3.bf16.msra.mxu1 %v2783_v32  ;;  %2545 = vmatprep.subr.bf16.mxu0 %v2784_v33  ;;  %v196_v32 = vrot.slane %v191_v22, %v3029_v43  ;;  %v3087_v33 = vcombine.low %v469_v16, %v476_v26  ;;  %v2797_v16 = vld [vmem:[%s3612_s1 + $0x1c8] sm:$0xff]   ;;  %v143_v26 = vrot.slane %v121_v13, %v3009_v35 }
  0x1e   :  { %2573 = vmatprep.subr.bf16.mxu1 %v2785_v34  ;;  %v381_v34 = vrot.slane %v365_v56, %v3009_v35  ;;  %v316_v40 = vmul.bf16 %v3084_v31, %v22_v20  ;;  %v324_v41 = vmul.bf16 %v3084_v31, %v30_v25  ;;  %v681_v60 = vmax.bf16 %v649_v51, %v617_v39  ;;  %v2798_v20 = vld [vmem:[%s3612_s1 + $0x108] sm:$0xff]   ;;  %v2802_v51 = vld [vmem:[%s3612_s1 + $0x110] sm:$0xff]  }
  0x1f   :  { %v3096_v45 = vcombine.low %v189_v27, %v196_v32  ;;  %v399_v3 = vcombine.high %v395_v46, %v395_v46  ;;  %v2800_v27 = vld [vmem:[%s3612_s1 + $0x150] sm:$0xff]   ;;  %v46_v39 = vld [vmem:[%s3615_s0 + $0xc8] sm:$0xff] }
  0x20   :  { %2546 = vmatpush3.bf16.msra.mxu0 %v2786_v36  ;;  %v103_v36 = vcombine.high %v87_v0, %v87_v0  ;;  %v478_v47 = vpack.i.b16 %v381_v34, %v381_v34  ;;  %v610_v52 = vadd.bf16 %v3087_v33, %v316_v40  ;;  %v618_v53 = vadd.bf16 %v3087_v33, %v324_v41  ;;  %v2801_v41 = vld [vmem:[%s3612_s1 + $0x1d0] sm:$0xff]  }
  0x21   :  { %2574 = vmatpush3.bf16.msra.mxu1 %v2787_v37  ;;  %2587 = vmatprep.subr.bf16.mxu0 %v2792_v50  ;;  %v407_v37 = vrot.slane %v3034_v44, %v3009_v35  ;;  %v641_v50 = vmul.bf16 1045249613, %v609_v38  ;;  %v397_v58 = vcombine.high %v381_v34, %v381_v34  ;;  %v499_v12 = vpack.i.b16 %v399_v3, %v399_v3  ;;  %v45_v34 = vld [vmem:[%s3615_s0 + $0xc0] sm:$0xff]  ;;  %v2814_v44 = vld [vmem:[%s3612_s1 + $0x128] sm:$0xff]  }
  0x22   :  { %2615 = vmatprep.subr.bf16.mxu1 %v2793_v55  ;;  %v485_v55 = vpack.i.b16 %v395_v46, %v395_v46  ;;  %v198_v56 = vpack.i.b16 %v103_v36, %v103_v36  ;;  %v642_v61 = vmul.bf16 1045249613, %v610_v52  ;;  %v650_v62 = vmul.bf16 1045249613, %v618_v53 }
  0x23   :  { %v673_v59 = vmax.bf16 %v641_v50, %v609_v38  ;;  %v3105_v0 = vrot.slane %v478_v47, %v3029_v43  ;;  %v492_v11 = vpack.i.b16 %v397_v58, %v397_v58  ;;  %v415_v18 = vcombine.high %v407_v37, %v407_v37  ;;  %v38_v38 = vld [vmem:[%s3615_s0 + $0x88] sm:$0xff] }
  0x24   :  { %v203_v1 = vrot.slane %v198_v56, %v3029_v43  ;;  %v674_v5 = vmax.bf16 %v642_v61, %v610_v52  ;;  %v682_v6 = vmax.bf16 %v650_v62, %v618_v53  ;;  %v3116_v10 = vrot.slane %v485_v55, %v3029_v43  ;;  %v2805_v61 = vld [vmem:[%s3612_s1 + $0x1d8] sm:$0xff]  }
  0x25   :  { %v2353_v4 = vcombine.high %v673_v59, %v681_v60  ;;  %v2352_v7 = vcombine.low %v673_v59, %v681_v60  ;;  %v3128_v22 = vrot.slane %v492_v11, %v3029_v43  ;;  %v3131_v25 = vrot.slane %v499_v12, %v3029_v43  ;;  %v2807_v11 = vld [vmem:[%s3612_s1 + $0x198] sm:$0xff]  }
  0x26   :  { %v2355_v14 = vcombine.high %v674_v5, %v682_v6  ;;  %v2354_v15 = vcombine.low %v674_v5, %v682_v6  ;;  %v3125_v21 = vcombine.low %v203_v1, %v210_v2  ;;  %v423_v30 = vrot.slane %v407_v37, %v3009_v35 }
  0x27   :  { %1921 = vmatprep.mubr.bf16.mxu0 %v2353_v4  ;;  %v437_v32 = vrot.slane %v415_v18, %v3009_v35  ;;  %v331_v36 = vmul.bf16 %v3067_v19, %v37_v28  ;;  %v219_v40 = vpack.i.b16 %v143_v26, %v143_v26  ;;  %v151_v37 = vcombine.high %v129_v17, %v129_v17 }
  0x28   :  { %1922 = vmatmul.mubr.bf16.vlgmr.msra.gmra.mrb[0].mxu0 %v2352_v7  ;;  %1970 = vmatprep.mubr.bf16.mxu1 %v2355_v14  ;;  %v339_v46 = vmul.bf16 %v3067_v19, %v45_v34  ;;  %v332_v47 = vmul.bf16 %v3084_v31, %v38_v38  ;;  %v340_v48 = vmul.bf16 %v3084_v31, %v46_v39  ;;  %v2803_v19 = vld [vmem:[%s3612_s1 + $0x190] sm:$0xff]   ;;  %v2804_v31 = vld [vmem:[%s3612_s1 + $0x158] sm:$0xff]   ;;  %v2811_v38 = vld [vmem:[%s3612_s1 + $0x1a0] sm:$0xff]  }
  0x29   :  { %2588 = vmatpush3.bf16.msra.mxu0 %v2794_v63  ;;  %1971 = vmatmul.mubr.bf16.vlgmr.msra.gmra.mrb[0].mxu1 %v2354_v15  ;;  %v217_v50 = vrot.slane %v212_v29, %v3029_v43  ;;  %v625_v52 = vadd.bf16 %v3075_v24, %v331_v36  ;;  %v224_v53 = vrot.slane %v219_v40, %v3029_v43  ;;  %v2812_v39 = vld [vmem:[%s3612_s1 + $0x168] sm:$0xff]  }
  0x2a   :  { %2589 = vmatprep.subr.bf16.mxu0 %v2796_v9  ;;  %2616 = vmatpush3.bf16.msra.mxu1 %v2795_v8  ;;  %v506_v55 = vpack.i.b16 %v423_v30, %v423_v30  ;;  %v513_v56 = vpack.i.b16 %v437_v32, %v437_v32  ;;  %v633_v57 = vadd.bf16 %v3075_v24, %v339_v46  ;;  %v2813_v46 = vld [vmem:[%s3612_s1 + $0x1e8] sm:$0xff]  }
  0x2b   :  { %2617 = vmatprep.subr.bf16.mxu1 %v2797_v16  ;;  %v626_v58 = vadd.bf16 %v3087_v33, %v332_v47  ;;  %v634_v59 = vadd.bf16 %v3087_v33, %v340_v48  ;;  %v153_v60 = vcombine.high %v143_v26, %v143_v26  ;;  %v657_v62 = vmul.bf16 1045249613, %v625_v52  ;;  %v2806_v33 = vld [vmem:[%s3612_s1 + $0x118] sm:$0xff]   ;;  %v2808_v16 = vld [vmem:[%s3612_s1 + $0x160] sm:$0xff]   ;;  %v23_v47 = vld [vmem:[%s3615_s0 + $0x10] sm:$0xff] }
  0x2c   :  { %v3179_v63 = vcombine.low %v217_v50, %v224_v53  ;;  %v511_v1 = vrot.slane %v506_v55, %v3029_v43  ;;  %v518_v2 = vrot.slane %v513_v56, %v3029_v43  ;;  %v665_v3 = vmul.bf16 1045249613, %v633_v57 }
  0x2d   :  { %2590 = vmatpush3.bf16.msra.mxu0 %v2798_v20  ;;  %v658_v24 = vmul.bf16 1045249613, %v626_v58  ;;  %v666_v4 = vmul.bf16 1045249613, %v634_v59  ;;  %v226_v5 = vpack.i.b16 %v151_v37, %v151_v37  ;;  %v689_v6 = vmax.bf16 %v657_v62, %v625_v52  ;;  %v32_v52 = vld [vmem:[%s3615_s0 + $0x58] sm:$0xff] }
  0x2e   :  { %2591 = vmatprep.subr.bf16.mxu0 %v2800_v27  ;;  %2618 = vmatpush3.bf16.msra.mxu1 %v2799_v23  ;;  %v3186_v7 = vcombine.low %v511_v1, %v518_v2  ;;  %v233_v8 = vpack.i.b16 %v153_v60, %v153_v60  ;;  %v445_v9 = vcombine.high %v423_v30, %v423_v30  ;;  %v2809_v23 = vld [vmem:[%s3612_s1 + $0x1e0] sm:$0xff]   ;;  %v2816_v60 = vld [vmem:[%s3612_s1 + $0x170] sm:$0xff]  }
  0x2f   :  { %2619 = vmatprep.subr.bf16.mxu1 %v2801_v41  ;;  %v697_v12 = vmax.bf16 %v665_v3, %v633_v57  ;;  %v690_v13 = vmax.bf16 %v658_v24, %v626_v58  ;;  %v698_v14 = vmax.bf16 %v666_v4, %v634_v59  ;;  %v231_v15 = vrot.slane %v226_v5, %v3029_v43 }
  0x30   :  { %v238_v17 = vrot.slane %v233_v8, %v3029_v43  ;;  %v447_v18 = vcombine.high %v437_v32, %v437_v32  ;;  %v520_v20 = vpack.i.b16 %v445_v9, %v445_v9  ;;  %v120_v26 = vrot.slane %v106_v49, %v3009_v35  ;;  %v2810_v32 = vld [vmem:[%s3612_s1 + $0x120] sm:$0xff]  }
  0x31   :  { %2592 = vmatpush3.bf16.msra.mxu0 %v2802_v51  ;;  %v2369_v27 = vcombine.high %v689_v6, %v697_v12  ;;  %v2371_v28 = vcombine.high %v690_v13, %v698_v14  ;;  %v2368_v29 = vcombine.low %v689_v6, %v697_v12  ;;  %v2370_v30 = vcombine.low %v690_v13, %v698_v14  ;;  %v24_v51 = vld [vmem:[%s3615_s0 + $0x18] sm:$0xff]  ;;  %v2818_v6 = vld [vmem:[%s3612_s1 + $0x130] sm:$0xff]  }
  0x32   :  { %2593 = vmatprep.subr.bf16.mxu0 %v2804_v31  ;;  %2620 = vmatpush3.bf16.msra.mxu1 %v2803_v19  ;;  %v3206_v34 = vcombine.low %v231_v15, %v238_v17  ;;  %v525_v36 = vrot.slane %v520_v20, %v3029_v43  ;;  %v527_v42 = vpack.i.b16 %v447_v18, %v447_v18  ;;  %v2815_v19 = vld [vmem:[%s3612_s1 + $0x1a8] sm:$0xff]   ;;  %v2819_v13 = vld [vmem:[%s3612_s1 + $0x1b0] sm:$0xff]   ;;  %v2820_v18 = vld [vmem:[%s3612_s1 + $0x178] sm:$0xff]  }
  0x33   :  { %2621 = vmatprep.subr.bf16.mxu1 %v2805_v61  ;;  %v122_v49 = vcombine.high %v120_v26, %v120_v26  ;;  %1929 = vmatprep.mubr.bf16.mxu0 %v2369_v27  ;;  %v3217_v40 = vcombine.low %v3105_v0, %v3116_v10  ;;  %v3221_v37 = vcombine.low %v3128_v22, %v3131_v25  ;;  %v31_v0 = vld [vmem:[%s3615_s0 + $0x50] sm:$0xff]  ;;  %v2821_v27 = vld [vmem:[%s3612_s1 + $0x1f8] sm:$0xff]  }
  0x34   :  { %v136_v41 = vrot.slane %v120_v26, %v3009_v35  ;;  %1978 = vmatprep.mubr.bf16.mxu1 %v2371_v28  ;;  %v532_v10 = vrot.slane %v527_v42, %v3029_v43  ;;  %v414_v25 = vrot.slane %v400_v54, %v3009_v35  ;;  %1930 = vmatmul.mubr.bf16.gmra.mrb[4].mxu0 %v2368_v29  ;;  %v39_v42 = vld [vmem:[%s3615_s0 + $0x90] sm:$0xff] }
  0x35   :  { %2594 = vmatpush3.bf16.msra.mxu0 %v2806_v33  ;;  %v150_v22 = vrot.slane %v122_v49, %v3009_v35  ;;  %v317_v48 = vmul.bf16 %v3096_v45, %v23_v47  ;;  %v325_v50 = vmul.bf16 %v3096_v45, %v31_v0  ;;  %1979 = vmatmul.mubr.bf16.gmra.mrb[4].mxu1 %v2370_v30  ;;  %v2817_v33 = vld [vmem:[%s3612_s1 + $0x1f0] sm:$0xff]  }
  0x36   :  { %2595 = vmatprep.subr.bf16.mxu0 %v2808_v16  ;;  %2622 = vmatpush3.bf16.msra.mxu1 %v2807_v11  ;;  %v240_v53 = vpack.i.b16 %v136_v41, %v136_v41  ;;  %v318_v54 = vmul.bf16 %v3125_v21, %v24_v51  ;;  %v326_v55 = vmul.bf16 %v3125_v21, %v32_v52  ;;  %v2825_v51 = vld [vmem:[%s3612_s1 + $0x2c0] sm:$0xff]  }
  0x37   :  { %2623 = vmatprep.subr.bf16.mxu1 %v2809_v23  ;;  %v3252_v56 = vcombine.low %v525_v36, %v532_v10  ;;  %v611_v31 = vadd.bf16 %v3217_v40, %v317_v48  ;;  %v619_v57 = vadd.bf16 %v3217_v40, %v325_v50  ;;  %v247_v59 = vpack.i.b16 %v150_v22, %v150_v22  ;;  %v2824_v10 = vld [vmem:[%s3612_s1 + $0x240] sm:$0xff]  }
  0x38   :  { %v245_v58 = vrot.slane %v240_v53, %v3029_v43  ;;  %v612_v61 = vadd.bf16 %v3221_v37, %v318_v54  ;;  %v620_v62 = vadd.bf16 %v3221_v37, %v326_v55  ;;  %v416_v1 = vcombine.high %v414_v25, %v414_v25  ;;  %v40_v53 = vld [vmem:[%s3615_s0 + $0x98] sm:$0xff]  ;;  %v2826_v55 = vld [vmem:[%s3612_s1 + $0x200] sm:$0xff]  }
  0x39   :  { %2596 = vmatpush3.bf16.msra.mxu0 %v2810_v32  ;;  %v430_v2 = vrot.slane %v414_v25, %v3009_v35  ;;  %v643_v3 = vmul.bf16 1045249613, %v611_v31  ;;  %v651_v24 = vmul.bf16 1045249613, %v619_v57  ;;  %v252_v4 = vrot.slane %v247_v59, %v3029_v43  ;;  %v2822_v32 = vld [vmem:[%s3612_s1 + $0x138] sm:$0xff]  }
  0x3a   :  { %2597 = vmatprep.subr.bf16.mxu0 %v2812_v39  ;;  %2624 = vmatpush3.bf16.msra.mxu1 %v2811_v38  ;;  %v152_v5 = vcombine.high %v136_v41, %v136_v41  ;;  %v644_v8 = vmul.bf16 1045249613, %v612_v61  ;;  %v652_v9 = vmul.bf16 1045249613, %v620_v62  ;;  %v444_v11 = vrot.slane %v416_v1, %v3009_v35  ;;  %v2823_v39 = vld [vmem:[%s3612_s1 + $0x1b8] sm:$0xff]   ;;  %v47_v41 = vld [vmem:[%s3615_s0 + $0xd0] sm:$0xff] }
  0x3b   :  { %2625 = vmatprep.subr.bf16.mxu1 %v2813_v46  ;;  %v534_v12 = vpack.i.b16 %v430_v2, %v430_v2  ;;  %v675_v14 = vmax.bf16 %v643_v3, %v611_v31  ;;  %v683_v15 = vmax.bf16 %v651_v24, %v619_v57  ;;  %v3277_v16 = vcombine.low %v245_v58, %v252_v4  ;;  %v2829_v4 = vld [vmem:[%s3612_s1 + $0x2c8] sm:$0xff]  }
  0x3c   :  { %v154_v17 = vcombine.high %v150_v22, %v150_v22  ;;  %v3282_v20 = vmax.bf16 %v644_v8, %v612_v61  ;;  %v3284_v26 = vmax.bf16 %v652_v9, %v620_v62  ;;  %v541_v23 = vpack.i.b16 %v444_v11, %v444_v11  ;;  %v2827_v62 = vld [vmem:[%s3612_s1 + $0x280] sm:$0xff]  }
  0x3d   :  { %2598 = vmatpush3.bf16.msra.mxu0 %v2814_v44  ;;  %v539_v35 = vrot.slane %v534_v12, %v3029_v43  ;;  %v2357_v28 = vcombine.high %v675_v14, %v683_v15  ;;  %v254_v29 = vpack.i.b16 %v152_v5, %v152_v5  ;;  %v446_v38 = vcombine.high %v430_v2, %v430_v2  ;;  %v48_v44 = vld [vmem:[%s3615_s0 + $0xd8] sm:$0xff]  ;;  %v2830_v5 = vld [vmem:[%s3612_s1 + $0x208] sm:$0xff]  }
  0x3e   :  { %2599 = vmatprep.subr.bf16.mxu0 %v2816_v60  ;;  %2626 = vmatpush3.bf16.msra.mxu1 %v2815_v19  ;;  %v261_v30 = vpack.i.b16 %v154_v17, %v154_v17  ;;  %v2359_v36 = vcombine.high %v3282_v20, %v3284_v26  ;;  %v546_v49 = vrot.slane %v541_v23, %v3029_v43  ;;  %v2834_v17 = vld [vmem:[%s3612_s1 + $0x210] sm:$0xff]   ;;  %v2837_v23 = vld [vmem:[%s3612_s1 + $0x2d8] sm:$0xff]  }
  0x3f   :  { %2627 = vmatprep.subr.bf16.mxu1 %v2817_v33  ;;  %2019 = vmatprep.mubr.bf16.mxu0 %v2357_v28  ;;  %v333_v46 = vmul.bf16 %v3096_v45, %v39_v42  ;;  %v259_v47 = vrot.slane %v254_v29, %v3029_v43  ;;  %v341_v22 = vmul.bf16 %v3096_v45, %v47_v41  ;;  %v2839_v28 = vld [vmem:[%s3612_s1 + $0x298] sm:$0xff]   ;;  %v2840_v29 = vld [vmem:[%s3612_s1 + $0x260] sm:$0xff]   ;;  %v2844_v42 = vld [vmem:[%s3612_s1 + $0x268] sm:$0xff]  }
  0x40   :  { %v266_v0 = vrot.slane %v261_v30, %v3029_v43  ;;  %2068 = vmatprep.mubr.bf16.mxu1 %v2359_v36  ;;  %v3312_v25 = vcombine.low %v539_v35, %v546_v49  ;;  %v448_v48 = vcombine.high %v444_v11, %v444_v11  ;;  %v2356_v50 = vcombine.low %v675_v14, %v683_v15  ;;  %v2832_v11 = vld [vmem:[%s3612_s1 + $0x250] sm:$0xff]   ;;  %v2836_v35 = vld [vmem:[%s3612_s1 + $0x258] sm:$0xff]   ;;  %v2841_v30 = vld [vmem:[%s3612_s1 + $0x2e0] sm:$0xff]  }
  0x41   :  { %2600 = vmatpush3.bf16.msra.mxu0 %v2818_v6  ;;  %v627_v52 = vadd.bf16 %v3217_v40, %v333_v46  ;;  %v548_v54 = vpack.i.b16 %v446_v38, %v446_v38  ;;  %v635_v19 = vadd.bf16 %v3217_v40, %v341_v22  ;;  %v334_v31 = vmul.bf16 %v3125_v21, %v40_v53  ;;  %v2828_v40 = vld [vmem:[%s3612_s1 + $0x248] sm:$0xff]   ;;  %v2843_v36 = vld [vmem:[%s3612_s1 + $0x2a0] sm:$0xff]   ;;  %v2848_v41 = vld [vmem:[%s3612_s1 + $0x270] sm:$0xff]  }
  0x42   :  { %2601 = vmatprep.subr.bf16.mxu0 %v2820_v18  ;;  %2628 = vmatpush3.bf16.msra.mxu1 %v2819_v13  ;;  %v3324_v45 = vcombine.low %v259_v47, %v266_v0  ;;  %v342_v57 = vmul.bf16 %v3125_v21, %v48_v44  ;;  %v555_v58 = vpack.i.b16 %v448_v48, %v448_v48  ;;  %v2833_v13 = vld [vmem:[%s3612_s1 + $0x2d0] sm:$0xff]   ;;  %v2845_v49 = vld [vmem:[%s3612_s1 + $0x2e8] sm:$0xff]   ;;  %v25_v47 = vld [vmem:[%s3615_s0 + $0x20] sm:$0xff] }
  0x43   :  { %2629 = vmatprep.subr.bf16.mxu1 %v2821_v27  ;;  %v2358_v59 = vcombine.low %v3282_v20, %v3284_v26  ;;  %v659_v60 = vmul.bf16 1045249613, %v627_v52  ;;  %v553_v61 = vrot.slane %v548_v54, %v3029_v43  ;;  %v667_v1 = vmul.bf16 1045249613, %v635_v19  ;;  %v2835_v20 = vld [vmem:[%s3612_s1 + $0x290] sm:$0xff]   ;;  %v2838_v27 = vld [vmem:[%s3612_s1 + $0x218] sm:$0xff]  }
  0x44   :  { %v628_v21 = vadd.bf16 %v3221_v37, %v334_v31  ;;  %v636_v2 = vadd.bf16 %v3221_v37, %v342_v57  ;;  %v560_v3 = vrot.slane %v555_v58, %v3029_v43  ;;  %v2831_v43 = vld [vmem:[%s3612_s1 + $0x288] sm:$0xff]   ;;  %v2849_v46 = vld [vmem:[%s3612_s1 + $0x2f0] sm:$0xff]   ;;  %v33_v0 = vld [vmem:[%s3615_s0 + $0x60] sm:$0xff] }
  0x45   :  { %2602 = vmatpush3.bf16.msra.mxu0 %v2822_v32  ;;  %v691_v24 = vmax.bf16 %v659_v60, %v627_v52  ;;  %v699_v33 = vmax.bf16 %v667_v1, %v635_v19  ;;  %v2842_v32 = vld [vmem:[%s3612_s1 + $0x220] sm:$0xff]   ;;  %v2846_v38 = vld [vmem:[%s3612_s1 + $0x228] sm:$0xff]   ;;  %v2851_v44 = vld [vmem:[%s3612_s1 + $0x2b0] sm:$0xff]  }
  0x46   :  { %2643 = vmatprep.subr.bf16.mxu0 %v2824_v10  ;;  %2630 = vmatpush3.bf16.msra.mxu1 %v2823_v39  ;;  %v660_v6 = vmul.bf16 1045249613, %v628_v21  ;;  %v668_v8 = vmul.bf16 1045249613, %v636_v2  ;;  %v3350_v9 = vcombine.low %v553_v61, %v560_v3  ;;  %v2847_v39 = vld [vmem:[%s3612_s1 + $0x2a8] sm:$0xff]   ;;  %v319_v10 = vmul.bf16 %v3179_v63, %v25_v47  ;;  %v2852_v54 = vld [vmem:[%s3612_s1 + $0x278] sm:$0xff]  }
  0x47   :  { %2671 = vmatprep.subr.bf16.mxu1 %v2825_v51  ;;  %v2373_v37 = vcombine.high %v691_v24, %v699_v33  ;;  %v2372_v15 = vcombine.low %v691_v24, %v699_v33  ;;  %v26_v22 = vld [vmem:[%s3615_s0 + $0x28] sm:$0xff]  ;;  %v327_v51 = vmul.bf16 %v3179_v63, %v33_v0  ;;  %v2853_v19 = vld [vmem:[%s3612_s1 + $0x2f8] sm:$0xff]   ;;  %v2867_v47 = vld [vmem:[%s3612_s1 + $0x390] sm:$0xff]  }
  0x48   :  { %2020 = vmatmul.mubr.bf16.vlgmr.msra.gmra.mrb[8].mxu0 %v2356_v50  ;;  %v692_v12 = vmax.bf16 %v660_v6, %v628_v21  ;;  %v700_v14 = vmax.bf16 %v668_v8, %v636_v2  ;;  %v34_v48 = vld [vmem:[%s3615_s0 + $0x68] sm:$0xff]  ;;  %v2850_v50 = vld [vmem:[%s3612_s1 + $0x230] sm:$0xff]   ;;  %v320_v52 = vmul.bf16 %v3206_v34, %v26_v22  ;;  %v2855_v1 = vld [vmem:[%s3612_s1 + $0x2b8] sm:$0xff]  }
  0x49   :  { %2644 = vmatpush3.bf16.msra.mxu0 %v2826_v55  ;;  %2069 = vmatmul.mubr.bf16.vlgmr.msra.gmra.mrb[8].mxu1 %v2358_v59  ;;  %v328_v53 = vmul.bf16 %v3206_v34, %v34_v48  ;;  %v613_v55 = vadd.bf16 %v3186_v7, %v319_v10  ;;  %v621_v31 = vadd.bf16 %v3186_v7, %v327_v51  ;;  %v2854_v59 = vld [vmem:[%s3612_s1 + $0x238] sm:$0xff]  }
  0x4a   :  { %2645 = vmatprep.subr.bf16.mxu0 %v2828_v40  ;;  %2672 = vmatpush3.bf16.msra.mxu1 %v2827_v62  ;;  %v2375_v18 = vcombine.high %v692_v12, %v700_v14  ;;  %v2374_v26 = vcombine.low %v692_v12, %v700_v14  ;;  %v614_v57 = vadd.bf16 %v3252_v56, %v320_v52  ;;  %v2860_v12 = vld [vmem:[%s3612_s1 + $0x348] sm:$0xff]   ;;  %v49_v14 = vld [vmem:[%s3615_s0 + $0xe0] sm:$0xff]  ;;  %v2868_v10 = vld [vmem:[%s3612_s1 + $0x358] sm:$0xff]  }
  0x4b   :  { %2673 = vmatprep.subr.bf16.mxu1 %v2829_v4  ;;  %2027 = vmatprep.mubr.bf16.mxu0 %v2373_v37  ;;  %v622_v58 = vadd.bf16 %v3252_v56, %v328_v53  ;;  %v645_v60 = vmul.bf16 1045249613, %v613_v55  ;;  %v653_v61 = vmul.bf16 1045249613, %v621_v31  ;;  %v2856_v4 = vld [vmem:[%s3612_s1 + $0x340] sm:$0xff]   ;;  %v2870_v51 = vld [vmem:[%s3612_s1 + $0x318] sm:$0xff]  }
  0x4c   :  { %2076 = vmatprep.mubr.bf16.mxu1 %v2375_v18  ;;  %v646_v62 = vmul.bf16 1045249613, %v614_v57  ;;  %v2858_v37 = vld [vmem:[%s3612_s1 + $0x300] sm:$0xff]   ;;  %v343_v18 = vmul.bf16 %v3179_v63, %v49_v14 }
  0x4d   :  { %2646 = vmatpush3.bf16.msra.mxu0 %v2830_v5  ;;  %v654_v40 = vmul.bf16 1045249613, %v622_v58  ;;  %v677_v21 = vmax.bf16 %v645_v60, %v613_v55  ;;  %v685_v2 = vmax.bf16 %v653_v61, %v621_v31  ;;  %v2857_v5 = vld [vmem:[%s3612_s1 + $0x3c0] sm:$0xff]   ;;  %v2879_v60 = vld [vmem:[%s3612_s1 + $0x3a8] sm:$0xff]   ;;  %v2880_v61 = vld [vmem:[%s3612_s1 + $0x370] sm:$0xff]  }
  0x4e   :  { %2647 = vmatprep.subr.bf16.mxu0 %v2832_v11  ;;  %2674 = vmatpush3.bf16.msra.mxu1 %v2831_v43  ;;  %v678_v3 = vmax.bf16 %v646_v62, %v614_v57  ;;  %v2859_v11 = vld [vmem:[%s3612_s1 + $0x380] sm:$0xff]   ;;  %v2876_v57 = vld [vmem:[%s3612_s1 + $0x368] sm:$0xff]   ;;  %v2881_v62 = vld [vmem:[%s3612_s1 + $0x3f0] sm:$0xff]  }
  0x4f   :  { %2675 = vmatprep.subr.bf16.mxu1 %v2833_v13  ;;  %v686_v24 = vmax.bf16 %v654_v40, %v622_v58  ;;  %v2360_v33 = vcombine.low %v677_v21, %v685_v2  ;;  %v2361_v6 = vcombine.high %v677_v21, %v685_v2  ;;  %v41_v13 = vld [vmem:[%s3615_s0 + $0xa0] sm:$0xff]  ;;  %v2877_v58 = vld [vmem:[%s3612_s1 + $0x3e8] sm:$0xff]   ;;  %v2882_v40 = vld [vmem:[%s3612_s1 + $0x330] sm:$0xff]  }
  0x50   :  { %2028 = vmatmul.mubr.bf16.gmra.mrb[12].mxu0 %v2372_v15  ;;  %v2861_v15 = vld [vmem:[%s3612_s1 + $0x3c8] sm:$0xff]   ;;  %v2873_v55 = vld [vmem:[%s3612_s1 + $0x3e0] sm:$0xff]   ;;  %v2884_v21 = vld [vmem:[%s3612_s1 + $0x378] sm:$0xff]  }
  0x51   :  { %2648 = vmatpush3.bf16.msra.mxu0 %v2834_v17  ;;  %2077 = vmatmul.mubr.bf16.gmra.mrb[12].mxu1 %v2374_v26  ;;  %v2362_v8 = vcombine.low %v678_v3, %v686_v24  ;;  %v2363_v43 = vcombine.high %v678_v3, %v686_v24  ;;  %v335_v17 = vmul.bf16 %v3179_v63, %v41_v13  ;;  %v50_v63 = vld [vmem:[%s3615_s0 + $0xe8] sm:$0xff]  ;;  %v2875_v31 = vld [vmem:[%s3612_s1 + $0x3a0] sm:$0xff]   ;;  %v2885_v2 = vld [vmem:[%s3612_s1 + $0x3f8] sm:$0xff]  }
  0x52   :  { %2649 = vmatprep.subr.bf16.mxu0 %v2836_v35  ;;  %2676 = vmatpush3.bf16.msra.mxu1 %v2835_v20  ;;  %v2862_v20 = vld [vmem:[%s3612_s1 + $0x308] sm:$0xff]   ;;  %v637_v35 = vadd.bf16 %v3186_v7, %v343_v18  ;;  %v27_v3 = vld [vmem:[%s3615_s0 + $0x30] sm:$0xff]  ;;  %v2886_v13 = vld [vmem:[%s3612_s1 + $0x338] sm:$0xff]  }
  0x53   :  { %2677 = vmatprep.subr.bf16.mxu1 %v2837_v23  ;;  %2117 = vmatprep.mubr.bf16.mxu0 %v2361_v6  ;;  %v629_v26 = vadd.bf16 %v3186_v7, %v335_v17  ;;  %v42_v23 = vld [vmem:[%s3615_s0 + $0xa8] sm:$0xff]  ;;  %v35_v24 = vld [vmem:[%s3615_s0 + $0x70] sm:$0xff]  ;;  %v52_v18 = vld [vmem:[%s3615_s0 + $0xf8] sm:$0xff] }
  0x54   :  { %2166 = vmatprep.mubr.bf16.mxu1 %v2363_v43  ;;  %v329_v6 = vmul.bf16 %v3277_v16, %v35_v24 }
  0x55   :  { %2650 = vmatpush3.bf16.msra.mxu0 %v2838_v27  ;;  %v2864_v27 = vld [vmem:[%s3612_s1 + $0x350] sm:$0xff]   ;;  %v661_v7 = vmul.bf16 1045249613, %v629_v26 }
  0x56   :  { %2651 = vmatprep.subr.bf16.mxu0 %v2840_v29  ;;  %2678 = vmatpush3.bf16.msra.mxu1 %v2839_v28  ;;  %v336_v28 = vmul.bf16 %v3206_v34, %v42_v23  ;;  %v344_v29 = vmul.bf16 %v3206_v34, %v50_v63  ;;  %v2865_v34 = vld [vmem:[%s3612_s1 + $0x3d0] sm:$0xff]  }
  0x57   :  { %2679 = vmatprep.subr.bf16.mxu1 %v2841_v30  ;;  %v669_v30 = vmul.bf16 1045249613, %v637_v35 }
  0x59   :  { %2652 = vmatpush3.bf16.msra.mxu0 %v2842_v32  ;;  %v2863_v32 = vld [vmem:[%s3612_s1 + $0x388] sm:$0xff]  }
  0x5a   :  { %2653 = vmatprep.subr.bf16.mxu0 %v2844_v42  ;;  %2680 = vmatpush3.bf16.msra.mxu1 %v2843_v36  ;;  %v630_v36 = vadd.bf16 %v3252_v56, %v336_v28  ;;  %v638_v42 = vadd.bf16 %v3252_v56, %v344_v29  ;;  %v346_v29 = vmul.bf16 %v3324_v45, %v52_v18 }
  0x5b   :  { %2681 = vmatprep.subr.bf16.mxu1 %v2845_v49  ;;  %v693_v49 = vmax.bf16 %v661_v7, %v629_v26  ;;  %v2887_v26 = vld [vmem:[%s3612_s1 + $0x3b8] sm:$0xff]  }
  0x5d   :  { %2654 = vmatpush3.bf16.msra.mxu0 %v2846_v38  ;;  %v701_v38 = vmax.bf16 %v669_v30, %v637_v35  ;;  %v623_v35 = vadd.bf16 %v3312_v25, %v329_v6 }
  0x5e   :  { %2655 = vmatprep.subr.bf16.mxu0 %v2848_v41  ;;  %2682 = vmatpush3.bf16.msra.mxu1 %v2847_v39  ;;  %v662_v39 = vmul.bf16 1045249613, %v630_v36  ;;  %v670_v41 = vmul.bf16 1045249613, %v638_v42 }
  0x5f   :  { %2683 = vmatprep.subr.bf16.mxu1 %v2849_v46  ;;  %v2866_v46 = vld [vmem:[%s3612_s1 + $0x310] sm:$0xff]   ;;  %v2377_v0 = vcombine.high %v693_v49, %v701_v38  ;;  %v2376_v56 = vcombine.low %v693_v49, %v701_v38  ;;  %v655_v7 = vmul.bf16 1045249613, %v623_v35 }
  0x60   :  { %v694_v22 = vmax.bf16 %v662_v39, %v630_v36  ;;  %v702_v48 = vmax.bf16 %v670_v41, %v638_v42 }
  0x61   :  { %2656 = vmatpush3.bf16.msra.mxu0 %v2850_v50  ;;  %v2869_v50 = vld [vmem:[%s3612_s1 + $0x3d8] sm:$0xff]   ;;  %v687_v39 = vmax.bf16 %v655_v7, %v623_v35 }
  0x62   :  { %2657 = vmatprep.subr.bf16.mxu0 %v2852_v54  ;;  %2684 = vmatpush3.bf16.msra.mxu1 %v2851_v44  ;;  %v2379_v52 = vcombine.high %v694_v22, %v702_v48  ;;  %v2378_v53 = vcombine.low %v694_v22, %v702_v48  ;;  %v2871_v44 = vld [vmem:[%s3612_s1 + $0x398] sm:$0xff]   ;;  %v2872_v54 = vld [vmem:[%s3612_s1 + $0x360] sm:$0xff]  }
  0x63   :  { %2685 = vmatprep.subr.bf16.mxu1 %v2853_v19  ;;  %v2874_v19 = vld [vmem:[%s3612_s1 + $0x320] sm:$0xff]  }
  0x65   :  { %2658 = vmatpush3.bf16.msra.mxu0 %v2854_v59  ;;  %v2878_v59 = vld [vmem:[%s3612_s1 + $0x328] sm:$0xff]  }
  0x66   :  { %2686 = vmatpush3.bf16.msra.mxu1 %v2855_v1  ;;  %2699 = vmatprep.subr.bf16.mxu0 %v2856_v4  ;;  %v2883_v1 = vld [vmem:[%s3612_s1 + $0x3b0] sm:$0xff]   ;;  %v321_v4 = vmul.bf16 %v3277_v16, %v27_v3 }
  0x67   :  { %2727 = vmatprep.subr.bf16.mxu1 %v2857_v5  ;;  %v28_v5 = vld [vmem:[%s3615_s0 + $0x38] sm:$0xff] }
  0x68   :  { %2118 = vmatmul.mubr.bf16.vlgmr.msra.gmra.mrb[16].mxu0 %v2360_v33  ;;  %v36_v33 = vld [vmem:[%s3615_s0 + $0x78] sm:$0xff]  ;;  %v615_v14 = vadd.bf16 %v3312_v25, %v321_v4 }
  0x69   :  { %2700 = vmatpush3.bf16.msra.mxu0 %v2858_v37  ;;  %2167 = vmatmul.mubr.bf16.vlgmr.msra.gmra.mrb[16].mxu1 %v2362_v8  ;;  %v322_v8 = vmul.bf16 %v3324_v45, %v28_v5  ;;  %v330_v43 = vmul.bf16 %v3324_v45, %v36_v33  ;;  %v43_v37 = vld [vmem:[%s3615_s0 + $0xb0] sm:$0xff] }
  0x6a   :  { %2701 = vmatprep.subr.bf16.mxu0 %v2860_v12  ;;  %2728 = vmatpush3.bf16.msra.mxu1 %v2859_v11  ;;  %v51_v11 = vld [vmem:[%s3615_s0 + $0xf0] sm:$0xff]  ;;  %v44_v12 = vld [vmem:[%s3615_s0 + $0xb8] sm:$0xff] }
  0x6b   :  { %2729 = vmatprep.subr.bf16.mxu1 %v2861_v15  ;;  %2125 = vmatprep.mubr.bf16.mxu0 %v2377_v0  ;;  %v337_v15 = vmul.bf16 %v3277_v16, %v43_v37  ;;  %v345_v17 = vmul.bf16 %v3277_v16, %v51_v11  ;;  %v616_v23 = vadd.bf16 %v3350_v9, %v322_v8  ;;  %v647_v16 = vmul.bf16 1045249613, %v615_v14 }
  0x6c   :  { %2174 = vmatprep.mubr.bf16.mxu1 %v2379_v52  ;;  %v624_v63 = vadd.bf16 %v3350_v9, %v330_v43 }
  0x6d   :  { %2702 = vmatpush3.bf16.msra.mxu0 %v2862_v20  ;;  %v338_v20 = vmul.bf16 %v3324_v45, %v44_v12  ;;  %v639_v28 = vadd.bf16 %v3312_v25, %v345_v17  ;;  %v648_v30 = vmul.bf16 1045249613, %v616_v23  ;;  %v679_v42 = vmax.bf16 %v647_v16, %v615_v14 }
  0x6e   :  { %2703 = vmatprep.subr.bf16.mxu0 %v2864_v27  ;;  %2730 = vmatpush3.bf16.msra.mxu1 %v2863_v32  ;;  %v631_v27 = vadd.bf16 %v3312_v25, %v337_v15  ;;  %v656_v32 = vmul.bf16 1045249613, %v624_v63 }
  0x6f   :  { %2731 = vmatprep.subr.bf16.mxu1 %v2865_v34  ;;  %v632_v36 = vadd.bf16 %v3350_v9, %v338_v20  ;;  %v671_v38 = vmul.bf16 1045249613, %v639_v28  ;;  %v640_v34 = vadd.bf16 %v3350_v9, %v346_v29  ;;  %v680_v41 = vmax.bf16 %v648_v30, %v616_v23 }
  0x70   :  { %2126 = vmatmul.mubr.bf16.gmra.mrb[20].mxu0 %v2376_v56  ;;  %v663_v49 = vmul.bf16 1045249613, %v631_v27  ;;  %v2364_v45 = vcombine.low %v679_v42, %v687_v39 }
  0x71   :  { %2704 = vmatpush3.bf16.msra.mxu0 %v2866_v46  ;;  %2175 = vmatmul.mubr.bf16.gmra.mrb[20].mxu1 %v2378_v53  ;;  %v688_v46 = vmax.bf16 %v656_v32, %v624_v63  ;;  %v703_v25 = vmax.bf16 %v671_v38, %v639_v28  ;;  %v672_v56 = vmul.bf16 1045249613, %v640_v34 }
  0x72   :  { %2732 = vmatpush3.bf16.msra.mxu1 %v2867_v47  ;;  %2705 = vmatprep.subr.bf16.mxu0 %v2868_v10  ;;  %v664_v47 = vmul.bf16 1045249613, %v632_v36  ;;  %v695_v0 = vmax.bf16 %v663_v49, %v631_v27  ;;  %v2365_v10 = vcombine.high %v679_v42, %v687_v39 }
  0x73   :  { %2733 = vmatprep.subr.bf16.mxu1 %v2869_v50  ;;  %v2366_v22 = vcombine.low %v680_v41, %v688_v46  ;;  %v2367_v48 = vcombine.high %v680_v41, %v688_v46  ;;  %v704_v52 = vmax.bf16 %v672_v56, %v640_v34 }
  0x74   :  { %v2381_v50 = vcombine.high %v695_v0, %v703_v25  ;;  %v2380_v53 = vcombine.low %v695_v0, %v703_v25  ;;  %2215 = vmatprep.mubr.bf16.mxu0 %v2365_v10 }
  0x75   :  { %2706 = vmatpush3.bf16.msra.mxu0 %v2870_v51  ;;  %v696_v51 = vmax.bf16 %v664_v47, %v632_v36  ;;  %2264 = vmatprep.mubr.bf16.mxu1 %v2367_v48 }
  0x76   :  { %2734 = vmatpush3.bf16.msra.mxu1 %v2871_v44  ;;  %2707 = vmatprep.subr.bf16.mxu0 %v2872_v54 }
  0x77   :  { %2735 = vmatprep.subr.bf16.mxu1 %v2873_v55  ;;  %v2383_v9 = vcombine.high %v696_v51, %v704_v52  ;;  %v2382_v44 = vcombine.low %v696_v51, %v704_v52 }
  0x79   :  { %2708 = vmatpush3.bf16.msra.mxu0 %v2874_v19 }
  0x7a   :  { %2736 = vmatpush3.bf16.msra.mxu1 %v2875_v31  ;;  %2709 = vmatprep.subr.bf16.mxu0 %v2876_v57 }
  0x7b   :  { %2737 = vmatprep.subr.bf16.mxu1 %v2877_v58 }
  0x7d   :  { %2710 = vmatpush3.bf16.msra.mxu0 %v2878_v59 }
  0x7e   :  { %2738 = vmatpush3.bf16.msra.mxu1 %v2879_v60  ;;  %2711 = vmatprep.subr.bf16.mxu0 %v2880_v61 }
  0x7f   :  { %2739 = vmatprep.subr.bf16.mxu1 %v2881_v62 }
  0x81   :  { %2712 = vmatpush3.bf16.msra.mxu0 %v2882_v40 }
  0x82   :  { %2740 = vmatpush3.bf16.msra.mxu1 %v2883_v1  ;;  %2713 = vmatprep.subr.bf16.mxu0 %v2884_v21 }
  0x83   :  { %2741 = vmatprep.subr.bf16.mxu1 %v2885_v2 }
  0x85   :  { %2714 = vmatpush3.bf16.msra.mxu0 %v2886_v13 }
  0x86   :  { %2742 = vmatpush3.bf16.msra.mxu1 %v2887_v26 }
  0x88   :  { %2216 = vmatmul.mubr.bf16.vlgmr.msra.gmra.mrb[24].mxu0 %v2364_v45 }
  0x89   :  { %2265 = vmatmul.mubr.bf16.vlgmr.msra.gmra.mrb[24].mxu1 %v2366_v22  ;;  %2223 = vmatprep.mubr.bf16.mxu0 %v2381_v50 }
  0x8a   :  { %2272 = vmatprep.mubr.bf16.mxu1 %v2383_v9 }
  0x90   :  { %2224 = vmatmul.mubr.bf16.gmra.mrb[28].mxu0 %v2380_v53 }
  0x91   :  { %2273 = vmatmul.mubr.bf16.gmra.mrb[28].mxu1 %v2382_v44 }
  0xfb   :  { %v2547_v54 = vpop.f32.mrb[0].mxu0 }
  0xfc   :  { %v2548_v55 = vpop.f32.mrb[1].mxu0  ;;  %v2575_v19 = vpop.f32.mrb[0].mxu1 }
  0xfd   :  { %v2549_v31 = vadd.f32 %v2548_v55, %v2547_v54  ;;  %v2550_v57 = vpop.f32.mrb[2].mxu0  ;;  %v2576_v58 = vpop.f32.mrb[1].mxu1 }
  0xfe   :  { %v2551_v59 = vpop.f32.mrb[3].mxu0  ;;  %v2577_v60 = vadd.f32 %v2576_v58, %v2575_v19  ;;  %v2578_v61 = vpop.f32.mrb[2].mxu1 }
  0xff   :  { %v2552_v62 = vadd.f32 %v2551_v59, %v2550_v57  ;;  %v2579_v40 = vpop.f32.mrb[3].mxu1 }
 0x100   :  { %v1973_v1 = vadd.f32 %v2577_v60, %v2549_v31  ;;  %v2580_v21 = vadd.f32 %v2579_v40, %v2578_v61 }
 0x102   :  { %v1976_v2 = vadd.f32 %v2580_v21, %v2552_v62 }
 0x107   :  { %v2553_v3 = vpop.f32.mrb[4].mxu0 }
 0x108   :  { %v2581_v24 = vpop.f32.mrb[4].mxu1  ;;  %v2554_v4 = vpop.f32.mrb[5].mxu0 }
 0x109   :  { %v2555_v5 = vadd.f32 %v2554_v4, %v2553_v3  ;;  %v2582_v33 = vpop.f32.mrb[5].mxu1  ;;  %v2556_v6 = vpop.f32.mrb[6].mxu0 }
 0x10a   :  { %v2583_v8 = vadd.f32 %v2582_v33, %v2581_v24  ;;  %v2584_v43 = vpop.f32.mrb[6].mxu1  ;;  %v2557_v37 = vpop.f32.mrb[7].mxu0 }
 0x10b   :  { %v2558_v11 = vadd.f32 %v2557_v37, %v2556_v6  ;;  %v2585_v12 = vpop.f32.mrb[7].mxu1 }
 0x10c   :  { %v1981_v13 = vadd.f32 %v2583_v8, %v2555_v5  ;;  %v2586_v14 = vadd.f32 %v2585_v12, %v2584_v43 }
 0x10e   :  { %v1984_v15 = vadd.f32 %v2586_v14, %v2558_v11 }
 0x11b   :  { %v2603_v17 = vpop.f32.mrb[8].mxu0 }
 0x11c   :  { %v2604_v18 = vpop.f32.mrb[9].mxu0  ;;  %v2631_v20 = vpop.f32.mrb[8].mxu1 }
 0x11d   :  { %v2605_v26 = vadd.f32 %v2604_v18, %v2603_v17  ;;  %v2606_v35 = vpop.f32.mrb[10].mxu0  ;;  %v2632_v23 = vpop.f32.mrb[9].mxu1 }
 0x11e   :  { %v2607_v63 = vpop.f32.mrb[11].mxu0  ;;  %v2633_v27 = vadd.f32 %v2632_v23, %v2631_v20  ;;  %v2634_v28 = vpop.f32.mrb[10].mxu1 }
 0x11f   :  { %v2022_v16 = vadd.f32 %v2605_v26, %v1973_v1  ;;  %v2608_v29 = vadd.f32 %v2607_v63, %v2606_v35  ;;  %v2635_v7 = vpop.f32.mrb[11].mxu1 }
 0x120   :  { %v2636_v36 = vadd.f32 %v2635_v7, %v2634_v28 }
 0x121   :  { %v2071_v30 = vadd.f32 %v2633_v27, %v2022_v16  ;;  %v2025_v32 = vadd.f32 %v2608_v29, %v1976_v2 }
 0x123   :  { %v2074_v42 = vadd.f32 %v2636_v36, %v2025_v32  ;;  %v2609_v49 = vpop.f32.mrb[12].mxu0 }
 0x124   :  { %v2610_v38 = vpop.f32.mrb[13].mxu0  ;;  %v2637_v41 = vpop.f32.mrb[12].mxu1 }
 0x125   :  { %v2611_v34 = vadd.f32 %v2610_v38, %v2609_v49  ;;  %v2612_v39 = vpop.f32.mrb[14].mxu0  ;;  %v2638_v47 = vpop.f32.mrb[13].mxu1 }
 0x126   :  { %v2613_v46 = vpop.f32.mrb[15].mxu0  ;;  %v2639_v56 = vadd.f32 %v2638_v47, %v2637_v41  ;;  %v2640_v45 = vpop.f32.mrb[14].mxu1 }
 0x127   :  { %v2030_v0 = vadd.f32 %v2611_v34, %v1981_v13  ;;  %v2614_v25 = vadd.f32 %v2613_v46, %v2612_v39  ;;  %v2641_v10 = vpop.f32.mrb[15].mxu1 }
 0x128   :  { %v2642_v50 = vadd.f32 %v2641_v10, %v2640_v45 }
 0x129   :  { %v2033_v22 = vadd.f32 %v2614_v25, %v1984_v15  ;;  %v2079_v48 = vadd.f32 %v2639_v56, %v2030_v0 }
 0x12b   :  { %v2082_v51 = vadd.f32 %v2642_v50, %v2033_v22 }
 0x13b   :  { %v2659_v52 = vpop.f32.mrb[16].mxu0 }
 0x13c   :  { %v2660_v53 = vpop.f32.mrb[17].mxu0  ;;  %v2687_v9 = vpop.f32.mrb[16].mxu1 }
 0x13d   :  { %v2661_v44 = vadd.f32 %v2660_v53, %v2659_v52  ;;  %v2662_v54 = vpop.f32.mrb[18].mxu0  ;;  %v2688_v55 = vpop.f32.mrb[17].mxu1 }
 0x13e   :  { %v2663_v19 = vpop.f32.mrb[19].mxu0  ;;  %v2689_v57 = vadd.f32 %v2688_v55, %v2687_v9  ;;  %v2690_v58 = vpop.f32.mrb[18].mxu1 }
 0x13f   :  { %v2120_v31 = vadd.f32 %v2661_v44, %v2071_v30  ;;  %v2664_v59 = vadd.f32 %v2663_v19, %v2662_v54  ;;  %v2691_v60 = vpop.f32.mrb[19].mxu1 }
 0x140   :  { %v2692_v40 = vadd.f32 %v2691_v60, %v2690_v58 }
 0x141   :  { %v2169_v61 = vadd.f32 %v2689_v57, %v2120_v31  ;;  %v2123_v62 = vadd.f32 %v2664_v59, %v2074_v42 }
 0x143   :  { %v2172_v1 = vadd.f32 %v2692_v40, %v2123_v62  ;;  %v2665_v21 = vpop.f32.mrb[20].mxu0 }
 0x144   :  { %v2666_v2 = vpop.f32.mrb[21].mxu0  ;;  %v2693_v4 = vpop.f32.mrb[20].mxu1 }
 0x145   :  { %v2667_v3 = vadd.f32 %v2666_v2, %v2665_v21  ;;  %v2668_v24 = vpop.f32.mrb[22].mxu0  ;;  %v2694_v8 = vpop.f32.mrb[21].mxu1 }
 0x146   :  { %v2669_v5 = vpop.f32.mrb[23].mxu0  ;;  %v2695_v43 = vadd.f32 %v2694_v8, %v2693_v4  ;;  %v2696_v37 = vpop.f32.mrb[22].mxu1 }
 0x147   :  { %v2128_v33 = vadd.f32 %v2667_v3, %v2079_v48  ;;  %v2670_v6 = vadd.f32 %v2669_v5, %v2668_v24  ;;  %v2697_v12 = vpop.f32.mrb[23].mxu1 }
 0x148   :  { %v2698_v14 = vadd.f32 %v2697_v12, %v2696_v37 }
 0x149   :  { %v2131_v11 = vadd.f32 %v2670_v6, %v2082_v51  ;;  %v2177_v13 = vadd.f32 %v2695_v43, %v2128_v33 }
 0x14b   :  { %v2180_v15 = vadd.f32 %v2698_v14, %v2131_v11 }
 0x15b   :  { %v2715_v17 = vpop.f32.mrb[24].mxu0 }
 0x15c   :  { %v2743_v18 = vpop.f32.mrb[24].mxu1  ;;  %v2716_v20 = vpop.f32.mrb[25].mxu0 }
 0x15d   :  { %v2744_v26 = vpop.f32.mrb[25].mxu1  ;;  %v2717_v35 = vadd.f32 %v2716_v20, %v2715_v17  ;;  %v2718_v63 = vpop.f32.mrb[26].mxu0 }
 0x15e   :  { %v2745_v23 = vadd.f32 %v2744_v26, %v2743_v18  ;;  %v2746_v16 = vpop.f32.mrb[26].mxu1  ;;  %v2719_v27 = vpop.f32.mrb[27].mxu0 }
 0x15f   :  { %v2747_v28 = vpop.f32.mrb[27].mxu1  ;;  %v2218_v29 = vadd.f32 %v2717_v35, %v2169_v61  ;;  %v2720_v7 = vadd.f32 %v2719_v27, %v2718_v63 }
 0x160   :  { %v2748_v30 = vadd.f32 %v2747_v28, %v2746_v16 }
 0x161   :  { %v2267_v32 = vadd.f32 %v2745_v23, %v2218_v29  ;;  %v2221_v36 = vadd.f32 %v2720_v7, %v2172_v1 }
 0x163   :  { %v2270_v42 = vadd.f32 %v2748_v30, %v2221_v36  ;;  %v2721_v49 = vpop.f32.mrb[28].mxu0  ;;  %v2290_v34 = vmul.f32 %v2267_v32, %v2267_v32 }
 0x164   :  { %v2749_v38 = vpop.f32.mrb[28].mxu1  ;;  %v2722_v39 = vpop.f32.mrb[29].mxu0 }
 0x165   :  { %v2750_v41 = vpop.f32.mrb[29].mxu1  ;;  %v2281_v46 = vadd.f32 %v2270_v42, %v2267_v32  ;;  %v2291_v47 = vmul.f32 %v2270_v42, %v2270_v42  ;;  %v2523_v0 = vpack.c.bf16 %v2270_v42, %v2267_v32  ;;  %v2723_v25 = vadd.f32 %v2722_v39, %v2721_v49  ;;  %v2724_v56 = vpop.f32.mrb[30].mxu0 }
 0x166   :  { %v2752_v45 = vpop.f32.mrb[30].mxu1  ;;  %v2751_v10 = vadd.f32 %v2750_v41, %v2749_v38  ;;  %v2725_v22 = vpop.f32.mrb[31].mxu0 }
 0x167   :  { %v2753_v48 = vpop.f32.mrb[31].mxu1  ;;  %v2294_v50 = vadd.f32 %v2291_v47, %v2290_v34  ;;  %2524 = vst [vmem:[%s3616_s4] sm:$0xff] %v2523_v0   ;;  %v2226_v51 = vadd.f32 %v2723_v25, %v2177_v13  ;;  %v2726_v52 = vadd.f32 %v2725_v22, %v2724_v56 }
 0x168   :  { %v2754_v53 = vadd.f32 %v2753_v48, %v2752_v45 }
 0x169   :  { %v2275_v9 = vadd.f32 %v2751_v10, %v2226_v51  ;;  %v2229_v44 = vadd.f32 %v2726_v52, %v2180_v15 }
 0x16b   :  { %v2282_v54 = vadd.f32 %v2281_v46, %v2275_v9  ;;  %v2292_v55 = vmul.f32 %v2275_v9, %v2275_v9  ;;  %v2278_v19 = vadd.f32 %v2754_v53, %v2229_v44 }
 0x16d   :  { %v2295_v31 = vadd.f32 %v2294_v50, %v2292_v55  ;;  %v2283_v57 = vadd.f32 %v2282_v54, %v2278_v19  ;;  %v2293_v58 = vmul.f32 %v2278_v19, %v2278_v19  ;;  %v2528_v59 = vpack.c.bf16 %v2278_v19, %v2275_v9 }
 0x16f   :  { %v2284_v60 = vrot.slane %v2283_v57, 4  ;;  %v2296_v61 = vadd.f32 %v2295_v31, %v2293_v58  ;;  %2530 = vst [vmem:[%s3616_s4 + $0x8] sm:$0xff] %v2528_v59  }
 0x171   :  { %v2285_v62 = vadd.f32 %v2284_v60, %v2283_v57  ;;  %v2297_v40 = vrot.slane %v2296_v61, 4 }
 0x173   :  { %v2286_v1 = vrot.slane %v2285_v62, 2  ;;  %v2298_v21 = vadd.f32 %v2297_v40, %v2296_v61 }
 0x175   :  { %v2287_v2 = vadd.f32 %v2286_v1, %v2285_v62  ;;  %v2299_v3 = vrot.slane %v2298_v21, 2 }
 0x177   :  { %v2288_v24 = vrot.slane %v2287_v2, 1  ;;  %v2300_v4 = vadd.f32 %v2299_v3, %v2298_v21 }
 0x179   :  { %v2301_v5 = vrot.slane %v2300_v4, 1  ;;  %v2289_v33 = vadd.f32 %v2288_v24, %v2287_v2 }
 0x17b   :  { %v2302_v6 = vadd.f32 %v2301_v5, %v2300_v4 }
 0x17d   :  { %v2304_v8 = vsel %vm2303_vm0, %v2289_v33, %v2302_v6 }
 0x17e   :  { %v2306_v43 = vsel %vm2305_vm1, %v2304_v8, 0.0 }
 0x17f   :  { %2307 = vst [vmem:[%s3617_s5] sm:$0xff] %v2306_v43 }

// kernel: discriminator_forward.9
= control target key start
LH: loop header
LB: loop body
LE: loop exit
PB: predicated region body
PF: predicated region fallthrough
CT: control target
= control target key end

     0   :  { %v2466_v22 = vmov 1966171168   ;;  %v35_v24 = vlaneseq  ;;  %s3021_s1 = inlined_call_operand.vmem [shape: bf16[2048,128], index: 1, kind: input, shape index: {}]   ;;  %s3022_s2 = inlined_call_operand.vmem [shape: bf16[1,2048], index: 2, kind: input, shape index: {}]   ;;  %s3023_s3 = inlined_call_operand.vmem [shape: bf16[1,2048], index: 3, kind: input, shape index: {}]   ;;  %s3024_s0 = inlined_call_operand.vmem [shape: bf16[8,2048], index: 0, kind: input, shape index: {}]   ;;  %s3025_s4 = inlined_call_operand.vmem [shape: f32[8,128], index: 4, kind: output, shape index: {}]  }
   0x1   :  { %v2330_v0 = vld [vmem:[%s3021_s1 + $0x40] sm:$0xff]   ;;  %v2334_v4 = vld [vmem:[%s3021_s1 + $0x48] sm:$0xff]   ;;  %v2338_v8 = vld [vmem:[%s3021_s1 + $0x50] sm:$0xff]   ;;  %v33_v23 = vunpack.c.l.s4 %v2466_v22 }
   0x2   :  { %v2331_v1 = vld [vmem:[%s3021_s1 + $0xc0] sm:$0xff]   ;;  %2153 = vmatprep.subr.bf16.mxu0 %v2330_v0  ;;  %v2335_v5 = vld [vmem:[%s3021_s1 + $0xc8] sm:$0xff]   ;;  %v2339_v9 = vld [vmem:[%s3021_s1 + $0xd0] sm:$0xff]   ;;  %v36_v30 = vshrl.u32 %v35_v24, 7 }
   0x3   :  { %v2332_v2 = vld [vmem:[%s3021_s1] sm:$0xff]   ;;  %2175 = vmatprep.subr.bf16.mxu1 %v2331_v1  ;;  %v2336_v6 = vld [vmem:[%s3021_s1 + $0x8] sm:$0xff]   ;;  %v2340_v10 = vld [vmem:[%s3021_s1 + $0x10] sm:$0xff]   ;;  %v34_v29 = vunpack.c.0.s8 %v33_v23 }
   0x4   :  { %v2333_v3 = vld [vmem:[%s3021_s1 + $0x80] sm:$0xff]   ;;  %2154 = vmatpush3.bf16.msra.mxu0 %v2332_v2  ;;  %v2337_v7 = vld [vmem:[%s3021_s1 + $0x88] sm:$0xff]   ;;  %v2341_v11 = vld [vmem:[%s3021_s1 + $0x90] sm:$0xff]   ;;  %v2602_v46 = vsub.s32 0, %v36_v30 }
   0x5   :  { %2176 = vmatpush3.bf16.msra.mxu1 %v2333_v3  ;;  %2155 = vmatprep.subr.bf16.mxu0 %v2334_v4  ;;  %v2342_v12 = vld [vmem:[%s3021_s1 + $0x58] sm:$0xff]   ;;  %v2346_v16 = vld [vmem:[%s3021_s1 + $0x60] sm:$0xff]   ;;  %v2350_v20 = vld [vmem:[%s3021_s1 + $0x68] sm:$0xff]   ;;  %v2582_v35 = vsub.s32 %v34_v29, %v36_v30 }
   0x6   :  { %2177 = vmatprep.subr.bf16.mxu1 %v2335_v5  ;;  %v2343_v13 = vld [vmem:[%s3021_s1 + $0xd8] sm:$0xff]   ;;  %v2347_v17 = vld [vmem:[%s3021_s1 + $0xe0] sm:$0xff]   ;;  %v2351_v21 = vld [vmem:[%s3021_s1 + $0xe8] sm:$0xff]  }
   0x7   :  { %v2344_v14 = vld [vmem:[%s3021_s1 + $0x18] sm:$0xff]   ;;  %v2348_v18 = vld [vmem:[%s3021_s1 + $0x20] sm:$0xff]   ;;  %v2352_v25 = vld [vmem:[%s3021_s1 + $0x28] sm:$0xff]  }
   0x8   :  { %2156 = vmatpush3.bf16.msra.mxu0 %v2336_v6  ;;  %v2345_v15 = vld [vmem:[%s3021_s1 + $0x98] sm:$0xff]   ;;  %v2349_v19 = vld [vmem:[%s3021_s1 + $0xa0] sm:$0xff]   ;;  %v2353_v26 = vld [vmem:[%s3021_s1 + $0xa8] sm:$0xff]  }
   0x9   :  { %2178 = vmatpush3.bf16.msra.mxu1 %v2337_v7  ;;  %2157 = vmatprep.subr.bf16.mxu0 %v2338_v8  ;;  %v2354_v27 = vld [vmem:[%s3021_s1 + $0x70] sm:$0xff]   ;;  %v2358_v33 = vld [vmem:[%s3021_s1 + $0x78] sm:$0xff]   ;;  %v27_v38 = vld [vmem:[%s3022_s2] sm:$0xff] }
   0xa   :  { %2179 = vmatprep.subr.bf16.mxu1 %v2339_v9  ;;  %v2355_v28 = vld [vmem:[%s3021_s1 + $0xf0] sm:$0xff]   ;;  %v2359_v34 = vld [vmem:[%s3021_s1 + $0xf8] sm:$0xff]   ;;  %v38_v39 = vrot.slane %v27_v38, %v2582_v35  ;;  %v297_v40 = vld [vmem:[%s3023_s3] sm:$0xff]  ;;  %v31_v41 = vcombine.high %v27_v38, %v27_v38 }
   0xb   :  { %v2356_v31 = vld [vmem:[%s3021_s1 + $0x30] sm:$0xff]   ;;  %v2360_v36 = vld [vmem:[%s3021_s1 + $0x38] sm:$0xff]   ;;  %v308_v42 = vrot.slane %v297_v40, %v2582_v35  ;;  %v2366_v43 = vld [vmem:[%s3021_s1 + $0x140] sm:$0xff]   ;;  %v301_v52 = vcombine.high %v297_v40, %v297_v40 }
   0xc   :  { %2158 = vmatpush3.bf16.msra.mxu0 %v2340_v10  ;;  %v2357_v32 = vld [vmem:[%s3021_s1 + $0xb0] sm:$0xff]   ;;  %v2361_v37 = vld [vmem:[%s3021_s1 + $0xb8] sm:$0xff]   ;;  %v46_v44 = vcombine.high %v38_v39, %v38_v39  ;;  %v54_v45 = vrot.slane %v38_v39, %v2582_v35  ;;  %v2367_v47 = vld [vmem:[%s3021_s1 + $0x1c0] sm:$0xff]   ;;  %v45_v57 = vrot.slane %v31_v41, %v2582_v35 }
   0xd   :  { %2180 = vmatpush3.bf16.msra.mxu1 %v2341_v11  ;;  %2159 = vmatprep.subr.bf16.mxu0 %v2342_v12  ;;  %v316_v48 = vcombine.high %v308_v42, %v308_v42  ;;  %v324_v49 = vrot.slane %v308_v42, %v2582_v35  ;;  %v315_v5 = vrot.slane %v301_v52, %v2582_v35  ;;  %v19_v6 = vld [vmem:[%s3024_s0] sm:$0xff] }
   0xe   :  { %2181 = vmatprep.subr.bf16.mxu1 %v2343_v13  ;;  %v68_v50 = vrot.slane %v46_v44, %v2582_v35  ;;  %v130_v51 = vpack.i.b16 %v54_v45, %v54_v45  ;;  %v76_v53 = vcombine.high %v54_v45, %v54_v45  ;;  %v47_v12 = vcombine.high %v45_v57, %v45_v57  ;;  %v2369_v41 = vld [vmem:[%s3021_s1 + $0x180] sm:$0xff]  }
   0xf   :  { %v338_v54 = vrot.slane %v316_v48, %v2582_v35  ;;  %v400_v55 = vpack.i.b16 %v324_v49, %v324_v49  ;;  %v346_v56 = vcombine.high %v324_v49, %v324_v49  ;;  %v61_v22 = vrot.slane %v45_v57, %v2582_v35  ;;  %v2371_v49 = vld [vmem:[%s3021_s1 + $0x1c8] sm:$0xff]  }
  0x10   :  { %2160 = vmatpush3.bf16.msra.mxu0 %v2344_v14  ;;  %v135_v58 = vrot.slane %v130_v51, %v2602_v46  ;;  %v137_v59 = vpack.i.b16 %v68_v50, %v68_v50  ;;  %v78_v60 = vcombine.high %v68_v50, %v68_v50  ;;  %v144_v61 = vpack.i.b16 %v76_v53, %v76_v53  ;;  %v20_v14 = vld [vmem:[%s3024_s0 + $0x8] sm:$0xff] }
  0x11   :  { %2182 = vmatpush3.bf16.msra.mxu1 %v2345_v15  ;;  %2161 = vmatprep.subr.bf16.mxu0 %v2346_v16  ;;  %v405_v62 = vrot.slane %v400_v55, %v2602_v46  ;;  %v407_v63 = vpack.i.b16 %v338_v54, %v338_v54  ;;  %v348_v0 = vcombine.high %v338_v54, %v338_v54  ;;  %v2372_v53 = vld [vmem:[%s3021_s1 + $0x108] sm:$0xff]  }
  0x12   :  { %2183 = vmatprep.subr.bf16.mxu1 %v2347_v17  ;;  %v414_v1 = vpack.i.b16 %v346_v56, %v346_v56  ;;  %v142_v2 = vrot.slane %v137_v59, %v2602_v46  ;;  %v149_v3 = vrot.slane %v144_v61, %v2602_v46  ;;  %v151_v4 = vpack.i.b16 %v78_v60, %v78_v60  ;;  %v2373_v56 = vld [vmem:[%s3021_s1 + $0x188] sm:$0xff]   ;;  %v2374_v60 = vld [vmem:[%s3021_s1 + $0x150] sm:$0xff]  }
  0x13   :  { %v412_v7 = vrot.slane %v407_v63, %v2602_v46  ;;  %v421_v9 = vpack.i.b16 %v348_v0, %v348_v0  ;;  %v75_v23 = vrot.slane %v47_v12, %v2582_v35  ;;  %v331_v24 = vrot.slane %v315_v5, %v2582_v35  ;;  %v2375_v63 = vld [vmem:[%s3021_s1 + $0x1d0] sm:$0xff]   ;;  %v2378_v12 = vld [vmem:[%s3021_s1 + $0x158] sm:$0xff]  }
  0x14   :  { %2162 = vmatpush3.bf16.msra.mxu0 %v2348_v18  ;;  %v419_v8 = vrot.slane %v414_v1, %v2602_v46  ;;  %v1993_v10 = vcombine.low %v135_v58, %v142_v2  ;;  %v156_v11 = vrot.slane %v151_v4, %v2602_v46  ;;  %v317_v18 = vcombine.high %v315_v5, %v315_v5 }
  0x15   :  { %2184 = vmatpush3.bf16.msra.mxu1 %v2349_v19  ;;  %2163 = vmatprep.subr.bf16.mxu0 %v2350_v20  ;;  %v2001_v13 = vcombine.low %v405_v62, %v412_v7  ;;  %v426_v15 = vrot.slane %v421_v9, %v2602_v46  ;;  %v158_v44 = vpack.i.b16 %v61_v22, %v61_v22 }
  0x16   :  { %2185 = vmatprep.subr.bf16.mxu1 %v2351_v21  ;;  %v289_v16 = vmul.bf16 %v1993_v10, %v19_v6  ;;  %v1994_v17 = vcombine.low %v149_v3, %v156_v11  ;;  %v165_v45 = vpack.i.b16 %v75_v23, %v75_v23  ;;  %v428_v54 = vpack.i.b16 %v331_v24, %v331_v24  ;;  %v2376_v3 = vld [vmem:[%s3021_s1 + $0x110] sm:$0xff]  }
  0x17   :  { %v2002_v19 = vcombine.low %v419_v8, %v426_v15  ;;  %v163_v61 = vrot.slane %v158_v44, %v2602_v46  ;;  %v2377_v8 = vld [vmem:[%s3021_s1 + $0x190] sm:$0xff]  }
  0x18   :  { %2164 = vmatpush3.bf16.msra.mxu0 %v2352_v25  ;;  %v559_v20 = vadd.bf16 %v2001_v13, %v289_v16  ;;  %v290_v21 = vmul.bf16 %v1994_v17, %v20_v14  ;;  %v170_v62 = vrot.slane %v165_v45, %v2602_v46  ;;  %v433_v4 = vrot.slane %v428_v54, %v2602_v46  ;;  %v2379_v16 = vld [vmem:[%s3021_s1 + $0x1d8] sm:$0xff]  }
  0x19   :  { %2186 = vmatpush3.bf16.msra.mxu1 %v2353_v26  ;;  %2165 = vmatprep.subr.bf16.mxu0 %v2354_v27  ;;  %v345_v27 = vrot.slane %v317_v18, %v2582_v35 }
  0x1a   :  { %2187 = vmatprep.subr.bf16.mxu1 %v2355_v28  ;;  %v567_v25 = vmul.bf16 1045249613, %v559_v20  ;;  %v560_v26 = vadd.bf16 %v2002_v19, %v290_v21  ;;  %v2633_v28 = vld [vmem:[%s3022_s2 + $0x8] sm:$0xff]  ;;  %v1995_v13 = vcombine.low %v163_v61, %v170_v62  ;;  %v2380_v21 = vld [vmem:[%s3021_s1 + $0x118] sm:$0xff]  }
  0x1b   :  { %v349_v42 = vcombine.high %v345_v27, %v345_v27  ;;  %v435_v55 = vpack.i.b16 %v345_v27, %v345_v27 }
  0x1c   :  { %2166 = vmatpush3.bf16.msra.mxu0 %v2356_v31  ;;  %v575_v29 = vmax.bf16 %v567_v25, %v559_v20  ;;  %v568_v30 = vmul.bf16 1045249613, %v560_v26  ;;  %v2368_v31 = vld [vmem:[%s3021_s1 + $0x100] sm:$0xff]  }
  0x1d   :  { %2188 = vmatpush3.bf16.msra.mxu1 %v2357_v32  ;;  %2167 = vmatprep.subr.bf16.mxu0 %v2358_v33  ;;  %v77_v32 = vcombine.high %v61_v22, %v61_v22  ;;  %v79_v33 = vcombine.high %v75_v23, %v75_v23  ;;  %v449_v58 = vpack.i.b16 %v349_v42, %v349_v42 }
  0x1e   :  { %2189 = vmatprep.subr.bf16.mxu1 %v2359_v34  ;;  %v80_v34 = vcombine.high %v2633_v28, %v2633_v28  ;;  %v2010_v38 = vcombine.high %v575_v29, %v575_v29  ;;  %v576_v39 = vmax.bf16 %v568_v30, %v560_v26  ;;  %v2009_v40 = vcombine.low %v575_v29, %v575_v29  ;;  %v2381_v26 = vld [vmem:[%s3021_s1 + $0x198] sm:$0xff]  }
  0x1f   :  { %v172_v50 = vpack.i.b16 %v77_v32, %v77_v32  ;;  %v179_v51 = vpack.i.b16 %v79_v33, %v79_v33  ;;  %v440_v5 = vrot.slane %v435_v55, %v2602_v46  ;;  %v454_v10 = vrot.slane %v449_v58, %v2602_v46  ;;  %v2382_v32 = vld [vmem:[%s3021_s1 + $0x160] sm:$0xff]   ;;  %v21_v33 = vld [vmem:[%s3024_s0 + $0x10] sm:$0xff] }
  0x20   :  { %2168 = vmatpush3.bf16.msra.mxu0 %v2360_v36  ;;  %v347_v36 = vcombine.high %v331_v24, %v331_v24  ;;  %1695 = vmatprep.mubr.bf16.mxu0 %v2010_v38  ;;  %v2011_v48 = vcombine.low %v576_v39, %v576_v39  ;;  %v94_v59 = vrot.slane %v80_v34, %v2582_v35  ;;  %v22_v34 = vld [vmem:[%s3024_s0 + $0x18] sm:$0xff] }
  0x21   :  { %2190 = vmatpush3.bf16.msra.mxu1 %v2361_v37  ;;  %2197 = vmatprep.subr.bf16.mxu0 %v2366_v43  ;;  %v2643_v37 = vld [vmem:[%s3023_s3 + $0x8] sm:$0xff]  ;;  %v177_v0 = vrot.slane %v172_v50, %v2602_v46  ;;  %v184_v1 = vrot.slane %v179_v51, %v2602_v46  ;;  %v2003_v22 = vcombine.low %v433_v4, %v440_v5 }
  0x22   :  { %2219 = vmatprep.subr.bf16.mxu1 %v2367_v47  ;;  %v2370_v43 = vld [vmem:[%s3021_s1 + $0x148] sm:$0xff]   ;;  %v2012_v47 = vcombine.high %v576_v39, %v576_v39  ;;  %v350_v52 = vcombine.high %v2643_v37, %v2643_v37  ;;  %v442_v57 = vpack.i.b16 %v347_v36, %v347_v36  ;;  %v96_v2 = vcombine.high %v94_v59, %v94_v59 }
  0x23   :  { %1696 = vmatmul.mubr.bf16.vlgmr.msra.gmra.mrb[0].mxu0 %v2009_v40  ;;  %v110_v6 = vrot.slane %v94_v59, %v2582_v35  ;;  %v1996_v17 = vcombine.low %v177_v0, %v184_v1  ;;  %v291_v42 = vmul.bf16 %v1995_v13, %v21_v33  ;;  %v2388_v0 = vld [vmem:[%s3021_s1 + $0x128] sm:$0xff]   ;;  %v87_v4 = vrot.slane %v2633_v28, %v2582_v35  ;;  %v2392_v28 = vld [vmem:[%s3021_s1 + $0x130] sm:$0xff]   ;;  %v2394_v13 = vld [vmem:[%s3021_s1 + $0x178] sm:$0xff]  }
  0x24   :  { %1735 = vmatprep.mubr.bf16.mxu1 %v2012_v47  ;;  %2198 = vmatpush3.bf16.msra.mxu0 %v2368_v31  ;;  %v364_v7 = vrot.slane %v350_v52, %v2582_v35  ;;  %v447_v9 = vrot.slane %v442_v57, %v2602_v46  ;;  %v124_v11 = vrot.slane %v96_v2, %v2582_v35  ;;  %v2384_v47 = vld [vmem:[%s3021_s1 + $0x120] sm:$0xff]   ;;  %v2387_v57 = vld [vmem:[%s3021_s1 + $0x1e8] sm:$0xff]  }
  0x25   :  { %1736 = vmatmul.mubr.bf16.vlgmr.msra.gmra.mrb[0].mxu1 %v2011_v48  ;;  %2199 = vmatprep.subr.bf16.mxu0 %v2370_v43  ;;  %v214_v14 = vpack.i.b16 %v110_v6, %v110_v6  ;;  %v126_v20 = vcombine.high %v110_v6, %v110_v6  ;;  %v292_v43 = vmul.bf16 %v1996_v17, %v22_v34  ;;  %v2385_v52 = vld [vmem:[%s3021_s1 + $0x1a0] sm:$0xff]   ;;  %v2389_v1 = vld [vmem:[%s3021_s1 + $0x1a8] sm:$0xff]   ;;  %v2390_v6 = vld [vmem:[%s3021_s1 + $0x170] sm:$0xff]  }
  0x26   :  { %2220 = vmatpush3.bf16.msra.mxu1 %v2369_v41  ;;  %v366_v15 = vcombine.high %v364_v7, %v364_v7  ;;  %v221_v18 = vpack.i.b16 %v124_v11, %v124_v11  ;;  %v380_v19 = vrot.slane %v364_v7, %v2582_v35  ;;  %v128_v25 = vcombine.high %v124_v11, %v124_v11  ;;  %v2383_v41 = vld [vmem:[%s3021_s1 + $0x1e0] sm:$0xff]   ;;  %v2391_v7 = vld [vmem:[%s3021_s1 + $0x1f0] sm:$0xff]  }
  0x27   :  { %2221 = vmatprep.subr.bf16.mxu1 %v2371_v49  ;;  %v2697_v23 = vrot.slane %v214_v14, %v2602_v46  ;;  %v2004_v27 = vcombine.low %v447_v9, %v454_v10  ;;  %v228_v31 = vpack.i.b16 %v126_v20, %v126_v20  ;;  %v561_v54 = vadd.bf16 %v2003_v22, %v291_v42  ;;  %v2393_v11 = vld [vmem:[%s3021_s1 + $0x1b0] sm:$0xff]   ;;  %v2399_v20 = vld [vmem:[%s3021_s1 + $0x2c0] sm:$0xff]  }
  0x28   :  { %2200 = vmatpush3.bf16.msra.mxu0 %v2372_v53  ;;  %v394_v24 = vrot.slane %v366_v15, %v2582_v35  ;;  %v2704_v29 = vrot.slane %v221_v18, %v2602_v46  ;;  %v484_v30 = vpack.i.b16 %v380_v19, %v380_v19  ;;  %v235_v38 = vpack.i.b16 %v128_v25, %v128_v25  ;;  %v2386_v53 = vld [vmem:[%s3021_s1 + $0x168] sm:$0xff]   ;;  %v2396_v15 = vld [vmem:[%s3021_s1 + $0x138] sm:$0xff]   ;;  %v2400_v25 = vld [vmem:[%s3021_s1 + $0x200] sm:$0xff]  }
  0x29   :  { %2201 = vmatprep.subr.bf16.mxu0 %v2374_v60  ;;  %v396_v39 = vcombine.high %v380_v19, %v380_v19  ;;  %v2730_v49 = vrot.slane %v228_v31, %v2602_v46  ;;  %v562_v55 = vadd.bf16 %v2004_v27, %v292_v43  ;;  %v569_v61 = vmul.bf16 1045249613, %v561_v54  ;;  %v2398_v19 = vld [vmem:[%s3021_s1 + $0x240] sm:$0xff]   ;;  %v2406_v43 = vld [vmem:[%s3021_s1 + $0x250] sm:$0xff]  }
  0x2a   :  { %2222 = vmatpush3.bf16.msra.mxu1 %v2373_v56  ;;  %v491_v36 = vpack.i.b16 %v394_v24, %v394_v24  ;;  %v398_v40 = vcombine.high %v394_v24, %v394_v24  ;;  %v1999_v44 = vcombine.low %v2697_v23, %v2704_v29  ;;  %v2721_v45 = vrot.slane %v484_v30, %v2602_v46  ;;  %v2451_v29 = vld [vmem:[%s3021_s1 + $0x3e8] sm:$0xff]  }
  0x2b   :  { %2223 = vmatprep.subr.bf16.mxu1 %v2375_v63  ;;  %v2733_v50 = vrot.slane %v235_v38, %v2602_v46  ;;  %v498_v51 = vpack.i.b16 %v396_v39, %v396_v39  ;;  %v570_v62 = vmul.bf16 1045249613, %v562_v55  ;;  %v577_v2 = vmax.bf16 %v569_v61, %v561_v54  ;;  %v2409_v61 = vld [vmem:[%s3021_s1 + $0x290] sm:$0xff]  }
  0x2c   :  { %2202 = vmatpush3.bf16.msra.mxu0 %v2376_v3  ;;  %v2727_v48 = vrot.slane %v491_v36, %v2602_v46  ;;  %v505_v56 = vpack.i.b16 %v398_v40, %v398_v40  ;;  %v357_v10 = vrot.slane %v2643_v37, %v2582_v35  ;;  %v2395_v37 = vld [vmem:[%s3021_s1 + $0x1f8] sm:$0xff]   ;;  %v103_v17 = vrot.slane %v87_v4, %v2582_v35  ;;  %v2404_v36 = vld [vmem:[%s3021_s1 + $0x208] sm:$0xff]  }
  0x2d   :  { %2203 = vmatprep.subr.bf16.mxu0 %v2378_v12  ;;  %v2000_v59 = vcombine.low %v2730_v49, %v2733_v50  ;;  %v2749_v60 = vrot.slane %v498_v51, %v2602_v46  ;;  %v578_v3 = vmax.bf16 %v570_v62, %v562_v55  ;;  %v95_v12 = vcombine.high %v87_v4, %v87_v4  ;;  %v2405_v40 = vld [vmem:[%s3021_s1 + $0x288] sm:$0xff]   ;;  %v2408_v55 = vld [vmem:[%s3021_s1 + $0x210] sm:$0xff]   ;;  %v2411_v4 = vld [vmem:[%s3021_s1 + $0x2d8] sm:$0xff]  }
  0x2e   :  { %2224 = vmatpush3.bf16.msra.mxu1 %v2377_v8  ;;  %v2007_v58 = vcombine.low %v2721_v45, %v2727_v48  ;;  %v2752_v63 = vrot.slane %v505_v56, %v2602_v46  ;;  %v2014_v8 = vcombine.high %v577_v2, %v577_v2  ;;  %v365_v14 = vcombine.high %v357_v10, %v357_v10  ;;  %v2452_v49 = vld [vmem:[%s3021_s1 + $0x328] sm:$0xff]   ;;  %v2454_v45 = vld [vmem:[%s3021_s1 + $0x370] sm:$0xff]  }
  0x2f   :  { %2225 = vmatprep.subr.bf16.mxu1 %v2379_v16  ;;  %v2016_v9 = vcombine.high %v578_v3, %v578_v3  ;;  %v2397_v16 = vld [vmem:[%s3021_s1 + $0x1b8] sm:$0xff]   ;;  %v117_v18 = vrot.slane %v95_v12, %v2582_v35  ;;  %v2013_v24 = vcombine.low %v577_v2, %v577_v2  ;;  %v125_v27 = vcombine.high %v103_v17, %v103_v17 }
  0x30   :  { %2204 = vmatpush3.bf16.msra.mxu0 %v2380_v21  ;;  %v2008_v5 = vcombine.low %v2749_v60, %v2752_v63  ;;  %1775 = vmatprep.mubr.bf16.mxu0 %v2014_v8  ;;  %v373_v21 = vrot.slane %v357_v10, %v2582_v35  ;;  %v387_v22 = vrot.slane %v365_v14, %v2582_v35  ;;  %v2403_v35 = vld [vmem:[%s3021_s1 + $0x2c8] sm:$0xff]   ;;  %v2412_v8 = vld [vmem:[%s3021_s1 + $0x218] sm:$0xff]   ;;  %v2455_v60 = vld [vmem:[%s3021_s1 + $0x3f0] sm:$0xff]  }
  0x31   :  { %2205 = vmatprep.subr.bf16.mxu0 %v2382_v32  ;;  %1815 = vmatprep.mubr.bf16.mxu1 %v2016_v9  ;;  %v127_v30 = vcombine.high %v117_v18, %v117_v18  ;;  %v2015_v31 = vcombine.low %v578_v3, %v578_v3  ;;  %v2402_v32 = vld [vmem:[%s3021_s1 + $0x248] sm:$0xff]   ;;  %v186_v38 = vpack.i.b16 %v103_v17, %v103_v17  ;;  %v2413_v10 = vld [vmem:[%s3021_s1 + $0x298] sm:$0xff]  }
  0x32   :  { %2226 = vmatpush3.bf16.msra.mxu1 %v2381_v26  ;;  %v2401_v26 = vld [vmem:[%s3021_s1 + $0x280] sm:$0xff]   ;;  %v395_v33 = vcombine.high %v373_v21, %v373_v21  ;;  %v397_v34 = vcombine.high %v387_v22, %v387_v22  ;;  %v193_v39 = vpack.i.b16 %v117_v18, %v117_v18  ;;  %v463_v51 = vpack.i.b16 %v387_v22, %v387_v22  ;;  %v2418_v18 = vld [vmem:[%s3021_s1 + $0x268] sm:$0xff]  }
  0x33   :  { %2227 = vmatprep.subr.bf16.mxu1 %v2383_v41  ;;  %v200_v41 = vpack.i.b16 %v125_v27, %v125_v27  ;;  %v207_v42 = vpack.i.b16 %v127_v30, %v127_v30  ;;  %v191_v56 = vrot.slane %v186_v38, %v2602_v46  ;;  %v2419_v22 = vld [vmem:[%s3021_s1 + $0x2e8] sm:$0xff]   ;;  %v2422_v27 = vld [vmem:[%s3021_s1 + $0x270] sm:$0xff]   ;;  %v2426_v38 = vld [vmem:[%s3021_s1 + $0x278] sm:$0xff]  }
  0x34   :  { %2206 = vmatpush3.bf16.msra.mxu0 %v2384_v47  ;;  %v456_v47 = vpack.i.b16 %v373_v21, %v373_v21  ;;  %v477_v54 = vpack.i.b16 %v397_v34, %v397_v34  ;;  %v468_v3 = vrot.slane %v463_v51, %v2602_v46  ;;  %v2424_v34 = vld [vmem:[%s3021_s1 + $0x230] sm:$0xff]   ;;  %v2431_v51 = vld [vmem:[%s3021_s1 + $0x3c0] sm:$0xff]  }
  0x35   :  { %2207 = vmatprep.subr.bf16.mxu0 %v2386_v53  ;;  %v470_v53 = vpack.i.b16 %v395_v33, %v395_v33  ;;  %v205_v62 = vrot.slane %v200_v41, %v2602_v46  ;;  %v2428_v41 = vld [vmem:[%s3021_s1 + $0x238] sm:$0xff]  }
  0x36   :  { %2228 = vmatpush3.bf16.msra.mxu1 %v2385_v52  ;;  %v2407_v52 = vld [vmem:[%s3021_s1 + $0x2d0] sm:$0xff]   ;;  %v461_v2 = vrot.slane %v456_v47, %v2602_v46 }
  0x37   :  { %2229 = vmatprep.subr.bf16.mxu1 %v2387_v57  ;;  %v198_v57 = vrot.slane %v193_v39, %v2602_v46  ;;  %v2425_v39 = vld [vmem:[%s3021_s1 + $0x2b0] sm:$0xff]  }
  0x38   :  { %2208 = vmatpush3.bf16.msra.mxu0 %v2388_v0  ;;  %v212_v0 = vrot.slane %v207_v42, %v2602_v46  ;;  %v2005_v12 = vcombine.low %v461_v2, %v468_v3  ;;  %v2430_v42 = vld [vmem:[%s3021_s1 + $0x340] sm:$0xff]   ;;  %v2442_v2 = vld [vmem:[%s3021_s1 + $0x358] sm:$0xff]   ;;  %v2441_v3 = vld [vmem:[%s3021_s1 + $0x390] sm:$0xff]  }
  0x39   :  { %2209 = vmatprep.subr.bf16.mxu0 %v2390_v6  ;;  %v475_v6 = vrot.slane %v470_v53, %v2602_v46  ;;  %v1997_v9 = vcombine.low %v191_v56, %v198_v57  ;;  %v2435_v56 = vld [vmem:[%s3021_s1 + $0x3c8] sm:$0xff]  }
  0x3a   :  { %2230 = vmatpush3.bf16.msra.mxu1 %v2389_v1  ;;  %v2410_v1 = vld [vmem:[%s3021_s1 + $0x258] sm:$0xff]   ;;  %v2436_v57 = vld [vmem:[%s3021_s1 + $0x308] sm:$0xff]  }
  0x3b   :  { %2231 = vmatprep.subr.bf16.mxu1 %v2391_v7  ;;  %v482_v7 = vrot.slane %v477_v54, %v2602_v46  ;;  %v2415_v46 = vld [vmem:[%s3021_s1 + $0x2e0] sm:$0xff]   ;;  %v2434_v54 = vld [vmem:[%s3021_s1 + $0x348] sm:$0xff]  }
  0x3c   :  { %2210 = vmatpush3.bf16.msra.mxu0 %v2392_v28  ;;  %v1998_v28 = vcombine.low %v205_v62, %v212_v0  ;;  %v2437_v62 = vld [vmem:[%s3021_s1 + $0x388] sm:$0xff]   ;;  %v2439_v0 = vld [vmem:[%s3021_s1 + $0x3d0] sm:$0xff]  }
  0x3d   :  { %2211 = vmatprep.subr.bf16.mxu0 %v2394_v13  ;;  %v23_v13 = vld [vmem:[%s3024_s0 + $0x20] sm:$0xff] }
  0x3e   :  { %2232 = vmatpush3.bf16.msra.mxu1 %v2393_v11  ;;  %v2414_v11 = vld [vmem:[%s3021_s1 + $0x260] sm:$0xff]   ;;  %v293_v14 = vmul.bf16 %v1997_v9, %v23_v13 }
  0x3f   :  { %2233 = vmatprep.subr.bf16.mxu1 %v2395_v37  ;;  %v2006_v37 = vcombine.low %v475_v6, %v482_v7  ;;  %v2444_v6 = vld [vmem:[%s3021_s1 + $0x318] sm:$0xff]   ;;  %v2446_v7 = vld [vmem:[%s3021_s1 + $0x360] sm:$0xff]  }
  0x40   :  { %2212 = vmatpush3.bf16.msra.mxu0 %v2396_v15  ;;  %v24_v15 = vld [vmem:[%s3024_s0 + $0x28] sm:$0xff]  ;;  %v2447_v9 = vld [vmem:[%s3021_s1 + $0x3e0] sm:$0xff]  }
  0x41   :  { %2241 = vmatprep.subr.bf16.mxu0 %v2398_v19  ;;  %v294_v17 = vmul.bf16 %v1998_v28, %v24_v15  ;;  %v563_v19 = vadd.bf16 %v2005_v12, %v293_v14  ;;  %v2448_v28 = vld [vmem:[%s3021_s1 + $0x320] sm:$0xff]   ;;  %v26_v12 = vld [vmem:[%s3024_s0 + $0x38] sm:$0xff] }
  0x42   :  { %2234 = vmatpush3.bf16.msra.mxu1 %v2397_v16  ;;  %v2416_v16 = vld [vmem:[%s3021_s1 + $0x220] sm:$0xff]   ;;  %v296_v13 = vmul.bf16 %v2000_v59, %v26_v12  ;;  %v2458_v15 = vld [vmem:[%s3021_s1 + $0x378] sm:$0xff]  }
  0x43   :  { %1776 = vmatmul.mubr.bf16.vlgmr.msra.gmra.mrb[4].mxu0 %v2013_v24  ;;  %2263 = vmatprep.subr.bf16.mxu1 %v2399_v20  ;;  %v2417_v20 = vld [vmem:[%s3021_s1 + $0x2a0] sm:$0xff]   ;;  %v564_v21 = vadd.bf16 %v2006_v37, %v294_v17  ;;  %v2420_v24 = vld [vmem:[%s3021_s1 + $0x228] sm:$0xff]   ;;  %v2457_v17 = vld [vmem:[%s3021_s1 + $0x3b0] sm:$0xff]  }
  0x44   :  { %2242 = vmatpush3.bf16.msra.mxu0 %v2400_v25  ;;  %v571_v25 = vmul.bf16 1045249613, %v563_v19  ;;  %v2449_v37 = vld [vmem:[%s3021_s1 + $0x3a0] sm:$0xff]  }
  0x45   :  { %1816 = vmatmul.mubr.bf16.vlgmr.msra.gmra.mrb[4].mxu1 %v2015_v31  ;;  %2243 = vmatprep.subr.bf16.mxu0 %v2402_v32  ;;  %v2421_v31 = vld [vmem:[%s3021_s1 + $0x2a8] sm:$0xff]  }
  0x46   :  { %2264 = vmatpush3.bf16.msra.mxu1 %v2401_v26  ;;  %v572_v26 = vmul.bf16 1045249613, %v564_v21  ;;  %v579_v30 = vmax.bf16 %v571_v25, %v563_v19  ;;  %v2460_v19 = vld [vmem:[%s3021_s1 + $0x338] sm:$0xff]  }
  0x47   :  { %2265 = vmatprep.subr.bf16.mxu1 %v2403_v35  ;;  %v2423_v35 = vld [vmem:[%s3021_s1 + $0x2f0] sm:$0xff]  }
  0x48   :  { %2244 = vmatpush3.bf16.msra.mxu0 %v2404_v36  ;;  %v580_v32 = vmax.bf16 %v572_v26, %v564_v21  ;;  %v2018_v33 = vcombine.high %v579_v30, %v579_v30  ;;  %v2017_v47 = vcombine.low %v579_v30, %v579_v30 }
  0x49   :  { %2245 = vmatprep.subr.bf16.mxu0 %v2406_v43  ;;  %v2429_v43 = vld [vmem:[%s3021_s1 + $0x2b8] sm:$0xff]  }
  0x4a   :  { %2266 = vmatpush3.bf16.msra.mxu1 %v2405_v40  ;;  %v2020_v36 = vcombine.high %v580_v32, %v580_v32  ;;  %1855 = vmatprep.mubr.bf16.mxu0 %v2018_v33  ;;  %v2427_v40 = vld [vmem:[%s3021_s1 + $0x2f8] sm:$0xff]   ;;  %v2019_v53 = vcombine.low %v580_v32, %v580_v32 }
  0x4b   :  { %2267 = vmatprep.subr.bf16.mxu1 %v2407_v52  ;;  %v2432_v52 = vld [vmem:[%s3021_s1 + $0x300] sm:$0xff]  }
  0x4c   :  { %2246 = vmatpush3.bf16.msra.mxu0 %v2408_v55  ;;  %1895 = vmatprep.mubr.bf16.mxu1 %v2020_v36  ;;  %v2433_v55 = vld [vmem:[%s3021_s1 + $0x380] sm:$0xff]  }
  0x4d   :  { %2247 = vmatprep.subr.bf16.mxu0 %v2410_v1  ;;  %v2440_v1 = vld [vmem:[%s3021_s1 + $0x310] sm:$0xff]  }
  0x4e   :  { %2268 = vmatpush3.bf16.msra.mxu1 %v2409_v61  ;;  %v2438_v61 = vld [vmem:[%s3021_s1 + $0x350] sm:$0xff]  }
  0x4f   :  { %2269 = vmatprep.subr.bf16.mxu1 %v2411_v4  ;;  %v2443_v4 = vld [vmem:[%s3021_s1 + $0x3d8] sm:$0xff]  }
  0x50   :  { %2248 = vmatpush3.bf16.msra.mxu0 %v2412_v8  ;;  %v2445_v8 = vld [vmem:[%s3021_s1 + $0x398] sm:$0xff]  }
  0x51   :  { %2249 = vmatprep.subr.bf16.mxu0 %v2414_v11 }
  0x52   :  { %2270 = vmatpush3.bf16.msra.mxu1 %v2413_v10  ;;  %v25_v10 = vld [vmem:[%s3024_s0 + $0x30] sm:$0xff] }
  0x53   :  { %2271 = vmatprep.subr.bf16.mxu1 %v2415_v46  ;;  %v295_v11 = vmul.bf16 %v1999_v44, %v25_v10  ;;  %v2450_v46 = vld [vmem:[%s3021_s1 + $0x368] sm:$0xff]   ;;  %v566_v44 = vadd.bf16 %v2008_v5, %v296_v13  ;;  %v2456_v5 = vld [vmem:[%s3021_s1 + $0x330] sm:$0xff]  }
  0x54   :  { %2250 = vmatpush3.bf16.msra.mxu0 %v2416_v16 }
  0x55   :  { %2251 = vmatprep.subr.bf16.mxu0 %v2418_v18  ;;  %v565_v23 = vadd.bf16 %v2007_v58, %v295_v11  ;;  %v574_v48 = vmul.bf16 1045249613, %v566_v44  ;;  %v2453_v58 = vld [vmem:[%s3021_s1 + $0x3a8] sm:$0xff]   ;;  %v2459_v18 = vld [vmem:[%s3021_s1 + $0x3f8] sm:$0xff]  }
  0x56   :  { %2272 = vmatpush3.bf16.msra.mxu1 %v2417_v20  ;;  %v2461_v20 = vld [vmem:[%s3021_s1 + $0x3b8] sm:$0xff]  }
  0x57   :  { %2273 = vmatprep.subr.bf16.mxu1 %v2419_v22  ;;  %v573_v50 = vmul.bf16 1045249613, %v565_v23  ;;  %v582_v63 = vmax.bf16 %v574_v48, %v566_v44 }
  0x58   :  { %2252 = vmatpush3.bf16.msra.mxu0 %v2420_v24 }
  0x59   :  { %2253 = vmatprep.subr.bf16.mxu0 %v2422_v27  ;;  %v581_v59 = vmax.bf16 %v573_v50, %v565_v23  ;;  %v2024_v16 = vcombine.high %v582_v63, %v582_v63  ;;  %v2023_v22 = vcombine.low %v582_v63, %v582_v63 }
  0x5a   :  { %2274 = vmatpush3.bf16.msra.mxu1 %v2421_v31 }
  0x5b   :  { %2275 = vmatprep.subr.bf16.mxu1 %v2423_v35  ;;  %v2022_v14 = vcombine.high %v581_v59, %v581_v59  ;;  %v2021_v21 = vcombine.low %v581_v59, %v581_v59 }
  0x5c   :  { %2254 = vmatpush3.bf16.msra.mxu0 %v2424_v34 }
  0x5d   :  { %2255 = vmatprep.subr.bf16.mxu0 %v2426_v38 }
  0x5e   :  { %2276 = vmatpush3.bf16.msra.mxu1 %v2425_v39 }
  0x5f   :  { %2277 = vmatprep.subr.bf16.mxu1 %v2427_v40 }
  0x60   :  { %2256 = vmatpush3.bf16.msra.mxu0 %v2428_v41 }
  0x61   :  { %2285 = vmatprep.subr.bf16.mxu0 %v2430_v42 }
  0x62   :  { %2278 = vmatpush3.bf16.msra.mxu1 %v2429_v43 }
  0x63   :  { %1856 = vmatmul.mubr.bf16.vlgmr.msra.gmra.mrb[8].mxu0 %v2017_v47  ;;  %2307 = vmatprep.subr.bf16.mxu1 %v2431_v51 }
  0x64   :  { %2286 = vmatpush3.bf16.msra.mxu0 %v2432_v52  ;;  %1935 = vmatprep.mubr.bf16.mxu0 %v2022_v14 }
  0x65   :  { %1896 = vmatmul.mubr.bf16.vlgmr.msra.gmra.mrb[8].mxu1 %v2019_v53  ;;  %2287 = vmatprep.subr.bf16.mxu0 %v2434_v54 }
  0x66   :  { %2308 = vmatpush3.bf16.msra.mxu1 %v2433_v55  ;;  %1975 = vmatprep.mubr.bf16.mxu1 %v2024_v16 }
  0x67   :  { %2309 = vmatprep.subr.bf16.mxu1 %v2435_v56 }
  0x68   :  { %2288 = vmatpush3.bf16.msra.mxu0 %v2436_v57 }
  0x69   :  { %2289 = vmatprep.subr.bf16.mxu0 %v2438_v61 }
  0x6a   :  { %2310 = vmatpush3.bf16.msra.mxu1 %v2437_v62 }
  0x6b   :  { %2311 = vmatprep.subr.bf16.mxu1 %v2439_v0 }
  0x6c   :  { %2290 = vmatpush3.bf16.msra.mxu0 %v2440_v1 }
  0x6d   :  { %2291 = vmatprep.subr.bf16.mxu0 %v2442_v2 }
  0x6e   :  { %2312 = vmatpush3.bf16.msra.mxu1 %v2441_v3 }
  0x6f   :  { %2313 = vmatprep.subr.bf16.mxu1 %v2443_v4 }
  0x70   :  { %2292 = vmatpush3.bf16.msra.mxu0 %v2444_v6 }
  0x71   :  { %2293 = vmatprep.subr.bf16.mxu0 %v2446_v7 }
  0x72   :  { %2314 = vmatpush3.bf16.msra.mxu1 %v2445_v8 }
  0x73   :  { %2315 = vmatprep.subr.bf16.mxu1 %v2447_v9 }
  0x74   :  { %2294 = vmatpush3.bf16.msra.mxu0 %v2448_v28 }
  0x75   :  { %2295 = vmatprep.subr.bf16.mxu0 %v2450_v46 }
  0x76   :  { %2316 = vmatpush3.bf16.msra.mxu1 %v2449_v37 }
  0x77   :  { %2317 = vmatprep.subr.bf16.mxu1 %v2451_v29 }
  0x78   :  { %2296 = vmatpush3.bf16.msra.mxu0 %v2452_v49 }
  0x79   :  { %2297 = vmatprep.subr.bf16.mxu0 %v2454_v45 }
  0x7a   :  { %2318 = vmatpush3.bf16.msra.mxu1 %v2453_v58 }
  0x7b   :  { %2319 = vmatprep.subr.bf16.mxu1 %v2455_v60 }
  0x7c   :  { %2298 = vmatpush3.bf16.msra.mxu0 %v2456_v5 }
  0x7d   :  { %2299 = vmatprep.subr.bf16.mxu0 %v2458_v15 }
  0x7e   :  { %2320 = vmatpush3.bf16.msra.mxu1 %v2457_v17 }
  0x7f   :  { %2321 = vmatprep.subr.bf16.mxu1 %v2459_v18 }
  0x80   :  { %2300 = vmatpush3.bf16.msra.mxu0 %v2460_v19 }
  0x82   :  { %2322 = vmatpush3.bf16.msra.mxu1 %v2461_v20 }
  0x83   :  { %1936 = vmatmul.mubr.bf16.vlgmr.msra.gmra.mrb[12].mxu0 %v2021_v21 }
  0x85   :  { %1976 = vmatmul.mubr.bf16.vlgmr.msra.gmra.mrb[12].mxu1 %v2023_v22 }
  0xf6   :  { %v2169_v24 = vpop.f32.mrb[0].mxu0 }
  0xf7   :  { %v2170_v25 = vpop.f32.mrb[1].mxu0 }
  0xf8   :  { %v2191_v26 = vpop.f32.mrb[0].mxu1  ;;  %v2171_v27 = vadd.f32 %v2170_v25, %v2169_v24  ;;  %v2172_v30 = vpop.f32.mrb[2].mxu0 }
  0xf9   :  { %v2192_v31 = vpop.f32.mrb[1].mxu1  ;;  %v2173_v32 = vpop.f32.mrb[3].mxu0 }
  0xfa   :  { %v2193_v35 = vadd.f32 %v2192_v31, %v2191_v26  ;;  %v2194_v33 = vpop.f32.mrb[2].mxu1 }
  0xfb   :  { %v2195_v34 = vpop.f32.mrb[3].mxu1 }
  0xfc   :  { %v1738_v36 = vadd.f32 %v2193_v35, %v2171_v27 }
 0x116   :  { %v2213_v38 = vpop.f32.mrb[4].mxu0 }
 0x117   :  { %v2214_v39 = vpop.f32.mrb[5].mxu0 }
 0x118   :  { %v2235_v40 = vpop.f32.mrb[4].mxu1  ;;  %v2215_v41 = vadd.f32 %v2214_v39, %v2213_v38  ;;  %v2216_v42 = vpop.f32.mrb[6].mxu0 }
 0x119   :  { %v2236_v43 = vpop.f32.mrb[5].mxu1  ;;  %v2217_v47 = vpop.f32.mrb[7].mxu0 }
 0x11a   :  { %v1778_v51 = vadd.f32 %v2215_v41, %v1738_v36  ;;  %v2237_v52 = vadd.f32 %v2236_v43, %v2235_v40  ;;  %v2238_v53 = vpop.f32.mrb[6].mxu1 }
 0x11b   :  { %v2239_v54 = vpop.f32.mrb[7].mxu1 }
 0x11c   :  { %v1818_v55 = vadd.f32 %v2237_v52, %v1778_v51 }
 0x136   :  { %v2257_v56 = vpop.f32.mrb[8].mxu0 }
 0x137   :  { %v2258_v57 = vpop.f32.mrb[9].mxu0 }
 0x138   :  { %v2279_v61 = vpop.f32.mrb[8].mxu1  ;;  %v2259_v62 = vadd.f32 %v2258_v57, %v2257_v56  ;;  %v2260_v0 = vpop.f32.mrb[10].mxu0 }
 0x139   :  { %v2280_v1 = vpop.f32.mrb[9].mxu1  ;;  %v2261_v2 = vpop.f32.mrb[11].mxu0 }
 0x13a   :  { %v1858_v3 = vadd.f32 %v2259_v62, %v1818_v55  ;;  %v2281_v4 = vadd.f32 %v2280_v1, %v2279_v61  ;;  %v2282_v6 = vpop.f32.mrb[10].mxu1 }
 0x13b   :  { %v2283_v7 = vpop.f32.mrb[11].mxu1 }
 0x13c   :  { %v1898_v8 = vadd.f32 %v2281_v4, %v1858_v3 }
 0x156   :  { %v2301_v9 = vpop.f32.mrb[12].mxu0 }
 0x157   :  { %v2302_v10 = vpop.f32.mrb[13].mxu0 }
 0x158   :  { %v2323_v28 = vpop.f32.mrb[12].mxu1  ;;  %v2303_v11 = vadd.f32 %v2302_v10, %v2301_v9  ;;  %v2304_v12 = vpop.f32.mrb[14].mxu0 }
 0x159   :  { %v2324_v46 = vpop.f32.mrb[13].mxu1  ;;  %v2305_v13 = vpop.f32.mrb[15].mxu0 }
 0x15a   :  { %v1938_v37 = vadd.f32 %v2303_v11, %v1898_v8  ;;  %v2325_v23 = vadd.f32 %v2324_v46, %v2323_v28  ;;  %v2326_v29 = vpop.f32.mrb[14].mxu1 }
 0x15b   :  { %v2327_v44 = vpop.f32.mrb[15].mxu1 }
 0x15c   :  { %v1978_v49 = vadd.f32 %v2325_v23, %v1938_v37 }
 0x15e   :  { %v1983_v50 = vsub.f32 0.0, %v1978_v49 }
 0x160   :  { %v1984_v45 = vmul.f32 1.442695, %v1983_v50 }
 0x162   :  { %2462 = vpow2.f32 %v1984_v45 }
 0x16c   :  { %v2463_v48 = vpop.eup %2462 }
 0x16d   :  { %v1986_v58 = vadd.f32 1.0, %v2463_v48 }
 0x16f   :  { %2464 = vrcp.f32 %v1986_v58 }
 0x179   :  { %v2465_v59 = vpop.eup %2464 }
 0x17a   :  { %1988 = vst [vmem:[%s3025_s4] sm:$0xff] %v2465_v59 }

</bundles_post_ra>
